<compile_context>
chip_gen: v7x
topology: tpu7x:2x2x1
jax: 0.10.0
libtpu: 0.0.40
codegen_flags: <defaults>
</compile_context>

<pallas_src>
import functools

import jax
import jax.numpy as jnp
from jax import lax
from jax.experimental import pallas as pl
from jax.experimental.pallas import tpu as pltpu

CPAD = 128  # conv output channels zero-padded to one full lane register
RELU_FLAGS = (True, False, True, True, True, True, True, True, False)
PHYS_DIMS = (160, 512, 512, 256, 256, 64, 16, 2)


# ----------------------------------------------------------------------------
# Pallas kernels
# ----------------------------------------------------------------------------
def _conv_relu_pool_kernel(p_ref, w_ref, b_ref, o_ref):
    """Fused conv3x3(pad=1) + bias + ReLU + 2x2 maxpool as one GEMM.

    p_ref: (bm, 16*Cin) bf16  stride-2 4x4 patches; rows = pooled positions (n,oh,ow).
    w_ref: (16*Cin, 4*CPAD) bf16  four 128-wide column blocks = pooling quadrants.
    b_ref: (1, CPAD) f32
    o_ref: (bm, CPAD) bf16  lane-dense pooled output.
    """
    acc = jnp.dot(p_ref[...], w_ref[...], preferred_element_type=jnp.float32)
    pooled = jnp.maximum(
        jnp.maximum(acc[:, 0 * CPAD:1 * CPAD], acc[:, 1 * CPAD:2 * CPAD]),
        jnp.maximum(acc[:, 2 * CPAD:3 * CPAD], acc[:, 3 * CPAD:4 * CPAD]),
    )
    y = jnp.maximum(pooled + b_ref[...], 0.0)
    o_ref[...] = y.astype(o_ref.dtype)


def conv_relu_pool(patches, w_big, b_pad, *, m_blocks=2):
    """patches: (M, 16*Cin) bf16 -> (M, CPAD) bf16 pooled conv block output."""
    M, K = patches.shape
    assert M % m_blocks == 0, (M, m_blocks)
    bm = M // m_blocks
    return pl.pallas_call(
        _conv_relu_pool_kernel,
        out_shape=jax.ShapeDtypeStruct((M, CPAD), jnp.bfloat16),
        grid=(m_blocks,),
        in_specs=[
            pl.BlockSpec((bm, K), lambda i: (i, 0)),
            pl.BlockSpec((K, 4 * CPAD), lambda i: (0, 0)),
            pl.BlockSpec((1, CPAD), lambda i: (0, 0)),
        ],
        out_specs=pl.BlockSpec((bm, CPAD), lambda i: (i, 0)),
        compiler_params=pltpu.CompilerParams(
            dimension_semantics=("parallel",)),
    )(patches, w_big, b_pad)


def _fc_stack_kernel(*refs, relu_flags):
    """Chained Linear(+ReLU) layers: bf16 weights/activations, f32 accumulation."""
    x_ref = refs[0]
    o_ref = refs[-1]
    h = x_ref[...]                                    # bf16 activations
    out = None
    for i, relu in enumerate(relu_flags):
        w_ref = refs[1 + 2 * i]
        b_ref = refs[2 + 2 * i]
        out = jnp.dot(h, w_ref[...], preferred_element_type=jnp.float32)
        out = out + b_ref[...]
        if relu:
            out = jnp.maximum(out, 0.0)
        if i + 1 < len(relu_flags):
            h = out.astype(jnp.bfloat16)              # feed next MXU dot in bf16
    o_ref[...] = out.astype(o_ref.dtype)


def fc_stack(x, fc_ws, fc_bs, *, relu_flags=RELU_FLAGS):
    """One pallas_call for the whole 9-layer FC stack (weights resident in VMEM)."""
    assert len(fc_ws) == len(fc_bs) == len(relu_flags)
    args = [x]
    in_specs = [pl.BlockSpec(x.shape, lambda: (0, 0))]
    for w, b in zip(fc_ws, fc_bs):
        args += [w, b]
        in_specs += [pl.BlockSpec(w.shape, lambda: (0, 0)),
                     pl.BlockSpec(b.shape, lambda: (0, 0))]
    out_dim = fc_ws[-1].shape[1]
    return pl.pallas_call(
        functools.partial(_fc_stack_kernel, relu_flags=relu_flags),
        out_shape=jax.ShapeDtypeStruct((x.shape[0], out_dim), jnp.float32),
        in_specs=in_specs,
        out_specs=pl.BlockSpec((x.shape[0], out_dim), lambda: (0, 0)),
        compiler_params=pltpu.CompilerParams(vmem_limit_bytes=32 * 1024 * 1024),
    )(*args)


# ----------------------------------------------------------------------------
# Host-side glue (tiny XLA ops): stride-2 4x4 patch extraction per conv block
# ----------------------------------------------------------------------------
def _pool_conv_patches(x):
    """x: (N, H, W, Cin) -> (N*(H//2)*(W//2), 16*Cin) bf16 stride-2 4x4 patches.

    Row (n, oh, ow) holds the 4x4 padded-input window at (2*oh, 2*ow): the union
    of the four 3x3 conv windows feeding pooled output (n, oh, ow).
    """
    N, H, W, Cin = x.shape
    xp = jnp.pad(x, ((0, 0), (1, 1), (1, 1), (0, 0)))
    cols = []
    for dh in range(4):
        for dw in range(4):
            cols.append(xp[:, dh:dh + H:2, dw:dw + W:2, :])
    patches = jnp.concatenate(cols, axis=-1)          # (N, H//2, W//2, 16*Cin)
    return patches.reshape(N * (H // 2) * (W // 2), 16 * Cin).astype(jnp.bfloat16)


# ----------------------------------------------------------------------------
# Parameter init (PyTorch-default-style) + one-time conversion to kernel layout
# ----------------------------------------------------------------------------
def _lin_init(key, fan_in, fan_out):
    k1, k2 = jax.random.split(key)
    bound = 1.0 / float(fan_in) ** 0.5
    w = jax.random.uniform(k1, (fan_out, fan_in), jnp.float32, -bound, bound)
    b = jax.random.uniform(k2, (fan_out,), jnp.float32, -bound, bound)
    return w, b


def _conv_init(key, cin, cout):
    k1, k2 = jax.random.split(key)
    bound = 1.0 / float(cin * 9) ** 0.5
    w = jax.random.uniform(k1, (cout, cin, 3, 3), jnp.float32, -bound, bound)
    b = jax.random.uniform(k2, (cout,), jnp.float32, -bound, bound)
    return w, b


def init_raw_params(key):
    keys = jax.random.split(key, 16)
    p = {}
    p["conv1"] = _conv_init(keys[0], 1, 16)
    p["conv2"] = _conv_init(keys[1], 16, 32)
    p["conv3"] = _conv_init(keys[2], 32, 64)
    p["pic_fc1"] = _lin_init(keys[3], 1024, 1024)
    p["pic_fc2"] = _lin_init(keys[4], 1024, 160)
    for i in range(len(PHYS_DIMS) - 1):
        p[f"phys_fc{i+1}"] = _lin_init(keys[5 + i], PHYS_DIMS[i], PHYS_DIMS[i + 1])
    return p


def _pack_conv(w, b, cin, cout):
    """torch (cout,cin,3,3) conv -> (16*cin, 4*CPAD) bf16 quadrant GEMM weight."""
    wt = jnp.transpose(w, (2, 3, 1, 0))               # (kh, kw, cin, cout)
    wb = jnp.zeros((4, 4, cin, 4, CPAD), jnp.float32)
    for q, (ph, pw) in enumerate(((0, 0), (0, 1), (1, 0), (1, 1))):
        wb = wb.at[ph:ph + 3, pw:pw + 3, :, q, :cout].set(wt)
    wb = wb.reshape(16 * cin, 4 * CPAD).astype(jnp.bfloat16)
    bp = jnp.zeros((1, CPAD), jnp.float32).at[0, :cout].set(b)
    return wb, bp


def prepare_kernel_params(raw):
    """One-time conversion: pack conv quadrant weights, transpose FC weights to
    (in, out) bf16, permute+pad pic_fc1 rows to consume the conv3 kernel output
    (rows p = oh*4+ow, lanes = 128-padded channels) in torch.flatten order."""
    p = {}
    for i, (cin, cout) in enumerate(((1, 16), (16, 32), (32, 64))):
        w, b = raw[f"conv{i+1}"]
        p[f"conv{i+1}_w"], p[f"conv{i+1}_b"] = _pack_conv(w, b, cin, cout)

    w1, b1 = raw["pic_fc1"]
    w1t = w1.T.reshape(64, 16, 1024)                  # (c, p, out); torch idx = c*16+p
    w1t = jnp.transpose(w1t, (1, 0, 2))               # (p, c, out)
    w1_big = (jnp.zeros((16, CPAD, 1024), jnp.float32)
              .at[:, :64, :].set(w1t)
              .reshape(16 * CPAD, 1024).astype(jnp.bfloat16))
    ws = [w1_big]
    bs = [b1.reshape(1, -1).astype(jnp.float32)]
    for name in ["pic_fc2"] + [f"phys_fc{i+1}" for i in range(len(PHYS_DIMS) - 1)]:
        w, b = raw[name]
        ws.append(w.T.astype(jnp.bfloat16))           # pre-transposed: no w.T per call
        bs.append(b.reshape(1, -1).astype(jnp.float32))
    p["fc_ws"] = tuple(ws)
    p["fc_bs"] = tuple(bs)
    return p


# ----------------------------------------------------------------------------
# UnitedNet forward: 3 fused conv kernels + 1 fused FC-stack kernel
# ----------------------------------------------------------------------------
def united_net_forward(params, x_nchw):
    N = x_nchw.shape[0]
    # NCHW -> NHWC is a free reshape for Cin == 1.
    x = x_nchw.astype(jnp.float32).reshape(N, 32, 32, 1)

    conv_cout = (16, 32, 64)
    y = None
    for i, cout in enumerate(conv_cout):
        patches = _pool_conv_patches(x)
        y = conv_relu_pool(patches, params[f"conv{i+1}_w"], params[f"conv{i+1}_b"])
        if i + 1 < len(conv_cout):
            h = x.shape[1] // 2
            x = y.reshape(N, h, h, CPAD)[..., :cout]  # real channels for next block

    # conv3 output rows = (n, oh, ow), lanes = 128-padded channels; flatten is a
    # free reshape because pic_fc1's rows were permuted/zero-padded at init.
    feats = y.reshape(N, 16 * CPAD)
    return fc_stack(feats, params["fc_ws"], params["fc_bs"])


# ----------------------------------------------------------------------------
# Pure-XLA f32 reference (for a loose numerical sanity check)
# ----------------------------------------------------------------------------
def reference_forward(raw, x_nchw):
    x = jnp.transpose(x_nchw.astype(jnp.float32), (0, 2, 3, 1))
    for i in range(3):
        w, b = raw[f"conv{i+1}"]
        x = lax.conv_general_dilated(
            x, jnp.transpose(w, (2, 3, 1, 0)), window_strides=(1, 1),
            padding=((1, 1), (1, 1)), dimension_numbers=("NHWC", "HWIO", "NHWC"))
        x = jnp.maximum(x + b, 0.0)
        x = lax.reduce_window(x, -jnp.inf, lax.max, (1, 2, 2, 1), (1, 2, 2, 1), "VALID")
    x = jnp.transpose(x, (0, 3, 1, 2)).reshape(x.shape[0], -1)
    names = ["pic_fc1", "pic_fc2"] + [f"phys_fc{i+1}" for i in range(len(PHYS_DIMS) - 1)]
    for name, relu in zip(names, RELU_FLAGS):
        w, b = raw[name]
        x = x @ w.T + b
        if relu:
            x = jnp.maximum(x, 0.0)
    return x


# ----------------------------------------------------------------------------
if __name__ == "__main__":
    key = jax.random.PRNGKey(0)
    pkey, xkey = jax.random.split(key)
    raw = init_raw_params(pkey)
    params = prepare_kernel_params(raw)

    # 32x32 single-channel input (64*4*4 = 1024 flatten implies 32x32), batch 2.
    x = jax.random.normal(xkey, (2, 1, 32, 32), dtype=jnp.float32)

    fwd = jax.jit(united_net_forward)
    scores = fwd(params, x)
    jax.block_until_ready(scores)

    assert scores.shape == (2, 2), scores.shape
    assert scores.dtype == jnp.float32

    # Loose sanity check vs. the f32 XLA reference (kernels run bf16 / f32-accum).
    ref = reference_forward(raw, x)
    err = float(jnp.max(jnp.abs(scores - ref)))
    scale = float(jnp.max(jnp.abs(ref)))
    assert err <= 0.25 * scale + 1e-3, (err, scale)

    print("KERNEL_OK")
</pallas_src>

<mosaic_0001>
module attributes {stable_mosaic.version = 11 : i64} {
  func.func @_conv_relu_pool_kernel(%arg0: i32, %arg1: memref<256x16xbf16, #tpu.memory_space<vmem>>, %arg2: memref<16x512xbf16, #tpu.memory_space<vmem>>, %arg3: memref<1x128xf32, #tpu.memory_space<vmem>>, %arg4: memref<256x128xbf16, #tpu.memory_space<vmem>>) attributes {dimension_semantics = [#tpu.dimension_semantics<parallel>], iteration_bounds = array<i64: 2>, scalar_prefetch = 0 : i64, scratch_operands = 0 : i64, tpu.core_type = #tpu.core_type<tc>, window_params = [{transform_indices = @transform_0, window_bounds = array<i64: 256, 16>}, {pipeline_mode = #tpu.pipeline_mode<synchronous>, transform_indices = @transform_1, window_bounds = array<i64: 16, 512>}, {pipeline_mode = #tpu.pipeline_mode<synchronous>, transform_indices = @transform_2, window_bounds = array<i64: 1, 128>}, {transform_indices = @transform_3, window_bounds = array<i64: 256, 128>}]} {
    %c0 = arith.constant 0 : index
    %c0_0 = arith.constant 0 : index
    %0 = vector.load %arg1[%c0, %c0_0] : memref<256x16xbf16, #tpu.memory_space<vmem>>, vector<256x16xbf16>
    %c0_1 = arith.constant 0 : index
    %c0_2 = arith.constant 0 : index
    %1 = vector.load %arg2[%c0_1, %c0_2] : memref<16x512xbf16, #tpu.memory_space<vmem>>, vector<16x512xbf16>
    %cst = arith.constant dense<0.000000e+00> : vector<256x512xf32>
    %2 = tpu.matmul %0, %1, %cst {dimension_numbers = #tpu.dot_dimension_numbers<[1], [0], [0], [1], [0, 0, 1, 1], [], []>} : vector<256x16xbf16>, vector<16x512xbf16>, vector<256x512xf32> -> vector<256x512xf32>
    %3 = vector.extract_strided_slice %2 {offsets = [0, 0], sizes = [256, 128], strides = [1, 1]} : vector<256x512xf32> to vector<256x128xf32>
    %4 = vector.extract_strided_slice %2 {offsets = [0, 128], sizes = [256, 128], strides = [1, 1]} : vector<256x512xf32> to vector<256x128xf32>
    %5 = arith.maximumf %3, %4 : vector<256x128xf32>
    %6 = vector.extract_strided_slice %2 {offsets = [0, 256], sizes = [256, 128], strides = [1, 1]} : vector<256x512xf32> to vector<256x128xf32>
    %7 = vector.extract_strided_slice %2 {offsets = [0, 384], sizes = [256, 128], strides = [1, 1]} : vector<256x512xf32> to vector<256x128xf32>
    %8 = arith.maximumf %6, %7 : vector<256x128xf32>
    %9 = arith.maximumf %5, %8 : vector<256x128xf32>
    %c0_3 = arith.constant 0 : index
    %c0_4 = arith.constant 0 : index
    %10 = vector.load %arg3[%c0_3, %c0_4] : memref<1x128xf32, #tpu.memory_space<vmem>>, vector<1x128xf32>
    %11 = vector.broadcast %10 : vector<1x128xf32> to vector<256x128xf32>
    %12 = arith.addf %9, %11 : vector<256x128xf32>
    %cst_5 = arith.constant 0.000000e+00 : f32
    %13 = vector.broadcast %cst_5 : f32 to vector<256x128xf32>
    %14 = arith.maximumf %12, %13 : vector<256x128xf32>
    %15 = arith.truncf %14 : vector<256x128xf32> to vector<256x128xbf16>
    %c0_6 = arith.constant 0 : index
    %c0_7 = arith.constant 0 : index
    %16 = vector.load %arg4[%c0_6, %c0_7] : memref<256x128xbf16, #tpu.memory_space<vmem>>, vector<256x128xbf16>
    tpu.vector_store %arg4[%c0_6, %c0_7], %15 {strides = array<i32>} : memref<256x128xbf16, #tpu.memory_space<vmem>>, vector<256x128xbf16>,
    return
  }
  func.func @transform_0(%arg0: i32) -> (i32, i32) {
    %c0_i32 = arith.constant 0 : i32
    %c0_i32_0 = arith.constant 0 : i32
    return %arg0, %c0_i32 : i32, i32
  }
  func.func @transform_1(%arg0: i32) -> (i32, i32) {
    %c0_i32 = arith.constant 0 : i32
    %c0_i32_0 = arith.constant 0 : i32
    %c0_i32_1 = arith.constant 0 : i32
    return %c0_i32, %c0_i32_0 : i32, i32
  }
  func.func @transform_2(%arg0: i32) -> (i32, i32) {
    %c0_i32 = arith.constant 0 : i32
    %c0_i32_0 = arith.constant 0 : i32
    %c0_i32_1 = arith.constant 0 : i32
    return %c0_i32, %c0_i32_0 : i32, i32
  }
  func.func @transform_3(%arg0: i32) -> (i32, i32) {
    %c0_i32 = arith.constant 0 : i32
    %c0_i32_0 = arith.constant 0 : i32
    return %arg0, %c0_i32 : i32, i32
  }
}

module attributes {stable_mosaic.version = 11 : i64} {
  func.func @_conv_relu_pool_kernel(%arg0: i32, %arg1: memref<64x256xbf16, #tpu.memory_space<vmem>>, %arg2: memref<256x512xbf16, #tpu.memory_space<vmem>>, %arg3: memref<1x128xf32, #tpu.memory_space<vmem>>, %arg4: memref<64x128xbf16, #tpu.memory_space<vmem>>) attributes {dimension_semantics = [#tpu.dimension_semantics<parallel>], iteration_bounds = array<i64: 2>, scalar_prefetch = 0 : i64, scratch_operands = 0 : i64, tpu.core_type = #tpu.core_type<tc>, window_params = [{transform_indices = @transform_0, window_bounds = array<i64: 64, 256>}, {pipeline_mode = #tpu.pipeline_mode<synchronous>, transform_indices = @transform_1, window_bounds = array<i64: 256, 512>}, {pipeline_mode = #tpu.pipeline_mode<synchronous>, transform_indices = @transform_2, window_bounds = array<i64: 1, 128>}, {transform_indices = @transform_3, window_bounds = array<i64: 64, 128>}]} {
    %c0 = arith.constant 0 : index
    %c0_0 = arith.constant 0 : index
    %0 = vector.load %arg1[%c0, %c0_0] : memref<64x256xbf16, #tpu.memory_space<vmem>>, vector<64x256xbf16>
    %c0_1 = arith.constant 0 : index
    %c0_2 = arith.constant 0 : index
    %1 = vector.load %arg2[%c0_1, %c0_2] : memref<256x512xbf16, #tpu.memory_space<vmem>>, vector<256x512xbf16>
    %cst = arith.constant dense<0.000000e+00> : vector<64x512xf32>
    %2 = tpu.matmul %0, %1, %cst {dimension_numbers = #tpu.dot_dimension_numbers<[1], [0], [0], [1], [0, 0, 1, 1], [], []>} : vector<64x256xbf16>, vector<256x512xbf16>, vector<64x512xf32> -> vector<64x512xf32>
    %3 = vector.extract_strided_slice %2 {offsets = [0, 0], sizes = [64, 128], strides = [1, 1]} : vector<64x512xf32> to vector<64x128xf32>
    %4 = vector.extract_strided_slice %2 {offsets = [0, 128], sizes = [64, 128], strides = [1, 1]} : vector<64x512xf32> to vector<64x128xf32>
    %5 = arith.maximumf %3, %4 : vector<64x128xf32>
    %6 = vector.extract_strided_slice %2 {offsets = [0, 256], sizes = [64, 128], strides = [1, 1]} : vector<64x512xf32> to vector<64x128xf32>
    %7 = vector.extract_strided_slice %2 {offsets = [0, 384], sizes = [64, 128], strides = [1, 1]} : vector<64x512xf32> to vector<64x128xf32>
    %8 = arith.maximumf %6, %7 : vector<64x128xf32>
    %9 = arith.maximumf %5, %8 : vector<64x128xf32>
    %c0_3 = arith.constant 0 : index
    %c0_4 = arith.constant 0 : index
    %10 = vector.load %arg3[%c0_3, %c0_4] : memref<1x128xf32, #tpu.memory_space<vmem>>, vector<1x128xf32>
    %11 = vector.broadcast %10 : vector<1x128xf32> to vector<64x128xf32>
    %12 = arith.addf %9, %11 : vector<64x128xf32>
    %cst_5 = arith.constant 0.000000e+00 : f32
    %13 = vector.broadcast %cst_5 : f32 to vector<64x128xf32>
    %14 = arith.maximumf %12, %13 : vector<64x128xf32>
    %15 = arith.truncf %14 : vector<64x128xf32> to vector<64x128xbf16>
    %c0_6 = arith.constant 0 : index
    %c0_7 = arith.constant 0 : index
    %16 = vector.load %arg4[%c0_6, %c0_7] : memref<64x128xbf16, #tpu.memory_space<vmem>>, vector<64x128xbf16>
    tpu.vector_store %arg4[%c0_6, %c0_7], %15 {strides = array<i32>} : memref<64x128xbf16, #tpu.memory_space<vmem>>, vector<64x128xbf16>,
    return
  }
  func.func @transform_0(%arg0: i32) -> (i32, i32) {
    %c0_i32 = arith.constant 0 : i32
    %c0_i32_0 = arith.constant 0 : i32
    return %arg0, %c0_i32 : i32, i32
  }
  func.func @transform_1(%arg0: i32) -> (i32, i32) {
    %c0_i32 = arith.constant 0 : i32
    %c0_i32_0 = arith.constant 0 : i32
    %c0_i32_1 = arith.constant 0 : i32
    return %c0_i32, %c0_i32_0 : i32, i32
  }
  func.func @transform_2(%arg0: i32) -> (i32, i32) {
    %c0_i32 = arith.constant 0 : i32
    %c0_i32_0 = arith.constant 0 : i32
    %c0_i32_1 = arith.constant 0 : i32
    return %c0_i32, %c0_i32_0 : i32, i32
  }
  func.func @transform_3(%arg0: i32) -> (i32, i32) {
    %c0_i32 = arith.constant 0 : i32
    %c0_i32_0 = arith.constant 0 : i32
    return %arg0, %c0_i32 : i32, i32
  }
}

module attributes {stable_mosaic.version = 11 : i64} {
  func.func @_conv_relu_pool_kernel(%arg0: i32, %arg1: memref<16x512xbf16, #tpu.memory_space<vmem>>, %arg2: memref<512x512xbf16, #tpu.memory_space<vmem>>, %arg3: memref<1x128xf32, #tpu.memory_space<vmem>>, %arg4: memref<16x128xbf16, #tpu.memory_space<vmem>>) attributes {dimension_semantics = [#tpu.dimension_semantics<parallel>], iteration_bounds = array<i64: 2>, scalar_prefetch = 0 : i64, scratch_operands = 0 : i64, tpu.core_type = #tpu.core_type<tc>, window_params = [{transform_indices = @transform_0, window_bounds = array<i64: 16, 512>}, {pipeline_mode = #tpu.pipeline_mode<synchronous>, transform_indices = @transform_1, window_bounds = array<i64: 512, 512>}, {pipeline_mode = #tpu.pipeline_mode<synchronous>, transform_indices = @transform_2, window_bounds = array<i64: 1, 128>}, {transform_indices = @transform_3, window_bounds = array<i64: 16, 128>}]} {
    %c0 = arith.constant 0 : index
    %c0_0 = arith.constant 0 : index
    %0 = vector.load %arg1[%c0, %c0_0] : memref<16x512xbf16, #tpu.memory_space<vmem>>, vector<16x512xbf16>
    %c0_1 = arith.constant 0 : index
    %c0_2 = arith.constant 0 : index
    %1 = vector.load %arg2[%c0_1, %c0_2] : memref<512x512xbf16, #tpu.memory_space<vmem>>, vector<512x512xbf16>
    %cst = arith.constant dense<0.000000e+00> : vector<16x512xf32>
    %2 = tpu.matmul %0, %1, %cst {dimension_numbers = #tpu.dot_dimension_numbers<[1], [0], [0], [1], [0, 0, 1, 1], [], []>} : vector<16x512xbf16>, vector<512x512xbf16>, vector<16x512xf32> -> vector<16x512xf32>
    %3 = vector.extract_strided_slice %2 {offsets = [0, 0], sizes = [16, 128], strides = [1, 1]} : vector<16x512xf32> to vector<16x128xf32>
    %4 = vector.extract_strided_slice %2 {offsets = [0, 128], sizes = [16, 128], strides = [1, 1]} : vector<16x512xf32> to vector<16x128xf32>
    %5 = arith.maximumf %3, %4 : vector<16x128xf32>
    %6 = vector.extract_strided_slice %2 {offsets = [0, 256], sizes = [16, 128], strides = [1, 1]} : vector<16x512xf32> to vector<16x128xf32>
    %7 = vector.extract_strided_slice %2 {offsets = [0, 384], sizes = [16, 128], strides = [1, 1]} : vector<16x512xf32> to vector<16x128xf32>
    %8 = arith.maximumf %6, %7 : vector<16x128xf32>
    %9 = arith.maximumf %5, %8 : vector<16x128xf32>
    %c0_3 = arith.constant 0 : index
    %c0_4 = arith.constant 0 : index
    %10 = vector.load %arg3[%c0_3, %c0_4] : memref<1x128xf32, #tpu.memory_space<vmem>>, vector<1x128xf32>
    %11 = vector.broadcast %10 : vector<1x128xf32> to vector<16x128xf32>
    %12 = arith.addf %9, %11 : vector<16x128xf32>
    %cst_5 = arith.constant 0.000000e+00 : f32
    %13 = vector.broadcast %cst_5 : f32 to vector<16x128xf32>
    %14 = arith.maximumf %12, %13 : vector<16x128xf32>
    %15 = arith.truncf %14 : vector<16x128xf32> to vector<16x128xbf16>
    %c0_6 = arith.constant 0 : index
    %c0_7 = arith.constant 0 : index
    %16 = vector.load %arg4[%c0_6, %c0_7] : memref<16x128xbf16, #tpu.memory_space<vmem>>, vector<16x128xbf16>
    tpu.vector_store %arg4[%c0_6, %c0_7], %15 {strides = array<i32>} : memref<16x128xbf16, #tpu.memory_space<vmem>>, vector<16x128xbf16>,
    return
  }
  func.func @transform_0(%arg0: i32) -> (i32, i32) {
    %c0_i32 = arith.constant 0 : i32
    %c0_i32_0 = arith.constant 0 : i32
    return %arg0, %c0_i32 : i32, i32
  }
  func.func @transform_1(%arg0: i32) -> (i32, i32) {
    %c0_i32 = arith.constant 0 : i32
    %c0_i32_0 = arith.constant 0 : i32
    %c0_i32_1 = arith.constant 0 : i32
    return %c0_i32, %c0_i32_0 : i32, i32
  }
  func.func @transform_2(%arg0: i32) -> (i32, i32) {
    %c0_i32 = arith.constant 0 : i32
    %c0_i32_0 = arith.constant 0 : i32
    %c0_i32_1 = arith.constant 0 : i32
    return %c0_i32, %c0_i32_0 : i32, i32
  }
  func.func @transform_3(%arg0: i32) -> (i32, i32) {
    %c0_i32 = arith.constant 0 : i32
    %c0_i32_0 = arith.constant 0 : i32
    return %arg0, %c0_i32 : i32, i32
  }
}

module attributes {stable_mosaic.version = 11 : i64} {
  func.func @_fc_stack_kernel(%arg0: memref<2x2048xbf16, #tpu.memory_space<vmem>>, %arg1: memref<2048x1024xbf16, #tpu.memory_space<vmem>>, %arg2: memref<1x1024xf32, #tpu.memory_space<vmem>>, %arg3: memref<1024x160xbf16, #tpu.memory_space<vmem>>, %arg4: memref<1x160xf32, #tpu.memory_space<vmem>>, %arg5: memref<160x512xbf16, #tpu.memory_space<vmem>>, %arg6: memref<1x512xf32, #tpu.memory_space<vmem>>, %arg7: memref<512x512xbf16, #tpu.memory_space<vmem>>, %arg8: memref<1x512xf32, #tpu.memory_space<vmem>>, %arg9: memref<512x256xbf16, #tpu.memory_space<vmem>>, %arg10: memref<1x256xf32, #tpu.memory_space<vmem>>, %arg11: memref<256x256xbf16, #tpu.memory_space<vmem>>, %arg12: memref<1x256xf32, #tpu.memory_space<vmem>>, %arg13: memref<256x64xbf16, #tpu.memory_space<vmem>>, %arg14: memref<1x64xf32, #tpu.memory_space<vmem>>, %arg15: memref<64x16xbf16, #tpu.memory_space<vmem>>, %arg16: memref<1x16xf32, #tpu.memory_space<vmem>>, %arg17: memref<16x2xbf16, #tpu.memory_space<vmem>>, %arg18: memref<1x2xf32, #tpu.memory_space<vmem>>, %arg19: memref<2x2xf32, #tpu.memory_space<vmem>>) attributes {dimension_semantics = [], scalar_prefetch = 0 : i64, scratch_operands = 0 : i64, tpu.core_type = #tpu.core_type<tc>} {
    %c0 = arith.constant 0 : index
    %c0_0 = arith.constant 0 : index
    %0 = vector.load %arg0[%c0, %c0_0] : memref<2x2048xbf16, #tpu.memory_space<vmem>>, vector<2x2048xbf16>
    %c0_1 = arith.constant 0 : index
    %c0_2 = arith.constant 0 : index
    %1 = vector.load %arg1[%c0_1, %c0_2] : memref<2048x1024xbf16, #tpu.memory_space<vmem>>, vector<2048x1024xbf16>
    %cst = arith.constant dense<0.000000e+00> : vector<2x1024xf32>
    %2 = tpu.matmul %0, %1, %cst {dimension_numbers = #tpu.dot_dimension_numbers<[1], [0], [0], [1], [0, 0, 1, 1], [], []>} : vector<2x2048xbf16>, vector<2048x1024xbf16>, vector<2x1024xf32> -> vector<2x1024xf32>
    %c0_3 = arith.constant 0 : index
    %c0_4 = arith.constant 0 : index
    %3 = vector.load %arg2[%c0_3, %c0_4] : memref<1x1024xf32, #tpu.memory_space<vmem>>, vector<1x1024xf32>
    %4 = vector.broadcast %3 : vector<1x1024xf32> to vector<2x1024xf32>
    %5 = arith.addf %2, %4 : vector<2x1024xf32>
    %cst_5 = arith.constant 0.000000e+00 : f32
    %6 = vector.broadcast %cst_5 : f32 to vector<2x1024xf32>
    %7 = arith.maximumf %5, %6 : vector<2x1024xf32>
    %8 = arith.truncf %7 : vector<2x1024xf32> to vector<2x1024xbf16>
    %c0_6 = arith.constant 0 : index
    %c0_7 = arith.constant 0 : index
    %9 = vector.load %arg3[%c0_6, %c0_7] : memref<1024x160xbf16, #tpu.memory_space<vmem>>, vector<1024x160xbf16>
    %cst_8 = arith.constant dense<0.000000e+00> : vector<2x160xf32>
    %10 = tpu.matmul %8, %9, %cst_8 {dimension_numbers = #tpu.dot_dimension_numbers<[1], [0], [0], [1], [0, 0, 1, 1], [], []>} : vector<2x1024xbf16>, vector<1024x160xbf16>, vector<2x160xf32> -> vector<2x160xf32>
    %c0_9 = arith.constant 0 : index
    %c0_10 = arith.constant 0 : index
    %11 = vector.load %arg4[%c0_9, %c0_10] : memref<1x160xf32, #tpu.memory_space<vmem>>, vector<1x160xf32>
    %12 = vector.broadcast %11 : vector<1x160xf32> to vector<2x160xf32>
    %13 = arith.addf %10, %12 : vector<2x160xf32>
    %14 = arith.truncf %13 : vector<2x160xf32> to vector<2x160xbf16>
    %c0_11 = arith.constant 0 : index
    %c0_12 = arith.constant 0 : index
    %15 = vector.load %arg5[%c0_11, %c0_12] : memref<160x512xbf16, #tpu.memory_space<vmem>>, vector<160x512xbf16>
    %cst_13 = arith.constant dense<0.000000e+00> : vector<2x512xf32>
    %16 = tpu.matmul %14, %15, %cst_13 {dimension_numbers = #tpu.dot_dimension_numbers<[1], [0], [0], [1], [0, 0, 1, 1], [], []>} : vector<2x160xbf16>, vector<160x512xbf16>, vector<2x512xf32> -> vector<2x512xf32>
    %c0_14 = arith.constant 0 : index
    %c0_15 = arith.constant 0 : index
    %17 = vector.load %arg6[%c0_14, %c0_15] : memref<1x512xf32, #tpu.memory_space<vmem>>, vector<1x512xf32>
    %18 = vector.broadcast %17 : vector<1x512xf32> to vector<2x512xf32>
    %19 = arith.addf %16, %18 : vector<2x512xf32>
    %cst_16 = arith.constant 0.000000e+00 : f32
    %20 = vector.broadcast %cst_16 : f32 to vector<2x512xf32>
    %21 = arith.maximumf %19, %20 : vector<2x512xf32>
    %22 = arith.truncf %21 : vector<2x512xf32> to vector<2x512xbf16>
    %c0_17 = arith.constant 0 : index
    %c0_18 = arith.constant 0 : index
    %23 = vector.load %arg7[%c0_17, %c0_18] : memref<512x512xbf16, #tpu.memory_space<vmem>>, vector<512x512xbf16>
    %cst_19 = arith.constant dense<0.000000e+00> : vector<2x512xf32>
    %24 = tpu.matmul %22, %23, %cst_19 {dimension_numbers = #tpu.dot_dimension_numbers<[1], [0], [0], [1], [0, 0, 1, 1], [], []>} : vector<2x512xbf16>, vector<512x512xbf16>, vector<2x512xf32> -> vector<2x512xf32>
    %c0_20 = arith.constant 0 : index
    %c0_21 = arith.constant 0 : index
    %25 = vector.load %arg8[%c0_20, %c0_21] : memref<1x512xf32, #tpu.memory_space<vmem>>, vector<1x512xf32>
    %26 = vector.broadcast %25 : vector<1x512xf32> to vector<2x512xf32>
    %27 = arith.addf %24, %26 : vector<2x512xf32>
    %cst_22 = arith.constant 0.000000e+00 : f32
    %28 = vector.broadcast %cst_22 : f32 to vector<2x512xf32>
    %29 = arith.maximumf %27, %28 : vector<2x512xf32>
    %30 = arith.truncf %29 : vector<2x512xf32> to vector<2x512xbf16>
    %c0_23 = arith.constant 0 : index
    %c0_24 = arith.constant 0 : index
    %31 = vector.load %arg9[%c0_23, %c0_24] : memref<512x256xbf16, #tpu.memory_space<vmem>>, vector<512x256xbf16>
    %cst_25 = arith.constant dense<0.000000e+00> : vector<2x256xf32>
    %32 = tpu.matmul %30, %31, %cst_25 {dimension_numbers = #tpu.dot_dimension_numbers<[1], [0], [0], [1], [0, 0, 1, 1], [], []>} : vector<2x512xbf16>, vector<512x256xbf16>, vector<2x256xf32> -> vector<2x256xf32>
    %c0_26 = arith.constant 0 : index
    %c0_27 = arith.constant 0 : index
    %33 = vector.load %arg10[%c0_26, %c0_27] : memref<1x256xf32, #tpu.memory_space<vmem>>, vector<1x256xf32>
    %34 = vector.broadcast %33 : vector<1x256xf32> to vector<2x256xf32>
    %35 = arith.addf %32, %34 : vector<2x256xf32>
    %cst_28 = arith.constant 0.000000e+00 : f32
    %36 = vector.broadcast %cst_28 : f32 to vector<2x256xf32>
    %37 = arith.maximumf %35, %36 : vector<2x256xf32>
    %38 = arith.truncf %37 : vector<2x256xf32> to vector<2x256xbf16>
    %c0_29 = arith.constant 0 : index
    %c0_30 = arith.constant 0 : index
    %39 = vector.load %arg11[%c0_29, %c0_30] : memref<256x256xbf16, #tpu.memory_space<vmem>>, vector<256x256xbf16>
    %cst_31 = arith.constant dense<0.000000e+00> : vector<2x256xf32>
    %40 = tpu.matmul %38, %39, %cst_31 {dimension_numbers = #tpu.dot_dimension_numbers<[1], [0], [0], [1], [0, 0, 1, 1], [], []>} : vector<2x256xbf16>, vector<256x256xbf16>, vector<2x256xf32> -> vector<2x256xf32>
    %c0_32 = arith.constant 0 : index
    %c0_33 = arith.constant 0 : index
    %41 = vector.load %arg12[%c0_32, %c0_33] : memref<1x256xf32, #tpu.memory_space<vmem>>, vector<1x256xf32>
    %42 = vector.broadcast %41 : vector<1x256xf32> to vector<2x256xf32>
    %43 = arith.addf %40, %42 : vector<2x256xf32>
    %cst_34 = arith.constant 0.000000e+00 : f32
    %44 = vector.broadcast %cst_34 : f32 to vector<2x256xf32>
    %45 = arith.maximumf %43, %44 : vector<2x256xf32>
    %46 = arith.truncf %45 : vector<2x256xf32> to vector<2x256xbf16>
    %c0_35 = arith.constant 0 : index
    %c0_36 = arith.constant 0 : index
    %47 = vector.load %arg13[%c0_35, %c0_36] : memref<256x64xbf16, #tpu.memory_space<vmem>>, vector<256x64xbf16>
    %cst_37 = arith.constant dense<0.000000e+00> : vector<2x64xf32>
    %48 = tpu.matmul %46, %47, %cst_37 {dimension_numbers = #tpu.dot_dimension_numbers<[1], [0], [0], [1], [0, 0, 1, 1], [], []>} : vector<2x256xbf16>, vector<256x64xbf16>, vector<2x64xf32> -> vector<2x64xf32>
    %c0_38 = arith.constant 0 : index
    %c0_39 = arith.constant 0 : index
    %49 = vector.load %arg14[%c0_38, %c0_39] : memref<1x64xf32, #tpu.memory_space<vmem>>, vector<1x64xf32>
    %50 = vector.broadcast %49 : vector<1x64xf32> to vector<2x64xf32>
    %51 = arith.addf %48, %50 : vector<2x64xf32>
    %cst_40 = arith.constant 0.000000e+00 : f32
    %52 = vector.broadcast %cst_40 : f32 to vector<2x64xf32>
    %53 = arith.maximumf %51, %52 : vector<2x64xf32>
    %54 = arith.truncf %53 : vector<2x64xf32> to vector<2x64xbf16>
    %c0_41 = arith.constant 0 : index
    %c0_42 = arith.constant 0 : index
    %55 = vector.load %arg15[%c0_41, %c0_42] : memref<64x16xbf16, #tpu.memory_space<vmem>>, vector<64x16xbf16>
    %cst_43 = arith.constant dense<0.000000e+00> : vector<2x16xf32>
    %56 = tpu.matmul %54, %55, %cst_43 {dimension_numbers = #tpu.dot_dimension_numbers<[1], [0], [0], [1], [0, 0, 1, 1], [], []>} : vector<2x64xbf16>, vector<64x16xbf16>, vector<2x16xf32> -> vector<2x16xf32>
    %c0_44 = arith.constant 0 : index
    %c0_45 = arith.constant 0 : index
    %57 = vector.load %arg16[%c0_44, %c0_45] : memref<1x16xf32, #tpu.memory_space<vmem>>, vector<1x16xf32>
    %58 = vector.broadcast %57 : vector<1x16xf32> to vector<2x16xf32>
    %59 = arith.addf %56, %58 : vector<2x16xf32>
    %cst_46 = arith.constant 0.000000e+00 : f32
    %60 = vector.broadcast %cst_46 : f32 to vector<2x16xf32>
    %61 = arith.maximumf %59, %60 : vector<2x16xf32>
    %62 = arith.truncf %61 : vector<2x16xf32> to vector<2x16xbf16>
    %c0_47 = arith.constant 0 : index
    %c0_48 = arith.constant 0 : index
    %63 = vector.load %arg17[%c0_47, %c0_48] : memref<16x2xbf16, #tpu.memory_space<vmem>>, vector<16x2xbf16>
    %cst_49 = arith.constant dense<0.000000e+00> : vector<2x2xf32>
    %64 = tpu.matmul %62, %63, %cst_49 {dimension_numbers = #tpu.dot_dimension_numbers<[1], [0], [0], [1], [0, 0, 1, 1], [], []>} : vector<2x16xbf16>, vector<16x2xbf16>, vector<2x2xf32> -> vector<2x2xf32>
    %c0_50 = arith.constant 0 : index
    %c0_51 = arith.constant 0 : index
    %65 = vector.load %arg18[%c0_50, %c0_51] : memref<1x2xf32, #tpu.memory_space<vmem>>, vector<1x2xf32>
    %66 = vector.broadcast %65 : vector<1x2xf32> to vector<2x2xf32>
    %67 = arith.addf %64, %66 : vector<2x2xf32>
    %c0_52 = arith.constant 0 : index
    %c0_53 = arith.constant 0 : index
    %68 = vector.load %arg19[%c0_52, %c0_53] : memref<2x2xf32, #tpu.memory_space<vmem>>, vector<2x2xf32>
    tpu.vector_store %arg19[%c0_52, %c0_53], %67 {strides = array<i32>} : memref<2x2xf32, #tpu.memory_space<vmem>>, vector<2x2xf32>,
    return
  }
}

</mosaic_0001>

<bundles_post_ra>
// kernel: united_net_forward.4
= control target key start
LH: loop header
LB: loop body
LE: loop exit
PB: predicated region body
PF: predicated region fallthrough
CT: control target
= control target key end

     0   :  { %8 = vsyncpa [#allocation3], 0  ;;  %s1795_s0 = inlined_call_operand.vmem [shape: bf16[512,16], index: 0, kind: input, shape index: {}]   ;;  %s1796_s1 = inlined_call_operand.hbm [shape: bf16[16,512], index: 1, kind: input, shape index: {}]   ;;  %s1797_s2 = inlined_call_operand.hbm [shape: f32[1,128], index: 2, kind: input, shape index: {}]   ;;  %s1798_s3 = inlined_call_operand.vmem [shape: bf16[512,128], index: 3, kind: output, shape index: {}]  }
   0x1   :  { %9 = vsyncpa [#allocation5], 0  ;;  %s1557_s12 = smov 0  }
   0x2 LB: > { %s1179_s13 = sadd.s32 4294967295, %s1530_s12   ;;  %p1181_p0 = scmp.ge.s32.totalorder %s1530_s12, 1  ;;  %s1530_s12 = sphi %s1557_s12, %s15_s12  }
   0x3   : > { %p114_p1 = scmp.lt.s32.totalorder %s1530_s12, 3  ;;  %s1532_s14 = smov [#allocation2]  }
   0x4   : > { %s126_s15 = sshll.u32 %s1532_s14, 4  ;;  %p1571_p3 = scmp.eq.s32.totalorder %s1179_s13, 0  ;;  %s127_s15 = int_to_ptr.vmem [resolvable:$true] %s126_s15 }
   0x5   : > { %p1565_p2 = pnand %p1181_p0, %p114_p1  ;;  %s1533_s18 = smov [#allocation4]  }
   0x6   : > { %s1803_s17 = scalar_select %p1571_p3, 1, 0 }
   0x7   : > { %s1802_s16 = scalar_select %p1565_p2, 1, 0 }
   0x8   : > { %p1414_p4 = pneg %p1565_p2  ;;  %s140_s19 = sshll.u32 %s1533_s18, 4  ;;  %s1583_s19 = int_to_ptr.vmem [resolvable:$true] %s140_s19 }
   0x9   : > { %s1460_s23 = scalar_lea.hbm %s1796_s1, 512 }
   0xa   : > { %p1579_p5 = pnand %p1571_p3, %p1414_p4  ;;  %p1461_p6 = scmp.ne.s32.totalorder %s1796_s1, %s1460_s23 }
   0xb   : > { %p1467_p10 = scmp.lt.u32.totalorder %s1460_s23, %s1796_s1 }
   0xc   : > { %p1462_p7 = pneg %p1579_p5 }
   0xe   : > { %p1463_p8 = pnand %p1462_p7, %p1461_p6 }
  0x10   : > { %p1464_p9 = pneg %p1463_p8 }
  0x12   : > { %p1469_p11 = pnand %p1467_p10, %p1464_p9 }
  0x14   : > { %1472 = shalt.err (!%p1469_p11)
}
  0x15   : > { %s1473_s28 = scalar_lea.vmem %s127_s15, 512  ;;  %p1481_p1 = scmp.lt.s32.totalorder %s127_s15, %s127_s15 }
  0x16   : > { %p1474_p12 = scmp.ne.s32.totalorder %s127_s15, %s1473_s28  ;;  %p1482_p4 = scmp.lt.s32.totalorder %s1473_s28, %s1473_s28 }
  0x18   : > { %p1476_p13 = pnand %p1474_p12, %p1462_p7  ;;  %p1483_p3 = por %p1482_p4, %p1481_p1 }
  0x1a   : > { %p1477_p0 = pneg %p1476_p13 }
  0x1c   : > { %p1484_p2 = pnand %p1483_p3, %p1477_p0 }
  0x1e   : > { %1487 = shalt.err (!%p1484_p2)
}
  0x1f   : > { %s1534_s29 = smov 256   ;;  %s1535_s30 = smov 16  }
  0x20   : > { %1417 = dma.hbm_to_vmem [thread:$0]  (!%p1579_p5), %s1796_s1, 512, %s127_s15, [#allocation3], %s1534_s29, %s1534_s29, %s1535_s30  }
  0x21   : > { %s1488_s8 = scalar_lea.hbm %s1797_s2, 16 }
  0x22   : > { %p1489_p6 = scmp.ne.s32.totalorder %s1797_s2, %s1488_s8  ;;  %p1495_p8 = scmp.lt.u32.totalorder %s1488_s8, %s1797_s2 }
  0x24   : > { %p1491_p2 = pnand %p1489_p6, %p1462_p7 }
  0x26   : > { %p1492_p3 = pneg %p1491_p2 }
  0x28   : > { %p1497_p9 = pnand %p1495_p8, %p1492_p3 }
  0x2a   : > { %1500 = shalt.err (!%p1497_p9)
}
  0x2b   : > { %s1501_s15 = scalar_lea.vmem %s1583_s19, 16  ;;  %s1508_s18 = scalar_lea.vmem %s1583_s19, 32 }
  0x2c   : > { %p1502_p10 = scmp.ne.s32.totalorder %s1583_s19, %s1501_s15  ;;  %p1509_p13 = scmp.lt.s32.totalorder %s1583_s19, %s1583_s19 }
  0x2d   : > { %p1510_p0 = scmp.lt.s32.totalorder %s1508_s18, %s1501_s15 }
  0x2e   : > { %p1504_p11 = pnand %p1502_p10, %p1462_p7 }
  0x2f   : > { %p1511_p1 = por %p1510_p0, %p1509_p13 }
  0x30   : > { %p1505_p12 = pneg %p1504_p11 }
  0x32   : > { %p1512_p4 = pnand %p1511_p1, %p1505_p12 }
  0x34   : > { %1515 = shalt.err (!%p1512_p4)
}
  0x35   : > { %1420 = dma.hbm_to_vmem [thread:$0]  (!%p1579_p5), %s1797_s2, 16, %s1583_s19, [#allocation5]  }
  0x36   : > { %p1805_p6 = scmp.ne.s32.totalorder %s1802_s16, 0 }
  0x37   : > { %p1806_p7 = scmp.ne.s32.totalorder (!%p1805_p6), %s1803_s17, 0 }
  0x38   : > { %162 = sbr.rel (%p1805_p6) target bundleno = 419 (0x1a3), region = 32 }
  0x3f   : > { %1521 = dma.done.wait (%p1806_p7), [#allocation3], 512  }
  0x40   : > { %1523 = vsyncadd (%p1806_p7), [#allocation3], 4294966784 }
  0x41   : > { %1525 = dma.done.wait (%p1806_p7), [#allocation5], 16  }
  0x42   : > { %1527 = vsyncadd (%p1806_p7), [#allocation5], 4294967280  ;;  %s1188_s20 = sshll.u32 %s1179_s13, 5  ;;  %v1536_v0 = vmov 0   ;;  %v1438_v1 = vld [vmem:[#allocation2 + $0x4] ss:$16 sps:$4 sm:$0xff]  }
  0x43   : > { %420 = vmatprep.mubr.bf16.mxu0 %v1536_v0  ;;  %613 = vmatprep.mubr.bf16.mxu1 %v1536_v0  ;;  %p191_p5 = scmp.lt.s32.totalorder %s1188_s20, 63  ;;  %v1440_v2 = vld [vmem:[#allocation2 + $0xc] ss:$16 sps:$4 sm:$0xff]   ;;  %v1442_v3 = vld [vmem:[#allocation2] ss:$16 sps:$4 sm:$0xff]   ;;  %vm339_vm0 = vcmask 130048  }
  0x44   : > { %388 = vmatprep.subr.bf16.mxu0 %v1438_v1  ;;  %v1443_v4 = vld [vmem:[#allocation2 + $0x8] ss:$16 sps:$4 sm:$0xff]   ;;  %581 = vmatprep.subr.bf16.mxu1 %v1440_v2  ;;  %v1735_v29 = vld [vmem:[#allocation4] ss:$0 sm:$0xff] }
  0x45   : > { %s1808_s20 = smov (!%p191_p5, %s1188_s20), 63  ;;  %389 = vmatpush1.bf16.msra.mxu0 %v1442_v3  ;;  %582 = vmatpush1.bf16.msra.mxu1 %v1443_v4 }
  0x46   : > { %s1189_s16 = sshll.u32 %s1808_s20, 2 }
  0x47   : > { %s1655_s17 = scalar_lea.vmem %s1795_s0, %s1189_s16  ;;  %s1744_s25 = scalar_lea.vmem %s1798_s3, %s1189_s16 }
  0x48   : > { %v1444_v5 = vld [vmem:[%s1655_s17] sm:$0xff]   ;;  %v1445_v6 = vld [vmem:[%s1655_s17 + $0x8] sm:$0xff]   ;;  %v1446_v7 = vld [vmem:[%s1655_s17 + $0x10] sm:$0xff]  }
  0x49   : > { %1212 = vmatmul.mubr.msk.bf16.vlgmr.msra.gmra.mrb[0].mxu0 %vm339_vm0, %v1444_v5  ;;  %1228 = vmatmul.mubr.msk.bf16.vlgmr.msra.gmra.mrb[0].mxu1 %vm339_vm0, %v1444_v5  ;;  %v1447_v8 = vld [vmem:[%s1655_s17 + $0x18] sm:$0xff]   ;;  %v1448_v9 = vld [vmem:[%s1655_s17 + $0x20] sm:$0xff]   ;;  %v1449_v10 = vld [vmem:[%s1655_s17 + $0x28] sm:$0xff]  }
  0x4a   : > { %430 = vmatprep.mubr.bf16.mxu0 %v1536_v0  ;;  %623 = vmatprep.mubr.bf16.mxu1 %v1536_v0  ;;  %v1450_v11 = vld [vmem:[%s1655_s17 + $0x30] sm:$0xff]   ;;  %v1451_v12 = vld [vmem:[%s1655_s17 + $0x38] sm:$0xff]   ;;  %v1452_v13 = vld [vmem:[%s1655_s17 + $0x40] sm:$0xff]  }
  0x4b   : > { %v1453_v14 = vld [vmem:[%s1655_s17 + $0x48] sm:$0xff]   ;;  %v1454_v15 = vld [vmem:[%s1655_s17 + $0x50] sm:$0xff]   ;;  %v1455_v16 = vld [vmem:[%s1655_s17 + $0x58] sm:$0xff]  }
  0x4c   : > { %v1456_v17 = vld [vmem:[%s1655_s17 + $0x60] sm:$0xff]   ;;  %v1457_v18 = vld [vmem:[%s1655_s17 + $0x68] sm:$0xff]   ;;  %v1458_v19 = vld [vmem:[%s1655_s17 + $0x70] sm:$0xff]  }
  0x4d   : > { %v1459_v20 = vld [vmem:[%s1655_s17 + $0x78] sm:$0xff]  }
  0x51   : > { %1213 = vmatmul.mubr.msk.bf16.gmra.mrb[4].mxu0 %vm339_vm0, %v1445_v6  ;;  %1229 = vmatmul.mubr.msk.bf16.gmra.mrb[4].mxu1 %vm339_vm0, %v1445_v6 }
  0x52   : > { %440 = vmatprep.mubr.bf16.mxu0 %v1536_v0  ;;  %633 = vmatprep.mubr.bf16.mxu1 %v1536_v0 }
  0x59   : > { %1214 = vmatmul.mubr.msk.bf16.gmra.mrb[8].mxu0 %vm339_vm0, %v1446_v7  ;;  %1230 = vmatmul.mubr.msk.bf16.gmra.mrb[8].mxu1 %vm339_vm0, %v1446_v7 }
  0x5a   : > { %450 = vmatprep.mubr.bf16.mxu0 %v1536_v0  ;;  %643 = vmatprep.mubr.bf16.mxu1 %v1536_v0 }
  0x61   : > { %1215 = vmatmul.mubr.msk.bf16.gmra.mrb[12].mxu0 %vm339_vm0, %v1447_v8  ;;  %1231 = vmatmul.mubr.msk.bf16.gmra.mrb[12].mxu1 %vm339_vm0, %v1447_v8 }
  0x62   : > { %460 = vmatprep.mubr.bf16.mxu0 %v1536_v0  ;;  %653 = vmatprep.mubr.bf16.mxu1 %v1536_v0 }
  0x69   : > { %1216 = vmatmul.mubr.msk.bf16.gmra.mrb[16].mxu0 %vm339_vm0, %v1448_v9  ;;  %1232 = vmatmul.mubr.msk.bf16.gmra.mrb[16].mxu1 %vm339_vm0, %v1448_v9 }
  0x6a   : > { %470 = vmatprep.mubr.bf16.mxu0 %v1536_v0  ;;  %663 = vmatprep.mubr.bf16.mxu1 %v1536_v0 }
  0x71   : > { %1217 = vmatmul.mubr.msk.bf16.gmra.mrb[20].mxu0 %vm339_vm0, %v1449_v10  ;;  %1233 = vmatmul.mubr.msk.bf16.gmra.mrb[20].mxu1 %vm339_vm0, %v1449_v10 }
  0x72   : > { %480 = vmatprep.mubr.bf16.mxu0 %v1536_v0  ;;  %673 = vmatprep.mubr.bf16.mxu1 %v1536_v0 }
  0x79   : > { %1218 = vmatmul.mubr.msk.bf16.gmra.mrb[24].mxu0 %vm339_vm0, %v1450_v11  ;;  %1234 = vmatmul.mubr.msk.bf16.gmra.mrb[24].mxu1 %vm339_vm0, %v1450_v11 }
  0x7a   : > { %490 = vmatprep.mubr.bf16.mxu0 %v1536_v0  ;;  %683 = vmatprep.mubr.bf16.mxu1 %v1536_v0 }
  0x81   : > { %1219 = vmatmul.mubr.msk.bf16.gmra.mrb[28].mxu0 %vm339_vm0, %v1451_v12  ;;  %1235 = vmatmul.mubr.msk.bf16.gmra.mrb[28].mxu1 %vm339_vm0, %v1451_v12 }
  0x82   : > { %500 = vmatprep.mubr.bf16.mxu0 %v1536_v0  ;;  %693 = vmatprep.mubr.bf16.mxu1 %v1536_v0 }
  0x89   : > { %1220 = vmatmul.mubr.msk.bf16.gmra.mrb[32].mxu0 %vm339_vm0, %v1452_v13  ;;  %1236 = vmatmul.mubr.msk.bf16.gmra.mrb[32].mxu1 %vm339_vm0, %v1452_v13 }
  0x8a   : > { %510 = vmatprep.mubr.bf16.mxu0 %v1536_v0  ;;  %703 = vmatprep.mubr.bf16.mxu1 %v1536_v0 }
  0x91   : > { %1221 = vmatmul.mubr.msk.bf16.gmra.mrb[36].mxu0 %vm339_vm0, %v1453_v14  ;;  %1237 = vmatmul.mubr.msk.bf16.gmra.mrb[36].mxu1 %vm339_vm0, %v1453_v14 }
  0x92   : > { %520 = vmatprep.mubr.bf16.mxu0 %v1536_v0  ;;  %713 = vmatprep.mubr.bf16.mxu1 %v1536_v0 }
  0x99   : > { %1222 = vmatmul.mubr.msk.bf16.gmra.mrb[40].mxu0 %vm339_vm0, %v1454_v15  ;;  %1238 = vmatmul.mubr.msk.bf16.gmra.mrb[40].mxu1 %vm339_vm0, %v1454_v15 }
  0x9a   : > { %530 = vmatprep.mubr.bf16.mxu0 %v1536_v0  ;;  %723 = vmatprep.mubr.bf16.mxu1 %v1536_v0 }
  0xa1   : > { %1223 = vmatmul.mubr.msk.bf16.gmra.mrb[44].mxu0 %vm339_vm0, %v1455_v16  ;;  %1239 = vmatmul.mubr.msk.bf16.gmra.mrb[44].mxu1 %vm339_vm0, %v1455_v16 }
  0xa2   : > { %540 = vmatprep.mubr.bf16.mxu0 %v1536_v0  ;;  %733 = vmatprep.mubr.bf16.mxu1 %v1536_v0 }
  0xa9   : > { %1224 = vmatmul.mubr.msk.bf16.gmra.mrb[48].mxu0 %vm339_vm0, %v1456_v17  ;;  %1240 = vmatmul.mubr.msk.bf16.gmra.mrb[48].mxu1 %vm339_vm0, %v1456_v17 }
  0xaa   : > { %550 = vmatprep.mubr.bf16.mxu0 %v1536_v0  ;;  %743 = vmatprep.mubr.bf16.mxu1 %v1536_v0 }
  0xb1   : > { %1225 = vmatmul.mubr.msk.bf16.gmra.mrb[52].mxu0 %vm339_vm0, %v1457_v18  ;;  %1241 = vmatmul.mubr.msk.bf16.gmra.mrb[52].mxu1 %vm339_vm0, %v1457_v18 }
  0xb2   : > { %560 = vmatprep.mubr.bf16.mxu0 %v1536_v0  ;;  %753 = vmatprep.mubr.bf16.mxu1 %v1536_v0 }
  0xb9   : > { %1226 = vmatmul.mubr.msk.bf16.gmra.mrb[56].mxu0 %vm339_vm0, %v1458_v19  ;;  %1242 = vmatmul.mubr.msk.bf16.gmra.mrb[56].mxu1 %vm339_vm0, %v1458_v19 }
  0xba   : > { %570 = vmatprep.mubr.bf16.mxu0 %v1536_v0  ;;  %763 = vmatprep.mubr.bf16.mxu1 %v1536_v0 }
  0xc1   : > { %1227 = vmatmul.mubr.msk.bf16.gmra.mrb[60].mxu0 %vm339_vm0, %v1459_v20  ;;  %1243 = vmatmul.mubr.msk.bf16.gmra.mrb[60].mxu1 %vm339_vm0, %v1459_v20 }
 0x11c   : > { %v422_v21 = vpop.f32.mrb[0].mxu0  ;;  %v615_v22 = vpop.f32.mrb[0].mxu1 }
 0x11d   : > { %v424_v23 = vpop.f32.mrb[1].mxu0  ;;  %v617_v24 = vpop.f32.mrb[1].mxu1 }
 0x11e   : > { %v774_v25 = vmax.f32 %v422_v21, %v424_v23  ;;  %v806_v26 = vmax.f32 %v615_v22, %v617_v24  ;;  %v426_v27 = vpop.f32.mrb[2].mxu0  ;;  %v619_v28 = vpop.f32.mrb[2].mxu1 }
 0x11f   : > { %v428_v30 = vpop.f32.mrb[3].mxu0  ;;  %v621_v31 = vpop.f32.mrb[3].mxu1 }
 0x120   : > { %v838_v32 = vmax.f32 %v774_v25, %v806_v26  ;;  %v775_v33 = vmax.f32 %v426_v27, %v428_v30  ;;  %v807_v34 = vmax.f32 %v619_v28, %v621_v31 }
 0x122   : > { %v877_v35 = vadd.f32 %v1735_v29, %v838_v32  ;;  %v839_v36 = vmax.f32 %v775_v33, %v807_v34 }
 0x124   : > { %v878_v37 = vadd.f32 %v1735_v29, %v839_v36  ;;  %v432_v38 = vpop.f32.mrb[4].mxu0  ;;  %v625_v39 = vpop.f32.mrb[4].mxu1  ;;  %v909_v42 = vmax.f32 %v877_v35, 0.0 }
 0x125   : > { %v434_v40 = vpop.f32.mrb[5].mxu0  ;;  %v627_v41 = vpop.f32.mrb[5].mxu1 }
 0x126   : > { %v910_v43 = vmax.f32 %v878_v37, 0.0  ;;  %v776_v44 = vmax.f32 %v432_v38, %v434_v40  ;;  %v808_v45 = vmax.f32 %v625_v39, %v627_v41  ;;  %v436_v46 = vpop.f32.mrb[6].mxu0  ;;  %v629_v47 = vpop.f32.mrb[6].mxu1 }
 0x127   : > { %v438_v48 = vpop.f32.mrb[7].mxu0  ;;  %v631_v49 = vpop.f32.mrb[7].mxu1 }
 0x128   : > { %v1314_v50 = vpack.c.bf16 %v910_v43, %v909_v42  ;;  %v840_v51 = vmax.f32 %v776_v44, %v808_v45  ;;  %v777_v52 = vmax.f32 %v436_v46, %v438_v48  ;;  %v809_v53 = vmax.f32 %v629_v47, %v631_v49 }
 0x12a   : > { %1315 = vst [vmem:[%s1744_s25] sm:$0xff] %v1314_v50   ;;  %v879_v54 = vadd.f32 %v1735_v29, %v840_v51  ;;  %v841_v55 = vmax.f32 %v777_v52, %v809_v53 }
 0x12c   : > { %v880_v56 = vadd.f32 %v1735_v29, %v841_v55  ;;  %v442_v57 = vpop.f32.mrb[8].mxu0  ;;  %v635_v58 = vpop.f32.mrb[8].mxu1  ;;  %v911_v61 = vmax.f32 %v879_v54, 0.0 }
 0x12d   : > { %v444_v59 = vpop.f32.mrb[9].mxu0  ;;  %v637_v60 = vpop.f32.mrb[9].mxu1 }
 0x12e   : > { %v912_v62 = vmax.f32 %v880_v56, 0.0  ;;  %v778_v63 = vmax.f32 %v442_v57, %v444_v59  ;;  %v810_v0 = vmax.f32 %v635_v58, %v637_v60  ;;  %v446_v1 = vpop.f32.mrb[10].mxu0  ;;  %v639_v2 = vpop.f32.mrb[10].mxu1 }
 0x12f   : > { %v448_v3 = vpop.f32.mrb[11].mxu0  ;;  %v641_v4 = vpop.f32.mrb[11].mxu1 }
 0x130   : > { %v1319_v5 = vpack.c.bf16 %v912_v62, %v911_v61  ;;  %v842_v6 = vmax.f32 %v778_v63, %v810_v0  ;;  %v779_v7 = vmax.f32 %v446_v1, %v448_v3  ;;  %v811_v8 = vmax.f32 %v639_v2, %v641_v4 }
 0x132   : > { %1391 = vst [vmem:[%s1744_s25 + $0x8] sm:$0xff] %v1319_v5   ;;  %v881_v9 = vadd.f32 %v1735_v29, %v842_v6  ;;  %v843_v10 = vmax.f32 %v779_v7, %v811_v8 }
 0x134   : > { %v882_v11 = vadd.f32 %v1735_v29, %v843_v10  ;;  %v452_v12 = vpop.f32.mrb[12].mxu0  ;;  %v645_v13 = vpop.f32.mrb[12].mxu1  ;;  %v913_v16 = vmax.f32 %v881_v9, 0.0 }
 0x135   : > { %v454_v14 = vpop.f32.mrb[13].mxu0  ;;  %v647_v15 = vpop.f32.mrb[13].mxu1 }
 0x136   : > { %v914_v17 = vmax.f32 %v882_v11, 0.0  ;;  %v780_v18 = vmax.f32 %v452_v12, %v454_v14  ;;  %v812_v19 = vmax.f32 %v645_v13, %v647_v15  ;;  %v456_v20 = vpop.f32.mrb[14].mxu0  ;;  %v649_v21 = vpop.f32.mrb[14].mxu1 }
 0x137   : > { %v458_v22 = vpop.f32.mrb[15].mxu0  ;;  %v651_v23 = vpop.f32.mrb[15].mxu1 }
 0x138   : > { %v1324_v24 = vpack.c.bf16 %v914_v17, %v913_v16  ;;  %v844_v25 = vmax.f32 %v780_v18, %v812_v19  ;;  %v781_v26 = vmax.f32 %v456_v20, %v458_v22  ;;  %v813_v27 = vmax.f32 %v649_v21, %v651_v23 }
 0x13a   : > { %1392 = vst [vmem:[%s1744_s25 + $0x10] sm:$0xff] %v1324_v24   ;;  %v883_v28 = vadd.f32 %v1735_v29, %v844_v25  ;;  %v845_v30 = vmax.f32 %v781_v26, %v813_v27 }
 0x13c   : > { %v884_v31 = vadd.f32 %v1735_v29, %v845_v30  ;;  %v462_v32 = vpop.f32.mrb[16].mxu0  ;;  %v655_v33 = vpop.f32.mrb[16].mxu1  ;;  %v915_v36 = vmax.f32 %v883_v28, 0.0 }
 0x13d   : > { %v464_v34 = vpop.f32.mrb[17].mxu0  ;;  %v657_v35 = vpop.f32.mrb[17].mxu1 }
 0x13e   : > { %v916_v37 = vmax.f32 %v884_v31, 0.0  ;;  %v782_v38 = vmax.f32 %v462_v32, %v464_v34  ;;  %v814_v39 = vmax.f32 %v655_v33, %v657_v35  ;;  %v466_v40 = vpop.f32.mrb[18].mxu0  ;;  %v659_v41 = vpop.f32.mrb[18].mxu1 }
 0x13f   : > { %v468_v42 = vpop.f32.mrb[19].mxu0  ;;  %v661_v43 = vpop.f32.mrb[19].mxu1 }
 0x140   : > { %v1329_v44 = vpack.c.bf16 %v916_v37, %v915_v36  ;;  %v846_v45 = vmax.f32 %v782_v38, %v814_v39  ;;  %v783_v46 = vmax.f32 %v466_v40, %v468_v42  ;;  %v815_v47 = vmax.f32 %v659_v41, %v661_v43 }
 0x142   : > { %1393 = vst [vmem:[%s1744_s25 + $0x18] sm:$0xff] %v1329_v44   ;;  %v885_v48 = vadd.f32 %v1735_v29, %v846_v45  ;;  %v847_v49 = vmax.f32 %v783_v46, %v815_v47 }
 0x144   : > { %v886_v50 = vadd.f32 %v1735_v29, %v847_v49  ;;  %v472_v51 = vpop.f32.mrb[20].mxu0  ;;  %v665_v52 = vpop.f32.mrb[20].mxu1  ;;  %v917_v55 = vmax.f32 %v885_v48, 0.0 }
 0x145   : > { %v474_v53 = vpop.f32.mrb[21].mxu0  ;;  %v667_v54 = vpop.f32.mrb[21].mxu1 }
 0x146   : > { %v918_v56 = vmax.f32 %v886_v50, 0.0  ;;  %v784_v57 = vmax.f32 %v472_v51, %v474_v53  ;;  %v816_v58 = vmax.f32 %v665_v52, %v667_v54  ;;  %v476_v59 = vpop.f32.mrb[22].mxu0  ;;  %v669_v60 = vpop.f32.mrb[22].mxu1 }
 0x147   : > { %v478_v61 = vpop.f32.mrb[23].mxu0  ;;  %v671_v62 = vpop.f32.mrb[23].mxu1 }
 0x148   : > { %v1334_v63 = vpack.c.bf16 %v918_v56, %v917_v55  ;;  %v848_v0 = vmax.f32 %v784_v57, %v816_v58  ;;  %v785_v1 = vmax.f32 %v476_v59, %v478_v61  ;;  %v817_v2 = vmax.f32 %v669_v60, %v671_v62 }
 0x14a   : > { %1394 = vst [vmem:[%s1744_s25 + $0x20] sm:$0xff] %v1334_v63   ;;  %v887_v3 = vadd.f32 %v1735_v29, %v848_v0  ;;  %v849_v4 = vmax.f32 %v785_v1, %v817_v2 }
 0x14c   : > { %v888_v5 = vadd.f32 %v1735_v29, %v849_v4  ;;  %v482_v6 = vpop.f32.mrb[24].mxu0  ;;  %v675_v7 = vpop.f32.mrb[24].mxu1  ;;  %v919_v10 = vmax.f32 %v887_v3, 0.0 }
 0x14d   : > { %v484_v8 = vpop.f32.mrb[25].mxu0  ;;  %v677_v9 = vpop.f32.mrb[25].mxu1 }
 0x14e   : > { %v920_v11 = vmax.f32 %v888_v5, 0.0  ;;  %v786_v12 = vmax.f32 %v482_v6, %v484_v8  ;;  %v818_v13 = vmax.f32 %v675_v7, %v677_v9  ;;  %v486_v14 = vpop.f32.mrb[26].mxu0  ;;  %v679_v15 = vpop.f32.mrb[26].mxu1 }
 0x14f   : > { %v488_v16 = vpop.f32.mrb[27].mxu0  ;;  %v681_v17 = vpop.f32.mrb[27].mxu1 }
 0x150   : > { %v1339_v18 = vpack.c.bf16 %v920_v11, %v919_v10  ;;  %v850_v19 = vmax.f32 %v786_v12, %v818_v13  ;;  %v787_v20 = vmax.f32 %v486_v14, %v488_v16  ;;  %v819_v21 = vmax.f32 %v679_v15, %v681_v17 }
 0x152   : > { %1395 = vst [vmem:[%s1744_s25 + $0x28] sm:$0xff] %v1339_v18   ;;  %v889_v22 = vadd.f32 %v1735_v29, %v850_v19  ;;  %v851_v23 = vmax.f32 %v787_v20, %v819_v21 }
 0x154   : > { %v890_v24 = vadd.f32 %v1735_v29, %v851_v23  ;;  %v492_v25 = vpop.f32.mrb[28].mxu0  ;;  %v685_v26 = vpop.f32.mrb[28].mxu1  ;;  %v921_v30 = vmax.f32 %v889_v22, 0.0 }
 0x155   : > { %v494_v27 = vpop.f32.mrb[29].mxu0  ;;  %v687_v28 = vpop.f32.mrb[29].mxu1 }
 0x156   : > { %v922_v31 = vmax.f32 %v890_v24, 0.0  ;;  %v788_v32 = vmax.f32 %v492_v25, %v494_v27  ;;  %v820_v33 = vmax.f32 %v685_v26, %v687_v28  ;;  %v496_v34 = vpop.f32.mrb[30].mxu0  ;;  %v689_v35 = vpop.f32.mrb[30].mxu1 }
 0x157   : > { %v498_v36 = vpop.f32.mrb[31].mxu0  ;;  %v691_v37 = vpop.f32.mrb[31].mxu1 }
 0x158   : > { %v1344_v38 = vpack.c.bf16 %v922_v31, %v921_v30  ;;  %v852_v39 = vmax.f32 %v788_v32, %v820_v33  ;;  %v789_v40 = vmax.f32 %v496_v34, %v498_v36  ;;  %v821_v41 = vmax.f32 %v689_v35, %v691_v37 }
 0x15a   : > { %1396 = vst [vmem:[%s1744_s25 + $0x30] sm:$0xff] %v1344_v38   ;;  %v891_v42 = vadd.f32 %v1735_v29, %v852_v39  ;;  %v853_v43 = vmax.f32 %v789_v40, %v821_v41 }
 0x15c   : > { %v892_v44 = vadd.f32 %v1735_v29, %v853_v43  ;;  %v502_v45 = vpop.f32.mrb[32].mxu0  ;;  %v695_v46 = vpop.f32.mrb[32].mxu1  ;;  %v923_v49 = vmax.f32 %v891_v42, 0.0 }
 0x15d   : > { %v504_v47 = vpop.f32.mrb[33].mxu0  ;;  %v697_v48 = vpop.f32.mrb[33].mxu1 }
 0x15e   : > { %v924_v50 = vmax.f32 %v892_v44, 0.0  ;;  %v790_v51 = vmax.f32 %v502_v45, %v504_v47  ;;  %v822_v52 = vmax.f32 %v695_v46, %v697_v48  ;;  %v506_v53 = vpop.f32.mrb[34].mxu0  ;;  %v699_v54 = vpop.f32.mrb[34].mxu1 }
 0x15f   : > { %v508_v55 = vpop.f32.mrb[35].mxu0  ;;  %v701_v56 = vpop.f32.mrb[35].mxu1 }
 0x160   : > { %v1349_v57 = vpack.c.bf16 %v924_v50, %v923_v49  ;;  %v854_v58 = vmax.f32 %v790_v51, %v822_v52  ;;  %v791_v59 = vmax.f32 %v506_v53, %v508_v55  ;;  %v823_v60 = vmax.f32 %v699_v54, %v701_v56 }
 0x162   : > { %1397 = vst [vmem:[%s1744_s25 + $0x38] sm:$0xff] %v1349_v57   ;;  %v893_v61 = vadd.f32 %v1735_v29, %v854_v58  ;;  %v855_v62 = vmax.f32 %v791_v59, %v823_v60 }
 0x164   : > { %v894_v63 = vadd.f32 %v1735_v29, %v855_v62  ;;  %v512_v0 = vpop.f32.mrb[36].mxu0  ;;  %v705_v1 = vpop.f32.mrb[36].mxu1  ;;  %v925_v4 = vmax.f32 %v893_v61, 0.0 }
 0x165   : > { %v514_v2 = vpop.f32.mrb[37].mxu0  ;;  %v707_v3 = vpop.f32.mrb[37].mxu1 }
 0x166   : > { %v926_v5 = vmax.f32 %v894_v63, 0.0  ;;  %v792_v6 = vmax.f32 %v512_v0, %v514_v2  ;;  %v824_v7 = vmax.f32 %v705_v1, %v707_v3  ;;  %v516_v8 = vpop.f32.mrb[38].mxu0  ;;  %v709_v9 = vpop.f32.mrb[38].mxu1 }
 0x167   : > { %v518_v10 = vpop.f32.mrb[39].mxu0  ;;  %v711_v11 = vpop.f32.mrb[39].mxu1 }
 0x168   : > { %v1354_v12 = vpack.c.bf16 %v926_v5, %v925_v4  ;;  %v856_v13 = vmax.f32 %v792_v6, %v824_v7  ;;  %v793_v14 = vmax.f32 %v516_v8, %v518_v10  ;;  %v825_v15 = vmax.f32 %v709_v9, %v711_v11 }
 0x16a   : > { %1398 = vst [vmem:[%s1744_s25 + $0x40] sm:$0xff] %v1354_v12   ;;  %v895_v16 = vadd.f32 %v1735_v29, %v856_v13  ;;  %v857_v17 = vmax.f32 %v793_v14, %v825_v15 }
 0x16c   : > { %v896_v18 = vadd.f32 %v1735_v29, %v857_v17  ;;  %v522_v19 = vpop.f32.mrb[40].mxu0  ;;  %v715_v20 = vpop.f32.mrb[40].mxu1  ;;  %v927_v23 = vmax.f32 %v895_v16, 0.0 }
 0x16d   : > { %v524_v21 = vpop.f32.mrb[41].mxu0  ;;  %v717_v22 = vpop.f32.mrb[41].mxu1 }
 0x16e   : > { %v928_v24 = vmax.f32 %v896_v18, 0.0  ;;  %v794_v25 = vmax.f32 %v522_v19, %v524_v21  ;;  %v826_v26 = vmax.f32 %v715_v20, %v717_v22  ;;  %v526_v27 = vpop.f32.mrb[42].mxu0  ;;  %v719_v28 = vpop.f32.mrb[42].mxu1 }
 0x16f   : > { %v528_v30 = vpop.f32.mrb[43].mxu0  ;;  %v721_v31 = vpop.f32.mrb[43].mxu1 }
 0x170   : > { %v1359_v32 = vpack.c.bf16 %v928_v24, %v927_v23  ;;  %v858_v33 = vmax.f32 %v794_v25, %v826_v26  ;;  %v795_v34 = vmax.f32 %v526_v27, %v528_v30  ;;  %v827_v35 = vmax.f32 %v719_v28, %v721_v31 }
 0x172   : > { %1399 = vst [vmem:[%s1744_s25 + $0x48] sm:$0xff] %v1359_v32   ;;  %v897_v36 = vadd.f32 %v1735_v29, %v858_v33  ;;  %v859_v37 = vmax.f32 %v795_v34, %v827_v35 }
 0x174   : > { %v898_v38 = vadd.f32 %v1735_v29, %v859_v37  ;;  %v532_v39 = vpop.f32.mrb[44].mxu0  ;;  %v725_v40 = vpop.f32.mrb[44].mxu1  ;;  %v929_v43 = vmax.f32 %v897_v36, 0.0 }
 0x175   : > { %v534_v41 = vpop.f32.mrb[45].mxu0  ;;  %v727_v42 = vpop.f32.mrb[45].mxu1 }
 0x176   : > { %v930_v44 = vmax.f32 %v898_v38, 0.0  ;;  %v796_v45 = vmax.f32 %v532_v39, %v534_v41  ;;  %v828_v46 = vmax.f32 %v725_v40, %v727_v42  ;;  %v536_v47 = vpop.f32.mrb[46].mxu0  ;;  %v729_v48 = vpop.f32.mrb[46].mxu1 }
 0x177   : > { %v538_v49 = vpop.f32.mrb[47].mxu0  ;;  %v731_v50 = vpop.f32.mrb[47].mxu1 }
 0x178   : > { %v1364_v51 = vpack.c.bf16 %v930_v44, %v929_v43  ;;  %v860_v52 = vmax.f32 %v796_v45, %v828_v46  ;;  %v797_v53 = vmax.f32 %v536_v47, %v538_v49  ;;  %v829_v54 = vmax.f32 %v729_v48, %v731_v50 }
 0x17a   : > { %1400 = vst [vmem:[%s1744_s25 + $0x50] sm:$0xff] %v1364_v51   ;;  %v899_v55 = vadd.f32 %v1735_v29, %v860_v52  ;;  %v861_v56 = vmax.f32 %v797_v53, %v829_v54 }
 0x17c   : > { %v900_v57 = vadd.f32 %v1735_v29, %v861_v56  ;;  %v542_v58 = vpop.f32.mrb[48].mxu0  ;;  %v735_v59 = vpop.f32.mrb[48].mxu1  ;;  %v931_v62 = vmax.f32 %v899_v55, 0.0 }
 0x17d   : > { %v544_v60 = vpop.f32.mrb[49].mxu0  ;;  %v737_v61 = vpop.f32.mrb[49].mxu1 }
 0x17e   : > { %v932_v63 = vmax.f32 %v900_v57, 0.0  ;;  %v798_v0 = vmax.f32 %v542_v58, %v544_v60  ;;  %v830_v1 = vmax.f32 %v735_v59, %v737_v61  ;;  %v546_v2 = vpop.f32.mrb[50].mxu0  ;;  %v739_v3 = vpop.f32.mrb[50].mxu1 }
 0x17f   : > { %v548_v4 = vpop.f32.mrb[51].mxu0  ;;  %v741_v5 = vpop.f32.mrb[51].mxu1 }
 0x180   : > { %v1369_v6 = vpack.c.bf16 %v932_v63, %v931_v62  ;;  %v862_v7 = vmax.f32 %v798_v0, %v830_v1  ;;  %v799_v8 = vmax.f32 %v546_v2, %v548_v4  ;;  %v831_v9 = vmax.f32 %v739_v3, %v741_v5 }
 0x182   : > { %1401 = vst [vmem:[%s1744_s25 + $0x58] sm:$0xff] %v1369_v6   ;;  %v901_v10 = vadd.f32 %v1735_v29, %v862_v7  ;;  %v863_v11 = vmax.f32 %v799_v8, %v831_v9 }
 0x184   : > { %v902_v12 = vadd.f32 %v1735_v29, %v863_v11  ;;  %v552_v13 = vpop.f32.mrb[52].mxu0  ;;  %v745_v14 = vpop.f32.mrb[52].mxu1  ;;  %v933_v17 = vmax.f32 %v901_v10, 0.0 }
 0x185   : > { %v554_v15 = vpop.f32.mrb[53].mxu0  ;;  %v747_v16 = vpop.f32.mrb[53].mxu1 }
 0x186   : > { %v934_v18 = vmax.f32 %v902_v12, 0.0  ;;  %v800_v19 = vmax.f32 %v552_v13, %v554_v15  ;;  %v832_v20 = vmax.f32 %v745_v14, %v747_v16  ;;  %v556_v21 = vpop.f32.mrb[54].mxu0  ;;  %v749_v22 = vpop.f32.mrb[54].mxu1 }
 0x187   : > { %v558_v23 = vpop.f32.mrb[55].mxu0  ;;  %v751_v24 = vpop.f32.mrb[55].mxu1 }
 0x188   : > { %v1374_v25 = vpack.c.bf16 %v934_v18, %v933_v17  ;;  %v864_v26 = vmax.f32 %v800_v19, %v832_v20  ;;  %v801_v27 = vmax.f32 %v556_v21, %v558_v23  ;;  %v833_v28 = vmax.f32 %v749_v22, %v751_v24 }
 0x18a   : > { %1402 = vst [vmem:[%s1744_s25 + $0x60] sm:$0xff] %v1374_v25   ;;  %v903_v30 = vadd.f32 %v1735_v29, %v864_v26  ;;  %v865_v31 = vmax.f32 %v801_v27, %v833_v28 }
 0x18c   : > { %v904_v32 = vadd.f32 %v1735_v29, %v865_v31  ;;  %v562_v33 = vpop.f32.mrb[56].mxu0  ;;  %v755_v34 = vpop.f32.mrb[56].mxu1  ;;  %v935_v37 = vmax.f32 %v903_v30, 0.0 }
 0x18d   : > { %v564_v35 = vpop.f32.mrb[57].mxu0  ;;  %v757_v36 = vpop.f32.mrb[57].mxu1 }
 0x18e   : > { %v936_v38 = vmax.f32 %v904_v32, 0.0  ;;  %v802_v39 = vmax.f32 %v562_v33, %v564_v35  ;;  %v834_v40 = vmax.f32 %v755_v34, %v757_v36  ;;  %v566_v41 = vpop.f32.mrb[58].mxu0  ;;  %v759_v42 = vpop.f32.mrb[58].mxu1 }
 0x18f   : > { %v568_v43 = vpop.f32.mrb[59].mxu0  ;;  %v761_v44 = vpop.f32.mrb[59].mxu1 }
 0x190   : > { %v1379_v45 = vpack.c.bf16 %v936_v38, %v935_v37  ;;  %v866_v46 = vmax.f32 %v802_v39, %v834_v40  ;;  %v803_v47 = vmax.f32 %v566_v41, %v568_v43  ;;  %v835_v48 = vmax.f32 %v759_v42, %v761_v44 }
 0x192   : > { %1403 = vst [vmem:[%s1744_s25 + $0x68] sm:$0xff] %v1379_v45   ;;  %v905_v49 = vadd.f32 %v1735_v29, %v866_v46  ;;  %v867_v50 = vmax.f32 %v803_v47, %v835_v48 }
 0x194   : > { %v906_v51 = vadd.f32 %v1735_v29, %v867_v50  ;;  %v572_v52 = vpop.f32.mrb[60].mxu0  ;;  %v765_v53 = vpop.f32.mrb[60].mxu1  ;;  %v937_v56 = vmax.f32 %v905_v49, 0.0 }
 0x195   : > { %v574_v54 = vpop.f32.mrb[61].mxu0  ;;  %v767_v55 = vpop.f32.mrb[61].mxu1 }
 0x196   : > { %v938_v57 = vmax.f32 %v906_v51, 0.0  ;;  %v804_v58 = vmax.f32 %v572_v52, %v574_v54  ;;  %v836_v59 = vmax.f32 %v765_v53, %v767_v55  ;;  %v576_v60 = vpop.f32.mrb[62].mxu0  ;;  %v769_v61 = vpop.f32.mrb[62].mxu1 }
 0x197   : > { %v578_v62 = vpop.f32.mrb[63].mxu0  ;;  %v771_v63 = vpop.f32.mrb[63].mxu1 }
 0x198   : > { %v1384_v0 = vpack.c.bf16 %v938_v57, %v937_v56  ;;  %v868_v1 = vmax.f32 %v804_v58, %v836_v59  ;;  %v805_v2 = vmax.f32 %v576_v60, %v578_v62  ;;  %v837_v3 = vmax.f32 %v769_v61, %v771_v63 }
 0x19a   : > { %1404 = vst [vmem:[%s1744_s25 + $0x70] sm:$0xff] %v1384_v0   ;;  %v907_v4 = vadd.f32 %v1735_v29, %v868_v1  ;;  %v869_v5 = vmax.f32 %v805_v2, %v837_v3 }
 0x19c   : > { %v908_v6 = vadd.f32 %v1735_v29, %v869_v5  ;;  %v939_v7 = vmax.f32 %v907_v4, 0.0 }
 0x19e   : > { %v940_v8 = vmax.f32 %v908_v6, 0.0 }
 0x1a0   : > { %v1389_v9 = vpack.c.bf16 %v940_v8, %v939_v7 }
 0x1a2   : > { %1405 = vst [vmem:[%s1744_s25 + $0x78] sm:$0xff] %v1389_v9  }
 0x1a3 PF: > { %s15_s12 = sadd.s32 1, %s1530_s12  }
 0x1a4   : > { %p12_p2 = scmp.ge.s32.totalorder %s15_s12, 4  }
 0x1a6   :  { %14 = sbr.rel (!%p12_p2) target bundleno = 2 (0x2), region = 71 }
 0x1ad   :  { %1123 = vsyncpa [#allocation3], 1 }
 0x1ae   :  { %1125 = vsyncpa [#allocation3 + $0x1], 1 }
 0x1af   :  { %1126 = vsyncpa [#allocation5], 1 }

// kernel: united_net_forward.5
= control target key start
LH: loop header
LB: loop body
LE: loop exit
PB: predicated region body
PF: predicated region fallthrough
CT: control target
= control target key end

     0   :  { %8 = vsyncpa [#allocation3], 0  ;;  %s1439_s0 = inlined_call_operand.vmem [shape: bf16[128,256], index: 0, kind: input, shape index: {}]   ;;  %s1440_s1 = inlined_call_operand.hbm [shape: bf16[256,512], index: 1, kind: input, shape index: {}]   ;;  %s1441_s2 = inlined_call_operand.hbm [shape: f32[1,128], index: 2, kind: input, shape index: {}]   ;;  %s1442_s3 = inlined_call_operand.vmem [shape: bf16[128,128], index: 3, kind: output, shape index: {}]  }
   0x1   :  { %9 = vsyncpa [#allocation5], 0  ;;  %s1312_s12 = smov 0  }
   0x2 LB: > { %s948_s13 = sadd.s32 4294967295, %s1286_s12   ;;  %p950_p0 = scmp.ge.s32.totalorder %s1286_s12, 1  ;;  %s1286_s12 = sphi %s1312_s12, %s15_s12  }
   0x3   : > { %p114_p1 = scmp.lt.s32.totalorder %s1286_s12, 3  ;;  %s1288_s14 = smov [#allocation2]  }
   0x4   : > { %s126_s15 = sshll.u32 %s1288_s14, 4  ;;  %p1326_p3 = scmp.eq.s32.totalorder %s948_s13, 0  ;;  %s127_s15 = int_to_ptr.vmem [resolvable:$true] %s126_s15 }
   0x5   : > { %p1320_p2 = pnand %p950_p0, %p114_p1  ;;  %s1289_s18 = smov [#allocation4]  }
   0x6   : > { %s1447_s17 = scalar_select %p1326_p3, 1, 0 }
   0x7   : > { %s1446_s16 = scalar_select %p1320_p2, 1, 0 }
   0x8   : > { %p1085_p4 = pneg %p1320_p2  ;;  %s140_s19 = sshll.u32 %s1289_s18, 4  ;;  %s1338_s19 = int_to_ptr.vmem [resolvable:$true] %s140_s19 }
   0x9   : > { %s1216_s23 = scalar_lea.hbm %s1440_s1, 8192 }
   0xa   : > { %p1334_p5 = pnand %p1326_p3, %p1085_p4  ;;  %p1217_p6 = scmp.ne.s32.totalorder %s1440_s1, %s1216_s23 }
   0xb   : > { %p1223_p10 = scmp.lt.u32.totalorder %s1216_s23, %s1440_s1 }
   0xc   : > { %p1218_p7 = pneg %p1334_p5 }
   0xe   : > { %p1219_p8 = pnand %p1218_p7, %p1217_p6 }
  0x10   : > { %p1220_p9 = pneg %p1219_p8 }
  0x12   : > { %p1225_p11 = pnand %p1223_p10, %p1220_p9 }
  0x14   : > { %1228 = shalt.err (!%p1225_p11)
}
  0x15   : > { %s1229_s28 = scalar_lea.vmem %s127_s15, 8192  ;;  %p1237_p1 = scmp.lt.s32.totalorder %s127_s15, %s127_s15 }
  0x16   : > { %p1230_p12 = scmp.ne.s32.totalorder %s127_s15, %s1229_s28  ;;  %p1238_p4 = scmp.lt.s32.totalorder %s1229_s28, %s1229_s28 }
  0x18   : > { %p1232_p13 = pnand %p1230_p12, %p1218_p7  ;;  %p1239_p3 = por %p1238_p4, %p1237_p1 }
  0x1a   : > { %p1233_p0 = pneg %p1232_p13 }
  0x1c   : > { %p1240_p2 = pnand %p1239_p3, %p1233_p0 }
  0x1e   : > { %1243 = shalt.err (!%p1240_p2)
}
  0x1f   : > { %s1290_s29 = smov 256   ;;  %s1291_s30 = smov 16  }
  0x20   : > { %1088 = dma.hbm_to_vmem [thread:$0]  (!%p1334_p5), %s1440_s1, 8192, %s127_s15, [#allocation3], %s1290_s29, %s1290_s29, %s1291_s30  }
  0x21   : > { %s1244_s8 = scalar_lea.hbm %s1441_s2, 16 }
  0x22   : > { %p1245_p6 = scmp.ne.s32.totalorder %s1441_s2, %s1244_s8  ;;  %p1251_p8 = scmp.lt.u32.totalorder %s1244_s8, %s1441_s2 }
  0x24   : > { %p1247_p2 = pnand %p1245_p6, %p1218_p7 }
  0x26   : > { %p1248_p3 = pneg %p1247_p2 }
  0x28   : > { %p1253_p9 = pnand %p1251_p8, %p1248_p3 }
  0x2a   : > { %1256 = shalt.err (!%p1253_p9)
}
  0x2b   : > { %s1257_s15 = scalar_lea.vmem %s1338_s19, 16  ;;  %s1264_s18 = scalar_lea.vmem %s1338_s19, 32 }
  0x2c   : > { %p1258_p10 = scmp.ne.s32.totalorder %s1338_s19, %s1257_s15  ;;  %p1265_p13 = scmp.lt.s32.totalorder %s1338_s19, %s1338_s19 }
  0x2d   : > { %p1266_p0 = scmp.lt.s32.totalorder %s1264_s18, %s1257_s15 }
  0x2e   : > { %p1260_p11 = pnand %p1258_p10, %p1218_p7 }
  0x2f   : > { %p1267_p1 = por %p1266_p0, %p1265_p13 }
  0x30   : > { %p1261_p12 = pneg %p1260_p11 }
  0x32   : > { %p1268_p4 = pnand %p1267_p1, %p1261_p12 }
  0x34   : > { %1271 = shalt.err (!%p1268_p4)
}
  0x35   : > { %1091 = dma.hbm_to_vmem [thread:$0]  (!%p1334_p5), %s1441_s2, 16, %s1338_s19, [#allocation5]  }
  0x36   : > { %p1449_p6 = scmp.ne.s32.totalorder %s1446_s16, 0 }
  0x37   : > { %p1450_p7 = scmp.ne.s32.totalorder (!%p1449_p6), %s1447_s17, 0 }
  0x38   : > { %163 = sbr.rel (%p1449_p6) target bundleno = 381 (0x17d), region = 32 }
  0x3f   : > { %1277 = dma.done.wait (%p1450_p7), [#allocation3], 8192  }
  0x40   : > { %1279 = vsyncadd (%p1450_p7), [#allocation3], 4294959104 }
  0x41   : > { %1281 = dma.done.wait (%p1450_p7), [#allocation5], 16  }
  0x42   : > { %1283 = vsyncadd (%p1450_p7), [#allocation5], 4294967280  ;;  %v1108_v0 = vld [vmem:[#allocation2 + $0x4] ss:$16 sps:$4 sm:$0xff]   ;;  %v1110_v1 = vld [vmem:[#allocation2 + $0xc] ss:$16 sps:$4 sm:$0xff]  }
  0x43   : > { %637 = vmatprep.subr.bf16.mxu0 %v1108_v0  ;;  %v1112_v2 = vld [vmem:[#allocation2] ss:$16 sps:$4 sm:$0xff]   ;;  %v1113_v3 = vld [vmem:[#allocation2 + $0x8] ss:$16 sps:$4 sm:$0xff]   ;;  %710 = vmatprep.subr.bf16.mxu1 %v1110_v1  ;;  %v1114_v4 = vld [vmem:[#allocation2 + $0x24] ss:$16 sps:$4 sm:$0xff]  }
  0x44   : > { %638 = vmatpush1.bf16.msra.mxu0 %v1112_v2  ;;  %711 = vmatpush1.bf16.msra.mxu1 %v1113_v3  ;;  %v1116_v5 = vld [vmem:[#allocation2 + $0x2c] ss:$16 sps:$4 sm:$0xff]   ;;  %v1118_v6 = vld [vmem:[#allocation2 + $0x20] ss:$16 sps:$4 sm:$0xff]   ;;  %v1119_v7 = vld [vmem:[#allocation2 + $0x28] ss:$16 sps:$4 sm:$0xff]  }
  0x45   : > { %639 = vmatprep.subr.bf16.mxu0 %v1114_v4  ;;  %712 = vmatprep.subr.bf16.mxu1 %v1116_v5  ;;  %v1120_v8 = vld [vmem:[#allocation2 + $0x44] ss:$16 sps:$4 sm:$0xff]   ;;  %v1122_v9 = vld [vmem:[#allocation2 + $0x4c] ss:$16 sps:$4 sm:$0xff]   ;;  %v1124_v10 = vld [vmem:[#allocation2 + $0x40] ss:$16 sps:$4 sm:$0xff]  }
  0x46   : > { %v1125_v11 = vld [vmem:[#allocation2 + $0x48] ss:$16 sps:$4 sm:$0xff]   ;;  %v1126_v12 = vld [vmem:[#allocation2 + $0x64] ss:$16 sps:$4 sm:$0xff]   ;;  %v1128_v13 = vld [vmem:[#allocation2 + $0x6c] ss:$16 sps:$4 sm:$0xff]  }
  0x47   : > { %v1130_v14 = vld [vmem:[#allocation2 + $0x60] ss:$16 sps:$4 sm:$0xff]   ;;  %v1131_v15 = vld [vmem:[#allocation2 + $0x68] ss:$16 sps:$4 sm:$0xff]   ;;  %v1132_v16 = vld [vmem:[#allocation2 + $0x84] ss:$16 sps:$4 sm:$0xff]  }
  0x48   : > { %640 = vmatpush1.bf16.msra.mxu0 %v1118_v6  ;;  %713 = vmatpush1.bf16.msra.mxu1 %v1119_v7  ;;  %v1134_v17 = vld [vmem:[#allocation2 + $0x8c] ss:$16 sps:$4 sm:$0xff]   ;;  %v1136_v18 = vld [vmem:[#allocation2 + $0x80] ss:$16 sps:$4 sm:$0xff]   ;;  %v1137_v19 = vld [vmem:[#allocation2 + $0x88] ss:$16 sps:$4 sm:$0xff]  }
  0x49   : > { %641 = vmatprep.subr.bf16.mxu0 %v1120_v8  ;;  %714 = vmatprep.subr.bf16.mxu1 %v1122_v9  ;;  %v1138_v20 = vld [vmem:[#allocation2 + $0xa4] ss:$16 sps:$4 sm:$0xff]   ;;  %v1140_v21 = vld [vmem:[#allocation2 + $0xac] ss:$16 sps:$4 sm:$0xff]   ;;  %v1142_v22 = vld [vmem:[#allocation2 + $0xa0] ss:$16 sps:$4 sm:$0xff]  }
  0x4a   : > { %v1143_v23 = vld [vmem:[#allocation2 + $0xa8] ss:$16 sps:$4 sm:$0xff]   ;;  %v1144_v24 = vld [vmem:[#allocation2 + $0xc4] ss:$16 sps:$4 sm:$0xff]   ;;  %v1146_v25 = vld [vmem:[#allocation2 + $0xcc] ss:$16 sps:$4 sm:$0xff]  }
  0x4b   : > { %v1148_v26 = vld [vmem:[#allocation2 + $0xc0] ss:$16 sps:$4 sm:$0xff]   ;;  %v1149_v27 = vld [vmem:[#allocation2 + $0xc8] ss:$16 sps:$4 sm:$0xff]   ;;  %v1150_v28 = vld [vmem:[#allocation2 + $0xe4] ss:$16 sps:$4 sm:$0xff]  }
  0x4c   : > { %642 = vmatpush1.bf16.msra.mxu0 %v1124_v10  ;;  %715 = vmatpush1.bf16.msra.mxu1 %v1125_v11  ;;  %v1152_v29 = vld [vmem:[#allocation2 + $0xec] ss:$16 sps:$4 sm:$0xff]   ;;  %s957_s16 = sshll.u32 %s948_s13, 3  ;;  %v1154_v30 = vld [vmem:[#allocation2 + $0xe0] ss:$16 sps:$4 sm:$0xff]  }
  0x4d   : > { %643 = vmatprep.subr.bf16.mxu0 %v1126_v12  ;;  %716 = vmatprep.subr.bf16.mxu1 %v1128_v13  ;;  %v1155_v31 = vld [vmem:[#allocation2 + $0xe8] ss:$16 sps:$4 sm:$0xff]   ;;  %v1156_v32 = vld [vmem:[#allocation2 + $0x104] ss:$16 sps:$4 sm:$0xff]   ;;  %v1158_v33 = vld [vmem:[#allocation2 + $0x10c] ss:$16 sps:$4 sm:$0xff]  }
  0x4e   : > { %p193_p5 = scmp.lt.s32.totalorder %s957_s16, 15  ;;  %v1160_v34 = vld [vmem:[#allocation2 + $0x100] ss:$16 sps:$4 sm:$0xff]   ;;  %v1161_v35 = vld [vmem:[#allocation2 + $0x108] ss:$16 sps:$4 sm:$0xff]  }
  0x4f   : > { %v1162_v36 = vld [vmem:[#allocation2 + $0x124] ss:$16 sps:$4 sm:$0xff]   ;;  %v1164_v37 = vld [vmem:[#allocation2 + $0x12c] ss:$16 sps:$4 sm:$0xff]   ;;  %v1166_v38 = vld [vmem:[#allocation2 + $0x120] ss:$16 sps:$4 sm:$0xff]  }
  0x50   : > { %644 = vmatpush1.bf16.msra.mxu0 %v1130_v14  ;;  %717 = vmatpush1.bf16.msra.mxu1 %v1131_v15  ;;  %s1452_s16 = smov (!%p193_p5, %s957_s16), 15  ;;  %v1167_v39 = vld [vmem:[#allocation2 + $0x128] ss:$16 sps:$4 sm:$0xff]   ;;  %v1168_v40 = vld [vmem:[#allocation2 + $0x144] ss:$16 sps:$4 sm:$0xff]  }
  0x51   : > { %645 = vmatprep.subr.bf16.mxu0 %v1132_v16  ;;  %718 = vmatprep.subr.bf16.mxu1 %v1134_v17  ;;  %v1170_v41 = vld [vmem:[#allocation2 + $0x14c] ss:$16 sps:$4 sm:$0xff]   ;;  %s1045_s13 = sshll.u32 %s1452_s16, 3  ;;  %v1172_v42 = vld [vmem:[#allocation2 + $0x140] ss:$16 sps:$4 sm:$0xff]   ;;  %s961_s23 = sshll.u32 %s1452_s16, 2 }
  0x52   : > { %v1173_v43 = vld [vmem:[#allocation2 + $0x148] ss:$16 sps:$4 sm:$0xff]   ;;  %v1174_v44 = vld [vmem:[#allocation2 + $0x164] ss:$16 sps:$4 sm:$0xff]   ;;  %s1406_s20 = scalar_lea.vmem %s1439_s0, %s1045_s13  ;;  %v1176_v45 = vld [vmem:[#allocation2 + $0x16c] ss:$16 sps:$4 sm:$0xff]   ;;  %s1424_s26 = scalar_lea.vmem %s1442_s3, %s961_s23 }
  0x53   : > { %v1178_v46 = vld [vmem:[#allocation2 + $0x160] ss:$16 sps:$4 sm:$0xff]   ;;  %v1179_v47 = vld [vmem:[#allocation2 + $0x168] ss:$16 sps:$4 sm:$0xff]   ;;  %v1206_v48 = vld [vmem:[%s1406_s20 + $0x4] ss:$8 sps:$4 sm:$0xff]  }
  0x54   : > { %646 = vmatpush1.bf16.msra.mxu0 %v1136_v18  ;;  %719 = vmatpush1.bf16.msra.mxu1 %v1137_v19  ;;  %v1180_v49 = vld [vmem:[#allocation2 + $0x184] ss:$16 sps:$4 sm:$0xff]   ;;  %v1182_v50 = vld [vmem:[#allocation2 + $0x18c] ss:$16 sps:$4 sm:$0xff]   ;;  %v1184_v51 = vld [vmem:[#allocation2 + $0x180] ss:$16 sps:$4 sm:$0xff]  }
  0x55   : > { %647 = vmatprep.subr.bf16.mxu0 %v1138_v20  ;;  %720 = vmatprep.subr.bf16.mxu1 %v1140_v21  ;;  %v1185_v52 = vld [vmem:[#allocation2 + $0x188] ss:$16 sps:$4 sm:$0xff]   ;;  %v1186_v53 = vld [vmem:[#allocation2 + $0x1a4] ss:$16 sps:$4 sm:$0xff]   ;;  %v1188_v54 = vld [vmem:[#allocation2 + $0x1ac] ss:$16 sps:$4 sm:$0xff]  }
  0x56   : > { %669 = vmatprep.mubr.bf16.mxu0 %v1206_v48  ;;  %742 = vmatprep.mubr.bf16.mxu1 %v1206_v48  ;;  %v1190_v55 = vld [vmem:[#allocation2 + $0x1a0] ss:$16 sps:$4 sm:$0xff]   ;;  %v1191_v56 = vld [vmem:[#allocation2 + $0x1a8] ss:$16 sps:$4 sm:$0xff]   ;;  %v1192_v57 = vld [vmem:[#allocation2 + $0x1c4] ss:$16 sps:$4 sm:$0xff]  }
  0x57   : > { %v1194_v58 = vld [vmem:[#allocation2 + $0x1cc] ss:$16 sps:$4 sm:$0xff]   ;;  %v1196_v59 = vld [vmem:[#allocation2 + $0x1c0] ss:$16 sps:$4 sm:$0xff]   ;;  %v1197_v60 = vld [vmem:[#allocation2 + $0x1c8] ss:$16 sps:$4 sm:$0xff]  }
  0x58   : > { %648 = vmatpush1.bf16.msra.mxu0 %v1142_v22  ;;  %721 = vmatpush1.bf16.msra.mxu1 %v1143_v23  ;;  %v1198_v61 = vld [vmem:[#allocation2 + $0x1e4] ss:$16 sps:$4 sm:$0xff]   ;;  %v1200_v62 = vld [vmem:[#allocation2 + $0x1ec] ss:$16 sps:$4 sm:$0xff]   ;;  %v1202_v63 = vld [vmem:[#allocation2 + $0x1e0] ss:$16 sps:$4 sm:$0xff]  }
  0x59   : > { %649 = vmatprep.subr.bf16.mxu0 %v1144_v24  ;;  %722 = vmatprep.subr.bf16.mxu1 %v1146_v25  ;;  %v1203_v0 = vld [vmem:[#allocation2 + $0x1e8] ss:$16 sps:$4 sm:$0xff]   ;;  %v1207_v2 = vld [vmem:[%s1406_s20 + $0x14] ss:$8 sps:$4 sm:$0xff]   ;;  %v1210_v4 = vld [vmem:[%s1406_s20 + $0x24] ss:$8 sps:$4 sm:$0xff]  }
  0x5a   : > { %v1204_v1 = vld [vmem:[%s1406_s20] ss:$8 sps:$4 sm:$0xff]   ;;  %v1209_v3 = vld [vmem:[%s1406_s20 + $0x10] ss:$8 sps:$4 sm:$0xff]   ;;  %v1213_v6 = vld [vmem:[%s1406_s20 + $0x34] ss:$8 sps:$4 sm:$0xff]  }
  0x5b   : > { %v1212_v5 = vld [vmem:[%s1406_s20 + $0x20] ss:$8 sps:$4 sm:$0xff]   ;;  %v1215_v7 = vld [vmem:[%s1406_s20 + $0x30] ss:$8 sps:$4 sm:$0xff]  }
  0x5c   : > { %650 = vmatpush1.bf16.msra.mxu0 %v1148_v26  ;;  %723 = vmatpush1.bf16.msra.mxu1 %v1149_v27  ;;  %v1416_v16 = vld [vmem:[#allocation4] ss:$0 sm:$0xff] }
  0x5d   : > { %651 = vmatprep.subr.bf16.mxu0 %v1150_v28  ;;  %724 = vmatprep.subr.bf16.mxu1 %v1152_v29 }
  0x60   : > { %652 = vmatpush1.bf16.msra.mxu0 %v1154_v30  ;;  %725 = vmatpush1.bf16.msra.mxu1 %v1155_v31 }
  0x61   : > { %653 = vmatprep.subr.bf16.mxu0 %v1156_v32  ;;  %726 = vmatprep.subr.bf16.mxu1 %v1158_v33 }
  0x64   : > { %654 = vmatpush1.bf16.msra.mxu0 %v1160_v34  ;;  %727 = vmatpush1.bf16.msra.mxu1 %v1161_v35 }
  0x65   : > { %655 = vmatprep.subr.bf16.mxu0 %v1162_v36  ;;  %728 = vmatprep.subr.bf16.mxu1 %v1164_v37 }
  0x68   : > { %656 = vmatpush1.bf16.msra.mxu0 %v1166_v38  ;;  %729 = vmatpush1.bf16.msra.mxu1 %v1167_v39 }
  0x69   : > { %657 = vmatprep.subr.bf16.mxu0 %v1168_v40  ;;  %730 = vmatprep.subr.bf16.mxu1 %v1170_v41 }
  0x6c   : > { %658 = vmatpush1.bf16.msra.mxu0 %v1172_v42  ;;  %731 = vmatpush1.bf16.msra.mxu1 %v1173_v43 }
  0x6d   : > { %659 = vmatprep.subr.bf16.mxu0 %v1174_v44  ;;  %732 = vmatprep.subr.bf16.mxu1 %v1176_v45 }
  0x70   : > { %660 = vmatpush1.bf16.msra.mxu0 %v1178_v46  ;;  %733 = vmatpush1.bf16.msra.mxu1 %v1179_v47 }
  0x71   : > { %661 = vmatprep.subr.bf16.mxu0 %v1180_v49  ;;  %734 = vmatprep.subr.bf16.mxu1 %v1182_v50 }
  0x74   : > { %662 = vmatpush1.bf16.msra.mxu0 %v1184_v51  ;;  %735 = vmatpush1.bf16.msra.mxu1 %v1185_v52 }
  0x75   : > { %663 = vmatprep.subr.bf16.mxu0 %v1186_v53  ;;  %736 = vmatprep.subr.bf16.mxu1 %v1188_v54 }
  0x78   : > { %664 = vmatpush1.bf16.msra.mxu0 %v1190_v55  ;;  %737 = vmatpush1.bf16.msra.mxu1 %v1191_v56 }
  0x79   : > { %665 = vmatprep.subr.bf16.mxu0 %v1192_v57  ;;  %738 = vmatprep.subr.bf16.mxu1 %v1194_v58 }
  0x7c   : > { %666 = vmatpush1.bf16.msra.mxu0 %v1196_v59  ;;  %739 = vmatpush1.bf16.msra.mxu1 %v1197_v60 }
  0x7d   : > { %667 = vmatprep.subr.bf16.mxu0 %v1198_v61  ;;  %740 = vmatprep.subr.bf16.mxu1 %v1200_v62 }
  0x80   : > { %668 = vmatpush1.bf16.msra.mxu0 %v1202_v63  ;;  %741 = vmatpush1.bf16.msra.mxu1 %v1203_v0 }
  0x83   : > { %670 = vmatmul.mubr.bf16.vlgmr.msra.gmra.mrb[0].mxu0 %v1204_v1  ;;  %743 = vmatmul.mubr.bf16.vlgmr.msra.gmra.mrb[0].mxu1 %v1204_v1 }
  0x84   : > { %679 = vmatprep.mubr.bf16.mxu0 %v1207_v2  ;;  %752 = vmatprep.mubr.bf16.mxu1 %v1207_v2 }
  0x8b   : > { %680 = vmatmul.mubr.bf16.gmra.mrb[4].mxu0 %v1209_v3  ;;  %753 = vmatmul.mubr.bf16.gmra.mrb[4].mxu1 %v1209_v3 }
  0x8c   : > { %689 = vmatprep.mubr.bf16.mxu0 %v1210_v4  ;;  %762 = vmatprep.mubr.bf16.mxu1 %v1210_v4 }
  0x93   : > { %690 = vmatmul.mubr.bf16.gmra.mrb[8].mxu0 %v1212_v5  ;;  %763 = vmatmul.mubr.bf16.gmra.mrb[8].mxu1 %v1212_v5 }
  0x94   : > { %699 = vmatprep.mubr.bf16.mxu0 %v1213_v6  ;;  %772 = vmatprep.mubr.bf16.mxu1 %v1213_v6 }
  0x9b   : > { %700 = vmatmul.mubr.bf16.gmra.mrb[12].mxu0 %v1215_v7  ;;  %773 = vmatmul.mubr.bf16.gmra.mrb[12].mxu1 %v1215_v7 }
 0x156   : > { %v671_v8 = vpop.f32.mrb[0].mxu0  ;;  %v744_v9 = vpop.f32.mrb[0].mxu1 }
 0x157   : > { %v673_v10 = vpop.f32.mrb[1].mxu0  ;;  %v746_v11 = vpop.f32.mrb[1].mxu1 }
 0x158   : > { %v783_v12 = vmax.f32 %v671_v8, %v673_v10  ;;  %v791_v13 = vmax.f32 %v744_v9, %v746_v11  ;;  %v675_v14 = vpop.f32.mrb[2].mxu0  ;;  %v748_v15 = vpop.f32.mrb[2].mxu1 }
 0x159   : > { %v677_v17 = vpop.f32.mrb[3].mxu0  ;;  %v750_v18 = vpop.f32.mrb[3].mxu1 }
 0x15a   : > { %v799_v19 = vmax.f32 %v783_v12, %v791_v13  ;;  %v784_v20 = vmax.f32 %v675_v14, %v677_v17  ;;  %v792_v21 = vmax.f32 %v748_v15, %v750_v18 }
 0x15c   : > { %v814_v22 = vadd.f32 %v1416_v16, %v799_v19  ;;  %v800_v23 = vmax.f32 %v784_v20, %v792_v21 }
 0x15e   : > { %v815_v24 = vadd.f32 %v1416_v16, %v800_v23  ;;  %v681_v25 = vpop.f32.mrb[4].mxu0  ;;  %v754_v26 = vpop.f32.mrb[4].mxu1  ;;  %v822_v29 = vmax.f32 %v814_v22, 0.0 }
 0x15f   : > { %v683_v27 = vpop.f32.mrb[5].mxu0  ;;  %v756_v28 = vpop.f32.mrb[5].mxu1 }
 0x160   : > { %v823_v30 = vmax.f32 %v815_v24, 0.0  ;;  %v785_v31 = vmax.f32 %v681_v25, %v683_v27  ;;  %v793_v32 = vmax.f32 %v754_v26, %v756_v28  ;;  %v685_v33 = vpop.f32.mrb[6].mxu0  ;;  %v758_v34 = vpop.f32.mrb[6].mxu1 }
 0x161   : > { %v687_v35 = vpop.f32.mrb[7].mxu0  ;;  %v760_v36 = vpop.f32.mrb[7].mxu1 }
 0x162   : > { %v1057_v37 = vpack.c.bf16 %v823_v30, %v822_v29  ;;  %v801_v38 = vmax.f32 %v785_v31, %v793_v32  ;;  %v786_v39 = vmax.f32 %v685_v33, %v687_v35  ;;  %v794_v40 = vmax.f32 %v758_v34, %v760_v36 }
 0x164   : > { %1058 = vst [vmem:[%s1424_s26] sm:$0xff] %v1057_v37   ;;  %v816_v41 = vadd.f32 %v1416_v16, %v801_v38  ;;  %v802_v42 = vmax.f32 %v786_v39, %v794_v40 }
 0x166   : > { %v817_v43 = vadd.f32 %v1416_v16, %v802_v42  ;;  %v691_v44 = vpop.f32.mrb[8].mxu0  ;;  %v764_v45 = vpop.f32.mrb[8].mxu1  ;;  %v824_v48 = vmax.f32 %v816_v41, 0.0 }
 0x167   : > { %v693_v46 = vpop.f32.mrb[9].mxu0  ;;  %v766_v47 = vpop.f32.mrb[9].mxu1 }
 0x168   : > { %v825_v49 = vmax.f32 %v817_v43, 0.0  ;;  %v787_v50 = vmax.f32 %v691_v44, %v693_v46  ;;  %v795_v51 = vmax.f32 %v764_v45, %v766_v47  ;;  %v695_v52 = vpop.f32.mrb[10].mxu0  ;;  %v768_v53 = vpop.f32.mrb[10].mxu1 }
 0x169   : > { %v697_v54 = vpop.f32.mrb[11].mxu0  ;;  %v770_v55 = vpop.f32.mrb[11].mxu1 }
 0x16a   : > { %v1062_v56 = vpack.c.bf16 %v825_v49, %v824_v48  ;;  %v803_v57 = vmax.f32 %v787_v50, %v795_v51  ;;  %v788_v58 = vmax.f32 %v695_v52, %v697_v54  ;;  %v796_v59 = vmax.f32 %v768_v53, %v770_v55 }
 0x16c   : > { %1074 = vst [vmem:[%s1424_s26 + $0x8] sm:$0xff] %v1062_v56   ;;  %v818_v60 = vadd.f32 %v1416_v16, %v803_v57  ;;  %v804_v61 = vmax.f32 %v788_v58, %v796_v59 }
 0x16e   : > { %v819_v62 = vadd.f32 %v1416_v16, %v804_v61  ;;  %v701_v63 = vpop.f32.mrb[12].mxu0  ;;  %v774_v0 = vpop.f32.mrb[12].mxu1  ;;  %v826_v3 = vmax.f32 %v818_v60, 0.0 }
 0x16f   : > { %v703_v1 = vpop.f32.mrb[13].mxu0  ;;  %v776_v2 = vpop.f32.mrb[13].mxu1 }
 0x170   : > { %v827_v4 = vmax.f32 %v819_v62, 0.0  ;;  %v789_v5 = vmax.f32 %v701_v63, %v703_v1  ;;  %v797_v6 = vmax.f32 %v774_v0, %v776_v2  ;;  %v705_v7 = vpop.f32.mrb[14].mxu0  ;;  %v778_v8 = vpop.f32.mrb[14].mxu1 }
 0x171   : > { %v707_v9 = vpop.f32.mrb[15].mxu0  ;;  %v780_v10 = vpop.f32.mrb[15].mxu1 }
 0x172   : > { %v1067_v11 = vpack.c.bf16 %v827_v4, %v826_v3  ;;  %v805_v12 = vmax.f32 %v789_v5, %v797_v6  ;;  %v790_v13 = vmax.f32 %v705_v7, %v707_v9  ;;  %v798_v14 = vmax.f32 %v778_v8, %v780_v10 }
 0x174   : > { %1075 = vst [vmem:[%s1424_s26 + $0x10] sm:$0xff] %v1067_v11   ;;  %v820_v15 = vadd.f32 %v1416_v16, %v805_v12  ;;  %v806_v17 = vmax.f32 %v790_v13, %v798_v14 }
 0x176   : > { %v821_v18 = vadd.f32 %v1416_v16, %v806_v17  ;;  %v828_v19 = vmax.f32 %v820_v15, 0.0 }
 0x178   : > { %v829_v20 = vmax.f32 %v821_v18, 0.0 }
 0x17a   : > { %v1072_v21 = vpack.c.bf16 %v829_v20, %v828_v19 }
 0x17c   : > { %1076 = vst [vmem:[%s1424_s26 + $0x18] sm:$0xff] %v1072_v21  }
 0x17d PF: > { %s15_s12 = sadd.s32 1, %s1286_s12  }
 0x17e   : > { %p12_p2 = scmp.ge.s32.totalorder %s15_s12, 4  }
 0x180   :  { %14 = sbr.rel (!%p12_p2) target bundleno = 2 (0x2), region = 71 }
 0x187   :  { %892 = vsyncpa [#allocation3], 1 }
 0x188   :  { %894 = vsyncpa [#allocation3 + $0x1], 1 }
 0x189   :  { %895 = vsyncpa [#allocation5], 1 }

// kernel: united_net_forward.6
= control target key start
LH: loop header
LB: loop body
LE: loop exit
PB: predicated region body
PF: predicated region fallthrough
CT: control target
= control target key end

     0   :  { %8 = vsyncpa [#allocation3], 0  ;;  %s1692_s12 = smov 0   ;;  %s2145_s0 = inlined_call_operand.vmem [shape: bf16[32,512], index: 0, kind: input, shape index: {}]   ;;  %s2146_s1 = inlined_call_operand.vmem [shape: bf16[512,512], index: 1, kind: input, shape index: {}]   ;;  %s2147_s2 = inlined_call_operand.hbm [shape: f32[1,128], index: 2, kind: input, shape index: {}]   ;;  %s2148_s3 = inlined_call_operand.vmem [shape: bf16[32,128], index: 3, kind: output, shape index: {}]  }
   0x1 LB: > { %s1249_s13 = sadd.s32 4294967295, %s1669_s12   ;;  %p1251_p0 = scmp.ge.s32.totalorder %s1669_s12, 1  ;;  %s1669_s12 = sphi %s1692_s12, %s14_s12  }
   0x2   : > { %p113_p1 = scmp.lt.s32.totalorder %s1669_s12, 3  ;;  %p1706_p3 = scmp.eq.s32.totalorder %s1249_s13, 0 }
   0x3   : > { %s1671_s16 = smov [#allocation2]   ;;  %s1631_s21 = scalar_lea.hbm %s2147_s2, 16 }
   0x4   : > { %p1700_p2 = pnand %p1251_p0, %p113_p1  ;;  %s129_s17 = sshll.u32 %s1671_s16, 4  ;;  %s130_s17 = int_to_ptr.vmem [resolvable:$true] %s129_s17 }
   0x5   : > { %s2153_s15 = scalar_select %p1706_p3, 1, 0 }
   0x6   : > { %s2152_s14 = scalar_select %p1700_p2, 1, 0 }
   0x7   : > { %p1418_p4 = pneg %p1700_p2  ;;  %p1632_p6 = scmp.ne.s32.totalorder %s2147_s2, %s1631_s21 }
   0x8   : > { %p1638_p10 = scmp.lt.u32.totalorder %s1631_s21, %s2147_s2 }
   0x9   : > { %p1714_p5 = pnand %p1706_p3, %p1418_p4 }
   0xb   : > { %p1633_p7 = pneg %p1714_p5 }
   0xd   : > { %p1634_p8 = pnand %p1633_p7, %p1632_p6 }
   0xf   : > { %p1635_p9 = pneg %p1634_p8 }
  0x11   : > { %p1640_p11 = pnand %p1638_p10, %p1635_p9 }
  0x13   : > { %1643 = shalt.err (!%p1640_p11)
}
  0x14   : > { %s1644_s26 = scalar_lea.vmem %s130_s17, 16  ;;  %s1651_s27 = scalar_lea.vmem %s130_s17, 32 }
  0x15   : > { %p1645_p12 = scmp.ne.s32.totalorder %s130_s17, %s1644_s26  ;;  %p1652_p1 = scmp.lt.s32.totalorder %s130_s17, %s130_s17 }
  0x16   : > { %p1653_p4 = scmp.lt.s32.totalorder %s1651_s27, %s1644_s26 }
  0x17   : > { %p1647_p13 = pnand %p1645_p12, %p1633_p7 }
  0x18   : > { %p1654_p3 = por %p1653_p4, %p1652_p1 }
  0x19   : > { %p1648_p0 = pneg %p1647_p13 }
  0x1b   : > { %p1655_p2 = pnand %p1654_p3, %p1648_p0 }
  0x1d   : > { %1658 = shalt.err (!%p1655_p2)
}
  0x1e   : > { %1421 = dma.hbm_to_vmem [thread:$0]  (!%p1714_p5), %s2147_s2, 16, %s130_s17, [#allocation3]  }
  0x1f   : > { %p2155_p6 = scmp.ne.s32.totalorder %s2152_s14, 0 }
  0x20   : > { %p2156_p8 = scmp.ne.s32.totalorder (!%p2155_p6), %s2153_s15, 0 }
  0x21   : > { %152 = sbr.rel (%p2155_p6) target bundleno = 396 (0x18c), region = 32 }
  0x28   : > { %1664 = dma.done.wait (%p2156_p8), [#allocation3], 16  }
  0x29   : > { %1666 = vsyncadd (%p2156_p8), [#allocation3], 4294967280  ;;  %v1433_v0 = vld [vmem:[%s2146_s1 + $0x4] ss:$16 sps:$4 sm:$0xff]   ;;  %v1435_v1 = vld [vmem:[%s2146_s1 + $0xc] ss:$16 sps:$4 sm:$0xff]  }
  0x2a   : > { %982 = vmatprep.subr.bf16.mxu0 %v1433_v0  ;;  %v1437_v2 = vld [vmem:[%s2146_s1] ss:$16 sps:$4 sm:$0xff]   ;;  %v1438_v3 = vld [vmem:[%s2146_s1 + $0x8] ss:$16 sps:$4 sm:$0xff]   ;;  %1068 = vmatprep.subr.bf16.mxu1 %v1435_v1  ;;  %v1439_v4 = vld [vmem:[%s2146_s1 + $0x24] ss:$16 sps:$4 sm:$0xff]  }
  0x2b   : > { %983 = vmatpush1.bf16.msra.mxu0 %v1437_v2  ;;  %1069 = vmatpush1.bf16.msra.mxu1 %v1438_v3  ;;  %v1441_v5 = vld [vmem:[%s2146_s1 + $0x2c] ss:$16 sps:$4 sm:$0xff]   ;;  %v1443_v6 = vld [vmem:[%s2146_s1 + $0x20] ss:$16 sps:$4 sm:$0xff]   ;;  %v1444_v7 = vld [vmem:[%s2146_s1 + $0x28] ss:$16 sps:$4 sm:$0xff]  }
  0x2c   : > { %984 = vmatprep.subr.bf16.mxu0 %v1439_v4  ;;  %1070 = vmatprep.subr.bf16.mxu1 %v1441_v5  ;;  %v1445_v8 = vld [vmem:[%s2146_s1 + $0x44] ss:$16 sps:$4 sm:$0xff]   ;;  %v1447_v9 = vld [vmem:[%s2146_s1 + $0x4c] ss:$16 sps:$4 sm:$0xff]   ;;  %v1449_v10 = vld [vmem:[%s2146_s1 + $0x40] ss:$16 sps:$4 sm:$0xff]  }
  0x2d   : > { %v1450_v11 = vld [vmem:[%s2146_s1 + $0x48] ss:$16 sps:$4 sm:$0xff]   ;;  %v1451_v12 = vld [vmem:[%s2146_s1 + $0x64] ss:$16 sps:$4 sm:$0xff]   ;;  %v1453_v13 = vld [vmem:[%s2146_s1 + $0x6c] ss:$16 sps:$4 sm:$0xff]  }
  0x2e   : > { %v1455_v14 = vld [vmem:[%s2146_s1 + $0x60] ss:$16 sps:$4 sm:$0xff]   ;;  %v1456_v15 = vld [vmem:[%s2146_s1 + $0x68] ss:$16 sps:$4 sm:$0xff]   ;;  %v1457_v16 = vld [vmem:[%s2146_s1 + $0x84] ss:$16 sps:$4 sm:$0xff]  }
  0x2f   : > { %985 = vmatpush1.bf16.msra.mxu0 %v1443_v6  ;;  %1071 = vmatpush1.bf16.msra.mxu1 %v1444_v7  ;;  %v1459_v17 = vld [vmem:[%s2146_s1 + $0x8c] ss:$16 sps:$4 sm:$0xff]   ;;  %v1461_v18 = vld [vmem:[%s2146_s1 + $0x80] ss:$16 sps:$4 sm:$0xff]   ;;  %v1462_v19 = vld [vmem:[%s2146_s1 + $0x88] ss:$16 sps:$4 sm:$0xff]  }
  0x30   : > { %986 = vmatprep.subr.bf16.mxu0 %v1445_v8  ;;  %1072 = vmatprep.subr.bf16.mxu1 %v1447_v9  ;;  %v1463_v20 = vld [vmem:[%s2146_s1 + $0xa4] ss:$16 sps:$4 sm:$0xff]   ;;  %v1465_v21 = vld [vmem:[%s2146_s1 + $0xac] ss:$16 sps:$4 sm:$0xff]   ;;  %v1467_v22 = vld [vmem:[%s2146_s1 + $0xa0] ss:$16 sps:$4 sm:$0xff]  }
  0x31   : > { %v1468_v23 = vld [vmem:[%s2146_s1 + $0xa8] ss:$16 sps:$4 sm:$0xff]   ;;  %v1469_v24 = vld [vmem:[%s2146_s1 + $0xc4] ss:$16 sps:$4 sm:$0xff]   ;;  %v1471_v25 = vld [vmem:[%s2146_s1 + $0xcc] ss:$16 sps:$4 sm:$0xff]  }
  0x32   : > { %v1473_v26 = vld [vmem:[%s2146_s1 + $0xc0] ss:$16 sps:$4 sm:$0xff]   ;;  %v1474_v27 = vld [vmem:[%s2146_s1 + $0xc8] ss:$16 sps:$4 sm:$0xff]   ;;  %v1475_v28 = vld [vmem:[%s2146_s1 + $0xe4] ss:$16 sps:$4 sm:$0xff]  }
  0x33   : > { %987 = vmatpush1.bf16.msra.mxu0 %v1449_v10  ;;  %1073 = vmatpush1.bf16.msra.mxu1 %v1450_v11  ;;  %v1477_v29 = vld [vmem:[%s2146_s1 + $0xec] ss:$16 sps:$4 sm:$0xff]   ;;  %s1256_s15 = sshll.u32 %s1249_s13, 1  ;;  %v1479_v30 = vld [vmem:[%s2146_s1 + $0xe0] ss:$16 sps:$4 sm:$0xff]  }
  0x34   : > { %988 = vmatprep.subr.bf16.mxu0 %v1451_v12  ;;  %1074 = vmatprep.subr.bf16.mxu1 %v1453_v13  ;;  %v1480_v31 = vld [vmem:[%s2146_s1 + $0xe8] ss:$16 sps:$4 sm:$0xff]   ;;  %v1481_v32 = vld [vmem:[%s2146_s1 + $0x104] ss:$16 sps:$4 sm:$0xff]   ;;  %v1483_v33 = vld [vmem:[%s2146_s1 + $0x10c] ss:$16 sps:$4 sm:$0xff]  }
  0x35   : > { %p178_p2 = scmp.lt.s32.totalorder %s1256_s15, 3  ;;  %v1485_v34 = vld [vmem:[%s2146_s1 + $0x100] ss:$16 sps:$4 sm:$0xff]   ;;  %v1486_v35 = vld [vmem:[%s2146_s1 + $0x108] ss:$16 sps:$4 sm:$0xff]  }
  0x36   : > { %v1487_v36 = vld [vmem:[%s2146_s1 + $0x124] ss:$16 sps:$4 sm:$0xff]   ;;  %v1489_v37 = vld [vmem:[%s2146_s1 + $0x12c] ss:$16 sps:$4 sm:$0xff]   ;;  %v1491_v38 = vld [vmem:[%s2146_s1 + $0x120] ss:$16 sps:$4 sm:$0xff]  }
  0x37   : > { %989 = vmatpush1.bf16.msra.mxu0 %v1455_v14  ;;  %1075 = vmatpush1.bf16.msra.mxu1 %v1456_v15  ;;  %s2158_s15 = smov (!%p178_p2, %s1256_s15), 3  ;;  %v1492_v39 = vld [vmem:[%s2146_s1 + $0x128] ss:$16 sps:$4 sm:$0xff]   ;;  %v1493_v40 = vld [vmem:[%s2146_s1 + $0x144] ss:$16 sps:$4 sm:$0xff]  }
  0x38   : > { %990 = vmatprep.subr.bf16.mxu0 %v1457_v16  ;;  %1076 = vmatprep.subr.bf16.mxu1 %v1459_v17  ;;  %v1495_v41 = vld [vmem:[%s2146_s1 + $0x14c] ss:$16 sps:$4 sm:$0xff]   ;;  %s1398_s14 = sshll.u32 %s2158_s15, 4  ;;  %v1497_v42 = vld [vmem:[%s2146_s1 + $0x140] ss:$16 sps:$4 sm:$0xff]  }
  0x39   : > { %v1498_v43 = vld [vmem:[%s2146_s1 + $0x148] ss:$16 sps:$4 sm:$0xff]   ;;  %v1499_v44 = vld [vmem:[%s2146_s1 + $0x164] ss:$16 sps:$4 sm:$0xff]   ;;  %s1883_s13 = scalar_lea.vmem %s2145_s0, %s1398_s14  ;;  %v1501_v45 = vld [vmem:[%s2146_s1 + $0x16c] ss:$16 sps:$4 sm:$0xff]  }
  0x3a   : > { %v1503_v46 = vld [vmem:[%s2146_s1 + $0x160] ss:$16 sps:$4 sm:$0xff]   ;;  %v1504_v47 = vld [vmem:[%s2146_s1 + $0x168] ss:$16 sps:$4 sm:$0xff]   ;;  %v1531_v48 = vld [vmem:[%s1883_s13 + $0x4] ss:$16 sps:$4 sm:$0xff]  }
  0x3b   : > { %991 = vmatpush1.bf16.msra.mxu0 %v1461_v18  ;;  %1077 = vmatpush1.bf16.msra.mxu1 %v1462_v19  ;;  %v1505_v49 = vld [vmem:[%s2146_s1 + $0x184] ss:$16 sps:$4 sm:$0xff]   ;;  %v1507_v50 = vld [vmem:[%s2146_s1 + $0x18c] ss:$16 sps:$4 sm:$0xff]   ;;  %v1509_v51 = vld [vmem:[%s2146_s1 + $0x180] ss:$16 sps:$4 sm:$0xff]  }
  0x3c   : > { %992 = vmatprep.subr.bf16.mxu0 %v1463_v20  ;;  %1078 = vmatprep.subr.bf16.mxu1 %v1465_v21  ;;  %v1510_v52 = vld [vmem:[%s2146_s1 + $0x188] ss:$16 sps:$4 sm:$0xff]   ;;  %v1511_v53 = vld [vmem:[%s2146_s1 + $0x1a4] ss:$16 sps:$4 sm:$0xff]   ;;  %v1513_v54 = vld [vmem:[%s2146_s1 + $0x1ac] ss:$16 sps:$4 sm:$0xff]  }
  0x3d   : > { %1014 = vmatprep.mubr.bf16.mxu0 %v1531_v48  ;;  %1100 = vmatprep.mubr.bf16.mxu1 %v1531_v48  ;;  %v1515_v55 = vld [vmem:[%s2146_s1 + $0x1a0] ss:$16 sps:$4 sm:$0xff]   ;;  %v1516_v56 = vld [vmem:[%s2146_s1 + $0x1a8] ss:$16 sps:$4 sm:$0xff]   ;;  %v1517_v57 = vld [vmem:[%s2146_s1 + $0x1c4] ss:$16 sps:$4 sm:$0xff]  }
  0x3e   : > { %v1519_v58 = vld [vmem:[%s2146_s1 + $0x1cc] ss:$16 sps:$4 sm:$0xff]   ;;  %v1521_v59 = vld [vmem:[%s2146_s1 + $0x1c0] ss:$16 sps:$4 sm:$0xff]   ;;  %v1522_v60 = vld [vmem:[%s2146_s1 + $0x1c8] ss:$16 sps:$4 sm:$0xff]  }
  0x3f   : > { %993 = vmatpush1.bf16.msra.mxu0 %v1467_v22  ;;  %1079 = vmatpush1.bf16.msra.mxu1 %v1468_v23  ;;  %v1523_v61 = vld [vmem:[%s2146_s1 + $0x1e4] ss:$16 sps:$4 sm:$0xff]   ;;  %v1525_v62 = vld [vmem:[%s2146_s1 + $0x1ec] ss:$16 sps:$4 sm:$0xff]   ;;  %v1527_v63 = vld [vmem:[%s2146_s1 + $0x1e0] ss:$16 sps:$4 sm:$0xff]  }
  0x40   : > { %994 = vmatprep.subr.bf16.mxu0 %v1469_v24  ;;  %1080 = vmatprep.subr.bf16.mxu1 %v1471_v25  ;;  %v1528_v0 = vld [vmem:[%s2146_s1 + $0x1e8] ss:$16 sps:$4 sm:$0xff]   ;;  %v1534_v1 = vld [vmem:[%s2146_s1 + $0x204] ss:$16 sps:$4 sm:$0xff]   ;;  %v1537_v2 = vld [vmem:[%s2146_s1 + $0x20c] ss:$16 sps:$4 sm:$0xff]  }
  0x41   : > { %v1529_v3 = vld [vmem:[%s1883_s13] ss:$16 sps:$4 sm:$0xff]   ;;  %v1535_v5 = vld [vmem:[%s2146_s1 + $0x208] ss:$16 sps:$4 sm:$0xff]   ;;  %v1540_v6 = vld [vmem:[%s2146_s1 + $0x224] ss:$16 sps:$4 sm:$0xff]  }
  0x42   : > { %v1532_v4 = vld [vmem:[%s2146_s1 + $0x200] ss:$16 sps:$4 sm:$0xff]   ;;  %v1543_v7 = vld [vmem:[%s2146_s1 + $0x22c] ss:$16 sps:$4 sm:$0xff]   ;;  %v1541_v9 = vld [vmem:[%s2146_s1 + $0x228] ss:$16 sps:$4 sm:$0xff]  }
  0x43   : > { %995 = vmatpush1.bf16.msra.mxu0 %v1473_v26  ;;  %1081 = vmatpush1.bf16.msra.mxu1 %v1474_v27  ;;  %v1538_v8 = vld [vmem:[%s2146_s1 + $0x220] ss:$16 sps:$4 sm:$0xff]   ;;  %v1546_v10 = vld [vmem:[%s2146_s1 + $0x244] ss:$16 sps:$4 sm:$0xff]   ;;  %v1549_v11 = vld [vmem:[%s2146_s1 + $0x24c] ss:$16 sps:$4 sm:$0xff]  }
  0x44   : > { %996 = vmatprep.subr.bf16.mxu0 %v1475_v28  ;;  %1082 = vmatprep.subr.bf16.mxu1 %v1477_v29  ;;  %v1544_v12 = vld [vmem:[%s2146_s1 + $0x240] ss:$16 sps:$4 sm:$0xff]   ;;  %v1547_v13 = vld [vmem:[%s2146_s1 + $0x248] ss:$16 sps:$4 sm:$0xff]   ;;  %v1552_v14 = vld [vmem:[%s2146_s1 + $0x264] ss:$16 sps:$4 sm:$0xff]  }
  0x45   : > { %v1555_v15 = vld [vmem:[%s2146_s1 + $0x26c] ss:$16 sps:$4 sm:$0xff]   ;;  %v1550_v16 = vld [vmem:[%s2146_s1 + $0x260] ss:$16 sps:$4 sm:$0xff]   ;;  %v1553_v17 = vld [vmem:[%s2146_s1 + $0x268] ss:$16 sps:$4 sm:$0xff]  }
  0x46   : > { %v1558_v18 = vld [vmem:[%s2146_s1 + $0x284] ss:$16 sps:$4 sm:$0xff]   ;;  %v1561_v19 = vld [vmem:[%s2146_s1 + $0x28c] ss:$16 sps:$4 sm:$0xff]   ;;  %v1556_v20 = vld [vmem:[%s2146_s1 + $0x280] ss:$16 sps:$4 sm:$0xff]  }
  0x47   : > { %997 = vmatpush1.bf16.msra.mxu0 %v1479_v30  ;;  %1083 = vmatpush1.bf16.msra.mxu1 %v1480_v31  ;;  %v1559_v21 = vld [vmem:[%s2146_s1 + $0x288] ss:$16 sps:$4 sm:$0xff]   ;;  %v1564_v22 = vld [vmem:[%s2146_s1 + $0x2a4] ss:$16 sps:$4 sm:$0xff]   ;;  %v1567_v23 = vld [vmem:[%s2146_s1 + $0x2ac] ss:$16 sps:$4 sm:$0xff]  }
  0x48   : > { %998 = vmatprep.subr.bf16.mxu0 %v1481_v32  ;;  %1084 = vmatprep.subr.bf16.mxu1 %v1483_v33  ;;  %v1562_v24 = vld [vmem:[%s2146_s1 + $0x2a0] ss:$16 sps:$4 sm:$0xff]   ;;  %v1565_v25 = vld [vmem:[%s2146_s1 + $0x2a8] ss:$16 sps:$4 sm:$0xff]   ;;  %v1570_v26 = vld [vmem:[%s2146_s1 + $0x2c4] ss:$16 sps:$4 sm:$0xff]  }
  0x49   : > { %v1573_v27 = vld [vmem:[%s2146_s1 + $0x2cc] ss:$16 sps:$4 sm:$0xff]   ;;  %v1568_v29 = vld [vmem:[%s2146_s1 + $0x2c0] ss:$16 sps:$4 sm:$0xff]   ;;  %v1571_v30 = vld [vmem:[%s2146_s1 + $0x2c8] ss:$16 sps:$4 sm:$0xff]  }
  0x4a   : > { %v1630_v28 = vld [vmem:[%s1883_s13 + $0xc] ss:$16 sps:$4 sm:$0xff]   ;;  %v1576_v31 = vld [vmem:[%s2146_s1 + $0x2e4] ss:$16 sps:$4 sm:$0xff]   ;;  %v1574_v33 = vld [vmem:[%s2146_s1 + $0x2e0] ss:$16 sps:$4 sm:$0xff]  }
  0x4b   : > { %999 = vmatpush1.bf16.msra.mxu0 %v1485_v34  ;;  %1085 = vmatpush1.bf16.msra.mxu1 %v1486_v35  ;;  %v1579_v32 = vld [vmem:[%s2146_s1 + $0x2ec] ss:$16 sps:$4 sm:$0xff]   ;;  %v1577_v34 = vld [vmem:[%s2146_s1 + $0x2e8] ss:$16 sps:$4 sm:$0xff]   ;;  %v1582_v35 = vld [vmem:[%s2146_s1 + $0x304] ss:$16 sps:$4 sm:$0xff]  }
  0x4c   : > { %1000 = vmatprep.subr.bf16.mxu0 %v1487_v36  ;;  %1086 = vmatprep.subr.bf16.mxu1 %v1489_v37  ;;  %v1585_v36 = vld [vmem:[%s2146_s1 + $0x30c] ss:$16 sps:$4 sm:$0xff]   ;;  %v1580_v37 = vld [vmem:[%s2146_s1 + $0x300] ss:$16 sps:$4 sm:$0xff]  }
  0x4d   : > { %v1603_v48 = vld [vmem:[%s2146_s1 + $0x36c] ss:$16 sps:$4 sm:$0xff]  }
  0x4f   : > { %1001 = vmatpush1.bf16.msra.mxu0 %v1491_v38  ;;  %1087 = vmatpush1.bf16.msra.mxu1 %v1492_v39  ;;  %v1583_v38 = vld [vmem:[%s2146_s1 + $0x308] ss:$16 sps:$4 sm:$0xff]   ;;  %v1588_v39 = vld [vmem:[%s2146_s1 + $0x324] ss:$16 sps:$4 sm:$0xff]  }
  0x50   : > { %1002 = vmatprep.subr.bf16.mxu0 %v1493_v40  ;;  %1088 = vmatprep.subr.bf16.mxu1 %v1495_v41  ;;  %v1591_v40 = vld [vmem:[%s2146_s1 + $0x32c] ss:$16 sps:$4 sm:$0xff]   ;;  %v1586_v41 = vld [vmem:[%s2146_s1 + $0x320] ss:$16 sps:$4 sm:$0xff]  }
  0x53   : > { %1003 = vmatpush1.bf16.msra.mxu0 %v1497_v42  ;;  %1089 = vmatpush1.bf16.msra.mxu1 %v1498_v43  ;;  %v1589_v42 = vld [vmem:[%s2146_s1 + $0x328] ss:$16 sps:$4 sm:$0xff]   ;;  %v1594_v43 = vld [vmem:[%s2146_s1 + $0x344] ss:$16 sps:$4 sm:$0xff]  }
  0x54   : > { %1004 = vmatprep.subr.bf16.mxu0 %v1499_v44  ;;  %1090 = vmatprep.subr.bf16.mxu1 %v1501_v45  ;;  %v1597_v44 = vld [vmem:[%s2146_s1 + $0x34c] ss:$16 sps:$4 sm:$0xff]   ;;  %v1592_v45 = vld [vmem:[%s2146_s1 + $0x340] ss:$16 sps:$4 sm:$0xff]  }
  0x57   : > { %1005 = vmatpush1.bf16.msra.mxu0 %v1503_v46  ;;  %1091 = vmatpush1.bf16.msra.mxu1 %v1504_v47  ;;  %v1595_v46 = vld [vmem:[%s2146_s1 + $0x348] ss:$16 sps:$4 sm:$0xff]   ;;  %v1600_v47 = vld [vmem:[%s2146_s1 + $0x364] ss:$16 sps:$4 sm:$0xff]  }
  0x58   : > { %1006 = vmatprep.subr.bf16.mxu0 %v1505_v49  ;;  %1092 = vmatprep.subr.bf16.mxu1 %v1507_v50  ;;  %v1598_v49 = vld [vmem:[%s2146_s1 + $0x360] ss:$16 sps:$4 sm:$0xff]   ;;  %v1601_v50 = vld [vmem:[%s2146_s1 + $0x368] ss:$16 sps:$4 sm:$0xff]  }
  0x5b   : > { %1007 = vmatpush1.bf16.msra.mxu0 %v1509_v51  ;;  %1093 = vmatpush1.bf16.msra.mxu1 %v1510_v52  ;;  %v1606_v51 = vld [vmem:[%s2146_s1 + $0x384] ss:$16 sps:$4 sm:$0xff]   ;;  %v1609_v52 = vld [vmem:[%s2146_s1 + $0x38c] ss:$16 sps:$4 sm:$0xff]  }
  0x5c   : > { %1008 = vmatprep.subr.bf16.mxu0 %v1511_v53  ;;  %1094 = vmatprep.subr.bf16.mxu1 %v1513_v54  ;;  %v1604_v53 = vld [vmem:[%s2146_s1 + $0x380] ss:$16 sps:$4 sm:$0xff]   ;;  %v1607_v54 = vld [vmem:[%s2146_s1 + $0x388] ss:$16 sps:$4 sm:$0xff]  }
  0x5f   : > { %1009 = vmatpush1.bf16.msra.mxu0 %v1515_v55  ;;  %1095 = vmatpush1.bf16.msra.mxu1 %v1516_v56  ;;  %v1612_v55 = vld [vmem:[%s2146_s1 + $0x3a4] ss:$16 sps:$4 sm:$0xff]   ;;  %v1615_v56 = vld [vmem:[%s2146_s1 + $0x3ac] ss:$16 sps:$4 sm:$0xff]  }
  0x60   : > { %1010 = vmatprep.subr.bf16.mxu0 %v1517_v57  ;;  %1096 = vmatprep.subr.bf16.mxu1 %v1519_v58  ;;  %v1610_v57 = vld [vmem:[%s2146_s1 + $0x3a0] ss:$16 sps:$4 sm:$0xff]   ;;  %v1613_v58 = vld [vmem:[%s2146_s1 + $0x3a8] ss:$16 sps:$4 sm:$0xff]  }
  0x63   : > { %1011 = vmatpush1.bf16.msra.mxu0 %v1521_v59  ;;  %1097 = vmatpush1.bf16.msra.mxu1 %v1522_v60  ;;  %v1618_v59 = vld [vmem:[%s2146_s1 + $0x3c4] ss:$16 sps:$4 sm:$0xff]   ;;  %v1621_v60 = vld [vmem:[%s2146_s1 + $0x3cc] ss:$16 sps:$4 sm:$0xff]  }
  0x64   : > { %1012 = vmatprep.subr.bf16.mxu0 %v1523_v61  ;;  %1098 = vmatprep.subr.bf16.mxu1 %v1525_v62  ;;  %v1616_v61 = vld [vmem:[%s2146_s1 + $0x3c0] ss:$16 sps:$4 sm:$0xff]   ;;  %v1619_v62 = vld [vmem:[%s2146_s1 + $0x3c8] ss:$16 sps:$4 sm:$0xff]  }
  0x67   : > { %1013 = vmatpush1.bf16.msra.mxu0 %v1527_v63  ;;  %1099 = vmatpush1.bf16.msra.mxu1 %v1528_v0  ;;  %v1624_v63 = vld [vmem:[%s2146_s1 + $0x3e4] ss:$16 sps:$4 sm:$0xff]   ;;  %v1627_v0 = vld [vmem:[%s2146_s1 + $0x3ec] ss:$16 sps:$4 sm:$0xff]  }
  0x68   : > { %1025 = vmatprep.subr.bf16.mxu0 %v1534_v1  ;;  %1111 = vmatprep.subr.bf16.mxu1 %v1537_v2  ;;  %v1622_v1 = vld [vmem:[%s2146_s1 + $0x3e0] ss:$16 sps:$4 sm:$0xff]   ;;  %v1625_v2 = vld [vmem:[%s2146_s1 + $0x3e8] ss:$16 sps:$4 sm:$0xff]  }
  0x6a   : > { %1015 = vmatmul.mubr.bf16.vlgmr.msra.gmra.mrb[0].mxu0 %v1529_v3  ;;  %1101 = vmatmul.mubr.bf16.vlgmr.msra.gmra.mrb[0].mxu1 %v1529_v3  ;;  %v1628_v3 = vld [vmem:[%s1883_s13 + $0x8] ss:$16 sps:$4 sm:$0xff]   ;;  %s1260_s13 = sshll.u32 %s2158_s15, 2 }
  0x6b   : > { %1026 = vmatpush1.bf16.msra.mxu0 %v1532_v4  ;;  %1112 = vmatpush1.bf16.msra.mxu1 %v1535_v5  ;;  %s188_s24 = scalar_lea.vmem %s2148_s3, %s1260_s13 }
  0x6c   : > { %1027 = vmatprep.subr.bf16.mxu0 %v1540_v6  ;;  %1113 = vmatprep.subr.bf16.mxu1 %v1543_v7 }
  0x6d   : > { %1057 = vmatprep.mubr.bf16.mxu0 %v1630_v28  ;;  %1143 = vmatprep.mubr.bf16.mxu1 %v1630_v28 }
  0x6f   : > { %1028 = vmatpush1.bf16.msra.mxu0 %v1538_v8  ;;  %1114 = vmatpush1.bf16.msra.mxu1 %v1541_v9 }
  0x70   : > { %1029 = vmatprep.subr.bf16.mxu0 %v1546_v10  ;;  %1115 = vmatprep.subr.bf16.mxu1 %v1549_v11 }
  0x73   : > { %1030 = vmatpush1.bf16.msra.mxu0 %v1544_v12  ;;  %1116 = vmatpush1.bf16.msra.mxu1 %v1547_v13  ;;  %v1393_v12 = vld [vmem:[#allocation2] ss:$0 sm:$0xff] }
  0x74   : > { %1031 = vmatprep.subr.bf16.mxu0 %v1552_v14  ;;  %1117 = vmatprep.subr.bf16.mxu1 %v1555_v15 }
  0x77   : > { %1032 = vmatpush1.bf16.msra.mxu0 %v1550_v16  ;;  %1118 = vmatpush1.bf16.msra.mxu1 %v1553_v17 }
  0x78   : > { %1033 = vmatprep.subr.bf16.mxu0 %v1558_v18  ;;  %1119 = vmatprep.subr.bf16.mxu1 %v1561_v19 }
  0x7b   : > { %1034 = vmatpush1.bf16.msra.mxu0 %v1556_v20  ;;  %1120 = vmatpush1.bf16.msra.mxu1 %v1559_v21 }
  0x7c   : > { %1035 = vmatprep.subr.bf16.mxu0 %v1564_v22  ;;  %1121 = vmatprep.subr.bf16.mxu1 %v1567_v23 }
  0x7f   : > { %1036 = vmatpush1.bf16.msra.mxu0 %v1562_v24  ;;  %1122 = vmatpush1.bf16.msra.mxu1 %v1565_v25 }
  0x80   : > { %1037 = vmatprep.subr.bf16.mxu0 %v1570_v26  ;;  %1123 = vmatprep.subr.bf16.mxu1 %v1573_v27 }
  0x83   : > { %1038 = vmatpush1.bf16.msra.mxu0 %v1568_v29  ;;  %1124 = vmatpush1.bf16.msra.mxu1 %v1571_v30 }
  0x84   : > { %1039 = vmatprep.subr.bf16.mxu0 %v1576_v31  ;;  %1125 = vmatprep.subr.bf16.mxu1 %v1579_v32 }
  0x87   : > { %1040 = vmatpush1.bf16.msra.mxu0 %v1574_v33  ;;  %1126 = vmatpush1.bf16.msra.mxu1 %v1577_v34 }
  0x88   : > { %1041 = vmatprep.subr.bf16.mxu0 %v1582_v35  ;;  %1127 = vmatprep.subr.bf16.mxu1 %v1585_v36 }
  0x8b   : > { %1042 = vmatpush1.bf16.msra.mxu0 %v1580_v37  ;;  %1128 = vmatpush1.bf16.msra.mxu1 %v1583_v38 }
  0x8c   : > { %1043 = vmatprep.subr.bf16.mxu0 %v1588_v39  ;;  %1129 = vmatprep.subr.bf16.mxu1 %v1591_v40 }
  0x8f   : > { %1044 = vmatpush1.bf16.msra.mxu0 %v1586_v41  ;;  %1130 = vmatpush1.bf16.msra.mxu1 %v1589_v42 }
  0x90   : > { %1045 = vmatprep.subr.bf16.mxu0 %v1594_v43  ;;  %1131 = vmatprep.subr.bf16.mxu1 %v1597_v44 }
  0x93   : > { %1046 = vmatpush1.bf16.msra.mxu0 %v1592_v45  ;;  %1132 = vmatpush1.bf16.msra.mxu1 %v1595_v46 }
  0x94   : > { %1047 = vmatprep.subr.bf16.mxu0 %v1600_v47  ;;  %1133 = vmatprep.subr.bf16.mxu1 %v1603_v48 }
  0x97   : > { %1048 = vmatpush1.bf16.msra.mxu0 %v1598_v49  ;;  %1134 = vmatpush1.bf16.msra.mxu1 %v1601_v50 }
  0x98   : > { %1049 = vmatprep.subr.bf16.mxu0 %v1606_v51  ;;  %1135 = vmatprep.subr.bf16.mxu1 %v1609_v52 }
  0x9b   : > { %1050 = vmatpush1.bf16.msra.mxu0 %v1604_v53  ;;  %1136 = vmatpush1.bf16.msra.mxu1 %v1607_v54 }
  0x9c   : > { %1051 = vmatprep.subr.bf16.mxu0 %v1612_v55  ;;  %1137 = vmatprep.subr.bf16.mxu1 %v1615_v56 }
  0x9f   : > { %1052 = vmatpush1.bf16.msra.mxu0 %v1610_v57  ;;  %1138 = vmatpush1.bf16.msra.mxu1 %v1613_v58 }
  0xa0   : > { %1053 = vmatprep.subr.bf16.mxu0 %v1618_v59  ;;  %1139 = vmatprep.subr.bf16.mxu1 %v1621_v60 }
  0xa3   : > { %1054 = vmatpush1.bf16.msra.mxu0 %v1616_v61  ;;  %1140 = vmatpush1.bf16.msra.mxu1 %v1619_v62 }
  0xa4   : > { %1055 = vmatprep.subr.bf16.mxu0 %v1624_v63  ;;  %1141 = vmatprep.subr.bf16.mxu1 %v1627_v0 }
  0xa7   : > { %1056 = vmatpush1.bf16.msra.mxu0 %v1622_v1  ;;  %1142 = vmatpush1.bf16.msra.mxu1 %v1625_v2 }
  0xaa   : > { %1058 = vmatmul.mubr.bf16.vlgmr.msra.gmra.mrb[0].mxu0 %v1628_v3  ;;  %1144 = vmatmul.mubr.bf16.vlgmr.msra.gmra.mrb[0].mxu1 %v1628_v3 }
 0x17d   : > { %v1059_v4 = vpop.f32.mrb[0].mxu0  ;;  %v1145_v5 = vpop.f32.mrb[0].mxu1 }
 0x17e   : > { %v1061_v6 = vpop.f32.mrb[1].mxu0  ;;  %v1147_v7 = vpop.f32.mrb[1].mxu1 }
 0x17f   : > { %v1154_v8 = vmax.f32 %v1059_v4, %v1061_v6  ;;  %v1156_v9 = vmax.f32 %v1145_v5, %v1147_v7  ;;  %v1063_v10 = vpop.f32.mrb[2].mxu0  ;;  %v1149_v11 = vpop.f32.mrb[2].mxu1 }
 0x180   : > { %v1065_v13 = vpop.f32.mrb[3].mxu0  ;;  %v1151_v14 = vpop.f32.mrb[3].mxu1 }
 0x181   : > { %v1158_v15 = vmax.f32 %v1154_v8, %v1156_v9  ;;  %v1155_v16 = vmax.f32 %v1063_v10, %v1065_v13  ;;  %v1157_v17 = vmax.f32 %v1149_v11, %v1151_v14 }
 0x183   : > { %v1167_v18 = vadd.f32 %v1393_v12, %v1158_v15  ;;  %v1159_v19 = vmax.f32 %v1155_v16, %v1157_v17 }
 0x185   : > { %v1168_v20 = vadd.f32 %v1393_v12, %v1159_v19  ;;  %v1169_v21 = vmax.f32 %v1167_v18, 0.0 }
 0x187   : > { %v1170_v22 = vmax.f32 %v1168_v20, 0.0 }
 0x189   : > { %v1404_v23 = vpack.c.bf16 %v1170_v22, %v1169_v21 }
 0x18b   : > { %1405 = vst [vmem:[%s188_s24] sm:$0xff] %v1404_v23  }
 0x18c PF: > { %s14_s12 = sadd.s32 1, %s1669_s12  }
 0x18d   : > { %p11_p3 = scmp.ge.s32.totalorder %s14_s12, 4  }
 0x18f   :  { %13 = sbr.rel (!%p11_p3) target bundleno = 1 (0x1), region = 67 }
 0x196   :  { %1203 = vsyncpa [#allocation3], 1 }
 0x197   :  { %1205 = vsyncpa [#allocation3 + $0x1], 1 }

// kernel: united_net_forward.7
= control target key start
LH: loop header
LB: loop body
LE: loop exit
PB: predicated region body
PF: predicated region fallthrough
CT: control target
= control target key end

     0   :  { %s17777_s0 = inlined_call_operand.vmem [shape: bf16[2,2048], index: 0, kind: input, shape index: {}]   ;;  %s17778_s1 = inlined_call_operand.vmem [shape: bf16[2048,1024], index: 1, kind: input, shape index: {}]   ;;  %s17779_s2 = inlined_call_operand.vmem [shape: f32[1,1024], index: 2, kind: input, shape index: {}]   ;;  %s17780_s3 = inlined_call_operand.vmem [shape: bf16[1024,160], index: 3, kind: input, shape index: {}]   ;;  %s17781_s4 = inlined_call_operand.vmem [shape: f32[1,160], index: 4, kind: input, shape index: {}]   ;;  %s17782_s5 = inlined_call_operand.hbm [shape: bf16[160,512], index: 5, kind: input, shape index: {}]   ;;  %s17783_s6 = inlined_call_operand.vmem [shape: f32[1,512], index: 6, kind: input, shape index: {}]   ;;  %s17784_s7 = inlined_call_operand.vmem [shape: bf16[512,512], index: 7, kind: input, shape index: {}]   ;;  %s17785_s8 = inlined_call_operand.vmem [shape: f32[1,512], index: 8, kind: input, shape index: {}]   ;;  %s17786_s9 = inlined_call_operand.hbm [shape: bf16[512,256], index: 9, kind: input, shape index: {}]   ;;  %s17787_s10 = inlined_call_operand.vmem [shape: f32[1,256], index: 10, kind: input, shape index: {}]   ;;  %s17788_s11 = inlined_call_operand.hbm [shape: bf16[256,256], index: 11, kind: input, shape index: {}]   ;;  %s17789_s12 = inlined_call_operand.vmem [shape: f32[1,256], index: 12, kind: input, shape index: {}]   ;;  %s17790_s13 = inlined_call_operand.vmem [shape: bf16[256,64], index: 13, kind: input, shape index: {}]   ;;  %s17791_s14 = inlined_call_operand.vmem [shape: f32[1,64], index: 14, kind: input, shape index: {}]   ;;  %s17792_s15 = inlined_call_operand.vmem [shape: bf16[64,16], index: 15, kind: input, shape index: {}]   ;;  %s17793_s16 = inlined_call_operand.vmem [shape: f32[1,16], index: 16, kind: input, shape index: {}]   ;;  %s17794_s17 = inlined_call_operand.vmem [shape: bf16[16,2], index: 17, kind: input, shape index: {}]   ;;  %s17795_s18 = inlined_call_operand.vmem [shape: f32[1,2], index: 18, kind: input, shape index: {}]   ;;  %s17796_s19 = inlined_call_operand.hbm [shape: f32[2,2], index: 19, kind: output, shape index: {}]  }
   0x1   :  { %17801 = sst [smem:[#allocation12_spill]] %s17777_s0 }
   0x2   :  { %17802 = sst [smem:[#allocation13_spill]] %s17778_s1 }
   0x3   :  { %17803 = sst [smem:[#allocation14_spill]] %s17779_s2 }
   0x4   :  { %17804 = sst [smem:[#allocation15_spill]] %s17780_s3 }
   0x5   :  { %24 = vsyncpa [#allocation3], 0 }
   0x6   :  { %25 = vsyncpa [#allocation6], 0 }
   0x7   :  { %26 = vsyncpa [#allocation4], 0  ;;  %s13430_s0 = smov [#allocation5]   ;;  %s13336_s1 = scalar_lea.hbm %s17786_s9, 8192 }
   0x8   :  { %s60_s30 = sshll.u32 %s13430_s0, 4  ;;  %p13337_p0 = scmp.ne.s32.totalorder %s17786_s9, %s13336_s1  ;;  %s61_s30 = int_to_ptr.vmem [resolvable:$true] %s60_s30 }
   0x9   :  { %p13340_p1 = scmp.lt.u32.totalorder %s13336_s1, %s17786_s9 }
   0xb   :  { %p13342_p2 = pnand %p13340_p1, %p13337_p0 }
   0xd   :  { %13345 = shalt.err (!%p13342_p2)
}
   0xe   :  { %s13346_s25 = scalar_lea.vmem %s61_s30, 8192  ;;  %p13351_p4 = scmp.lt.s32.totalorder %s61_s30, %s61_s30 }
   0xf   :  { %p13347_p3 = scmp.ne.s32.totalorder %s61_s30, %s13346_s25  ;;  %p13352_p5 = scmp.lt.s32.totalorder %s13346_s25, %s13346_s25 }
  0x11   :  { %p13353_p6 = por %p13352_p5, %p13351_p4 }
  0x13   :  { %p13354_p7 = pnand %p13353_p6, %p13347_p3 }
  0x15   :  { %13357 = shalt.err (!%p13354_p7)
}
  0x16   :  { %s17800_s3 = smov 128   ;;  %s13432_s26 = smov 8  }
  0x17   :  { %66 = dma.hbm_to_vmem [thread:$0]  %s17786_s9, 8192, %s61_s30, [#allocation6], %s17800_s3, %s17800_s3, %s13432_s26  }
  0x18   :  { %s13433_s29 = smov [#allocation2]   ;;  %s13358_s1 = scalar_lea.hbm %s17782_s5, 5120 }
  0x19   :  { %s42_s0 = sshll.u32 %s13433_s29, 4  ;;  %p13359_p8 = scmp.ne.s32.totalorder %s17782_s5, %s13358_s1  ;;  %s43_s0 = int_to_ptr.vmem [resolvable:$true] %s42_s0 }
  0x1a   :  { %p13362_p9 = scmp.lt.u32.totalorder %s13358_s1, %s17782_s5 }
  0x1c   :  { %p13364_p10 = pnand %p13362_p9, %p13359_p8 }
  0x1e   :  { %13367 = shalt.err (!%p13364_p10)
}
  0x1f   :  { %s13368_s25 = scalar_lea.vmem %s43_s0, 5120  ;;  %p13373_p12 = scmp.lt.s32.totalorder %s43_s0, %s43_s0 }
  0x20   :  { %p13369_p11 = scmp.ne.s32.totalorder %s43_s0, %s13368_s25  ;;  %p13374_p13 = scmp.lt.s32.totalorder %s13368_s25, %s13368_s25 }
  0x22   :  { %p13375_p0 = por %p13374_p13, %p13373_p12 }
  0x24   :  { %p13376_p1 = pnand %p13375_p0, %p13369_p11 }
  0x26   :  { %13379 = shalt.err (!%p13376_p1)
}
  0x27   :  { %s13434_s9 = smov 256   ;;  %s13435_s30 = smov 16  }
  0x28   :  { %48 = dma.hbm_to_vmem [thread:$0]  %s17782_s5, 5120, %s43_s0, [#allocation3], %s13434_s9, %s13434_s9, %s13435_s30  }
  0x29   :  { %s13436_s29 = smov [#allocation7]   ;;  %s13380_s22 = scalar_lea.hbm %s17788_s11, 4096 }
  0x2a   :  { %s74_s20 = sshll.u32 %s13436_s29, 4  ;;  %p13381_p2 = scmp.ne.s32.totalorder %s17788_s11, %s13380_s22  ;;  %s75_s20 = int_to_ptr.vmem [resolvable:$true] %s74_s20 }
  0x2b   :  { %p13384_p3 = scmp.lt.u32.totalorder %s13380_s22, %s17788_s11 }
  0x2d   :  { %p13386_p4 = pnand %p13384_p3, %p13381_p2 }
  0x2f   :  { %13389 = shalt.err (!%p13386_p4)
}
  0x30   :  { %s13390_s3 = scalar_lea.vmem %s75_s20, 4096  ;;  %p13395_p6 = scmp.lt.s32.totalorder %s75_s20, %s75_s20 }
  0x31   :  { %p13391_p5 = scmp.ne.s32.totalorder %s75_s20, %s13390_s3  ;;  %p13396_p7 = scmp.lt.s32.totalorder %s13390_s3, %s13390_s3 }
  0x33   :  { %p13397_p8 = por %p13396_p7, %p13395_p6 }
  0x35   :  { %p13398_p9 = pnand %p13397_p8, %p13391_p5 }
  0x37   :  { %13401 = shalt.err (!%p13398_p9)
}
  0x38   :  { %s17805_s5 = smov 128  }
  0x39   :  { %80 = dma.hbm_to_vmem [thread:$0]  %s17788_s11, 4096, %s75_s20, [#allocation6], %s17805_s5, %s17805_s5, %s13432_s26  }
  0x3a   :  { %13424 = dma.done.wait [#allocation3], 5120  }
  0x3b   :  { %13425 = vsyncadd [#allocation3], 4294962176 }
  0x3c   :  { %13426 = dma.done.wait [#allocation6], 12288  }
  0x3d   :  { %13427 = vsyncadd [#allocation6], 4294955008  ;;  %s17806_s28 = sld [smem:[#allocation13_spill]]  ;;  %v1133_v32 = vlaneseq  ;;  %v13437_v33 = vmov 1966171168   ;;  %s17807_s2 = sld [smem:[#allocation12_spill]] }
  0x3e   :  { %v1177_v34 = vunpack.c.l.s4 %v13437_v33  ;;  %s17808_s27 = sld [smem:[#allocation14_spill]]  ;;  %s17809_s24 = sld [smem:[#allocation15_spill]]  ;;  %vm8945_vm0 = vcmask 261120   ;;  %vm13439_vm1 = vmmov 0   ;;  %vm10948_vm2 = vcmask 523264  }
  0x3f   :  { %v13649_v43 = vshrl.u32 %v1133_v32, 7  ;;  %vm11009_vm3 = vcmask 130048   ;;  %s13440_s5 = smov [#allocation8]   ;;  %vm11053_vm4 = vcmask 9216  }
  0x40   :  { %v1178_v44 = vunpack.c.0.s8 %v1177_v34  ;;  %s11061_s0 = sshll.u32 %s13440_s5, 4  ;;  %s11062_s0 = int_to_ptr.vmem [resolvable:$true] %s11061_s0 }
  0x41   :  { %p13407_p11 = scmp.lt.s32.totalorder %s11062_s0, %s11062_s0 }
  0x42   :  { %v13664_v53 = vsub.s32 %v1178_v44, %v13649_v43 }
  0x43   :  { %v107_v0 = vld [vmem:[%s17806_s28] sm:$0xff]  ;;  %v108_v2 = vld [vmem:[%s17806_s28 + $0x8] sm:$0xff] }
  0x44   :  { %v111_v1 = vld [vmem:[%s17806_s28 + $0x20] sm:$0xff]  ;;  %v112_v4 = vld [vmem:[%s17806_s28 + $0x28] sm:$0xff] }
  0x45   :  { %v11072_v3 = vcombine.high %v107_v0, %v111_v1  ;;  %v11071_v5 = vcombine.low %v107_v0, %v111_v1  ;;  %v115_v6 = vld [vmem:[%s17806_s28 + $0x40] sm:$0xff]  ;;  %v11074_v8 = vcombine.high %v108_v2, %v112_v4  ;;  %v11073_v9 = vcombine.low %v108_v2, %v112_v4  ;;  %v116_v11 = vld [vmem:[%s17806_s28 + $0x48] sm:$0xff] }
  0x46   :  { %v119_v7 = vld [vmem:[%s17806_s28 + $0x60] sm:$0xff]  ;;  %v120_v12 = vld [vmem:[%s17806_s28 + $0x68] sm:$0xff] }
  0x47   :  { %v11080_v10 = vcombine.high %v115_v6, %v119_v7  ;;  %v123_v13 = vld [vmem:[%s17806_s28 + $0x80] sm:$0xff]  ;;  %6409 = vmatprep.subr.bf16.mxu0 %v11072_v3  ;;  %v11082_v14 = vcombine.high %v116_v11, %v120_v12  ;;  %v124_v16 = vld [vmem:[%s17806_s28 + $0x88] sm:$0xff]  ;;  %6737 = vmatprep.subr.bf16.mxu1 %v11074_v8  ;;  %v11079_v18 = vcombine.low %v115_v6, %v119_v7 }
  0x48   :  { %v127_v15 = vld [vmem:[%s17806_s28 + $0xa0] sm:$0xff]  ;;  %v128_v17 = vld [vmem:[%s17806_s28 + $0xa8] sm:$0xff]  ;;  %6410 = vmatpush1.bf16.msra.mxu0 %v11071_v5  ;;  %6738 = vmatpush1.bf16.msra.mxu1 %v11073_v9  ;;  %v11081_v19 = vcombine.low %v116_v11, %v120_v12 }
  0x49   :  { %6411 = vmatprep.subr.bf16.mxu0 %v11080_v10  ;;  %v11088_v20 = vcombine.high %v123_v13, %v127_v15  ;;  %6739 = vmatprep.subr.bf16.mxu1 %v11082_v14  ;;  %v11090_v21 = vcombine.high %v124_v16, %v128_v17  ;;  %v131_v22 = vld [vmem:[%s17806_s28 + $0xc0] sm:$0xff]  ;;  %v132_v24 = vld [vmem:[%s17806_s28 + $0xc8] sm:$0xff]  ;;  %v11087_v26 = vcombine.low %v123_v13, %v127_v15 }
  0x4a   :  { %v135_v23 = vld [vmem:[%s17806_s28 + $0xe0] sm:$0xff]  ;;  %v136_v25 = vld [vmem:[%s17806_s28 + $0xe8] sm:$0xff]  ;;  %v11089_v27 = vcombine.low %v124_v16, %v128_v17 }
  0x4b   :  { %v11096_v28 = vcombine.high %v131_v22, %v135_v23  ;;  %v11098_v29 = vcombine.high %v132_v24, %v136_v25  ;;  %v139_v30 = vld [vmem:[%s17806_s28 + $0x100] sm:$0xff]  ;;  %v140_v35 = vld [vmem:[%s17806_s28 + $0x108] sm:$0xff]  ;;  %v11095_v37 = vcombine.low %v131_v22, %v135_v23  ;;  %v11097_v38 = vcombine.low %v132_v24, %v136_v25 }
  0x4c   :  { %6412 = vmatpush1.bf16.msra.mxu0 %v11079_v18  ;;  %6740 = vmatpush1.bf16.msra.mxu1 %v11081_v19  ;;  %v143_v31 = vld [vmem:[%s17806_s28 + $0x120] sm:$0xff]  ;;  %v144_v36 = vld [vmem:[%s17806_s28 + $0x128] sm:$0xff] }
  0x4d   :  { %6413 = vmatprep.subr.bf16.mxu0 %v11088_v20  ;;  %6741 = vmatprep.subr.bf16.mxu1 %v11090_v21  ;;  %v11104_v39 = vcombine.high %v139_v30, %v143_v31  ;;  %v11106_v40 = vcombine.high %v140_v35, %v144_v36  ;;  %v147_v41 = vld [vmem:[%s17806_s28 + $0x140] sm:$0xff]  ;;  %v148_v45 = vld [vmem:[%s17806_s28 + $0x148] sm:$0xff]  ;;  %v11103_v47 = vcombine.low %v139_v30, %v143_v31 }
  0x4e   :  { %v151_v42 = vld [vmem:[%s17806_s28 + $0x160] sm:$0xff]  ;;  %v152_v46 = vld [vmem:[%s17806_s28 + $0x168] sm:$0xff]  ;;  %v11105_v48 = vcombine.low %v140_v35, %v144_v36 }
  0x4f   :  { %v11112_v49 = vcombine.high %v147_v41, %v151_v42  ;;  %v11114_v50 = vcombine.high %v148_v45, %v152_v46  ;;  %v155_v51 = vld [vmem:[%s17806_s28 + $0x180] sm:$0xff]  ;;  %v156_v54 = vld [vmem:[%s17806_s28 + $0x188] sm:$0xff]  ;;  %v11111_v56 = vcombine.low %v147_v41, %v151_v42  ;;  %v11113_v57 = vcombine.low %v148_v45, %v152_v46 }
  0x50   :  { %6414 = vmatpush1.bf16.msra.mxu0 %v11087_v26  ;;  %6742 = vmatpush1.bf16.msra.mxu1 %v11089_v27  ;;  %v159_v52 = vld [vmem:[%s17806_s28 + $0x1a0] sm:$0xff]  ;;  %v160_v55 = vld [vmem:[%s17806_s28 + $0x1a8] sm:$0xff] }
  0x51   :  { %6415 = vmatprep.subr.bf16.mxu0 %v11096_v28  ;;  %6743 = vmatprep.subr.bf16.mxu1 %v11098_v29  ;;  %v11120_v58 = vcombine.high %v155_v51, %v159_v52  ;;  %v13675_v59 = vld [vmem:[%s17807_s2] sm:$0xff]  ;;  %v11122_v60 = vcombine.high %v156_v54, %v160_v55  ;;  %v164_v0 = vld [vmem:[%s17806_s28 + $0x1c8] sm:$0xff]  ;;  %v11119_v2 = vcombine.low %v155_v51, %v159_v52 }
  0x52   :  { %v163_v61 = vld [vmem:[%s17806_s28 + $0x1c0] sm:$0xff]  ;;  %v13685_v63 = vrot.slane %v13675_v59, %v13664_v53  ;;  %v168_v1 = vld [vmem:[%s17806_s28 + $0x1e8] sm:$0xff]  ;;  %v11121_v4 = vcombine.low %v156_v54, %v160_v55 }
  0x53   :  { %v167_v62 = vld [vmem:[%s17806_s28 + $0x1e0] sm:$0xff]  ;;  %v11130_v6 = vcombine.high %v164_v0, %v168_v1  ;;  %v172_v10 = vld [vmem:[%s17806_s28 + $0x208] sm:$0xff]  ;;  %v11129_v13 = vcombine.low %v164_v0, %v168_v1 }
  0x54   :  { %6416 = vmatpush1.bf16.msra.mxu0 %v11095_v37  ;;  %6744 = vmatpush1.bf16.msra.mxu1 %v11097_v38  ;;  %v1190_v3 = vcombine.high %v13685_v63, %v13685_v63  ;;  %v11128_v5 = vcombine.high %v163_v61, %v167_v62  ;;  %v171_v7 = vld [vmem:[%s17806_s28 + $0x200] sm:$0xff]  ;;  %v176_v11 = vld [vmem:[%s17806_s28 + $0x228] sm:$0xff]  ;;  %v11127_v12 = vcombine.low %v163_v61, %v167_v62 }
  0x55   :  { %6417 = vmatprep.subr.bf16.mxu0 %v11104_v39  ;;  %6745 = vmatprep.subr.bf16.mxu1 %v11106_v40  ;;  %v175_v8 = vld [vmem:[%s17806_s28 + $0x220] sm:$0xff]  ;;  %v11138_v15 = vcombine.high %v172_v10, %v176_v11  ;;  %v180_v18 = vld [vmem:[%s17806_s28 + $0x248] sm:$0xff]  ;;  %v11137_v21 = vcombine.low %v172_v10, %v176_v11 }
  0x56   :  { %v13702_v9 = vrot.slane %v1190_v3, %v13664_v53  ;;  %v11136_v14 = vcombine.high %v171_v7, %v175_v8  ;;  %v179_v16 = vld [vmem:[%s17806_s28 + $0x240] sm:$0xff]  ;;  %v184_v19 = vld [vmem:[%s17806_s28 + $0x268] sm:$0xff]  ;;  %v11135_v20 = vcombine.low %v171_v7, %v175_v8 }
  0x57   :  { %v183_v17 = vld [vmem:[%s17806_s28 + $0x260] sm:$0xff]  ;;  %v11146_v23 = vcombine.high %v180_v18, %v184_v19  ;;  %v188_v26 = vld [vmem:[%s17806_s28 + $0x288] sm:$0xff]  ;;  %v11145_v29 = vcombine.low %v180_v18, %v184_v19 }
  0x58   :  { %6418 = vmatpush1.bf16.msra.mxu0 %v11103_v47  ;;  %6746 = vmatpush1.bf16.msra.mxu1 %v11105_v48  ;;  %v11144_v22 = vcombine.high %v179_v16, %v183_v17  ;;  %v187_v24 = vld [vmem:[%s17806_s28 + $0x280] sm:$0xff]  ;;  %v192_v27 = vld [vmem:[%s17806_s28 + $0x2a8] sm:$0xff]  ;;  %v11143_v28 = vcombine.low %v179_v16, %v183_v17 }
  0x59   :  { %6419 = vmatprep.subr.bf16.mxu0 %v11112_v49  ;;  %6747 = vmatprep.subr.bf16.mxu1 %v11114_v50  ;;  %v191_v25 = vld [vmem:[%s17806_s28 + $0x2a0] sm:$0xff]  ;;  %v11154_v31 = vcombine.high %v188_v26, %v192_v27  ;;  %v196_v34 = vld [vmem:[%s17806_s28 + $0x2c8] sm:$0xff]  ;;  %v11153_v37 = vcombine.low %v188_v26, %v192_v27 }
  0x5a   :  { %6441 = vmatprep.mubr.bf16.mxu0 %v13702_v9  ;;  %6769 = vmatprep.mubr.bf16.mxu1 %v13702_v9  ;;  %v11152_v30 = vcombine.high %v187_v24, %v191_v25  ;;  %v195_v32 = vld [vmem:[%s17806_s28 + $0x2c0] sm:$0xff]  ;;  %v200_v35 = vld [vmem:[%s17806_s28 + $0x2e8] sm:$0xff]  ;;  %v11151_v36 = vcombine.low %v187_v24, %v191_v25 }
  0x5b   :  { %v199_v33 = vld [vmem:[%s17806_s28 + $0x2e0] sm:$0xff]  ;;  %v11162_v39 = vcombine.high %v196_v34, %v200_v35  ;;  %v204_v42 = vld [vmem:[%s17806_s28 + $0x308] sm:$0xff]  ;;  %v11161_v46 = vcombine.low %v196_v34, %v200_v35 }
  0x5c   :  { %6420 = vmatpush1.bf16.msra.mxu0 %v11111_v56  ;;  %6748 = vmatpush1.bf16.msra.mxu1 %v11113_v57  ;;  %v11160_v38 = vcombine.high %v195_v32, %v199_v33  ;;  %v203_v40 = vld [vmem:[%s17806_s28 + $0x300] sm:$0xff]  ;;  %v208_v44 = vld [vmem:[%s17806_s28 + $0x328] sm:$0xff]  ;;  %v11159_v45 = vcombine.low %v195_v32, %v199_v33  ;;  %v13838_v33 = vcombine.high %v13702_v9, %v13702_v9 }
  0x5d   :  { %6421 = vmatprep.subr.bf16.mxu0 %v11120_v58  ;;  %6749 = vmatprep.subr.bf16.mxu1 %v11122_v60  ;;  %v207_v41 = vld [vmem:[%s17806_s28 + $0x320] sm:$0xff]  ;;  %v11170_v48 = vcombine.high %v204_v42, %v208_v44  ;;  %v212_v51 = vld [vmem:[%s17806_s28 + $0x348] sm:$0xff]  ;;  %v11169_v55 = vcombine.low %v204_v42, %v208_v44 }
  0x5e   :  { %v11168_v47 = vcombine.high %v203_v40, %v207_v41  ;;  %v211_v49 = vld [vmem:[%s17806_s28 + $0x340] sm:$0xff]  ;;  %v216_v52 = vld [vmem:[%s17806_s28 + $0x368] sm:$0xff]  ;;  %v11167_v54 = vcombine.low %v203_v40, %v207_v41 }
  0x5f   :  { %v215_v50 = vld [vmem:[%s17806_s28 + $0x360] sm:$0xff]  ;;  %v11178_v57 = vcombine.high %v212_v51, %v216_v52  ;;  %v220_v61 = vld [vmem:[%s17806_s28 + $0x388] sm:$0xff]  ;;  %v11177_v1 = vcombine.low %v212_v51, %v216_v52 }
  0x60   :  { %6422 = vmatpush1.bf16.msra.mxu0 %v11119_v2  ;;  %6750 = vmatpush1.bf16.msra.mxu1 %v11121_v4  ;;  %v11176_v56 = vcombine.high %v211_v49, %v215_v50  ;;  %v219_v58 = vld [vmem:[%s17806_s28 + $0x380] sm:$0xff]  ;;  %v224_v62 = vld [vmem:[%s17806_s28 + $0x3a8] sm:$0xff]  ;;  %v11175_v0 = vcombine.low %v211_v49, %v215_v50 }
  0x61   :  { %6423 = vmatprep.subr.bf16.mxu0 %v11128_v5  ;;  %6751 = vmatprep.subr.bf16.mxu1 %v11130_v6  ;;  %v223_v60 = vld [vmem:[%s17806_s28 + $0x3a0] sm:$0xff]  ;;  %v11186_v3 = vcombine.high %v220_v61, %v224_v62  ;;  %v228_v6 = vld [vmem:[%s17806_s28 + $0x3c8] sm:$0xff]  ;;  %v11185_v10 = vcombine.low %v220_v61, %v224_v62 }
  0x62   :  { %v11184_v2 = vcombine.high %v219_v58, %v223_v60  ;;  %v227_v4 = vld [vmem:[%s17806_s28 + $0x3c0] sm:$0xff]  ;;  %v232_v7 = vld [vmem:[%s17806_s28 + $0x3e8] sm:$0xff]  ;;  %v11183_v8 = vcombine.low %v219_v58, %v223_v60 }
  0x63   :  { %v231_v5 = vld [vmem:[%s17806_s28 + $0x3e0] sm:$0xff]  ;;  %v240_v16 = vld [vmem:[%s17806_s28 + $0x428] sm:$0xff]  ;;  %v11193_v18 = vcombine.low %v228_v6, %v232_v7 }
  0x64   :  { %6424 = vmatpush1.bf16.msra.mxu0 %v11127_v12  ;;  %6752 = vmatpush1.bf16.msra.mxu1 %v11129_v13  ;;  %v11192_v11 = vcombine.high %v227_v4, %v231_v5  ;;  %v11194_v12 = vcombine.high %v228_v6, %v232_v7  ;;  %v235_v13 = vld [vmem:[%s17806_s28 + $0x400] sm:$0xff]  ;;  %v11191_v17 = vcombine.low %v227_v4, %v231_v5  ;;  %v244_v24 = vld [vmem:[%s17806_s28 + $0x448] sm:$0xff] }
  0x65   :  { %6425 = vmatprep.subr.bf16.mxu0 %v11136_v14  ;;  %6753 = vmatprep.subr.bf16.mxu1 %v11138_v15  ;;  %v239_v14 = vld [vmem:[%s17806_s28 + $0x420] sm:$0xff]  ;;  %v236_v15 = vld [vmem:[%s17806_s28 + $0x408] sm:$0xff] }
  0x66   :  { %v11200_v19 = vcombine.high %v235_v13, %v239_v14  ;;  %v248_v25 = vld [vmem:[%s17806_s28 + $0x468] sm:$0xff]  ;;  %v11199_v26 = vcombine.low %v235_v13, %v239_v14  ;;  %v11201_v27 = vcombine.low %v236_v15, %v240_v16 }
  0x67   :  { %v256_v32 = vld [vmem:[%s17806_s28 + $0x4a8] sm:$0xff]  ;;  %v11209_v35 = vcombine.low %v244_v24, %v248_v25 }
  0x68   :  { %6426 = vmatpush1.bf16.msra.mxu0 %v11135_v20  ;;  %6754 = vmatpush1.bf16.msra.mxu1 %v11137_v21  ;;  %v11202_v20 = vcombine.high %v236_v15, %v240_v16  ;;  %v243_v21 = vld [vmem:[%s17806_s28 + $0x440] sm:$0xff]  ;;  %v264_v41 = vld [vmem:[%s17806_s28 + $0x4e8] sm:$0xff] }
  0x69   :  { %6427 = vmatprep.subr.bf16.mxu0 %v11144_v22  ;;  %6755 = vmatprep.subr.bf16.mxu1 %v11146_v23  ;;  %v247_v22 = vld [vmem:[%s17806_s28 + $0x460] sm:$0xff]  ;;  %v13816_v23 = vrot.slane %v13685_v63, %v13664_v53  ;;  %v272_v50 = vld [vmem:[%s17806_s28 + $0x528] sm:$0xff] }
  0x6a   :  { %v255_v63 = vld [vmem:[%s17806_s28 + $0x4a0] sm:$0xff]  ;;  %v11207_v34 = vcombine.low %v243_v21, %v247_v22  ;;  %v280_v60 = vld [vmem:[%s17806_s28 + $0x568] sm:$0xff] }
  0x6b   :  { %v288_v5 = vld [vmem:[%s17806_s28 + $0x5a8] sm:$0xff] }
  0x6c   :  { %6428 = vmatpush1.bf16.msra.mxu0 %v11143_v28  ;;  %6756 = vmatpush1.bf16.msra.mxu1 %v11145_v29  ;;  %v11208_v28 = vcombine.high %v243_v21, %v247_v22  ;;  %v251_v29 = vld [vmem:[%s17806_s28 + $0x480] sm:$0xff]  ;;  %v296_v14 = vld [vmem:[%s17806_s28 + $0x5e8] sm:$0xff] }
  0x6d   :  { %6429 = vmatprep.subr.bf16.mxu0 %v11152_v30  ;;  %6757 = vmatprep.subr.bf16.mxu1 %v11154_v31  ;;  %v252_v30 = vld [vmem:[%s17806_s28 + $0x488] sm:$0xff]  ;;  %v11210_v31 = vcombine.high %v244_v24, %v248_v25  ;;  %v11215_v42 = vcombine.low %v251_v29, %v255_v63 }
  0x6e   :  { %v11218_v40 = vcombine.high %v252_v30, %v256_v32  ;;  %v11217_v44 = vcombine.low %v252_v30, %v256_v32  ;;  %v304_v22 = vld [vmem:[%s17806_s28 + $0x628] sm:$0xff] }
  0x6f   :  { %v312_v30 = vld [vmem:[%s17806_s28 + $0x668] sm:$0xff] }
  0x70   :  { %6430 = vmatpush1.bf16.msra.mxu0 %v11151_v36  ;;  %6758 = vmatpush1.bf16.msra.mxu1 %v11153_v37  ;;  %v11216_v36 = vcombine.high %v251_v29, %v255_v63  ;;  %v259_v37 = vld [vmem:[%s17806_s28 + $0x4c0] sm:$0xff]  ;;  %v308_v29 = vld [vmem:[%s17806_s28 + $0x648] sm:$0xff] }
  0x71   :  { %6431 = vmatprep.subr.bf16.mxu0 %v11160_v38  ;;  %6759 = vmatprep.subr.bf16.mxu1 %v11162_v39  ;;  %v263_v38 = vld [vmem:[%s17806_s28 + $0x4e0] sm:$0xff]  ;;  %v260_v39 = vld [vmem:[%s17806_s28 + $0x4c8] sm:$0xff] }
  0x72   :  { %v11226_v49 = vcombine.high %v260_v39, %v264_v41  ;;  %v11223_v51 = vcombine.low %v259_v37, %v263_v38  ;;  %v11225_v52 = vcombine.low %v260_v39, %v264_v41  ;;  %v320_v39 = vld [vmem:[%s17806_s28 + $0x6a8] sm:$0xff]  ;;  %v11273_v41 = vcombine.low %v308_v29, %v312_v30 }
  0x74   :  { %6432 = vmatpush1.bf16.msra.mxu0 %v11159_v45  ;;  %6760 = vmatpush1.bf16.msra.mxu1 %v11161_v46  ;;  %v11224_v45 = vcombine.high %v259_v37, %v263_v38  ;;  %v267_v46 = vld [vmem:[%s17806_s28 + $0x500] sm:$0xff]  ;;  %v316_v37 = vld [vmem:[%s17806_s28 + $0x688] sm:$0xff]  ;;  %v11274_v38 = vcombine.high %v308_v29, %v312_v30 }
  0x75   :  { %6433 = vmatprep.subr.bf16.mxu0 %v11168_v47  ;;  %6761 = vmatprep.subr.bf16.mxu1 %v11170_v48  ;;  %v271_v47 = vld [vmem:[%s17806_s28 + $0x520] sm:$0xff]  ;;  %v268_v48 = vld [vmem:[%s17806_s28 + $0x508] sm:$0xff] }
  0x76   :  { %v11234_v58 = vcombine.high %v268_v48, %v272_v50  ;;  %v11231_v61 = vcombine.low %v267_v46, %v271_v47  ;;  %v11233_v62 = vcombine.low %v268_v48, %v272_v50  ;;  %v328_v48 = vld [vmem:[%s17806_s28 + $0x6e8] sm:$0xff]  ;;  %v11281_v50 = vcombine.low %v316_v37, %v320_v39 }
  0x77   :  { %v368_v29 = vld [vmem:[%s17806_s28 + $0x828] sm:$0xff] }
  0x78   :  { %6434 = vmatpush1.bf16.msra.mxu0 %v11167_v54  ;;  %6762 = vmatpush1.bf16.msra.mxu1 %v11169_v55  ;;  %v11232_v54 = vcombine.high %v267_v46, %v271_v47  ;;  %v275_v55 = vld [vmem:[%s17806_s28 + $0x540] sm:$0xff]  ;;  %v324_v46 = vld [vmem:[%s17806_s28 + $0x6c8] sm:$0xff]  ;;  %v11282_v47 = vcombine.high %v316_v37, %v320_v39 }
  0x79   :  { %6435 = vmatprep.subr.bf16.mxu0 %v11176_v56  ;;  %6763 = vmatprep.subr.bf16.mxu1 %v11178_v57  ;;  %v279_v56 = vld [vmem:[%s17806_s28 + $0x560] sm:$0xff]  ;;  %v276_v57 = vld [vmem:[%s17806_s28 + $0x548] sm:$0xff] }
  0x7a   :  { %v11242_v4 = vcombine.high %v276_v57, %v280_v60  ;;  %v11239_v6 = vcombine.low %v275_v55, %v279_v56  ;;  %v11241_v7 = vcombine.low %v276_v57, %v280_v60  ;;  %v336_v57 = vld [vmem:[%s17806_s28 + $0x728] sm:$0xff]  ;;  %v11289_v60 = vcombine.low %v324_v46, %v328_v48 }
  0x7c   :  { %6436 = vmatpush1.bf16.msra.mxu0 %v11175_v0  ;;  %6764 = vmatpush1.bf16.msra.mxu1 %v11177_v1  ;;  %v11240_v0 = vcombine.high %v275_v55, %v279_v56  ;;  %v283_v1 = vld [vmem:[%s17806_s28 + $0x580] sm:$0xff]  ;;  %v332_v55 = vld [vmem:[%s17806_s28 + $0x708] sm:$0xff]  ;;  %v11290_v56 = vcombine.high %v324_v46, %v328_v48 }
  0x7d   :  { %6437 = vmatprep.subr.bf16.mxu0 %v11184_v2  ;;  %6765 = vmatprep.subr.bf16.mxu1 %v11186_v3  ;;  %v287_v2 = vld [vmem:[%s17806_s28 + $0x5a0] sm:$0xff]  ;;  %v284_v3 = vld [vmem:[%s17806_s28 + $0x588] sm:$0xff] }
  0x7e   :  { %v11250_v13 = vcombine.high %v284_v3, %v288_v5  ;;  %v11247_v15 = vcombine.low %v283_v1, %v287_v2  ;;  %v11249_v16 = vcombine.low %v284_v3, %v288_v5  ;;  %v344_v3 = vld [vmem:[%s17806_s28 + $0x768] sm:$0xff]  ;;  %v11297_v5 = vcombine.low %v332_v55, %v336_v57  ;;  %v383_v46 = vld [vmem:[%s17806_s28 + $0x8a0] sm:$0xff] }
  0x80   :  { %6438 = vmatpush1.bf16.msra.mxu0 %v11183_v8  ;;  %6766 = vmatpush1.bf16.msra.mxu1 %v11185_v10  ;;  %v11248_v8 = vcombine.high %v283_v1, %v287_v2  ;;  %v291_v10 = vld [vmem:[%s17806_s28 + $0x5c0] sm:$0xff]  ;;  %v340_v1 = vld [vmem:[%s17806_s28 + $0x748] sm:$0xff]  ;;  %v11298_v2 = vcombine.high %v332_v55, %v336_v57 }
  0x81   :  { %6439 = vmatprep.subr.bf16.mxu0 %v11192_v11  ;;  %6767 = vmatprep.subr.bf16.mxu1 %v11194_v12  ;;  %v295_v11 = vld [vmem:[%s17806_s28 + $0x5e0] sm:$0xff]  ;;  %v292_v12 = vld [vmem:[%s17806_s28 + $0x5c8] sm:$0xff] }
  0x82   :  { %v11258_v21 = vcombine.high %v292_v12, %v296_v14  ;;  %v11255_v24 = vcombine.low %v291_v10, %v295_v11  ;;  %v11257_v25 = vcombine.low %v292_v12, %v296_v14  ;;  %v352_v12 = vld [vmem:[%s17806_s28 + $0x7a8] sm:$0xff]  ;;  %v11305_v14 = vcombine.low %v340_v1, %v344_v3  ;;  %v387_v55 = vld [vmem:[%s17806_s28 + $0x8c0] sm:$0xff] }
  0x83   :  { %v388_v57 = vld [vmem:[%s17806_s28 + $0x8c8] sm:$0xff] }
  0x84   :  { %6440 = vmatpush1.bf16.msra.mxu0 %v11191_v17  ;;  %6768 = vmatpush1.bf16.msra.mxu1 %v11193_v18  ;;  %v11256_v17 = vcombine.high %v291_v10, %v295_v11  ;;  %v299_v18 = vld [vmem:[%s17806_s28 + $0x600] sm:$0xff]  ;;  %v348_v10 = vld [vmem:[%s17806_s28 + $0x788] sm:$0xff]  ;;  %v11306_v11 = vcombine.high %v340_v1, %v344_v3 }
  0x85   :  { %6450 = vmatprep.subr.bf16.mxu0 %v11200_v19  ;;  %6778 = vmatprep.subr.bf16.mxu1 %v11202_v20  ;;  %v303_v19 = vld [vmem:[%s17806_s28 + $0x620] sm:$0xff]  ;;  %v300_v20 = vld [vmem:[%s17806_s28 + $0x608] sm:$0xff] }
  0x86   :  { %v11266_v63 = vcombine.high %v300_v20, %v304_v22  ;;  %v11265_v32 = vcombine.low %v300_v20, %v304_v22  ;;  %v360_v20 = vld [vmem:[%s17806_s28 + $0x7e8] sm:$0xff]  ;;  %v395_v1 = vld [vmem:[%s17806_s28 + $0x900] sm:$0xff] }
  0x87   :  { %6442 = vmatmul.mubr.bf16.vlgmr.msra.gmra.mrb[0].mxu0 %v13816_v23  ;;  %6770 = vmatmul.mubr.bf16.vlgmr.msra.gmra.mrb[0].mxu1 %v13816_v23  ;;  %v396_v3 = vld [vmem:[%s17806_s28 + $0x908] sm:$0xff] }
  0x88   :  { %6451 = vmatpush1.bf16.msra.mxu0 %v11199_v26  ;;  %6779 = vmatpush1.bf16.msra.mxu1 %v11201_v27  ;;  %v11264_v26 = vcombine.high %v299_v18, %v303_v19  ;;  %v307_v27 = vld [vmem:[%s17806_s28 + $0x640] sm:$0xff] }
  0x89   :  { %6452 = vmatprep.subr.bf16.mxu0 %v11208_v28  ;;  %6780 = vmatprep.subr.bf16.mxu1 %v11210_v31  ;;  %v311_v28 = vld [vmem:[%s17806_s28 + $0x660] sm:$0xff]  ;;  %v11263_v31 = vcombine.low %v299_v18, %v303_v19  ;;  %v356_v18 = vld [vmem:[%s17806_s28 + $0x7c8] sm:$0xff]  ;;  %v11314_v19 = vcombine.high %v348_v10, %v352_v12 }
  0x8a   :  { %6482 = vmatprep.mubr.bf16.mxu0 %v13838_v33  ;;  %6810 = vmatprep.mubr.bf16.mxu1 %v13838_v33 }
  0x8c   :  { %6453 = vmatpush1.bf16.msra.mxu0 %v11207_v34  ;;  %6781 = vmatpush1.bf16.msra.mxu1 %v11209_v35  ;;  %v11272_v34 = vcombine.high %v307_v27, %v311_v28  ;;  %v315_v35 = vld [vmem:[%s17806_s28 + $0x680] sm:$0xff] }
  0x8d   :  { %6454 = vmatprep.subr.bf16.mxu0 %v11216_v36  ;;  %6782 = vmatprep.subr.bf16.mxu1 %v11218_v40  ;;  %v319_v36 = vld [vmem:[%s17806_s28 + $0x6a0] sm:$0xff]  ;;  %v11271_v40 = vcombine.low %v307_v27, %v311_v28  ;;  %v364_v28 = vld [vmem:[%s17806_s28 + $0x808] sm:$0xff] }
  0x8e   :  { %v367_v27 = vld [vmem:[%s17806_s28 + $0x820] sm:$0xff]  ;;  %v11330_v37 = vcombine.high %v364_v28, %v368_v29 }
  0x90   :  { %6455 = vmatpush1.bf16.msra.mxu0 %v11215_v42  ;;  %6783 = vmatpush1.bf16.msra.mxu1 %v11217_v44  ;;  %v11280_v42 = vcombine.high %v315_v35, %v319_v36  ;;  %v323_v44 = vld [vmem:[%s17806_s28 + $0x6c0] sm:$0xff] }
  0x91   :  { %6456 = vmatprep.subr.bf16.mxu0 %v11224_v45  ;;  %6784 = vmatprep.subr.bf16.mxu1 %v11226_v49  ;;  %v327_v45 = vld [vmem:[%s17806_s28 + $0x6e0] sm:$0xff]  ;;  %v11279_v49 = vcombine.low %v315_v35, %v319_v36  ;;  %v372_v36 = vld [vmem:[%s17806_s28 + $0x848] sm:$0xff] }
  0x92   :  { %v375_v35 = vld [vmem:[%s17806_s28 + $0x860] sm:$0xff] }
  0x94   :  { %6457 = vmatpush1.bf16.msra.mxu0 %v11223_v51  ;;  %6785 = vmatpush1.bf16.msra.mxu1 %v11225_v52  ;;  %v11288_v51 = vcombine.high %v323_v44, %v327_v45  ;;  %v331_v52 = vld [vmem:[%s17806_s28 + $0x700] sm:$0xff] }
  0x95   :  { %6458 = vmatprep.subr.bf16.mxu0 %v11232_v54  ;;  %6786 = vmatprep.subr.bf16.mxu1 %v11234_v58  ;;  %v335_v54 = vld [vmem:[%s17806_s28 + $0x720] sm:$0xff]  ;;  %v11287_v58 = vcombine.low %v323_v44, %v327_v45 }
  0x96   :  { %v379_v45 = vld [vmem:[%s17806_s28 + $0x880] sm:$0xff] }
  0x98   :  { %6459 = vmatpush1.bf16.msra.mxu0 %v11231_v61  ;;  %6787 = vmatpush1.bf16.msra.mxu1 %v11233_v62  ;;  %v11296_v61 = vcombine.high %v331_v52, %v335_v54  ;;  %v339_v62 = vld [vmem:[%s17806_s28 + $0x740] sm:$0xff] }
  0x99   :  { %6460 = vmatprep.subr.bf16.mxu0 %v11240_v0  ;;  %6788 = vmatprep.subr.bf16.mxu1 %v11242_v4  ;;  %v343_v0 = vld [vmem:[%s17806_s28 + $0x760] sm:$0xff]  ;;  %v11295_v4 = vcombine.low %v331_v52, %v335_v54  ;;  %v11344_v54 = vcombine.high %v379_v45, %v383_v46 }
  0x9c   :  { %6461 = vmatpush1.bf16.msra.mxu0 %v11239_v6  ;;  %6789 = vmatpush1.bf16.msra.mxu1 %v11241_v7  ;;  %v11304_v6 = vcombine.high %v339_v62, %v343_v0  ;;  %v347_v7 = vld [vmem:[%s17806_s28 + $0x780] sm:$0xff] }
  0x9d   :  { %6462 = vmatprep.subr.bf16.mxu0 %v11248_v8  ;;  %6790 = vmatprep.subr.bf16.mxu1 %v11250_v13  ;;  %v351_v8 = vld [vmem:[%s17806_s28 + $0x7a0] sm:$0xff]  ;;  %v11303_v13 = vcombine.low %v339_v62, %v343_v0 }
  0x9e   :  { %v11311_v22 = vcombine.low %v347_v7, %v351_v8 }
  0xa0   :  { %6463 = vmatpush1.bf16.msra.mxu0 %v11247_v15  ;;  %6791 = vmatpush1.bf16.msra.mxu1 %v11249_v16  ;;  %v11312_v15 = vcombine.high %v347_v7, %v351_v8  ;;  %v355_v16 = vld [vmem:[%s17806_s28 + $0x7c0] sm:$0xff] }
  0xa1   :  { %6464 = vmatprep.subr.bf16.mxu0 %v11256_v17  ;;  %6792 = vmatprep.subr.bf16.mxu1 %v11258_v21  ;;  %v359_v17 = vld [vmem:[%s17806_s28 + $0x7e0] sm:$0xff]  ;;  %v1175_v21 = vcombine.high %v13675_v59, %v13675_v59  ;;  %v11322_v59 = vcombine.high %v356_v18, %v360_v20 }
  0xa2   :  { %v11319_v30 = vcombine.low %v355_v16, %v359_v17 }
  0xa4   :  { %6465 = vmatpush1.bf16.msra.mxu0 %v11255_v24  ;;  %6793 = vmatpush1.bf16.msra.mxu1 %v11257_v25  ;;  %v11313_v24 = vcombine.low %v348_v10, %v352_v12  ;;  %v11320_v25 = vcombine.high %v355_v16, %v359_v17  ;;  %v403_v10 = vld [vmem:[%s17806_s28 + $0x940] sm:$0xff]  ;;  %v404_v12 = vld [vmem:[%s17806_s28 + $0x948] sm:$0xff] }
  0xa5   :  { %6466 = vmatprep.subr.bf16.mxu0 %v11264_v26  ;;  %6794 = vmatprep.subr.bf16.mxu1 %v11266_v63  ;;  %v363_v26 = vld [vmem:[%s17806_s28 + $0x800] sm:$0xff]  ;;  %v14015_v63 = vrot.slane %v1175_v21, %v13664_v53 }
  0xa7   :  { %v1191_v39 = vcombine.high %v14015_v63, %v14015_v63 }
  0xa8   :  { %6467 = vmatpush1.bf16.msra.mxu0 %v11263_v31  ;;  %6795 = vmatpush1.bf16.msra.mxu1 %v11265_v32  ;;  %v11321_v31 = vcombine.low %v356_v18, %v360_v20  ;;  %v11328_v32 = vcombine.high %v363_v26, %v367_v27  ;;  %v411_v18 = vld [vmem:[%s17806_s28 + $0x980] sm:$0xff]  ;;  %v412_v20 = vld [vmem:[%s17806_s28 + $0x988] sm:$0xff] }
  0xa9   :  { %6468 = vmatprep.subr.bf16.mxu0 %v11272_v34  ;;  %6796 = vmatprep.subr.bf16.mxu1 %v11274_v38  ;;  %v371_v34 = vld [vmem:[%s17806_s28 + $0x840] sm:$0xff]  ;;  %v376_v38 = vld [vmem:[%s17806_s28 + $0x868] sm:$0xff] }
  0xaa   :  { %v11336_v44 = vcombine.high %v371_v34, %v375_v35  ;;  %v11338_v48 = vcombine.high %v372_v36, %v376_v38  ;;  %v11337_v52 = vcombine.low %v372_v36, %v376_v38  ;;  %v431_v36 = vld [vmem:[%s17806_s28 + $0xa20] sm:$0xff] }
  0xac   :  { %6469 = vmatpush1.bf16.msra.mxu0 %v11271_v40  ;;  %6797 = vmatpush1.bf16.msra.mxu1 %v11273_v41  ;;  %v14033_v40 = vcombine.high %v13816_v23, %v13816_v23  ;;  %v11327_v41 = vcombine.low %v363_v26, %v367_v27  ;;  %v419_v27 = vld [vmem:[%s17806_s28 + $0x9c0] sm:$0xff] }
  0xad   :  { %6470 = vmatprep.subr.bf16.mxu0 %v11280_v42  ;;  %6798 = vmatprep.subr.bf16.mxu1 %v11282_v47  ;;  %v11329_v42 = vcombine.low %v364_v28, %v368_v29  ;;  %v380_v47 = vld [vmem:[%s17806_s28 + $0x888] sm:$0xff]  ;;  %v423_v28 = vld [vmem:[%s17806_s28 + $0x9e0] sm:$0xff] }
  0xb0   :  { %6471 = vmatpush1.bf16.msra.mxu0 %v11279_v49  ;;  %6799 = vmatpush1.bf16.msra.mxu1 %v11281_v50  ;;  %v384_v49 = vld [vmem:[%s17806_s28 + $0x8a8] sm:$0xff]  ;;  %v14048_v50 = vrot.slane %v1191_v39, %v13664_v53 }
  0xb1   :  { %6472 = vmatprep.subr.bf16.mxu0 %v11288_v51  ;;  %6800 = vmatprep.subr.bf16.mxu1 %v11290_v56  ;;  %v11335_v51 = vcombine.low %v371_v34, %v375_v35  ;;  %v391_v56 = vld [vmem:[%s17806_s28 + $0x8e0] sm:$0xff]  ;;  %v11345_v62 = vcombine.low %v380_v47, %v384_v49  ;;  %v11384_v34 = vcombine.high %v419_v27, %v423_v28  ;;  %v432_v39 = vld [vmem:[%s17806_s28 + $0xa28] sm:$0xff] }
  0xb2   :  { %v11352_v0 = vcombine.high %v387_v55, %v391_v56  ;;  %v427_v35 = vld [vmem:[%s17806_s28 + $0xa00] sm:$0xff] }
  0xb4   :  { %6473 = vmatpush1.bf16.msra.mxu0 %v11287_v58  ;;  %6801 = vmatpush1.bf16.msra.mxu1 %v11289_v60  ;;  %v11346_v58 = vcombine.high %v380_v47, %v384_v49  ;;  %v392_v60 = vld [vmem:[%s17806_s28 + $0x8e8] sm:$0xff] }
  0xb5   :  { %6474 = vmatprep.subr.bf16.mxu0 %v11296_v61  ;;  %6802 = vmatprep.subr.bf16.mxu1 %v11298_v2  ;;  %v11343_v61 = vcombine.low %v379_v45, %v383_v46  ;;  %v399_v2 = vld [vmem:[%s17806_s28 + $0x920] sm:$0xff]  ;;  %v11353_v7 = vcombine.low %v388_v57, %v392_v60  ;;  %v436_v47 = vld [vmem:[%s17806_s28 + $0xa48] sm:$0xff] }
  0xb6   :  { %v11360_v8 = vcombine.high %v395_v1, %v399_v2  ;;  %v435_v45 = vld [vmem:[%s17806_s28 + $0xa40] sm:$0xff]  ;;  %v440_v49 = vld [vmem:[%s17806_s28 + $0xa68] sm:$0xff] }
  0xb7   :  { %v439_v46 = vld [vmem:[%s17806_s28 + $0xa60] sm:$0xff] }
  0xb8   :  { %6475 = vmatpush1.bf16.msra.mxu0 %v11295_v4  ;;  %6803 = vmatpush1.bf16.msra.mxu1 %v11297_v5  ;;  %v11354_v4 = vcombine.high %v388_v57, %v392_v60  ;;  %v400_v5 = vld [vmem:[%s17806_s28 + $0x928] sm:$0xff] }
  0xb9   :  { %6476 = vmatprep.subr.bf16.mxu0 %v11304_v6  ;;  %6804 = vmatprep.subr.bf16.mxu1 %v11306_v11  ;;  %v11351_v6 = vcombine.low %v387_v55, %v391_v56  ;;  %v407_v11 = vld [vmem:[%s17806_s28 + $0x960] sm:$0xff]  ;;  %v11361_v16 = vcombine.low %v396_v3, %v400_v5  ;;  %v444_v57 = vld [vmem:[%s17806_s28 + $0xa88] sm:$0xff] }
  0xba   :  { %v11368_v17 = vcombine.high %v403_v10, %v407_v11  ;;  %v443_v55 = vld [vmem:[%s17806_s28 + $0xa80] sm:$0xff]  ;;  %v448_v60 = vld [vmem:[%s17806_s28 + $0xaa8] sm:$0xff] }
  0xbb   :  { %v447_v56 = vld [vmem:[%s17806_s28 + $0xaa0] sm:$0xff] }
  0xbc   :  { %6477 = vmatpush1.bf16.msra.mxu0 %v11303_v13  ;;  %6805 = vmatpush1.bf16.msra.mxu1 %v11305_v14  ;;  %v11362_v13 = vcombine.high %v396_v3, %v400_v5  ;;  %v408_v14 = vld [vmem:[%s17806_s28 + $0x968] sm:$0xff] }
  0xbd   :  { %6478 = vmatprep.subr.bf16.mxu0 %v11312_v15  ;;  %6806 = vmatprep.subr.bf16.mxu1 %v11314_v19  ;;  %v11359_v15 = vcombine.low %v395_v1, %v399_v2  ;;  %v415_v19 = vld [vmem:[%s17806_s28 + $0x9a0] sm:$0xff]  ;;  %v11370_v21 = vcombine.high %v404_v12, %v408_v14  ;;  %v452_v3 = vld [vmem:[%s17806_s28 + $0xac8] sm:$0xff] }
  0xbe   :  { %v11376_v26 = vcombine.high %v411_v18, %v415_v19  ;;  %v451_v1 = vld [vmem:[%s17806_s28 + $0xac0] sm:$0xff]  ;;  %v456_v5 = vld [vmem:[%s17806_s28 + $0xae8] sm:$0xff] }
  0xbf   :  { %v455_v2 = vld [vmem:[%s17806_s28 + $0xae0] sm:$0xff] }
  0xc0   :  { %6479 = vmatpush1.bf16.msra.mxu0 %v11311_v22  ;;  %6807 = vmatpush1.bf16.msra.mxu1 %v11313_v24  ;;  %v416_v22 = vld [vmem:[%s17806_s28 + $0x9a8] sm:$0xff]  ;;  %v11367_v24 = vcombine.low %v403_v10, %v407_v11  ;;  %v459_v10 = vld [vmem:[%s17806_s28 + $0xb00] sm:$0xff] }
  0xc1   :  { %6480 = vmatprep.subr.bf16.mxu0 %v11320_v25  ;;  %6808 = vmatprep.subr.bf16.mxu1 %v11322_v59  ;;  %v11369_v25 = vcombine.low %v404_v12, %v408_v14  ;;  %v420_v59 = vld [vmem:[%s17806_s28 + $0x9c8] sm:$0xff]  ;;  %v11378_v29 = vcombine.high %v412_v20, %v416_v22  ;;  %v463_v11 = vld [vmem:[%s17806_s28 + $0xb20] sm:$0xff] }
  0xc2   :  { %v460_v12 = vld [vmem:[%s17806_s28 + $0xb08] sm:$0xff] }
  0xc3   :  { %v464_v14 = vld [vmem:[%s17806_s28 + $0xb28] sm:$0xff] }
  0xc4   :  { %6481 = vmatpush1.bf16.msra.mxu0 %v11319_v30  ;;  %6809 = vmatpush1.bf16.msra.mxu1 %v11321_v31  ;;  %v424_v30 = vld [vmem:[%s17806_s28 + $0x9e8] sm:$0xff]  ;;  %v11375_v31 = vcombine.low %v411_v18, %v415_v19  ;;  %v467_v18 = vld [vmem:[%s17806_s28 + $0xb40] sm:$0xff] }
  0xc5   :  { %6491 = vmatprep.subr.bf16.mxu0 %v11328_v32  ;;  %6819 = vmatprep.subr.bf16.mxu1 %v11330_v37  ;;  %v11377_v32 = vcombine.low %v412_v20, %v416_v22  ;;  %v428_v37 = vld [vmem:[%s17806_s28 + $0xa08] sm:$0xff]  ;;  %v11386_v38 = vcombine.high %v420_v59, %v424_v30  ;;  %v471_v19 = vld [vmem:[%s17806_s28 + $0xb60] sm:$0xff] }
  0xc6   :  { %v468_v20 = vld [vmem:[%s17806_s28 + $0xb48] sm:$0xff] }
  0xc7   :  { %6483 = vmatmul.mubr.bf16.vlgmr.msra.gmra.mrb[0].mxu0 %v14033_v40  ;;  %6811 = vmatmul.mubr.bf16.vlgmr.msra.gmra.mrb[0].mxu1 %v14033_v40  ;;  %v472_v22 = vld [vmem:[%s17806_s28 + $0xb68] sm:$0xff] }
  0xc8   :  { %6492 = vmatpush1.bf16.msra.mxu0 %v11327_v41  ;;  %6820 = vmatpush1.bf16.msra.mxu1 %v11329_v42  ;;  %v11383_v41 = vcombine.low %v419_v27, %v423_v28  ;;  %v11385_v42 = vcombine.low %v420_v59, %v424_v30  ;;  %v475_v27 = vld [vmem:[%s17806_s28 + $0xb80] sm:$0xff]  ;;  %v476_v59 = vld [vmem:[%s17806_s28 + $0xb88] sm:$0xff] }
  0xc9   :  { %6493 = vmatprep.subr.bf16.mxu0 %v11336_v44  ;;  %6821 = vmatprep.subr.bf16.mxu1 %v11338_v48  ;;  %v11392_v44 = vcombine.high %v427_v35, %v431_v36  ;;  %v11394_v48 = vcombine.high %v428_v37, %v432_v39  ;;  %v479_v28 = vld [vmem:[%s17806_s28 + $0xba0] sm:$0xff]  ;;  %v480_v30 = vld [vmem:[%s17806_s28 + $0xba8] sm:$0xff] }
  0xca   :  { %6523 = vmatprep.mubr.bf16.mxu0 %v14048_v50  ;;  %6851 = vmatprep.mubr.bf16.mxu1 %v14048_v50 }
  0xcc   :  { %6494 = vmatpush1.bf16.msra.mxu0 %v11335_v51  ;;  %6822 = vmatpush1.bf16.msra.mxu1 %v11337_v52  ;;  %v11391_v51 = vcombine.low %v427_v35, %v431_v36  ;;  %v11393_v52 = vcombine.low %v428_v37, %v432_v39  ;;  %v483_v35 = vld [vmem:[%s17806_s28 + $0xbc0] sm:$0xff]  ;;  %v484_v37 = vld [vmem:[%s17806_s28 + $0xbc8] sm:$0xff] }
  0xcd   :  { %6495 = vmatprep.subr.bf16.mxu0 %v11344_v54  ;;  %6823 = vmatprep.subr.bf16.mxu1 %v11346_v58  ;;  %v11400_v54 = vcombine.high %v435_v45, %v439_v46  ;;  %v11402_v58 = vcombine.high %v436_v47, %v440_v49  ;;  %v487_v36 = vld [vmem:[%s17806_s28 + $0xbe0] sm:$0xff]  ;;  %v488_v39 = vld [vmem:[%s17806_s28 + $0xbe8] sm:$0xff] }
  0xd0   :  { %6496 = vmatpush1.bf16.msra.mxu0 %v11343_v61  ;;  %6824 = vmatpush1.bf16.msra.mxu1 %v11345_v62  ;;  %v11399_v61 = vcombine.low %v435_v45, %v439_v46  ;;  %v11401_v62 = vcombine.low %v436_v47, %v440_v49  ;;  %v491_v45 = vld [vmem:[%s17806_s28 + $0xc00] sm:$0xff]  ;;  %v492_v47 = vld [vmem:[%s17806_s28 + $0xc08] sm:$0xff] }
  0xd1   :  { %6497 = vmatprep.subr.bf16.mxu0 %v11352_v0  ;;  %6825 = vmatprep.subr.bf16.mxu1 %v11354_v4  ;;  %v11408_v0 = vcombine.high %v443_v55, %v447_v56  ;;  %v11410_v4 = vcombine.high %v444_v57, %v448_v60  ;;  %v495_v46 = vld [vmem:[%s17806_s28 + $0xc20] sm:$0xff]  ;;  %v496_v49 = vld [vmem:[%s17806_s28 + $0xc28] sm:$0xff] }
  0xd4   :  { %6498 = vmatpush1.bf16.msra.mxu0 %v11351_v6  ;;  %6826 = vmatpush1.bf16.msra.mxu1 %v11353_v7  ;;  %v11407_v6 = vcombine.low %v443_v55, %v447_v56  ;;  %v11409_v7 = vcombine.low %v444_v57, %v448_v60  ;;  %v499_v55 = vld [vmem:[%s17806_s28 + $0xc40] sm:$0xff]  ;;  %v11458_v57 = vcombine.high %v492_v47, %v496_v49  ;;  %v504_v60 = vld [vmem:[%s17806_s28 + $0xc68] sm:$0xff] }
  0xd5   :  { %6499 = vmatprep.subr.bf16.mxu0 %v11360_v8  ;;  %6827 = vmatprep.subr.bf16.mxu1 %v11362_v13  ;;  %v11416_v8 = vcombine.high %v451_v1, %v455_v2  ;;  %v11418_v13 = vcombine.high %v452_v3, %v456_v5  ;;  %v503_v56 = vld [vmem:[%s17806_s28 + $0xc60] sm:$0xff] }
  0xd8   :  { %6500 = vmatpush1.bf16.msra.mxu0 %v11359_v15  ;;  %6828 = vmatpush1.bf16.msra.mxu1 %v11361_v16  ;;  %v11415_v15 = vcombine.low %v451_v1, %v455_v2  ;;  %v11417_v16 = vcombine.low %v452_v3, %v456_v5  ;;  %v11464_v1 = vcombine.high %v499_v55, %v503_v56  ;;  %v507_v2 = vld [vmem:[%s17806_s28 + $0xc80] sm:$0xff]  ;;  %v512_v5 = vld [vmem:[%s17806_s28 + $0xca8] sm:$0xff] }
  0xd9   :  { %6501 = vmatprep.subr.bf16.mxu0 %v11368_v17  ;;  %6829 = vmatprep.subr.bf16.mxu1 %v11370_v21  ;;  %v11424_v17 = vcombine.high %v459_v10, %v463_v11  ;;  %v11426_v21 = vcombine.high %v460_v12, %v464_v14  ;;  %v511_v3 = vld [vmem:[%s17806_s28 + $0xca0] sm:$0xff] }
  0xdc   :  { %6502 = vmatpush1.bf16.msra.mxu0 %v11367_v24  ;;  %6830 = vmatpush1.bf16.msra.mxu1 %v11369_v25  ;;  %v11423_v24 = vcombine.low %v459_v10, %v463_v11  ;;  %v11425_v25 = vcombine.low %v460_v12, %v464_v14  ;;  %v11472_v10 = vcombine.high %v507_v2, %v511_v3  ;;  %v515_v11 = vld [vmem:[%s17806_s28 + $0xcc0] sm:$0xff] }
  0xdd   :  { %6503 = vmatprep.subr.bf16.mxu0 %v11376_v26  ;;  %6831 = vmatprep.subr.bf16.mxu1 %v11378_v29  ;;  %v11432_v26 = vcombine.high %v467_v18, %v471_v19  ;;  %v11434_v29 = vcombine.high %v468_v20, %v472_v22  ;;  %v519_v12 = vld [vmem:[%s17806_s28 + $0xce0] sm:$0xff] }
  0xe0   :  { %6504 = vmatpush1.bf16.msra.mxu0 %v11375_v31  ;;  %6832 = vmatpush1.bf16.msra.mxu1 %v11377_v32  ;;  %v11431_v31 = vcombine.low %v467_v18, %v471_v19  ;;  %v11433_v32 = vcombine.low %v468_v20, %v472_v22  ;;  %v11480_v18 = vcombine.high %v515_v11, %v519_v12  ;;  %v523_v19 = vld [vmem:[%s17806_s28 + $0xd00] sm:$0xff] }
  0xe1   :  { %6505 = vmatprep.subr.bf16.mxu0 %v11384_v34  ;;  %6833 = vmatprep.subr.bf16.mxu1 %v11386_v38  ;;  %v11440_v34 = vcombine.high %v475_v27, %v479_v28  ;;  %v11442_v38 = vcombine.high %v476_v59, %v480_v30  ;;  %v527_v20 = vld [vmem:[%s17806_s28 + $0xd20] sm:$0xff] }
  0xe4   :  { %6506 = vmatpush1.bf16.msra.mxu0 %v11383_v41  ;;  %6834 = vmatpush1.bf16.msra.mxu1 %v11385_v42  ;;  %v11439_v41 = vcombine.low %v475_v27, %v479_v28  ;;  %v11441_v42 = vcombine.low %v476_v59, %v480_v30  ;;  %v11488_v27 = vcombine.high %v523_v19, %v527_v20  ;;  %v531_v28 = vld [vmem:[%s17806_s28 + $0xd40] sm:$0xff] }
  0xe5   :  { %6507 = vmatprep.subr.bf16.mxu0 %v11392_v44  ;;  %6835 = vmatprep.subr.bf16.mxu1 %v11394_v48  ;;  %v11448_v44 = vcombine.high %v483_v35, %v487_v36  ;;  %v11450_v48 = vcombine.high %v484_v37, %v488_v39  ;;  %v535_v59 = vld [vmem:[%s17806_s28 + $0xd60] sm:$0xff] }
  0xe8   :  { %6508 = vmatpush1.bf16.msra.mxu0 %v11391_v51  ;;  %6836 = vmatpush1.bf16.msra.mxu1 %v11393_v52  ;;  %v11447_v51 = vcombine.low %v483_v35, %v487_v36  ;;  %v11449_v52 = vcombine.low %v484_v37, %v488_v39  ;;  %v11496_v35 = vcombine.high %v531_v28, %v535_v59  ;;  %v539_v36 = vld [vmem:[%s17806_s28 + $0xd80] sm:$0xff] }
  0xe9   :  { %6509 = vmatprep.subr.bf16.mxu0 %v11400_v54  ;;  %6837 = vmatprep.subr.bf16.mxu1 %v11402_v58  ;;  %v11456_v54 = vcombine.high %v491_v45, %v495_v46  ;;  %v500_v58 = vld [vmem:[%s17806_s28 + $0xc48] sm:$0xff]  ;;  %v543_v37 = vld [vmem:[%s17806_s28 + $0xda0] sm:$0xff] }
  0xec   :  { %6510 = vmatpush1.bf16.msra.mxu0 %v11399_v61  ;;  %6838 = vmatpush1.bf16.msra.mxu1 %v11401_v62  ;;  %v14236_v61 = vrot.slane %v14015_v63, %v13664_v53  ;;  %v11455_v62 = vcombine.low %v491_v45, %v495_v46  ;;  %v11466_v63 = vcombine.high %v500_v58, %v504_v60  ;;  %v547_v46 = vld [vmem:[%s17806_s28 + $0xdc0] sm:$0xff] }
  0xed   :  { %6511 = vmatprep.subr.bf16.mxu0 %v11408_v0  ;;  %6839 = vmatprep.subr.bf16.mxu1 %v11410_v4  ;;  %v11457_v0 = vcombine.low %v492_v47, %v496_v49  ;;  %v508_v4 = vld [vmem:[%s17806_s28 + $0xc88] sm:$0xff]  ;;  %v11504_v45 = vcombine.high %v539_v36, %v543_v37  ;;  %v551_v47 = vld [vmem:[%s17806_s28 + $0xde0] sm:$0xff] }
  0xee   :  { %v11474_v14 = vcombine.high %v508_v4, %v512_v5 }
  0xf0   :  { %6512 = vmatpush1.bf16.msra.mxu0 %v11407_v6  ;;  %6840 = vmatpush1.bf16.msra.mxu1 %v11409_v7  ;;  %v14252_v6 = vcombine.high %v14048_v50, %v14048_v50  ;;  %v11463_v7 = vcombine.low %v499_v55, %v503_v56  ;;  %v11512_v55 = vcombine.high %v547_v46, %v551_v47  ;;  %v555_v56 = vld [vmem:[%s17806_s28 + $0xe00] sm:$0xff] }
  0xf1   :  { %6513 = vmatprep.subr.bf16.mxu0 %v11416_v8  ;;  %6841 = vmatprep.subr.bf16.mxu1 %v11418_v13  ;;  %v11465_v8 = vcombine.low %v500_v58, %v504_v60  ;;  %v516_v13 = vld [vmem:[%s17806_s28 + $0xcc8] sm:$0xff] }
  0xf2   :  { %v556_v58 = vld [vmem:[%s17806_s28 + $0xe08] sm:$0xff] }
  0xf4   :  { %6514 = vmatpush1.bf16.msra.mxu0 %v11415_v15  ;;  %6842 = vmatpush1.bf16.msra.mxu1 %v11417_v16  ;;  %v520_v15 = vld [vmem:[%s17806_s28 + $0xce8] sm:$0xff]  ;;  %v11471_v16 = vcombine.low %v507_v2, %v511_v3  ;;  %v563_v3 = vld [vmem:[%s17806_s28 + $0xe40] sm:$0xff] }
  0xf5   :  { %6515 = vmatprep.subr.bf16.mxu0 %v11424_v17  ;;  %6843 = vmatprep.subr.bf16.mxu1 %v11426_v21  ;;  %v11473_v17 = vcombine.low %v508_v4, %v512_v5  ;;  %v524_v21 = vld [vmem:[%s17806_s28 + $0xd08] sm:$0xff]  ;;  %v11482_v22 = vcombine.high %v516_v13, %v520_v15  ;;  %v567_v4 = vld [vmem:[%s17806_s28 + $0xe60] sm:$0xff] }
  0xf8   :  { %6516 = vmatpush1.bf16.msra.mxu0 %v11423_v24  ;;  %6844 = vmatpush1.bf16.msra.mxu1 %v11425_v25  ;;  %v528_v24 = vld [vmem:[%s17806_s28 + $0xd28] sm:$0xff]  ;;  %v11479_v25 = vcombine.low %v515_v11, %v519_v12  ;;  %v11528_v11 = vcombine.high %v563_v3, %v567_v4  ;;  %v571_v12 = vld [vmem:[%s17806_s28 + $0xe80] sm:$0xff] }
  0xf9   :  { %6517 = vmatprep.subr.bf16.mxu0 %v11432_v26  ;;  %6845 = vmatprep.subr.bf16.mxu1 %v11434_v29  ;;  %v11481_v26 = vcombine.low %v516_v13, %v520_v15  ;;  %v532_v29 = vld [vmem:[%s17806_s28 + $0xd48] sm:$0xff]  ;;  %v11490_v30 = vcombine.high %v524_v21, %v528_v24  ;;  %v575_v13 = vld [vmem:[%s17806_s28 + $0xea0] sm:$0xff] }
  0xfc   :  { %6518 = vmatpush1.bf16.msra.mxu0 %v11431_v31  ;;  %6846 = vmatpush1.bf16.msra.mxu1 %v11433_v32  ;;  %v536_v31 = vld [vmem:[%s17806_s28 + $0xd68] sm:$0xff]  ;;  %v11487_v32 = vcombine.low %v523_v19, %v527_v20  ;;  %v11536_v19 = vcombine.high %v571_v12, %v575_v13  ;;  %v579_v20 = vld [vmem:[%s17806_s28 + $0xec0] sm:$0xff] }
  0xfd   :  { %6519 = vmatprep.subr.bf16.mxu0 %v11440_v34  ;;  %6847 = vmatprep.subr.bf16.mxu1 %v11442_v38  ;;  %v11489_v34 = vcombine.low %v524_v21, %v528_v24  ;;  %v540_v38 = vld [vmem:[%s17806_s28 + $0xd88] sm:$0xff]  ;;  %v11498_v39 = vcombine.high %v532_v29, %v536_v31  ;;  %v583_v21 = vld [vmem:[%s17806_s28 + $0xee0] sm:$0xff] }
 0x100   :  { %6520 = vmatpush1.bf16.msra.mxu0 %v11439_v41  ;;  %6848 = vmatpush1.bf16.msra.mxu1 %v11441_v42  ;;  %v544_v41 = vld [vmem:[%s17806_s28 + $0xda8] sm:$0xff]  ;;  %v11495_v42 = vcombine.low %v531_v28, %v535_v59  ;;  %v11544_v28 = vcombine.high %v579_v20, %v583_v21  ;;  %v587_v59 = vld [vmem:[%s17806_s28 + $0xf00] sm:$0xff] }
 0x101   :  { %6521 = vmatprep.subr.bf16.mxu0 %v11448_v44  ;;  %6849 = vmatprep.subr.bf16.mxu1 %v11450_v48  ;;  %v11497_v44 = vcombine.low %v532_v29, %v536_v31  ;;  %v548_v48 = vld [vmem:[%s17806_s28 + $0xdc8] sm:$0xff]  ;;  %v11506_v49 = vcombine.high %v540_v38, %v544_v41  ;;  %v591_v29 = vld [vmem:[%s17806_s28 + $0xf20] sm:$0xff] }
 0x104   :  { %6522 = vmatpush1.bf16.msra.mxu0 %v11447_v51  ;;  %6850 = vmatpush1.bf16.msra.mxu1 %v11449_v52  ;;  %v552_v51 = vld [vmem:[%s17806_s28 + $0xde8] sm:$0xff]  ;;  %v11503_v52 = vcombine.low %v539_v36, %v543_v37  ;;  %v11552_v36 = vcombine.high %v587_v59, %v591_v29  ;;  %v595_v37 = vld [vmem:[%s17806_s28 + $0xf40] sm:$0xff] }
 0x105   :  { %6532 = vmatprep.subr.bf16.mxu0 %v11456_v54  ;;  %6860 = vmatprep.subr.bf16.mxu1 %v11458_v57  ;;  %v11505_v54 = vcombine.low %v540_v38, %v544_v41  ;;  %v559_v57 = vld [vmem:[%s17806_s28 + $0xe20] sm:$0xff]  ;;  %v11514_v60 = vcombine.high %v548_v48, %v552_v51 }
 0x106   :  { %v11520_v2 = vcombine.high %v555_v56, %v559_v57  ;;  %v599_v38 = vld [vmem:[%s17806_s28 + $0xf60] sm:$0xff] }
 0x107   :  { %6524 = vmatmul.mubr.bf16.vlgmr.msra.gmra.mrb[0].mxu0 %v14236_v61  ;;  %6852 = vmatmul.mubr.bf16.vlgmr.msra.gmra.mrb[0].mxu1 %v14236_v61 }
 0x108   :  { %6533 = vmatpush1.bf16.msra.mxu0 %v11455_v62  ;;  %6861 = vmatpush1.bf16.msra.mxu1 %v11457_v0  ;;  %v560_v62 = vld [vmem:[%s17806_s28 + $0xe28] sm:$0xff]  ;;  %v11511_v0 = vcombine.low %v547_v46, %v551_v47  ;;  %v11560_v46 = vcombine.high %v595_v37, %v599_v38  ;;  %v603_v47 = vld [vmem:[%s17806_s28 + $0xf80] sm:$0xff] }
 0x109   :  { %6534 = vmatprep.subr.bf16.mxu0 %v11464_v1  ;;  %6862 = vmatprep.subr.bf16.mxu1 %v11466_v63  ;;  %v11513_v1 = vcombine.low %v548_v48, %v552_v51  ;;  %v564_v63 = vld [vmem:[%s17806_s28 + $0xe48] sm:$0xff]  ;;  %v11522_v5 = vcombine.high %v556_v58, %v560_v62  ;;  %v607_v48 = vld [vmem:[%s17806_s28 + $0xfa0] sm:$0xff] }
 0x10a   :  { %6564 = vmatprep.mubr.bf16.mxu0 %v14252_v6  ;;  %6892 = vmatprep.mubr.bf16.mxu1 %v14252_v6 }
 0x10c   :  { %6535 = vmatpush1.bf16.msra.mxu0 %v11463_v7  ;;  %6863 = vmatpush1.bf16.msra.mxu1 %v11465_v8  ;;  %v568_v7 = vld [vmem:[%s17806_s28 + $0xe68] sm:$0xff]  ;;  %v11519_v8 = vcombine.low %v555_v56, %v559_v57  ;;  %v11568_v57 = vcombine.high %v603_v47, %v607_v48 }
 0x10d   :  { %6536 = vmatprep.subr.bf16.mxu0 %v11472_v10  ;;  %6864 = vmatprep.subr.bf16.mxu1 %v11474_v14  ;;  %v11521_v10 = vcombine.low %v556_v58, %v560_v62  ;;  %v572_v14 = vld [vmem:[%s17806_s28 + $0xe88] sm:$0xff]  ;;  %v11530_v15 = vcombine.high %v564_v63, %v568_v7  ;;  %v615_v58 = vld [vmem:[%s17806_s28 + $0xfe0] sm:$0xff] }
 0x10e   :  { %v616_v62 = vld [vmem:[%s17806_s28 + $0xfe8] sm:$0xff] }
 0x110   :  { %6537 = vmatpush1.bf16.msra.mxu0 %v11471_v16  ;;  %6865 = vmatpush1.bf16.msra.mxu1 %v11473_v17  ;;  %v576_v16 = vld [vmem:[%s17806_s28 + $0xea8] sm:$0xff]  ;;  %v11527_v17 = vcombine.low %v563_v3, %v567_v4 }
 0x111   :  { %6538 = vmatprep.subr.bf16.mxu0 %v11480_v18  ;;  %6866 = vmatprep.subr.bf16.mxu1 %v11482_v22  ;;  %v11529_v18 = vcombine.low %v564_v63, %v568_v7  ;;  %v580_v22 = vld [vmem:[%s17806_s28 + $0xec8] sm:$0xff]  ;;  %v11538_v24 = vcombine.high %v572_v14, %v576_v16  ;;  %v619_v63 = vld [vmem:[%s17806_s28 + $0x1000] sm:$0xff] }
 0x112   :  { %v620_v7 = vld [vmem:[%s17806_s28 + $0x1008] sm:$0xff] }
 0x114   :  { %6539 = vmatpush1.bf16.msra.mxu0 %v11479_v25  ;;  %6867 = vmatpush1.bf16.msra.mxu1 %v11481_v26  ;;  %v584_v25 = vld [vmem:[%s17806_s28 + $0xee8] sm:$0xff]  ;;  %v11535_v26 = vcombine.low %v571_v12, %v575_v13 }
 0x115   :  { %6540 = vmatprep.subr.bf16.mxu0 %v11488_v27  ;;  %6868 = vmatprep.subr.bf16.mxu1 %v11490_v30  ;;  %v11537_v27 = vcombine.low %v572_v14, %v576_v16  ;;  %v588_v30 = vld [vmem:[%s17806_s28 + $0xf08] sm:$0xff]  ;;  %v11546_v31 = vcombine.high %v580_v22, %v584_v25  ;;  %v631_v16 = vld [vmem:[%s17806_s28 + $0x1060] sm:$0xff] }
 0x118   :  { %6541 = vmatpush1.bf16.msra.mxu0 %v11487_v32  ;;  %6869 = vmatpush1.bf16.msra.mxu1 %v11489_v34  ;;  %v592_v32 = vld [vmem:[%s17806_s28 + $0xf28] sm:$0xff]  ;;  %v11543_v34 = vcombine.low %v579_v20, %v583_v21  ;;  %v14451_v21 = vcombine.high %v14236_v61, %v14236_v61 }
 0x119   :  { %6542 = vmatprep.subr.bf16.mxu0 %v11496_v35  ;;  %6870 = vmatprep.subr.bf16.mxu1 %v11498_v39  ;;  %v11545_v35 = vcombine.low %v580_v22, %v584_v25  ;;  %v596_v39 = vld [vmem:[%s17806_s28 + $0xf48] sm:$0xff]  ;;  %v11554_v41 = vcombine.high %v588_v30, %v592_v32 }
 0x11c   :  { %6543 = vmatpush1.bf16.msra.mxu0 %v11495_v42  ;;  %6871 = vmatpush1.bf16.msra.mxu1 %v11497_v44  ;;  %v600_v42 = vld [vmem:[%s17806_s28 + $0xf68] sm:$0xff]  ;;  %v11551_v44 = vcombine.low %v587_v59, %v591_v29 }
 0x11d   :  { %6544 = vmatprep.subr.bf16.mxu0 %v11504_v45  ;;  %6872 = vmatprep.subr.bf16.mxu1 %v11506_v49  ;;  %v11553_v45 = vcombine.low %v588_v30, %v592_v32  ;;  %v604_v49 = vld [vmem:[%s17806_s28 + $0xf88] sm:$0xff]  ;;  %v11562_v51 = vcombine.high %v596_v39, %v600_v42  ;;  %v11561_v56 = vcombine.low %v596_v39, %v600_v42 }
 0x11e   :  { %v640_v29 = vld [vmem:[%s17806_s28 + $0x10a8] sm:$0xff] }
 0x11f   :  { %v648_v39 = vld [vmem:[%s17806_s28 + $0x10e8] sm:$0xff] }
 0x120   :  { %6545 = vmatpush1.bf16.msra.mxu0 %v11503_v52  ;;  %6873 = vmatpush1.bf16.msra.mxu1 %v11505_v54  ;;  %v608_v52 = vld [vmem:[%s17806_s28 + $0xfa8] sm:$0xff]  ;;  %v11559_v54 = vcombine.low %v595_v37, %v599_v38 }
 0x121   :  { %6546 = vmatprep.subr.bf16.mxu0 %v11512_v55  ;;  %6874 = vmatprep.subr.bf16.mxu1 %v11514_v60  ;;  %v611_v55 = vld [vmem:[%s17806_s28 + $0xfc0] sm:$0xff]  ;;  %v612_v60 = vld [vmem:[%s17806_s28 + $0xfc8] sm:$0xff]  ;;  %v11569_v3 = vcombine.low %v604_v49, %v608_v52 }
 0x122   :  { %v11576_v4 = vcombine.high %v611_v55, %v615_v58  ;;  %v11575_v12 = vcombine.low %v611_v55, %v615_v58  ;;  %v11577_v13 = vcombine.low %v612_v60, %v616_v62  ;;  %v644_v37 = vld [vmem:[%s17806_s28 + $0x10c8] sm:$0xff]  ;;  %v659_v55 = vld [vmem:[%s17806_s28 + $0x1140] sm:$0xff] }
 0x124   :  { %6547 = vmatpush1.bf16.msra.mxu0 %v11511_v0  ;;  %6875 = vmatpush1.bf16.msra.mxu1 %v11513_v1  ;;  %v11570_v0 = vcombine.high %v604_v49, %v608_v52  ;;  %v14417_v1 = vld [vmem:[%s17807_s2 + $0x8] sm:$0xff]  ;;  %v11609_v52 = vcombine.low %v644_v37, %v648_v39 }
 0x125   :  { %6548 = vmatprep.subr.bf16.mxu0 %v11520_v2  ;;  %6876 = vmatprep.subr.bf16.mxu1 %v11522_v5  ;;  %v11567_v2 = vcombine.low %v603_v47, %v607_v48  ;;  %v623_v5 = vld [vmem:[%s17806_s28 + $0x1020] sm:$0xff]  ;;  %v652_v47 = vld [vmem:[%s17806_s28 + $0x1108] sm:$0xff]  ;;  %v11610_v48 = vcombine.high %v644_v37, %v648_v39 }
 0x126   :  { %v11584_v14 = vcombine.high %v619_v63, %v623_v5  ;;  %v11583_v22 = vcombine.low %v619_v63, %v623_v5  ;;  %v656_v49 = vld [vmem:[%s17806_s28 + $0x1128] sm:$0xff] }
 0x127   :  { %v11618_v58 = vcombine.high %v652_v47, %v656_v49  ;;  %v668_v63 = vld [vmem:[%s17806_s28 + $0x1188] sm:$0xff] }
 0x128   :  { %6549 = vmatpush1.bf16.msra.mxu0 %v11519_v8  ;;  %6877 = vmatpush1.bf16.msra.mxu1 %v11521_v10  ;;  %v11578_v8 = vcombine.high %v612_v60, %v616_v62  ;;  %v624_v10 = vld [vmem:[%s17806_s28 + $0x1028] sm:$0xff] }
 0x129   :  { %6550 = vmatprep.subr.bf16.mxu0 %v11528_v11  ;;  %6878 = vmatprep.subr.bf16.mxu1 %v11530_v15  ;;  %v14433_v11 = vrot.slane %v14417_v1, %v13664_v53  ;;  %v627_v15 = vld [vmem:[%s17806_s28 + $0x1040] sm:$0xff]  ;;  %v664_v60 = vld [vmem:[%s17806_s28 + $0x1168] sm:$0xff] }
 0x12a   :  { %v11592_v25 = vcombine.high %v627_v15, %v631_v16 }
 0x12b   :  { %v1239_v20 = vcombine.high %v14433_v11, %v14433_v11 }
 0x12c   :  { %6551 = vmatpush1.bf16.msra.mxu0 %v11527_v17  ;;  %6879 = vmatpush1.bf16.msra.mxu1 %v11529_v18  ;;  %v628_v17 = vld [vmem:[%s17806_s28 + $0x1048] sm:$0xff]  ;;  %v11586_v18 = vcombine.high %v620_v7, %v624_v10 }
 0x12d   :  { %6552 = vmatprep.subr.bf16.mxu0 %v11536_v19  ;;  %6880 = vmatprep.subr.bf16.mxu1 %v11538_v24  ;;  %v632_v19 = vld [vmem:[%s17806_s28 + $0x1068] sm:$0xff]  ;;  %v11585_v24 = vcombine.low %v620_v7, %v624_v10  ;;  %v14466_v30 = vrot.slane %v1239_v20, %v13664_v53 }
 0x12e   :  { %v11594_v59 = vcombine.high %v628_v17, %v632_v19  ;;  %v11593_v32 = vcombine.low %v628_v17, %v632_v19  ;;  %v672_v7 = vld [vmem:[%s17806_s28 + $0x11a8] sm:$0xff] }
 0x12f   :  { %v680_v17 = vld [vmem:[%s17806_s28 + $0x11e8] sm:$0xff]  ;;  %v11633_v19 = vcombine.low %v668_v63, %v672_v7 }
 0x130   :  { %6553 = vmatpush1.bf16.msra.mxu0 %v11535_v26  ;;  %6881 = vmatpush1.bf16.msra.mxu1 %v11537_v27  ;;  %v635_v26 = vld [vmem:[%s17806_s28 + $0x1080] sm:$0xff] }
 0x131   :  { %6554 = vmatprep.subr.bf16.mxu0 %v11544_v28  ;;  %6882 = vmatprep.subr.bf16.mxu1 %v11546_v31  ;;  %v639_v27 = vld [vmem:[%s17806_s28 + $0x10a0] sm:$0xff]  ;;  %v636_v28 = vld [vmem:[%s17806_s28 + $0x1088] sm:$0xff]  ;;  %v11591_v31 = vcombine.low %v627_v15, %v631_v16  ;;  %v11634_v16 = vcombine.high %v668_v63, %v672_v7 }
 0x132   :  { %v11602_v38 = vcombine.high %v636_v28, %v640_v29  ;;  %v11601_v42 = vcombine.low %v636_v28, %v640_v29  ;;  %v676_v15 = vld [vmem:[%s17806_s28 + $0x11c8] sm:$0xff] }
 0x134   :  { %6555 = vmatpush1.bf16.msra.mxu0 %v11543_v34  ;;  %6883 = vmatpush1.bf16.msra.mxu1 %v11545_v35  ;;  %v11600_v34 = vcombine.high %v635_v26, %v639_v27  ;;  %v643_v35 = vld [vmem:[%s17806_s28 + $0x10c0] sm:$0xff] }
 0x135   :  { %6556 = vmatprep.subr.bf16.mxu0 %v11552_v36  ;;  %6884 = vmatprep.subr.bf16.mxu1 %v11554_v41  ;;  %v647_v36 = vld [vmem:[%s17806_s28 + $0x10e0] sm:$0xff]  ;;  %v11599_v41 = vcombine.low %v635_v26, %v639_v27  ;;  %v684_v26 = vld [vmem:[%s17806_s28 + $0x1208] sm:$0xff] }
 0x136   :  { %v688_v27 = vld [vmem:[%s17806_s28 + $0x1228] sm:$0xff] }
 0x138   :  { %6557 = vmatpush1.bf16.msra.mxu0 %v11551_v44  ;;  %6885 = vmatpush1.bf16.msra.mxu1 %v11553_v45  ;;  %v11608_v44 = vcombine.high %v643_v35, %v647_v36  ;;  %v651_v45 = vld [vmem:[%s17806_s28 + $0x1100] sm:$0xff] }
 0x139   :  { %6558 = vmatprep.subr.bf16.mxu0 %v11560_v46  ;;  %6886 = vmatprep.subr.bf16.mxu1 %v11562_v51  ;;  %v655_v46 = vld [vmem:[%s17806_s28 + $0x1120] sm:$0xff]  ;;  %v11607_v51 = vcombine.low %v643_v35, %v647_v36  ;;  %v692_v35 = vld [vmem:[%s17806_s28 + $0x1248] sm:$0xff] }
 0x13a   :  { %v11615_v62 = vcombine.low %v651_v45, %v655_v46  ;;  %v696_v36 = vld [vmem:[%s17806_s28 + $0x1268] sm:$0xff] }
 0x13c   :  { %6559 = vmatpush1.bf16.msra.mxu0 %v11559_v54  ;;  %6887 = vmatpush1.bf16.msra.mxu1 %v11561_v56  ;;  %v11616_v54 = vcombine.high %v651_v45, %v655_v46  ;;  %v663_v56 = vld [vmem:[%s17806_s28 + $0x1160] sm:$0xff]  ;;  %v700_v45 = vld [vmem:[%s17806_s28 + $0x1288] sm:$0xff] }
 0x13d   :  { %6560 = vmatprep.subr.bf16.mxu0 %v11568_v57  ;;  %6888 = vmatprep.subr.bf16.mxu1 %v11570_v0  ;;  %v660_v57 = vld [vmem:[%s17806_s28 + $0x1148] sm:$0xff]  ;;  %v11617_v0 = vcombine.low %v652_v47, %v656_v49 }
 0x13e   :  { %v11626_v5 = vcombine.high %v660_v57, %v664_v60  ;;  %v11625_v10 = vcombine.low %v660_v57, %v664_v60  ;;  %v704_v46 = vld [vmem:[%s17806_s28 + $0x12a8] sm:$0xff] }
 0x140   :  { %6561 = vmatpush1.bf16.msra.mxu0 %v11567_v2  ;;  %6889 = vmatpush1.bf16.msra.mxu1 %v11569_v3  ;;  %v11624_v2 = vcombine.high %v659_v55, %v663_v56  ;;  %v667_v3 = vld [vmem:[%s17806_s28 + $0x1180] sm:$0xff] }
 0x141   :  { %6562 = vmatprep.subr.bf16.mxu0 %v11576_v4  ;;  %6890 = vmatprep.subr.bf16.mxu1 %v11578_v8  ;;  %v671_v4 = vld [vmem:[%s17806_s28 + $0x11a0] sm:$0xff]  ;;  %v11623_v8 = vcombine.low %v659_v55, %v663_v56  ;;  %v708_v55 = vld [vmem:[%s17806_s28 + $0x12c8] sm:$0xff] }
 0x142   :  { %v712_v56 = vld [vmem:[%s17806_s28 + $0x12e8] sm:$0xff] }
 0x144   :  { %6563 = vmatpush1.bf16.msra.mxu0 %v11575_v12  ;;  %6891 = vmatpush1.bf16.msra.mxu1 %v11577_v13  ;;  %v11632_v12 = vcombine.high %v667_v3, %v671_v4  ;;  %v675_v13 = vld [vmem:[%s17806_s28 + $0x11c0] sm:$0xff] }
 0x145   :  { %6573 = vmatprep.subr.bf16.mxu0 %v11584_v14  ;;  %6901 = vmatprep.subr.bf16.mxu1 %v11586_v18  ;;  %v679_v14 = vld [vmem:[%s17806_s28 + $0x11e0] sm:$0xff]  ;;  %v11631_v18 = vcombine.low %v667_v3, %v671_v4  ;;  %v716_v3 = vld [vmem:[%s17806_s28 + $0x1308] sm:$0xff] }
 0x146   :  { %v11640_v20 = vcombine.high %v675_v13, %v679_v14  ;;  %v11639_v28 = vcombine.low %v675_v13, %v679_v14  ;;  %v720_v4 = vld [vmem:[%s17806_s28 + $0x1328] sm:$0xff] }
 0x147   :  { %6565 = vmatmul.mubr.bf16.vlgmr.msra.gmra.mrb[0].mxu0 %v14451_v21  ;;  %6893 = vmatmul.mubr.bf16.vlgmr.msra.gmra.mrb[0].mxu1 %v14451_v21  ;;  %v724_v13 = vld [vmem:[%s17806_s28 + $0x1348] sm:$0xff] }
 0x148   :  { %6574 = vmatpush1.bf16.msra.mxu0 %v11583_v22  ;;  %6902 = vmatpush1.bf16.msra.mxu1 %v11585_v24  ;;  %v11642_v22 = vcombine.high %v676_v15, %v680_v17  ;;  %v683_v24 = vld [vmem:[%s17806_s28 + $0x1200] sm:$0xff]  ;;  %v728_v14 = vld [vmem:[%s17806_s28 + $0x1368] sm:$0xff] }
 0x149   :  { %6575 = vmatprep.subr.bf16.mxu0 %v11592_v25  ;;  %6903 = vmatprep.subr.bf16.mxu1 %v11594_v59  ;;  %v687_v25 = vld [vmem:[%s17806_s28 + $0x1220] sm:$0xff]  ;;  %v11641_v59 = vcombine.low %v676_v15, %v680_v17 }
 0x14a   :  { %6605 = vmatprep.mubr.bf16.mxu0 %v14466_v30  ;;  %6933 = vmatprep.mubr.bf16.mxu1 %v14466_v30  ;;  %v11648_v29 = vcombine.high %v683_v24, %v687_v25  ;;  %v11647_v37 = vcombine.low %v683_v24, %v687_v25  ;;  %v736_v24 = vld [vmem:[%s17806_s28 + $0x13a8] sm:$0xff] }
 0x14c   :  { %6576 = vmatpush1.bf16.msra.mxu0 %v11591_v31  ;;  %6904 = vmatpush1.bf16.msra.mxu1 %v11593_v32  ;;  %v11650_v31 = vcombine.high %v684_v26, %v688_v27  ;;  %v691_v32 = vld [vmem:[%s17806_s28 + $0x1240] sm:$0xff] }
 0x14d   :  { %6577 = vmatprep.subr.bf16.mxu0 %v11600_v34  ;;  %6905 = vmatprep.subr.bf16.mxu1 %v11602_v38  ;;  %v695_v34 = vld [vmem:[%s17806_s28 + $0x1260] sm:$0xff]  ;;  %v11649_v38 = vcombine.low %v684_v26, %v688_v27  ;;  %v11689_v26 = vcombine.low %v724_v13, %v728_v14 }
 0x14e   :  { %v11656_v39 = vcombine.high %v691_v32, %v695_v34  ;;  %v11655_v47 = vcombine.low %v691_v32, %v695_v34  ;;  %v744_v32 = vld [vmem:[%s17806_s28 + $0x13e8] sm:$0xff] }
 0x150   :  { %6578 = vmatpush1.bf16.msra.mxu0 %v11599_v41  ;;  %6906 = vmatpush1.bf16.msra.mxu1 %v11601_v42  ;;  %v11658_v41 = vcombine.high %v692_v35, %v696_v36  ;;  %v699_v42 = vld [vmem:[%s17806_s28 + $0x1280] sm:$0xff] }
 0x151   :  { %6579 = vmatprep.subr.bf16.mxu0 %v11608_v44  ;;  %6907 = vmatprep.subr.bf16.mxu1 %v11610_v48  ;;  %v703_v44 = vld [vmem:[%s17806_s28 + $0x12a0] sm:$0xff]  ;;  %v11657_v48 = vcombine.low %v692_v35, %v696_v36 }
 0x152   :  { %v11664_v49 = vcombine.high %v699_v42, %v703_v44  ;;  %v11663_v57 = vcombine.low %v699_v42, %v703_v44  ;;  %v752_v42 = vld [vmem:[%s17806_s28 + $0x1428] sm:$0xff] }
 0x154   :  { %6580 = vmatpush1.bf16.msra.mxu0 %v11607_v51  ;;  %6908 = vmatpush1.bf16.msra.mxu1 %v11609_v52  ;;  %v11666_v51 = vcombine.high %v700_v45, %v704_v46  ;;  %v707_v52 = vld [vmem:[%s17806_s28 + $0x12c0] sm:$0xff] }
 0x155   :  { %6581 = vmatprep.subr.bf16.mxu0 %v11616_v54  ;;  %6909 = vmatprep.subr.bf16.mxu1 %v11618_v58  ;;  %v711_v54 = vld [vmem:[%s17806_s28 + $0x12e0] sm:$0xff]  ;;  %v11665_v58 = vcombine.low %v700_v45, %v704_v46 }
 0x156   :  { %v11672_v60 = vcombine.high %v707_v52, %v711_v54  ;;  %v11671_v63 = vcombine.low %v707_v52, %v711_v54  ;;  %v756_v52 = vld [vmem:[%s17806_s28 + $0x1448] sm:$0xff] }
 0x157   :  { %v760_v54 = vld [vmem:[%s17806_s28 + $0x1468] sm:$0xff] }
 0x158   :  { %6582 = vmatpush1.bf16.msra.mxu0 %v11615_v62  ;;  %6910 = vmatpush1.bf16.msra.mxu1 %v11617_v0  ;;  %v11674_v62 = vcombine.high %v708_v55, %v712_v56  ;;  %v715_v0 = vld [vmem:[%s17806_s28 + $0x1300] sm:$0xff] }
 0x159   :  { %6583 = vmatprep.subr.bf16.mxu0 %v11624_v2  ;;  %6911 = vmatprep.subr.bf16.mxu1 %v11626_v5  ;;  %v719_v2 = vld [vmem:[%s17806_s28 + $0x1320] sm:$0xff]  ;;  %v11673_v5 = vcombine.low %v708_v55, %v712_v56 }
 0x15a   :  { %v11680_v7 = vcombine.high %v715_v0, %v719_v2  ;;  %v11679_v15 = vcombine.low %v715_v0, %v719_v2  ;;  %v764_v0 = vld [vmem:[%s17806_s28 + $0x1488] sm:$0xff] }
 0x15b   :  { %v768_v2 = vld [vmem:[%s17806_s28 + $0x14a8] sm:$0xff] }
 0x15c   :  { %6584 = vmatpush1.bf16.msra.mxu0 %v11623_v8  ;;  %6912 = vmatpush1.bf16.msra.mxu1 %v11625_v10  ;;  %v11682_v8 = vcombine.high %v716_v3, %v720_v4  ;;  %v723_v10 = vld [vmem:[%s17806_s28 + $0x1340] sm:$0xff] }
 0x15d   :  { %6585 = vmatprep.subr.bf16.mxu0 %v11632_v12  ;;  %6913 = vmatprep.subr.bf16.mxu1 %v11634_v16  ;;  %v727_v12 = vld [vmem:[%s17806_s28 + $0x1360] sm:$0xff]  ;;  %v11681_v16 = vcombine.low %v716_v3, %v720_v4  ;;  %v11721_v4 = vcombine.low %v756_v52, %v760_v54 }
 0x15e   :  { %v11688_v17 = vcombine.high %v723_v10, %v727_v12  ;;  %v11687_v25 = vcombine.low %v723_v10, %v727_v12  ;;  %v772_v10 = vld [vmem:[%s17806_s28 + $0x14c8] sm:$0xff] }
 0x15f   :  { %v776_v12 = vld [vmem:[%s17806_s28 + $0x14e8] sm:$0xff] }
 0x160   :  { %6586 = vmatpush1.bf16.msra.mxu0 %v11631_v18  ;;  %6914 = vmatpush1.bf16.msra.mxu1 %v11633_v19  ;;  %v11690_v18 = vcombine.high %v724_v13, %v728_v14  ;;  %v731_v19 = vld [vmem:[%s17806_s28 + $0x1380] sm:$0xff]  ;;  %v11729_v14 = vcombine.low %v764_v0, %v768_v2 }
 0x161   :  { %6587 = vmatprep.subr.bf16.mxu0 %v11640_v20  ;;  %6915 = vmatprep.subr.bf16.mxu1 %v11642_v22  ;;  %v735_v20 = vld [vmem:[%s17806_s28 + $0x13a0] sm:$0xff]  ;;  %v732_v22 = vld [vmem:[%s17806_s28 + $0x1388] sm:$0xff] }
 0x162   :  { %v11696_v27 = vcombine.high %v731_v19, %v735_v20  ;;  %v11695_v34 = vcombine.low %v731_v19, %v735_v20  ;;  %v11697_v35 = vcombine.low %v732_v22, %v736_v24  ;;  %v780_v19 = vld [vmem:[%s17806_s28 + $0x1508] sm:$0xff] }
 0x163   :  { %v784_v20 = vld [vmem:[%s17806_s28 + $0x1528] sm:$0xff] }
 0x164   :  { %6588 = vmatpush1.bf16.msra.mxu0 %v11639_v28  ;;  %6916 = vmatpush1.bf16.msra.mxu1 %v11641_v59  ;;  %v11698_v28 = vcombine.high %v732_v22, %v736_v24  ;;  %v739_v59 = vld [vmem:[%s17806_s28 + $0x13c0] sm:$0xff]  ;;  %v11737_v24 = vcombine.low %v772_v10, %v776_v12 }
 0x165   :  { %6589 = vmatprep.subr.bf16.mxu0 %v11648_v29  ;;  %6917 = vmatprep.subr.bf16.mxu1 %v11650_v31  ;;  %v743_v29 = vld [vmem:[%s17806_s28 + $0x13e0] sm:$0xff]  ;;  %v740_v31 = vld [vmem:[%s17806_s28 + $0x13c8] sm:$0xff] }
 0x166   :  { %v11704_v36 = vcombine.high %v739_v59, %v743_v29  ;;  %v11703_v44 = vcombine.low %v739_v59, %v743_v29  ;;  %v11705_v45 = vcombine.low %v740_v31, %v744_v32  ;;  %v788_v59 = vld [vmem:[%s17806_s28 + $0x1548] sm:$0xff] }
 0x167   :  { %v792_v29 = vld [vmem:[%s17806_s28 + $0x1568] sm:$0xff] }
 0x168   :  { %6590 = vmatpush1.bf16.msra.mxu0 %v11647_v37  ;;  %6918 = vmatpush1.bf16.msra.mxu1 %v11649_v38  ;;  %v11706_v37 = vcombine.high %v740_v31, %v744_v32  ;;  %v747_v38 = vld [vmem:[%s17806_s28 + $0x1400] sm:$0xff]  ;;  %v11745_v32 = vcombine.low %v780_v19, %v784_v20 }
 0x169   :  { %6591 = vmatprep.subr.bf16.mxu0 %v11656_v39  ;;  %6919 = vmatprep.subr.bf16.mxu1 %v11658_v41  ;;  %v751_v39 = vld [vmem:[%s17806_s28 + $0x1420] sm:$0xff]  ;;  %v748_v41 = vld [vmem:[%s17806_s28 + $0x1408] sm:$0xff] }
 0x16a   :  { %v11712_v46 = vcombine.high %v747_v38, %v751_v39  ;;  %v11711_v55 = vcombine.low %v747_v38, %v751_v39  ;;  %v11713_v56 = vcombine.low %v748_v41, %v752_v42  ;;  %v796_v38 = vld [vmem:[%s17806_s28 + $0x1588] sm:$0xff] }
 0x16b   :  { %v800_v39 = vld [vmem:[%s17806_s28 + $0x15a8] sm:$0xff] }
 0x16c   :  { %6592 = vmatpush1.bf16.msra.mxu0 %v11655_v47  ;;  %6920 = vmatpush1.bf16.msra.mxu1 %v11657_v48  ;;  %v11714_v47 = vcombine.high %v748_v41, %v752_v42  ;;  %v755_v48 = vld [vmem:[%s17806_s28 + $0x1440] sm:$0xff]  ;;  %v11753_v42 = vcombine.low %v788_v59, %v792_v29 }
 0x16d   :  { %6593 = vmatprep.subr.bf16.mxu0 %v11664_v49  ;;  %6921 = vmatprep.subr.bf16.mxu1 %v11666_v51  ;;  %v759_v49 = vld [vmem:[%s17806_s28 + $0x1460] sm:$0xff]  ;;  %v14648_v51 = vrot.slane %v14433_v11, %v13664_v53 }
 0x16e   :  { %v763_v11 = vld [vmem:[%s17806_s28 + $0x1480] sm:$0xff]  ;;  %v11719_v3 = vcombine.low %v755_v48, %v759_v49 }
 0x170   :  { %6594 = vmatpush1.bf16.msra.mxu0 %v11663_v57  ;;  %6922 = vmatpush1.bf16.msra.mxu1 %v11665_v58  ;;  %v11720_v57 = vcombine.high %v755_v48, %v759_v49  ;;  %v11722_v58 = vcombine.high %v756_v52, %v760_v54  ;;  %v804_v48 = vld [vmem:[%s17806_s28 + $0x15c8] sm:$0xff]  ;;  %v11761_v54 = vcombine.low %v796_v38, %v800_v39 }
 0x171   :  { %6595 = vmatprep.subr.bf16.mxu0 %v11672_v60  ;;  %6923 = vmatprep.subr.bf16.mxu1 %v11674_v62  ;;  %v767_v60 = vld [vmem:[%s17806_s28 + $0x14a0] sm:$0xff]  ;;  %v14664_v62 = vcombine.high %v14466_v30, %v14466_v30  ;;  %v808_v49 = vld [vmem:[%s17806_s28 + $0x15e8] sm:$0xff] }
 0x172   :  { %v11727_v13 = vcombine.low %v763_v11, %v767_v60 }
 0x174   :  { %6596 = vmatpush1.bf16.msra.mxu0 %v11671_v63  ;;  %6924 = vmatpush1.bf16.msra.mxu1 %v11673_v5  ;;  %v11728_v63 = vcombine.high %v763_v11, %v767_v60  ;;  %v11730_v5 = vcombine.high %v764_v0, %v768_v2  ;;  %v812_v11 = vld [vmem:[%s17806_s28 + $0x1608] sm:$0xff]  ;;  %v11769_v2 = vcombine.low %v804_v48, %v808_v49 }
 0x175   :  { %6597 = vmatprep.subr.bf16.mxu0 %v11680_v7  ;;  %6925 = vmatprep.subr.bf16.mxu1 %v11682_v8  ;;  %v771_v7 = vld [vmem:[%s17806_s28 + $0x14c0] sm:$0xff]  ;;  %v816_v60 = vld [vmem:[%s17806_s28 + $0x1628] sm:$0xff] }
 0x176   :  { %v775_v8 = vld [vmem:[%s17806_s28 + $0x14e0] sm:$0xff] }
 0x177   :  { %v11735_v22 = vcombine.low %v771_v7, %v775_v8 }
 0x178   :  { %6598 = vmatpush1.bf16.msra.mxu0 %v11679_v15  ;;  %6926 = vmatpush1.bf16.msra.mxu1 %v11681_v16  ;;  %v11736_v15 = vcombine.high %v771_v7, %v775_v8  ;;  %v11738_v16 = vcombine.high %v772_v10, %v776_v12  ;;  %v820_v7 = vld [vmem:[%s17806_s28 + $0x1648] sm:$0xff]  ;;  %v11777_v12 = vcombine.low %v812_v11, %v816_v60 }
 0x179   :  { %6599 = vmatprep.subr.bf16.mxu0 %v11688_v17  ;;  %6927 = vmatprep.subr.bf16.mxu1 %v11690_v18  ;;  %v779_v17 = vld [vmem:[%s17806_s28 + $0x1500] sm:$0xff]  ;;  %v824_v8 = vld [vmem:[%s17806_s28 + $0x1668] sm:$0xff] }
 0x17a   :  { %v783_v18 = vld [vmem:[%s17806_s28 + $0x1520] sm:$0xff] }
 0x17b   :  { %v11743_v31 = vcombine.low %v779_v17, %v783_v18 }
 0x17c   :  { %6600 = vmatpush1.bf16.msra.mxu0 %v11687_v25  ;;  %6928 = vmatpush1.bf16.msra.mxu1 %v11689_v26  ;;  %v11744_v25 = vcombine.high %v779_v17, %v783_v18  ;;  %v11746_v26 = vcombine.high %v780_v19, %v784_v20  ;;  %v828_v17 = vld [vmem:[%s17806_s28 + $0x1688] sm:$0xff]  ;;  %v11785_v20 = vcombine.low %v820_v7, %v824_v8 }
 0x17d   :  { %6601 = vmatprep.subr.bf16.mxu0 %v11696_v27  ;;  %6929 = vmatprep.subr.bf16.mxu1 %v11698_v28  ;;  %v787_v27 = vld [vmem:[%s17806_s28 + $0x1540] sm:$0xff]  ;;  %v832_v18 = vld [vmem:[%s17806_s28 + $0x16a8] sm:$0xff] }
 0x17e   :  { %v791_v28 = vld [vmem:[%s17806_s28 + $0x1560] sm:$0xff] }
 0x17f   :  { %v11751_v41 = vcombine.low %v787_v27, %v791_v28 }
 0x180   :  { %6602 = vmatpush1.bf16.msra.mxu0 %v11695_v34  ;;  %6930 = vmatpush1.bf16.msra.mxu1 %v11697_v35  ;;  %v11752_v34 = vcombine.high %v787_v27, %v791_v28  ;;  %v11754_v35 = vcombine.high %v788_v59, %v792_v29  ;;  %v836_v27 = vld [vmem:[%s17806_s28 + $0x16c8] sm:$0xff]  ;;  %v11793_v29 = vcombine.low %v828_v17, %v832_v18 }
 0x181   :  { %6603 = vmatprep.subr.bf16.mxu0 %v11704_v36  ;;  %6931 = vmatprep.subr.bf16.mxu1 %v11706_v37  ;;  %v795_v36 = vld [vmem:[%s17806_s28 + $0x1580] sm:$0xff]  ;;  %v840_v28 = vld [vmem:[%s17806_s28 + $0x16e8] sm:$0xff] }
 0x182   :  { %v799_v37 = vld [vmem:[%s17806_s28 + $0x15a0] sm:$0xff] }
 0x183   :  { %v11759_v52 = vcombine.low %v795_v36, %v799_v37 }
 0x184   :  { %6604 = vmatpush1.bf16.msra.mxu0 %v11703_v44  ;;  %6932 = vmatpush1.bf16.msra.mxu1 %v11705_v45  ;;  %v11760_v44 = vcombine.high %v795_v36, %v799_v37  ;;  %v11762_v45 = vcombine.high %v796_v38, %v800_v39  ;;  %v844_v36 = vld [vmem:[%s17806_s28 + $0x1708] sm:$0xff]  ;;  %v11801_v39 = vcombine.low %v836_v27, %v840_v28 }
 0x185   :  { %6614 = vmatprep.subr.bf16.mxu0 %v11712_v46  ;;  %6942 = vmatprep.subr.bf16.mxu1 %v11714_v47  ;;  %v803_v46 = vld [vmem:[%s17806_s28 + $0x15c0] sm:$0xff]  ;;  %v848_v37 = vld [vmem:[%s17806_s28 + $0x1728] sm:$0xff] }
 0x186   :  { %v807_v47 = vld [vmem:[%s17806_s28 + $0x15e0] sm:$0xff] }
 0x187   :  { %6606 = vmatmul.mubr.bf16.vlgmr.msra.gmra.mrb[0].mxu0 %v14648_v51  ;;  %6934 = vmatmul.mubr.bf16.vlgmr.msra.gmra.mrb[0].mxu1 %v14648_v51  ;;  %v11767_v0 = vcombine.low %v803_v46, %v807_v47 }
 0x188   :  { %6615 = vmatpush1.bf16.msra.mxu0 %v11711_v55  ;;  %6943 = vmatpush1.bf16.msra.mxu1 %v11713_v56  ;;  %v11768_v55 = vcombine.high %v803_v46, %v807_v47  ;;  %v11770_v56 = vcombine.high %v804_v48, %v808_v49  ;;  %v852_v46 = vld [vmem:[%s17806_s28 + $0x1748] sm:$0xff]  ;;  %v11809_v49 = vcombine.low %v844_v36, %v848_v37 }
 0x189   :  { %6616 = vmatprep.subr.bf16.mxu0 %v11720_v57  ;;  %6944 = vmatprep.subr.bf16.mxu1 %v11722_v58  ;;  %v811_v57 = vld [vmem:[%s17806_s28 + $0x1600] sm:$0xff]  ;;  %v856_v47 = vld [vmem:[%s17806_s28 + $0x1768] sm:$0xff] }
 0x18a   :  { %6646 = vmatprep.mubr.bf16.mxu0 %v14664_v62  ;;  %6974 = vmatprep.mubr.bf16.mxu1 %v14664_v62  ;;  %v815_v58 = vld [vmem:[%s17806_s28 + $0x1620] sm:$0xff] }
 0x18b   :  { %v11775_v10 = vcombine.low %v811_v57, %v815_v58 }
 0x18c   :  { %6617 = vmatpush1.bf16.msra.mxu0 %v11719_v3  ;;  %6945 = vmatpush1.bf16.msra.mxu1 %v11721_v4  ;;  %v11776_v3 = vcombine.high %v811_v57, %v815_v58  ;;  %v11778_v4 = vcombine.high %v812_v11, %v816_v60  ;;  %v860_v57 = vld [vmem:[%s17806_s28 + $0x1788] sm:$0xff]  ;;  %v11817_v60 = vcombine.low %v852_v46, %v856_v47 }
 0x18d   :  { %6618 = vmatprep.subr.bf16.mxu0 %v11728_v63  ;;  %6946 = vmatprep.subr.bf16.mxu1 %v11730_v5  ;;  %v819_v63 = vld [vmem:[%s17806_s28 + $0x1640] sm:$0xff]  ;;  %v864_v58 = vld [vmem:[%s17806_s28 + $0x17a8] sm:$0xff] }
 0x18e   :  { %v823_v5 = vld [vmem:[%s17806_s28 + $0x1660] sm:$0xff] }
 0x18f   :  { %v11783_v19 = vcombine.low %v819_v63, %v823_v5 }
 0x190   :  { %6619 = vmatpush1.bf16.msra.mxu0 %v11727_v13  ;;  %6947 = vmatpush1.bf16.msra.mxu1 %v11729_v14  ;;  %v11784_v13 = vcombine.high %v819_v63, %v823_v5  ;;  %v11786_v14 = vcombine.high %v820_v7, %v824_v8  ;;  %v1224_v63 = vcombine.high %v14417_v1, %v14417_v1  ;;  %v868_v5 = vld [vmem:[%s17806_s28 + $0x17c8] sm:$0xff]  ;;  %v875_v1 = vld [vmem:[%s17806_s28 + $0x1800] sm:$0xff] }
 0x191   :  { %6620 = vmatprep.subr.bf16.mxu0 %v11736_v15  ;;  %6948 = vmatprep.subr.bf16.mxu1 %v11738_v16  ;;  %v827_v15 = vld [vmem:[%s17806_s28 + $0x1680] sm:$0xff]  ;;  %v872_v7 = vld [vmem:[%s17806_s28 + $0x17e8] sm:$0xff] }
 0x192   :  { %v831_v16 = vld [vmem:[%s17806_s28 + $0x16a0] sm:$0xff] }
 0x193   :  { %v11791_v59 = vcombine.low %v827_v15, %v831_v16 }
 0x194   :  { %6621 = vmatpush1.bf16.msra.mxu0 %v11735_v22  ;;  %6949 = vmatpush1.bf16.msra.mxu1 %v11737_v24  ;;  %v11792_v22 = vcombine.high %v827_v15, %v831_v16  ;;  %v11794_v24 = vcombine.high %v828_v17, %v832_v18  ;;  %v14841_v15 = vrot.slane %v1224_v63, %v13664_v53  ;;  %v876_v16 = vld [vmem:[%s17806_s28 + $0x1808] sm:$0xff]  ;;  %v915_v63 = vld [vmem:[%s17806_s28 + $0x1940] sm:$0xff] }
 0x195   :  { %6622 = vmatprep.subr.bf16.mxu0 %v11744_v25  ;;  %6950 = vmatprep.subr.bf16.mxu1 %v11746_v26  ;;  %v835_v25 = vld [vmem:[%s17806_s28 + $0x16c0] sm:$0xff]  ;;  %v880_v17 = vld [vmem:[%s17806_s28 + $0x1828] sm:$0xff] }
 0x196   :  { %v839_v26 = vld [vmem:[%s17806_s28 + $0x16e0] sm:$0xff] }
 0x197   :  { %v11799_v38 = vcombine.low %v835_v25, %v839_v26 }
 0x198   :  { %6623 = vmatpush1.bf16.msra.mxu0 %v11743_v31  ;;  %6951 = vmatpush1.bf16.msra.mxu1 %v11745_v32  ;;  %v11800_v31 = vcombine.high %v835_v25, %v839_v26  ;;  %v11802_v32 = vcombine.high %v836_v27, %v840_v28  ;;  %v887_v25 = vld [vmem:[%s17806_s28 + $0x1860] sm:$0xff]  ;;  %v1240_v26 = vcombine.high %v14841_v15, %v14841_v15  ;;  %v884_v28 = vld [vmem:[%s17806_s28 + $0x1848] sm:$0xff] }
 0x199   :  { %6624 = vmatprep.subr.bf16.mxu0 %v11752_v34  ;;  %6952 = vmatprep.subr.bf16.mxu1 %v11754_v35  ;;  %v843_v34 = vld [vmem:[%s17806_s28 + $0x1700] sm:$0xff]  ;;  %v14859_v27 = vcombine.high %v14648_v51, %v14648_v51 }
 0x19a   :  { %v847_v35 = vld [vmem:[%s17806_s28 + $0x1720] sm:$0xff] }
 0x19b   :  { %v11807_v48 = vcombine.low %v843_v34, %v847_v35 }
 0x19c   :  { %6625 = vmatpush1.bf16.msra.mxu0 %v11751_v41  ;;  %6953 = vmatpush1.bf16.msra.mxu1 %v11753_v42  ;;  %v11808_v41 = vcombine.high %v843_v34, %v847_v35  ;;  %v11810_v42 = vcombine.high %v844_v36, %v848_v37  ;;  %v891_v35 = vld [vmem:[%s17806_s28 + $0x1880] sm:$0xff]  ;;  %v14874_v37 = vrot.slane %v1240_v26, %v13664_v53 }
 0x19d   :  { %6626 = vmatprep.subr.bf16.mxu0 %v11760_v44  ;;  %6954 = vmatprep.subr.bf16.mxu1 %v11762_v45  ;;  %v851_v44 = vld [vmem:[%s17806_s28 + $0x1740] sm:$0xff] }
 0x19e   :  { %v855_v45 = vld [vmem:[%s17806_s28 + $0x1760] sm:$0xff] }
 0x19f   :  { %v11815_v11 = vcombine.low %v851_v44, %v855_v45  ;;  %v895_v36 = vld [vmem:[%s17806_s28 + $0x18a0] sm:$0xff] }
 0x1a0   :  { %6627 = vmatpush1.bf16.msra.mxu0 %v11759_v52  ;;  %6955 = vmatpush1.bf16.msra.mxu1 %v11761_v54  ;;  %v11816_v52 = vcombine.high %v851_v44, %v855_v45  ;;  %v11818_v54 = vcombine.high %v852_v46, %v856_v47  ;;  %v11856_v44 = vcombine.high %v891_v35, %v895_v36  ;;  %v899_v46 = vld [vmem:[%s17806_s28 + $0x18c0] sm:$0xff] }
 0x1a1   :  { %6628 = vmatprep.subr.bf16.mxu0 %v11768_v55  ;;  %6956 = vmatprep.subr.bf16.mxu1 %v11770_v56  ;;  %v859_v55 = vld [vmem:[%s17806_s28 + $0x1780] sm:$0xff] }
 0x1a2   :  { %v863_v56 = vld [vmem:[%s17806_s28 + $0x17a0] sm:$0xff] }
 0x1a3   :  { %v11823_v8 = vcombine.low %v859_v55, %v863_v56  ;;  %v903_v47 = vld [vmem:[%s17806_s28 + $0x18e0] sm:$0xff] }
 0x1a4   :  { %6629 = vmatpush1.bf16.msra.mxu0 %v11767_v0  ;;  %6957 = vmatpush1.bf16.msra.mxu1 %v11769_v2  ;;  %v11824_v0 = vcombine.high %v859_v55, %v863_v56  ;;  %v11826_v2 = vcombine.high %v860_v57, %v864_v58  ;;  %v11864_v55 = vcombine.high %v899_v46, %v903_v47  ;;  %v935_v26 = vld [vmem:[%s17806_s28 + $0x19e0] sm:$0xff] }
 0x1a5   :  { %6630 = vmatprep.subr.bf16.mxu0 %v11776_v3  ;;  %6958 = vmatprep.subr.bf16.mxu1 %v11778_v4  ;;  %v867_v3 = vld [vmem:[%s17806_s28 + $0x17c0] sm:$0xff] }
 0x1a6   :  { %v871_v4 = vld [vmem:[%s17806_s28 + $0x17e0] sm:$0xff] }
 0x1a7   :  { %v11831_v18 = vcombine.low %v867_v3, %v871_v4 }
 0x1a8   :  { %6631 = vmatpush1.bf16.msra.mxu0 %v11775_v10  ;;  %6959 = vmatpush1.bf16.msra.mxu1 %v11777_v12  ;;  %v11825_v10 = vcombine.low %v860_v57, %v864_v58  ;;  %v11832_v12 = vcombine.high %v867_v3, %v871_v4  ;;  %v907_v57 = vld [vmem:[%s17806_s28 + $0x1900] sm:$0xff] }
 0x1a9   :  { %6632 = vmatprep.subr.bf16.mxu0 %v11784_v13  ;;  %6960 = vmatprep.subr.bf16.mxu1 %v11786_v14  ;;  %v11834_v13 = vcombine.high %v868_v5, %v872_v7  ;;  %v879_v14 = vld [vmem:[%s17806_s28 + $0x1820] sm:$0xff] }
 0x1aa   :  { %v911_v58 = vld [vmem:[%s17806_s28 + $0x1920] sm:$0xff] }
 0x1ab   :  { %v11872_v3 = vcombine.high %v907_v57, %v911_v58 }
 0x1ac   :  { %6633 = vmatpush1.bf16.msra.mxu0 %v11783_v19  ;;  %6961 = vmatpush1.bf16.msra.mxu1 %v11785_v20  ;;  %v11833_v19 = vcombine.low %v868_v5, %v872_v7  ;;  %v11840_v20 = vcombine.high %v875_v1, %v879_v14  ;;  %v919_v5 = vld [vmem:[%s17806_s28 + $0x1960] sm:$0xff]  ;;  %v916_v7 = vld [vmem:[%s17806_s28 + $0x1948] sm:$0xff] }
 0x1ad   :  { %6634 = vmatprep.subr.bf16.mxu0 %v11792_v22  ;;  %6962 = vmatprep.subr.bf16.mxu1 %v11794_v24  ;;  %v11842_v22 = vcombine.high %v876_v16, %v880_v17  ;;  %v883_v24 = vld [vmem:[%s17806_s28 + $0x1840] sm:$0xff] }
 0x1b0   :  { %6635 = vmatpush1.bf16.msra.mxu0 %v11791_v59  ;;  %6963 = vmatpush1.bf16.msra.mxu1 %v11793_v29  ;;  %v888_v59 = vld [vmem:[%s17806_s28 + $0x1868] sm:$0xff]  ;;  %v11839_v29 = vcombine.low %v875_v1, %v879_v14  ;;  %v923_v14 = vld [vmem:[%s17806_s28 + $0x1980] sm:$0xff] }
 0x1b1   :  { %6636 = vmatprep.subr.bf16.mxu0 %v11800_v31  ;;  %6964 = vmatprep.subr.bf16.mxu1 %v11802_v32  ;;  %v11841_v31 = vcombine.low %v876_v16, %v880_v17  ;;  %v11848_v32 = vcombine.high %v883_v24, %v887_v25  ;;  %v11850_v34 = vcombine.high %v884_v28, %v888_v59  ;;  %v927_v16 = vld [vmem:[%s17806_s28 + $0x19a0] sm:$0xff]  ;;  %v924_v17 = vld [vmem:[%s17806_s28 + $0x1988] sm:$0xff] }
 0x1b4   :  { %6637 = vmatpush1.bf16.msra.mxu0 %v11799_v38  ;;  %6965 = vmatpush1.bf16.msra.mxu1 %v11801_v39  ;;  %v892_v38 = vld [vmem:[%s17806_s28 + $0x1888] sm:$0xff] }
 0x1b5   :  { %6638 = vmatprep.subr.bf16.mxu0 %v11808_v41  ;;  %6966 = vmatprep.subr.bf16.mxu1 %v11810_v42  ;;  %v896_v39 = vld [vmem:[%s17806_s28 + $0x18a8] sm:$0xff]  ;;  %v11847_v41 = vcombine.low %v883_v24, %v887_v25  ;;  %v11849_v42 = vcombine.low %v884_v28, %v888_v59  ;;  %v931_v25 = vld [vmem:[%s17806_s28 + $0x19c0] sm:$0xff] }
 0x1b6   :  { %v11858_v45 = vcombine.high %v892_v38, %v896_v39  ;;  %v932_v28 = vld [vmem:[%s17806_s28 + $0x19c8] sm:$0xff] }
 0x1b7   :  { %v936_v59 = vld [vmem:[%s17806_s28 + $0x19e8] sm:$0xff] }
 0x1b8   :  { %6639 = vmatpush1.bf16.msra.mxu0 %v11807_v48  ;;  %6967 = vmatpush1.bf16.msra.mxu1 %v11809_v49  ;;  %v900_v48 = vld [vmem:[%s17806_s28 + $0x18c8] sm:$0xff] }
 0x1b9   :  { %6640 = vmatprep.subr.bf16.mxu0 %v11816_v52  ;;  %6968 = vmatprep.subr.bf16.mxu1 %v11818_v54  ;;  %v904_v49 = vld [vmem:[%s17806_s28 + $0x18e8] sm:$0xff]  ;;  %v11855_v52 = vcombine.low %v891_v35, %v895_v36  ;;  %v11857_v54 = vcombine.low %v892_v38, %v896_v39  ;;  %v939_v35 = vld [vmem:[%s17806_s28 + $0x1a00] sm:$0xff] }
 0x1ba   :  { %v11866_v56 = vcombine.high %v900_v48, %v904_v49  ;;  %v943_v36 = vld [vmem:[%s17806_s28 + $0x1a20] sm:$0xff]  ;;  %v940_v38 = vld [vmem:[%s17806_s28 + $0x1a08] sm:$0xff] }
 0x1bb   :  { %v944_v39 = vld [vmem:[%s17806_s28 + $0x1a28] sm:$0xff] }
 0x1bc   :  { %6641 = vmatpush1.bf16.msra.mxu0 %v11815_v11  ;;  %6969 = vmatpush1.bf16.msra.mxu1 %v11817_v60  ;;  %v908_v11 = vld [vmem:[%s17806_s28 + $0x1908] sm:$0xff] }
 0x1bd   :  { %6642 = vmatprep.subr.bf16.mxu0 %v11824_v0  ;;  %6970 = vmatprep.subr.bf16.mxu1 %v11826_v2  ;;  %v912_v60 = vld [vmem:[%s17806_s28 + $0x1928] sm:$0xff]  ;;  %v11863_v0 = vcombine.low %v899_v46, %v903_v47  ;;  %v11865_v2 = vcombine.low %v900_v48, %v904_v49  ;;  %v947_v46 = vld [vmem:[%s17806_s28 + $0x1a40] sm:$0xff] }
 0x1be   :  { %v11874_v4 = vcombine.high %v908_v11, %v912_v60  ;;  %v951_v47 = vld [vmem:[%s17806_s28 + $0x1a60] sm:$0xff]  ;;  %v948_v48 = vld [vmem:[%s17806_s28 + $0x1a48] sm:$0xff] }
 0x1bf   :  { %v952_v49 = vld [vmem:[%s17806_s28 + $0x1a68] sm:$0xff] }
 0x1c0   :  { %6643 = vmatpush1.bf16.msra.mxu0 %v11823_v8  ;;  %6971 = vmatpush1.bf16.msra.mxu1 %v11825_v10  ;;  %v920_v8 = vld [vmem:[%s17806_s28 + $0x1968] sm:$0xff]  ;;  %v11871_v10 = vcombine.low %v907_v57, %v911_v58  ;;  %v955_v57 = vld [vmem:[%s17806_s28 + $0x1a80] sm:$0xff] }
 0x1c1   :  { %6644 = vmatprep.subr.bf16.mxu0 %v11832_v12  ;;  %6972 = vmatprep.subr.bf16.mxu1 %v11834_v13  ;;  %v11873_v12 = vcombine.low %v908_v11, %v912_v60  ;;  %v11880_v13 = vcombine.high %v915_v63, %v919_v5  ;;  %v11882_v1 = vcombine.high %v916_v7, %v920_v8  ;;  %v959_v58 = vld [vmem:[%s17806_s28 + $0x1aa0] sm:$0xff]  ;;  %v956_v11 = vld [vmem:[%s17806_s28 + $0x1a88] sm:$0xff] }
 0x1c2   :  { %v960_v60 = vld [vmem:[%s17806_s28 + $0x1aa8] sm:$0xff] }
 0x1c4   :  { %6645 = vmatpush1.bf16.msra.mxu0 %v11831_v18  ;;  %6973 = vmatpush1.bf16.msra.mxu1 %v11833_v19  ;;  %v928_v18 = vld [vmem:[%s17806_s28 + $0x19a8] sm:$0xff]  ;;  %v11879_v19 = vcombine.low %v915_v63, %v919_v5  ;;  %v963_v63 = vld [vmem:[%s17806_s28 + $0x1ac0] sm:$0xff] }
 0x1c5   :  { %6655 = vmatprep.subr.bf16.mxu0 %v11840_v20  ;;  %6983 = vmatprep.subr.bf16.mxu1 %v11842_v22  ;;  %v11881_v20 = vcombine.low %v916_v7, %v920_v8  ;;  %v11888_v22 = vcombine.high %v923_v14, %v927_v16  ;;  %v11890_v24 = vcombine.high %v924_v17, %v928_v18  ;;  %v967_v5 = vld [vmem:[%s17806_s28 + $0x1ae0] sm:$0xff]  ;;  %v964_v7 = vld [vmem:[%s17806_s28 + $0x1ac8] sm:$0xff] }
 0x1c6   :  { %v968_v8 = vld [vmem:[%s17806_s28 + $0x1ae8] sm:$0xff] }
 0x1c7   :  { %6647 = vmatmul.mubr.bf16.vlgmr.msra.gmra.mrb[0].mxu0 %v14859_v27  ;;  %6975 = vmatmul.mubr.bf16.vlgmr.msra.gmra.mrb[0].mxu1 %v14859_v27 }
 0x1c8   :  { %6656 = vmatpush1.bf16.msra.mxu0 %v11839_v29  ;;  %6984 = vmatpush1.bf16.msra.mxu1 %v11841_v31  ;;  %v11887_v29 = vcombine.low %v923_v14, %v927_v16  ;;  %v11889_v31 = vcombine.low %v924_v17, %v928_v18  ;;  %v971_v14 = vld [vmem:[%s17806_s28 + $0x1b00] sm:$0xff]  ;;  %v972_v17 = vld [vmem:[%s17806_s28 + $0x1b08] sm:$0xff] }
 0x1c9   :  { %6657 = vmatprep.subr.bf16.mxu0 %v11848_v32  ;;  %6985 = vmatprep.subr.bf16.mxu1 %v11850_v34  ;;  %v11896_v32 = vcombine.high %v931_v25, %v935_v26  ;;  %v11898_v34 = vcombine.high %v932_v28, %v936_v59  ;;  %v975_v16 = vld [vmem:[%s17806_s28 + $0x1b20] sm:$0xff]  ;;  %v976_v18 = vld [vmem:[%s17806_s28 + $0x1b28] sm:$0xff] }
 0x1ca   :  { %6687 = vmatprep.mubr.bf16.mxu0 %v14874_v37  ;;  %7015 = vmatprep.mubr.bf16.mxu1 %v14874_v37 }
 0x1cc   :  { %6658 = vmatpush1.bf16.msra.mxu0 %v11847_v41  ;;  %6986 = vmatpush1.bf16.msra.mxu1 %v11849_v42  ;;  %v11895_v41 = vcombine.low %v931_v25, %v935_v26  ;;  %v11897_v42 = vcombine.low %v932_v28, %v936_v59  ;;  %v979_v25 = vld [vmem:[%s17806_s28 + $0x1b40] sm:$0xff]  ;;  %v980_v28 = vld [vmem:[%s17806_s28 + $0x1b48] sm:$0xff] }
 0x1cd   :  { %6659 = vmatprep.subr.bf16.mxu0 %v11856_v44  ;;  %6987 = vmatprep.subr.bf16.mxu1 %v11858_v45  ;;  %v11904_v44 = vcombine.high %v939_v35, %v943_v36  ;;  %v11906_v45 = vcombine.high %v940_v38, %v944_v39  ;;  %v983_v26 = vld [vmem:[%s17806_s28 + $0x1b60] sm:$0xff]  ;;  %v984_v59 = vld [vmem:[%s17806_s28 + $0x1b68] sm:$0xff] }
 0x1d0   :  { %6660 = vmatpush1.bf16.msra.mxu0 %v11855_v52  ;;  %6988 = vmatpush1.bf16.msra.mxu1 %v11857_v54  ;;  %v11903_v52 = vcombine.low %v939_v35, %v943_v36  ;;  %v11905_v54 = vcombine.low %v940_v38, %v944_v39  ;;  %v987_v35 = vld [vmem:[%s17806_s28 + $0x1b80] sm:$0xff]  ;;  %v988_v38 = vld [vmem:[%s17806_s28 + $0x1b88] sm:$0xff] }
 0x1d1   :  { %6661 = vmatprep.subr.bf16.mxu0 %v11864_v55  ;;  %6989 = vmatprep.subr.bf16.mxu1 %v11866_v56  ;;  %v11912_v55 = vcombine.high %v947_v46, %v951_v47  ;;  %v11914_v56 = vcombine.high %v948_v48, %v952_v49  ;;  %v991_v36 = vld [vmem:[%s17806_s28 + $0x1ba0] sm:$0xff]  ;;  %v992_v39 = vld [vmem:[%s17806_s28 + $0x1ba8] sm:$0xff] }
 0x1d4   :  { %6662 = vmatpush1.bf16.msra.mxu0 %v11863_v0  ;;  %6990 = vmatpush1.bf16.msra.mxu1 %v11865_v2  ;;  %v11911_v0 = vcombine.low %v947_v46, %v951_v47  ;;  %v11913_v2 = vcombine.low %v948_v48, %v952_v49  ;;  %v995_v46 = vld [vmem:[%s17806_s28 + $0x1bc0] sm:$0xff]  ;;  %v996_v48 = vld [vmem:[%s17806_s28 + $0x1bc8] sm:$0xff] }
 0x1d5   :  { %6663 = vmatprep.subr.bf16.mxu0 %v11872_v3  ;;  %6991 = vmatprep.subr.bf16.mxu1 %v11874_v4  ;;  %v11920_v3 = vcombine.high %v955_v57, %v959_v58  ;;  %v11922_v4 = vcombine.high %v956_v11, %v960_v60  ;;  %v999_v47 = vld [vmem:[%s17806_s28 + $0x1be0] sm:$0xff]  ;;  %v1000_v49 = vld [vmem:[%s17806_s28 + $0x1be8] sm:$0xff] }
 0x1d8   :  { %6664 = vmatpush1.bf16.msra.mxu0 %v11871_v10  ;;  %6992 = vmatpush1.bf16.msra.mxu1 %v11873_v12  ;;  %v11919_v10 = vcombine.low %v955_v57, %v959_v58  ;;  %v11921_v12 = vcombine.low %v956_v11, %v960_v60  ;;  %v1003_v57 = vld [vmem:[%s17806_s28 + $0x1c00] sm:$0xff]  ;;  %v1004_v11 = vld [vmem:[%s17806_s28 + $0x1c08] sm:$0xff] }
 0x1d9   :  { %6665 = vmatprep.subr.bf16.mxu0 %v11880_v13  ;;  %6993 = vmatprep.subr.bf16.mxu1 %v11882_v1  ;;  %v11928_v13 = vcombine.high %v963_v63, %v967_v5  ;;  %v11930_v1 = vcombine.high %v964_v7, %v968_v8  ;;  %v1007_v58 = vld [vmem:[%s17806_s28 + $0x1c20] sm:$0xff]  ;;  %v1008_v60 = vld [vmem:[%s17806_s28 + $0x1c28] sm:$0xff] }
 0x1dc   :  { %6666 = vmatpush1.bf16.msra.mxu0 %v11879_v19  ;;  %6994 = vmatpush1.bf16.msra.mxu1 %v11881_v20  ;;  %v11927_v19 = vcombine.low %v963_v63, %v967_v5  ;;  %v11929_v20 = vcombine.low %v964_v7, %v968_v8  ;;  %v1011_v63 = vld [vmem:[%s17806_s28 + $0x1c40] sm:$0xff]  ;;  %v15062_v7 = vrot.slane %v14841_v15, %v13664_v53  ;;  %v1012_v8 = vld [vmem:[%s17806_s28 + $0x1c48] sm:$0xff] }
 0x1dd   :  { %6667 = vmatprep.subr.bf16.mxu0 %v11888_v22  ;;  %6995 = vmatprep.subr.bf16.mxu1 %v11890_v24  ;;  %v11936_v22 = vcombine.high %v971_v14, %v975_v16  ;;  %v11938_v24 = vcombine.high %v972_v17, %v976_v18  ;;  %v1015_v5 = vld [vmem:[%s17806_s28 + $0x1c60] sm:$0xff] }
 0x1de   :  { %v1019_v53 = vld [vmem:[%s17806_s28 + $0x1c80] sm:$0xff] }
 0x1df   :  { %v1023_v15 = vld [vmem:[%s17806_s28 + $0x1ca0] sm:$0xff] }
 0x1e0   :  { %6668 = vmatpush1.bf16.msra.mxu0 %v11887_v29  ;;  %6996 = vmatpush1.bf16.msra.mxu1 %v11889_v31  ;;  %v11935_v29 = vcombine.low %v971_v14, %v975_v16  ;;  %v11937_v31 = vcombine.low %v972_v17, %v976_v18  ;;  %v15078_v16 = vcombine.high %v14874_v37, %v14874_v37  ;;  %v1020_v17 = vld [vmem:[%s17806_s28 + $0x1c88] sm:$0xff] }
 0x1e1   :  { %6669 = vmatprep.subr.bf16.mxu0 %v11896_v32  ;;  %6997 = vmatprep.subr.bf16.mxu1 %v11898_v34  ;;  %v11944_v32 = vcombine.high %v979_v25, %v983_v26  ;;  %v11946_v34 = vcombine.high %v980_v28, %v984_v59  ;;  %v1024_v18 = vld [vmem:[%s17806_s28 + $0x1ca8] sm:$0xff] }
 0x1e4   :  { %6670 = vmatpush1.bf16.msra.mxu0 %v11895_v41  ;;  %6998 = vmatpush1.bf16.msra.mxu1 %v11897_v42  ;;  %v11943_v41 = vcombine.low %v979_v25, %v983_v26  ;;  %v11945_v42 = vcombine.low %v980_v28, %v984_v59  ;;  %v1027_v25 = vld [vmem:[%s17806_s28 + $0x1cc0] sm:$0xff]  ;;  %v1028_v28 = vld [vmem:[%s17806_s28 + $0x1cc8] sm:$0xff] }
 0x1e5   :  { %6671 = vmatprep.subr.bf16.mxu0 %v11904_v44  ;;  %6999 = vmatprep.subr.bf16.mxu1 %v11906_v45  ;;  %v11952_v44 = vcombine.high %v987_v35, %v991_v36  ;;  %v11954_v45 = vcombine.high %v988_v38, %v992_v39  ;;  %v1031_v26 = vld [vmem:[%s17806_s28 + $0x1ce0] sm:$0xff]  ;;  %v1032_v59 = vld [vmem:[%s17806_s28 + $0x1ce8] sm:$0xff] }
 0x1e8   :  { %6672 = vmatpush1.bf16.msra.mxu0 %v11903_v52  ;;  %7000 = vmatpush1.bf16.msra.mxu1 %v11905_v54  ;;  %v11951_v52 = vcombine.low %v987_v35, %v991_v36  ;;  %v11953_v54 = vcombine.low %v988_v38, %v992_v39  ;;  %v1035_v35 = vld [vmem:[%s17806_s28 + $0x1d00] sm:$0xff]  ;;  %v1036_v38 = vld [vmem:[%s17806_s28 + $0x1d08] sm:$0xff] }
 0x1e9   :  { %6673 = vmatprep.subr.bf16.mxu0 %v11912_v55  ;;  %7001 = vmatprep.subr.bf16.mxu1 %v11914_v56  ;;  %v11960_v55 = vcombine.high %v995_v46, %v999_v47  ;;  %v11962_v56 = vcombine.high %v996_v48, %v1000_v49  ;;  %v1039_v36 = vld [vmem:[%s17806_s28 + $0x1d20] sm:$0xff]  ;;  %v1040_v39 = vld [vmem:[%s17806_s28 + $0x1d28] sm:$0xff] }
 0x1ec   :  { %6674 = vmatpush1.bf16.msra.mxu0 %v11911_v0  ;;  %7002 = vmatpush1.bf16.msra.mxu1 %v11913_v2  ;;  %v11959_v0 = vcombine.low %v995_v46, %v999_v47  ;;  %v11961_v2 = vcombine.low %v996_v48, %v1000_v49  ;;  %v1043_v46 = vld [vmem:[%s17806_s28 + $0x1d40] sm:$0xff]  ;;  %v1044_v48 = vld [vmem:[%s17806_s28 + $0x1d48] sm:$0xff] }
 0x1ed   :  { %6675 = vmatprep.subr.bf16.mxu0 %v11920_v3  ;;  %7003 = vmatprep.subr.bf16.mxu1 %v11922_v4  ;;  %v11968_v3 = vcombine.high %v1003_v57, %v1007_v58  ;;  %v11970_v4 = vcombine.high %v1004_v11, %v1008_v60  ;;  %v1047_v47 = vld [vmem:[%s17806_s28 + $0x1d60] sm:$0xff]  ;;  %v1048_v49 = vld [vmem:[%s17806_s28 + $0x1d68] sm:$0xff] }
 0x1f0   :  { %6676 = vmatpush1.bf16.msra.mxu0 %v11919_v10  ;;  %7004 = vmatpush1.bf16.msra.mxu1 %v11921_v12  ;;  %v1016_v10 = vld [vmem:[%s17806_s28 + $0x1c68] sm:$0xff]  ;;  %v11967_v12 = vcombine.low %v1003_v57, %v1007_v58  ;;  %v1051_v57 = vld [vmem:[%s17806_s28 + $0x1d80] sm:$0xff] }
 0x1f1   :  { %6677 = vmatprep.subr.bf16.mxu0 %v11928_v13  ;;  %7005 = vmatprep.subr.bf16.mxu1 %v11930_v1  ;;  %v11969_v13 = vcombine.low %v1004_v11, %v1008_v60  ;;  %v11976_v1 = vcombine.high %v1011_v63, %v1015_v5  ;;  %v11978_v14 = vcombine.high %v1012_v8, %v1016_v10  ;;  %v1055_v58 = vld [vmem:[%s17806_s28 + $0x1da0] sm:$0xff]  ;;  %v1052_v11 = vld [vmem:[%s17806_s28 + $0x1d88] sm:$0xff] }
 0x1f2   :  { %v1056_v60 = vld [vmem:[%s17806_s28 + $0x1da8] sm:$0xff] }
 0x1f4   :  { %6678 = vmatpush1.bf16.msra.mxu0 %v11927_v19  ;;  %7006 = vmatpush1.bf16.msra.mxu1 %v11929_v20  ;;  %v11975_v19 = vcombine.low %v1011_v63, %v1015_v5  ;;  %v11977_v20 = vcombine.low %v1012_v8, %v1016_v10  ;;  %v1059_v63 = vld [vmem:[%s17806_s28 + $0x1dc0] sm:$0xff]  ;;  %v1060_v8 = vld [vmem:[%s17806_s28 + $0x1dc8] sm:$0xff] }
 0x1f5   :  { %6679 = vmatprep.subr.bf16.mxu0 %v11936_v22  ;;  %7007 = vmatprep.subr.bf16.mxu1 %v11938_v24  ;;  %v11984_v22 = vcombine.high %v1019_v53, %v1023_v15  ;;  %v11986_v24 = vcombine.high %v1020_v17, %v1024_v18  ;;  %v1063_v5 = vld [vmem:[%s17806_s28 + $0x1de0] sm:$0xff]  ;;  %v1064_v10 = vld [vmem:[%s17806_s28 + $0x1de8] sm:$0xff] }
 0x1f8   :  { %6680 = vmatpush1.bf16.msra.mxu0 %v11935_v29  ;;  %7008 = vmatpush1.bf16.msra.mxu1 %v11937_v31  ;;  %v11983_v29 = vcombine.low %v1019_v53, %v1023_v15  ;;  %v11985_v31 = vcombine.low %v1020_v17, %v1024_v18  ;;  %v1067_v53 = vld [vmem:[%s17806_s28 + $0x1e00] sm:$0xff]  ;;  %v1068_v17 = vld [vmem:[%s17806_s28 + $0x1e08] sm:$0xff] }
 0x1f9   :  { %6681 = vmatprep.subr.bf16.mxu0 %v11944_v32  ;;  %7009 = vmatprep.subr.bf16.mxu1 %v11946_v34  ;;  %v11992_v32 = vcombine.high %v1027_v25, %v1031_v26  ;;  %v11994_v34 = vcombine.high %v1028_v28, %v1032_v59  ;;  %v1071_v15 = vld [vmem:[%s17806_s28 + $0x1e20] sm:$0xff]  ;;  %v1072_v18 = vld [vmem:[%s17806_s28 + $0x1e28] sm:$0xff] }
 0x1fc   :  { %6682 = vmatpush1.bf16.msra.mxu0 %v11943_v41  ;;  %7010 = vmatpush1.bf16.msra.mxu1 %v11945_v42  ;;  %v11991_v41 = vcombine.low %v1027_v25, %v1031_v26  ;;  %v11993_v42 = vcombine.low %v1028_v28, %v1032_v59  ;;  %v1075_v25 = vld [vmem:[%s17806_s28 + $0x1e40] sm:$0xff]  ;;  %v1076_v28 = vld [vmem:[%s17806_s28 + $0x1e48] sm:$0xff] }
 0x1fd   :  { %6683 = vmatprep.subr.bf16.mxu0 %v11952_v44  ;;  %7011 = vmatprep.subr.bf16.mxu1 %v11954_v45  ;;  %v12000_v44 = vcombine.high %v1035_v35, %v1039_v36  ;;  %v12002_v45 = vcombine.high %v1036_v38, %v1040_v39  ;;  %v1079_v26 = vld [vmem:[%s17806_s28 + $0x1e60] sm:$0xff]  ;;  %v1080_v59 = vld [vmem:[%s17806_s28 + $0x1e68] sm:$0xff] }
 0x200   :  { %6684 = vmatpush1.bf16.msra.mxu0 %v11951_v52  ;;  %7012 = vmatpush1.bf16.msra.mxu1 %v11953_v54  ;;  %v11999_v52 = vcombine.low %v1035_v35, %v1039_v36  ;;  %v12001_v54 = vcombine.low %v1036_v38, %v1040_v39  ;;  %v1083_v35 = vld [vmem:[%s17806_s28 + $0x1e80] sm:$0xff]  ;;  %v1084_v38 = vld [vmem:[%s17806_s28 + $0x1e88] sm:$0xff] }
 0x201   :  { %6685 = vmatprep.subr.bf16.mxu0 %v11960_v55  ;;  %7013 = vmatprep.subr.bf16.mxu1 %v11962_v56  ;;  %v12008_v55 = vcombine.high %v1043_v46, %v1047_v47  ;;  %v12010_v56 = vcombine.high %v1044_v48, %v1048_v49  ;;  %v1087_v36 = vld [vmem:[%s17806_s28 + $0x1ea0] sm:$0xff]  ;;  %v1088_v39 = vld [vmem:[%s17806_s28 + $0x1ea8] sm:$0xff] }
 0x204   :  { %6686 = vmatpush1.bf16.msra.mxu0 %v11959_v0  ;;  %7014 = vmatpush1.bf16.msra.mxu1 %v11961_v2  ;;  %v12007_v0 = vcombine.low %v1043_v46, %v1047_v47  ;;  %v12009_v2 = vcombine.low %v1044_v48, %v1048_v49  ;;  %v1091_v46 = vld [vmem:[%s17806_s28 + $0x1ec0] sm:$0xff]  ;;  %v1092_v48 = vld [vmem:[%s17806_s28 + $0x1ec8] sm:$0xff] }
 0x205   :  { %6696 = vmatprep.subr.bf16.mxu0 %v11968_v3  ;;  %7024 = vmatprep.subr.bf16.mxu1 %v11970_v4  ;;  %v12016_v3 = vcombine.high %v1051_v57, %v1055_v58  ;;  %v12018_v4 = vcombine.high %v1052_v11, %v1056_v60  ;;  %v1095_v47 = vld [vmem:[%s17806_s28 + $0x1ee0] sm:$0xff]  ;;  %v1096_v49 = vld [vmem:[%s17806_s28 + $0x1ee8] sm:$0xff] }
 0x207   :  { %6688 = vmatmul.mubr.bf16.vlgmr.msra.gmra.mrb[0].mxu0 %v15062_v7  ;;  %7016 = vmatmul.mubr.bf16.vlgmr.msra.gmra.mrb[0].mxu1 %v15062_v7 }
 0x208   :  { %6697 = vmatpush1.bf16.msra.mxu0 %v11967_v12  ;;  %7025 = vmatpush1.bf16.msra.mxu1 %v11969_v13  ;;  %v12015_v12 = vcombine.low %v1051_v57, %v1055_v58  ;;  %v12017_v13 = vcombine.low %v1052_v11, %v1056_v60  ;;  %v1099_v57 = vld [vmem:[%s17806_s28 + $0x1f00] sm:$0xff]  ;;  %v1100_v11 = vld [vmem:[%s17806_s28 + $0x1f08] sm:$0xff] }
 0x209   :  { %6698 = vmatprep.subr.bf16.mxu0 %v11976_v1  ;;  %7026 = vmatprep.subr.bf16.mxu1 %v11978_v14  ;;  %v12024_v1 = vcombine.high %v1059_v63, %v1063_v5  ;;  %v12026_v14 = vcombine.high %v1060_v8, %v1064_v10  ;;  %v1103_v58 = vld [vmem:[%s17806_s28 + $0x1f20] sm:$0xff]  ;;  %v1104_v60 = vld [vmem:[%s17806_s28 + $0x1f28] sm:$0xff] }
 0x20a   :  { %6728 = vmatprep.mubr.bf16.mxu0 %v15078_v16  ;;  %7056 = vmatprep.mubr.bf16.mxu1 %v15078_v16 }
 0x20c   :  { %6699 = vmatpush1.bf16.msra.mxu0 %v11975_v19  ;;  %7027 = vmatpush1.bf16.msra.mxu1 %v11977_v20  ;;  %v12023_v19 = vcombine.low %v1059_v63, %v1063_v5  ;;  %v12025_v20 = vcombine.low %v1060_v8, %v1064_v10  ;;  %v1107_v63 = vld [vmem:[%s17806_s28 + $0x1f40] sm:$0xff]  ;;  %v1108_v8 = vld [vmem:[%s17806_s28 + $0x1f48] sm:$0xff] }
 0x20d   :  { %6700 = vmatprep.subr.bf16.mxu0 %v11984_v22  ;;  %7028 = vmatprep.subr.bf16.mxu1 %v11986_v24  ;;  %v12032_v22 = vcombine.high %v1067_v53, %v1071_v15  ;;  %v12034_v24 = vcombine.high %v1068_v17, %v1072_v18  ;;  %v1111_v5 = vld [vmem:[%s17806_s28 + $0x1f60] sm:$0xff]  ;;  %v1112_v10 = vld [vmem:[%s17806_s28 + $0x1f68] sm:$0xff] }
 0x210   :  { %6701 = vmatpush1.bf16.msra.mxu0 %v11983_v29  ;;  %7029 = vmatpush1.bf16.msra.mxu1 %v11985_v31  ;;  %v12031_v29 = vcombine.low %v1067_v53, %v1071_v15  ;;  %v12033_v31 = vcombine.low %v1068_v17, %v1072_v18  ;;  %v1115_v53 = vld [vmem:[%s17806_s28 + $0x1f80] sm:$0xff]  ;;  %v1116_v17 = vld [vmem:[%s17806_s28 + $0x1f88] sm:$0xff] }
 0x211   :  { %6702 = vmatprep.subr.bf16.mxu0 %v11992_v32  ;;  %7030 = vmatprep.subr.bf16.mxu1 %v11994_v34  ;;  %v12040_v32 = vcombine.high %v1075_v25, %v1079_v26  ;;  %v12042_v34 = vcombine.high %v1076_v28, %v1080_v59  ;;  %v1119_v15 = vld [vmem:[%s17806_s28 + $0x1fa0] sm:$0xff]  ;;  %v1120_v18 = vld [vmem:[%s17806_s28 + $0x1fa8] sm:$0xff] }
 0x214   :  { %6703 = vmatpush1.bf16.msra.mxu0 %v11991_v41  ;;  %7031 = vmatpush1.bf16.msra.mxu1 %v11993_v42  ;;  %v12039_v41 = vcombine.low %v1075_v25, %v1079_v26  ;;  %v12041_v42 = vcombine.low %v1076_v28, %v1080_v59  ;;  %v1123_v25 = vld [vmem:[%s17806_s28 + $0x1fc0] sm:$0xff]  ;;  %v1124_v28 = vld [vmem:[%s17806_s28 + $0x1fc8] sm:$0xff] }
 0x215   :  { %6704 = vmatprep.subr.bf16.mxu0 %v12000_v44  ;;  %7032 = vmatprep.subr.bf16.mxu1 %v12002_v45  ;;  %v12048_v44 = vcombine.high %v1083_v35, %v1087_v36  ;;  %v12050_v45 = vcombine.high %v1084_v38, %v1088_v39  ;;  %v1127_v26 = vld [vmem:[%s17806_s28 + $0x1fe0] sm:$0xff]  ;;  %v1128_v59 = vld [vmem:[%s17806_s28 + $0x1fe8] sm:$0xff] }
 0x218   :  { %6705 = vmatpush1.bf16.msra.mxu0 %v11999_v52  ;;  %7033 = vmatpush1.bf16.msra.mxu1 %v12001_v54  ;;  %v12047_v52 = vcombine.low %v1083_v35, %v1087_v36  ;;  %v12049_v54 = vcombine.low %v1084_v38, %v1088_v39  ;;  %v109_v35 = vld [vmem:[%s17806_s28 + $0x10] sm:$0xff]  ;;  %v110_v38 = vld [vmem:[%s17806_s28 + $0x18] sm:$0xff] }
 0x219   :  { %6706 = vmatprep.subr.bf16.mxu0 %v12008_v55  ;;  %7034 = vmatprep.subr.bf16.mxu1 %v12010_v56  ;;  %v12056_v55 = vcombine.high %v1091_v46, %v1095_v47  ;;  %v12058_v56 = vcombine.high %v1092_v48, %v1096_v49  ;;  %v113_v36 = vld [vmem:[%s17806_s28 + $0x30] sm:$0xff]  ;;  %v114_v39 = vld [vmem:[%s17806_s28 + $0x38] sm:$0xff] }
 0x21c   :  { %6707 = vmatpush1.bf16.msra.mxu0 %v12007_v0  ;;  %7035 = vmatpush1.bf16.msra.mxu1 %v12009_v2  ;;  %v12055_v0 = vcombine.low %v1091_v46, %v1095_v47  ;;  %v12057_v2 = vcombine.low %v1092_v48, %v1096_v49  ;;  %v117_v46 = vld [vmem:[%s17806_s28 + $0x50] sm:$0xff]  ;;  %v15266_v48 = vcombine.high %v15062_v7, %v15062_v7  ;;  %v118_v49 = vld [vmem:[%s17806_s28 + $0x58] sm:$0xff] }
 0x21d   :  { %6708 = vmatprep.subr.bf16.mxu0 %v12016_v3  ;;  %7036 = vmatprep.subr.bf16.mxu1 %v12018_v4  ;;  %v12064_v3 = vcombine.high %v1099_v57, %v1103_v58  ;;  %v12066_v4 = vcombine.high %v1100_v11, %v1104_v60  ;;  %v121_v47 = vld [vmem:[%s17806_s28 + $0x70] sm:$0xff] }
 0x220   :  { %6709 = vmatpush1.bf16.msra.mxu0 %v12015_v12  ;;  %7037 = vmatpush1.bf16.msra.mxu1 %v12017_v13  ;;  %v12063_v12 = vcombine.low %v1099_v57, %v1103_v58  ;;  %v12065_v13 = vcombine.low %v1100_v11, %v1104_v60  ;;  %v125_v58 = vld [vmem:[%s17806_s28 + $0x90] sm:$0xff]  ;;  %v126_v60 = vld [vmem:[%s17806_s28 + $0x98] sm:$0xff] }
 0x221   :  { %6710 = vmatprep.subr.bf16.mxu0 %v12024_v1  ;;  %7038 = vmatprep.subr.bf16.mxu1 %v12026_v14  ;;  %v12072_v1 = vcombine.high %v1107_v63, %v1111_v5  ;;  %v12074_v14 = vcombine.high %v1108_v8, %v1112_v10  ;;  %v129_v11 = vld [vmem:[%s17806_s28 + $0xb0] sm:$0xff] }
 0x224   :  { %6711 = vmatpush1.bf16.msra.mxu0 %v12023_v19  ;;  %7039 = vmatpush1.bf16.msra.mxu1 %v12025_v20  ;;  %v12071_v19 = vcombine.low %v1107_v63, %v1111_v5  ;;  %v12073_v20 = vcombine.low %v1108_v8, %v1112_v10  ;;  %v133_v5 = vld [vmem:[%s17806_s28 + $0xd0] sm:$0xff]  ;;  %v134_v10 = vld [vmem:[%s17806_s28 + $0xd8] sm:$0xff] }
 0x225   :  { %6712 = vmatprep.subr.bf16.mxu0 %v12032_v22  ;;  %7040 = vmatprep.subr.bf16.mxu1 %v12034_v24  ;;  %v12080_v22 = vcombine.high %v1115_v53, %v1119_v15  ;;  %v12082_v24 = vcombine.high %v1116_v17, %v1120_v18  ;;  %v137_v8 = vld [vmem:[%s17806_s28 + $0xf0] sm:$0xff] }
 0x228   :  { %6713 = vmatpush1.bf16.msra.mxu0 %v12031_v29  ;;  %7041 = vmatpush1.bf16.msra.mxu1 %v12033_v31  ;;  %v12079_v29 = vcombine.low %v1115_v53, %v1119_v15  ;;  %v12081_v31 = vcombine.low %v1116_v17, %v1120_v18  ;;  %v141_v15 = vld [vmem:[%s17806_s28 + $0x110] sm:$0xff]  ;;  %v146_v18 = vld [vmem:[%s17806_s28 + $0x138] sm:$0xff] }
 0x229   :  { %6714 = vmatprep.subr.bf16.mxu0 %v12040_v32  ;;  %7042 = vmatprep.subr.bf16.mxu1 %v12042_v34  ;;  %v12088_v32 = vcombine.high %v1123_v25, %v1127_v26  ;;  %v12090_v34 = vcombine.high %v1124_v28, %v1128_v59  ;;  %v145_v17 = vld [vmem:[%s17806_s28 + $0x130] sm:$0xff] }
 0x22c   :  { %6715 = vmatpush1.bf16.msra.mxu0 %v12039_v41  ;;  %7043 = vmatpush1.bf16.msra.mxu1 %v12041_v42  ;;  %v12087_v41 = vcombine.low %v1123_v25, %v1127_v26  ;;  %v12089_v42 = vcombine.low %v1124_v28, %v1128_v59  ;;  %v149_v25 = vld [vmem:[%s17806_s28 + $0x150] sm:$0xff]  ;;  %v150_v28 = vld [vmem:[%s17806_s28 + $0x158] sm:$0xff] }
 0x22d   :  { %6716 = vmatprep.subr.bf16.mxu0 %v12048_v44  ;;  %7044 = vmatprep.subr.bf16.mxu1 %v12050_v45  ;;  %v11076_v44 = vcombine.high %v109_v35, %v113_v36  ;;  %v11078_v45 = vcombine.high %v110_v38, %v114_v39  ;;  %v153_v26 = vld [vmem:[%s17806_s28 + $0x170] sm:$0xff]  ;;  %v154_v59 = vld [vmem:[%s17806_s28 + $0x178] sm:$0xff] }
 0x230   :  { %6717 = vmatpush1.bf16.msra.mxu0 %v12047_v52  ;;  %7045 = vmatpush1.bf16.msra.mxu1 %v12049_v54  ;;  %v122_v52 = vld [vmem:[%s17806_s28 + $0x78] sm:$0xff]  ;;  %v11075_v54 = vcombine.low %v109_v35, %v113_v36  ;;  %v157_v35 = vld [vmem:[%s17806_s28 + $0x190] sm:$0xff] }
 0x231   :  { %6718 = vmatprep.subr.bf16.mxu0 %v12056_v55  ;;  %7046 = vmatprep.subr.bf16.mxu1 %v12058_v56  ;;  %v11077_v55 = vcombine.low %v110_v38, %v114_v39  ;;  %v11084_v56 = vcombine.high %v117_v46, %v121_v47  ;;  %v11086_v57 = vcombine.high %v118_v49, %v122_v52  ;;  %v161_v36 = vld [vmem:[%s17806_s28 + $0x1b0] sm:$0xff]  ;;  %v158_v38 = vld [vmem:[%s17806_s28 + $0x198] sm:$0xff] }
 0x232   :  { %v162_v39 = vld [vmem:[%s17806_s28 + $0x1b8] sm:$0xff] }
 0x234   :  { %6719 = vmatpush1.bf16.msra.mxu0 %v12055_v0  ;;  %7047 = vmatpush1.bf16.msra.mxu1 %v12057_v2  ;;  %v130_v0 = vld [vmem:[%s17806_s28 + $0xb8] sm:$0xff]  ;;  %v11083_v2 = vcombine.low %v117_v46, %v121_v47  ;;  %v165_v46 = vld [vmem:[%s17806_s28 + $0x1d0] sm:$0xff] }
 0x235   :  { %6720 = vmatprep.subr.bf16.mxu0 %v12064_v3  ;;  %7048 = vmatprep.subr.bf16.mxu1 %v12066_v4  ;;  %v11085_v3 = vcombine.low %v118_v49, %v122_v52  ;;  %v11092_v4 = vcombine.high %v125_v58, %v129_v11  ;;  %v11094_v63 = vcombine.high %v126_v60, %v130_v0  ;;  %v169_v47 = vld [vmem:[%s17806_s28 + $0x1f0] sm:$0xff]  ;;  %v166_v49 = vld [vmem:[%s17806_s28 + $0x1d8] sm:$0xff] }
 0x236   :  { %v170_v52 = vld [vmem:[%s17806_s28 + $0x1f8] sm:$0xff] }
 0x238   :  { %6721 = vmatpush1.bf16.msra.mxu0 %v12063_v12  ;;  %7049 = vmatpush1.bf16.msra.mxu1 %v12065_v13  ;;  %v138_v12 = vld [vmem:[%s17806_s28 + $0xf8] sm:$0xff]  ;;  %v11091_v13 = vcombine.low %v125_v58, %v129_v11  ;;  %v173_v58 = vld [vmem:[%s17806_s28 + $0x210] sm:$0xff] }
 0x239   :  { %6722 = vmatprep.subr.bf16.mxu0 %v12072_v1  ;;  %7050 = vmatprep.subr.bf16.mxu1 %v12074_v14  ;;  %v11093_v1 = vcombine.low %v126_v60, %v130_v0  ;;  %v11100_v14 = vcombine.high %v133_v5, %v137_v8  ;;  %v11102_v53 = vcombine.high %v134_v10, %v138_v12  ;;  %v177_v11 = vld [vmem:[%s17806_s28 + $0x230] sm:$0xff]  ;;  %v174_v60 = vld [vmem:[%s17806_s28 + $0x218] sm:$0xff] }
 0x23a   :  { %v178_v0 = vld [vmem:[%s17806_s28 + $0x238] sm:$0xff] }
 0x23c   :  { %6723 = vmatpush1.bf16.msra.mxu0 %v12071_v19  ;;  %7051 = vmatpush1.bf16.msra.mxu1 %v12073_v20  ;;  %v11099_v19 = vcombine.low %v133_v5, %v137_v8  ;;  %v11101_v20 = vcombine.low %v134_v10, %v138_v12  ;;  %v181_v5 = vld [vmem:[%s17806_s28 + $0x250] sm:$0xff]  ;;  %v182_v10 = vld [vmem:[%s17806_s28 + $0x258] sm:$0xff] }
 0x23d   :  { %6724 = vmatprep.subr.bf16.mxu0 %v12080_v22  ;;  %7052 = vmatprep.subr.bf16.mxu1 %v12082_v24  ;;  %v11108_v22 = vcombine.high %v141_v15, %v145_v17  ;;  %v185_v8 = vld [vmem:[%s17806_s28 + $0x270] sm:$0xff]  ;;  %v186_v12 = vld [vmem:[%s17806_s28 + $0x278] sm:$0xff] }
 0x240   :  { %6725 = vmatpush1.bf16.msra.mxu0 %v12079_v29  ;;  %7053 = vmatpush1.bf16.msra.mxu1 %v12081_v31  ;;  %v11107_v29 = vcombine.low %v141_v15, %v145_v17  ;;  %v189_v15 = vld [vmem:[%s17806_s28 + $0x290] sm:$0xff] }
 0x241   :  { %6726 = vmatprep.subr.bf16.mxu0 %v12088_v32  ;;  %7054 = vmatprep.subr.bf16.mxu1 %v12090_v34  ;;  %v11116_v32 = vcombine.high %v149_v25, %v153_v26  ;;  %v11118_v34 = vcombine.high %v150_v28, %v154_v59  ;;  %v193_v17 = vld [vmem:[%s17806_s28 + $0x2b0] sm:$0xff] }
 0x244   :  { %6727 = vmatpush1.bf16.msra.mxu0 %v12087_v41  ;;  %7055 = vmatpush1.bf16.msra.mxu1 %v12089_v42  ;;  %v11115_v41 = vcombine.low %v149_v25, %v153_v26  ;;  %v11117_v42 = vcombine.low %v150_v28, %v154_v59  ;;  %v197_v25 = vld [vmem:[%s17806_s28 + $0x2d0] sm:$0xff]  ;;  %v198_v28 = vld [vmem:[%s17806_s28 + $0x2d8] sm:$0xff] }
 0x245   :  { %7065 = vmatprep.subr.bf16.mxu0 %v11076_v44  ;;  %7393 = vmatprep.subr.bf16.mxu1 %v11078_v45  ;;  %v11124_v44 = vcombine.high %v157_v35, %v161_v36  ;;  %v11126_v45 = vcombine.high %v158_v38, %v162_v39  ;;  %v201_v26 = vld [vmem:[%s17806_s28 + $0x2f0] sm:$0xff]  ;;  %v202_v59 = vld [vmem:[%s17806_s28 + $0x2f8] sm:$0xff] }
 0x247   :  { %6729 = vmatmul.mubr.bf16.vlgmr.msra.gmra.mrb[0].mxu0 %v15266_v48  ;;  %7057 = vmatmul.mubr.bf16.vlgmr.msra.gmra.mrb[0].mxu1 %v15266_v48 }
 0x248   :  { %7066 = vmatpush1.bf16.msra.mxu0 %v11075_v54  ;;  %7394 = vmatpush1.bf16.msra.mxu1 %v11077_v55  ;;  %v11123_v54 = vcombine.low %v157_v35, %v161_v36  ;;  %v11125_v55 = vcombine.low %v158_v38, %v162_v39  ;;  %v205_v35 = vld [vmem:[%s17806_s28 + $0x310] sm:$0xff]  ;;  %v206_v38 = vld [vmem:[%s17806_s28 + $0x318] sm:$0xff] }
 0x249   :  { %7067 = vmatprep.subr.bf16.mxu0 %v11084_v56  ;;  %7395 = vmatprep.subr.bf16.mxu1 %v11086_v57  ;;  %v11132_v56 = vcombine.high %v165_v46, %v169_v47  ;;  %v11134_v57 = vcombine.high %v166_v49, %v170_v52  ;;  %v209_v36 = vld [vmem:[%s17806_s28 + $0x330] sm:$0xff]  ;;  %v210_v39 = vld [vmem:[%s17806_s28 + $0x338] sm:$0xff] }
 0x24a   :  { %7097 = vmatprep.mubr.bf16.mxu0 %v13702_v9  ;;  %7425 = vmatprep.mubr.bf16.mxu1 %v13702_v9  ;;  %v142_v9 = vld [vmem:[%s17806_s28 + $0x118] sm:$0xff] }
 0x24b   :  { %v11110_v24 = vcombine.high %v142_v9, %v146_v18  ;;  %v11109_v31 = vcombine.low %v142_v9, %v146_v18  ;;  %v190_v9 = vld [vmem:[%s17806_s28 + $0x298] sm:$0xff] }
 0x24c   :  { %7068 = vmatpush1.bf16.msra.mxu0 %v11083_v2  ;;  %7396 = vmatpush1.bf16.msra.mxu1 %v11085_v3  ;;  %v11131_v2 = vcombine.low %v165_v46, %v169_v47  ;;  %v11133_v3 = vcombine.low %v166_v49, %v170_v52  ;;  %v194_v18 = vld [vmem:[%s17806_s28 + $0x2b8] sm:$0xff]  ;;  %v213_v46 = vld [vmem:[%s17806_s28 + $0x350] sm:$0xff] }
 0x24d   :  { %7069 = vmatprep.subr.bf16.mxu0 %v11092_v4  ;;  %7397 = vmatprep.subr.bf16.mxu1 %v11094_v63  ;;  %v11140_v4 = vcombine.high %v173_v58, %v177_v11  ;;  %v11142_v63 = vcombine.high %v174_v60, %v178_v0  ;;  %v217_v47 = vld [vmem:[%s17806_s28 + $0x370] sm:$0xff]  ;;  %v214_v49 = vld [vmem:[%s17806_s28 + $0x358] sm:$0xff] }
 0x24e   :  { %v218_v52 = vld [vmem:[%s17806_s28 + $0x378] sm:$0xff] }
 0x250   :  { %7070 = vmatpush1.bf16.msra.mxu0 %v11091_v13  ;;  %7398 = vmatpush1.bf16.msra.mxu1 %v11093_v1  ;;  %v11139_v13 = vcombine.low %v173_v58, %v177_v11  ;;  %v11141_v1 = vcombine.low %v174_v60, %v178_v0  ;;  %v221_v58 = vld [vmem:[%s17806_s28 + $0x390] sm:$0xff]  ;;  %v222_v60 = vld [vmem:[%s17806_s28 + $0x398] sm:$0xff] }
 0x251   :  { %7071 = vmatprep.subr.bf16.mxu0 %v11100_v14  ;;  %7399 = vmatprep.subr.bf16.mxu1 %v11102_v53  ;;  %v11148_v14 = vcombine.high %v181_v5, %v185_v8  ;;  %v11150_v53 = vcombine.high %v182_v10, %v186_v12  ;;  %v225_v11 = vld [vmem:[%s17806_s28 + $0x3b0] sm:$0xff]  ;;  %v226_v0 = vld [vmem:[%s17806_s28 + $0x3b8] sm:$0xff] }
 0x254   :  { %7072 = vmatpush1.bf16.msra.mxu0 %v11099_v19  ;;  %7400 = vmatpush1.bf16.msra.mxu1 %v11101_v20  ;;  %v11147_v19 = vcombine.low %v181_v5, %v185_v8  ;;  %v11149_v20 = vcombine.low %v182_v10, %v186_v12  ;;  %v229_v5 = vld [vmem:[%s17806_s28 + $0x3d0] sm:$0xff]  ;;  %v230_v10 = vld [vmem:[%s17806_s28 + $0x3d8] sm:$0xff] }
 0x255   :  { %7073 = vmatprep.subr.bf16.mxu0 %v11108_v22  ;;  %7401 = vmatprep.subr.bf16.mxu1 %v11110_v24  ;;  %v11156_v22 = vcombine.high %v189_v15, %v193_v17  ;;  %v11158_v24 = vcombine.high %v190_v9, %v194_v18  ;;  %v233_v8 = vld [vmem:[%s17806_s28 + $0x3f0] sm:$0xff]  ;;  %v234_v12 = vld [vmem:[%s17806_s28 + $0x3f8] sm:$0xff] }
 0x258   :  { %7074 = vmatpush1.bf16.msra.mxu0 %v11107_v29  ;;  %7402 = vmatpush1.bf16.msra.mxu1 %v11109_v31  ;;  %v11155_v29 = vcombine.low %v189_v15, %v193_v17  ;;  %v11157_v31 = vcombine.low %v190_v9, %v194_v18  ;;  %v237_v15 = vld [vmem:[%s17806_s28 + $0x410] sm:$0xff]  ;;  %v238_v9 = vld [vmem:[%s17806_s28 + $0x418] sm:$0xff] }
 0x259   :  { %7075 = vmatprep.subr.bf16.mxu0 %v11116_v32  ;;  %7403 = vmatprep.subr.bf16.mxu1 %v11118_v34  ;;  %v11164_v32 = vcombine.high %v197_v25, %v201_v26  ;;  %v11166_v34 = vcombine.high %v198_v28, %v202_v59  ;;  %v241_v17 = vld [vmem:[%s17806_s28 + $0x430] sm:$0xff]  ;;  %v242_v18 = vld [vmem:[%s17806_s28 + $0x438] sm:$0xff] }
 0x25c   :  { %7076 = vmatpush1.bf16.msra.mxu0 %v11115_v41  ;;  %7404 = vmatpush1.bf16.msra.mxu1 %v11117_v42  ;;  %v11163_v41 = vcombine.low %v197_v25, %v201_v26  ;;  %v11165_v42 = vcombine.low %v198_v28, %v202_v59  ;;  %v245_v25 = vld [vmem:[%s17806_s28 + $0x450] sm:$0xff]  ;;  %v246_v28 = vld [vmem:[%s17806_s28 + $0x458] sm:$0xff] }
 0x25d   :  { %7077 = vmatprep.subr.bf16.mxu0 %v11124_v44  ;;  %7405 = vmatprep.subr.bf16.mxu1 %v11126_v45  ;;  %v11172_v44 = vcombine.high %v205_v35, %v209_v36  ;;  %v11174_v45 = vcombine.high %v206_v38, %v210_v39  ;;  %v249_v26 = vld [vmem:[%s17806_s28 + $0x470] sm:$0xff]  ;;  %v250_v59 = vld [vmem:[%s17806_s28 + $0x478] sm:$0xff] }
 0x260   :  { %7078 = vmatpush1.bf16.msra.mxu0 %v11123_v54  ;;  %7406 = vmatpush1.bf16.msra.mxu1 %v11125_v55  ;;  %v11171_v54 = vcombine.low %v205_v35, %v209_v36  ;;  %v11173_v55 = vcombine.low %v206_v38, %v210_v39  ;;  %v253_v35 = vld [vmem:[%s17806_s28 + $0x490] sm:$0xff]  ;;  %v254_v38 = vld [vmem:[%s17806_s28 + $0x498] sm:$0xff] }
 0x261   :  { %7079 = vmatprep.subr.bf16.mxu0 %v11132_v56  ;;  %7407 = vmatprep.subr.bf16.mxu1 %v11134_v57  ;;  %v11180_v56 = vcombine.high %v213_v46, %v217_v47  ;;  %v11182_v57 = vcombine.high %v214_v49, %v218_v52  ;;  %v257_v36 = vld [vmem:[%s17806_s28 + $0x4b0] sm:$0xff]  ;;  %v258_v39 = vld [vmem:[%s17806_s28 + $0x4b8] sm:$0xff] }
 0x264   :  { %7080 = vmatpush1.bf16.msra.mxu0 %v11131_v2  ;;  %7408 = vmatpush1.bf16.msra.mxu1 %v11133_v3  ;;  %v11179_v2 = vcombine.low %v213_v46, %v217_v47  ;;  %v11181_v3 = vcombine.low %v214_v49, %v218_v52  ;;  %v261_v46 = vld [vmem:[%s17806_s28 + $0x4d0] sm:$0xff]  ;;  %v266_v49 = vld [vmem:[%s17806_s28 + $0x4f8] sm:$0xff]  ;;  %v11219_v52 = vcombine.low %v253_v35, %v257_v36 }
 0x265   :  { %7081 = vmatprep.subr.bf16.mxu0 %v11140_v4  ;;  %7409 = vmatprep.subr.bf16.mxu1 %v11142_v63  ;;  %v11188_v4 = vcombine.high %v221_v58, %v225_v11  ;;  %v11190_v63 = vcombine.high %v222_v60, %v226_v0  ;;  %v265_v47 = vld [vmem:[%s17806_s28 + $0x4f0] sm:$0xff] }
 0x268   :  { %7082 = vmatpush1.bf16.msra.mxu0 %v11139_v13  ;;  %7410 = vmatpush1.bf16.msra.mxu1 %v11141_v1  ;;  %v11187_v13 = vcombine.low %v221_v58, %v225_v11  ;;  %v11189_v1 = vcombine.low %v222_v60, %v226_v0  ;;  %v273_v58 = vld [vmem:[%s17806_s28 + $0x530] sm:$0xff]  ;;  %v274_v11 = vld [vmem:[%s17806_s28 + $0x538] sm:$0xff]  ;;  %v11227_v60 = vcombine.low %v261_v46, %v265_v47 }
 0x269   :  { %7083 = vmatprep.subr.bf16.mxu0 %v11148_v14  ;;  %7411 = vmatprep.subr.bf16.mxu1 %v11150_v53  ;;  %v11196_v14 = vcombine.high %v229_v5, %v233_v8  ;;  %v11198_v53 = vcombine.high %v230_v10, %v234_v12 }
 0x26c   :  { %7084 = vmatpush1.bf16.msra.mxu0 %v11147_v19  ;;  %7412 = vmatpush1.bf16.msra.mxu1 %v11149_v20  ;;  %v11195_v19 = vcombine.low %v229_v5, %v233_v8  ;;  %v11197_v20 = vcombine.low %v230_v10, %v234_v12  ;;  %v278_v5 = vld [vmem:[%s17806_s28 + $0x558] sm:$0xff] }
 0x26d   :  { %7085 = vmatprep.subr.bf16.mxu0 %v11156_v22  ;;  %7413 = vmatprep.subr.bf16.mxu1 %v11158_v24  ;;  %v11204_v22 = vcombine.high %v237_v15, %v241_v17  ;;  %v11206_v24 = vcombine.high %v238_v9, %v242_v18  ;;  %v282_v8 = vld [vmem:[%s17806_s28 + $0x578] sm:$0xff] }
 0x270   :  { %7086 = vmatpush1.bf16.msra.mxu0 %v11155_v29  ;;  %7414 = vmatpush1.bf16.msra.mxu1 %v11157_v31  ;;  %v11203_v29 = vcombine.low %v237_v15, %v241_v17  ;;  %v11205_v31 = vcombine.low %v238_v9, %v242_v18  ;;  %v286_v15 = vld [vmem:[%s17806_s28 + $0x598] sm:$0xff]  ;;  %v11245_v18 = vcombine.low %v278_v5, %v282_v8 }
 0x271   :  { %7087 = vmatprep.subr.bf16.mxu0 %v11164_v32  ;;  %7415 = vmatprep.subr.bf16.mxu1 %v11166_v34  ;;  %v11212_v32 = vcombine.high %v245_v25, %v249_v26  ;;  %v11214_v34 = vcombine.high %v246_v28, %v250_v59  ;;  %v290_v17 = vld [vmem:[%s17806_s28 + $0x5b8] sm:$0xff] }
 0x274   :  { %7088 = vmatpush1.bf16.msra.mxu0 %v11163_v41  ;;  %7416 = vmatpush1.bf16.msra.mxu1 %v11165_v42  ;;  %v11211_v41 = vcombine.low %v245_v25, %v249_v26  ;;  %v11213_v42 = vcombine.low %v246_v28, %v250_v59  ;;  %v294_v25 = vld [vmem:[%s17806_s28 + $0x5d8] sm:$0xff]  ;;  %v11253_v59 = vcombine.low %v286_v15, %v290_v17 }
 0x275   :  { %7089 = vmatprep.subr.bf16.mxu0 %v11172_v44  ;;  %7417 = vmatprep.subr.bf16.mxu1 %v11174_v45  ;;  %v11220_v44 = vcombine.high %v253_v35, %v257_v36  ;;  %v11222_v45 = vcombine.high %v254_v38, %v258_v39  ;;  %v298_v26 = vld [vmem:[%s17806_s28 + $0x5f8] sm:$0xff] }
 0x276   :  { %v302_v35 = vld [vmem:[%s17806_s28 + $0x618] sm:$0xff] }
 0x277   :  { %v306_v36 = vld [vmem:[%s17806_s28 + $0x638] sm:$0xff] }
 0x278   :  { %7090 = vmatpush1.bf16.msra.mxu0 %v11171_v54  ;;  %7418 = vmatpush1.bf16.msra.mxu1 %v11173_v55  ;;  %v11221_v54 = vcombine.low %v254_v38, %v258_v39  ;;  %v11228_v55 = vcombine.high %v261_v46, %v265_v47  ;;  %v11261_v39 = vcombine.low %v294_v25, %v298_v26  ;;  %v310_v46 = vld [vmem:[%s17806_s28 + $0x658] sm:$0xff] }
 0x279   :  { %7091 = vmatprep.subr.bf16.mxu0 %v11180_v56  ;;  %7419 = vmatprep.subr.bf16.mxu1 %v11182_v57  ;;  %v269_v57 = vld [vmem:[%s17806_s28 + $0x510] sm:$0xff]  ;;  %v314_v47 = vld [vmem:[%s17806_s28 + $0x678] sm:$0xff] }
 0x27a   :  { %v11235_v10 = vcombine.low %v269_v57, %v273_v58 }
 0x27c   :  { %7092 = vmatpush1.bf16.msra.mxu0 %v11179_v2  ;;  %7420 = vmatpush1.bf16.msra.mxu1 %v11181_v3  ;;  %v11236_v2 = vcombine.high %v269_v57, %v273_v58  ;;  %v318_v57 = vld [vmem:[%s17806_s28 + $0x698] sm:$0xff] }
 0x27d   :  { %7093 = vmatprep.subr.bf16.mxu0 %v11188_v4  ;;  %7421 = vmatprep.subr.bf16.mxu1 %v11190_v63  ;;  %v277_v4 = vld [vmem:[%s17806_s28 + $0x550] sm:$0xff]  ;;  %v322_v58 = vld [vmem:[%s17806_s28 + $0x6b8] sm:$0xff] }
 0x27e   :  { %v281_v63 = vld [vmem:[%s17806_s28 + $0x570] sm:$0xff] }
 0x27f   :  { %v11243_v9 = vcombine.low %v277_v4, %v281_v63 }
 0x280   :  { %7094 = vmatpush1.bf16.msra.mxu0 %v11187_v13  ;;  %7422 = vmatpush1.bf16.msra.mxu1 %v11189_v1  ;;  %v11244_v13 = vcombine.high %v277_v4, %v281_v63  ;;  %v11246_v1 = vcombine.high %v278_v5, %v282_v8  ;;  %v326_v4 = vld [vmem:[%s17806_s28 + $0x6d8] sm:$0xff]  ;;  %v11285_v8 = vcombine.low %v318_v57, %v322_v58 }
 0x281   :  { %7095 = vmatprep.subr.bf16.mxu0 %v11196_v14  ;;  %7423 = vmatprep.subr.bf16.mxu1 %v11198_v53  ;;  %v285_v14 = vld [vmem:[%s17806_s28 + $0x590] sm:$0xff]  ;;  %v330_v63 = vld [vmem:[%s17806_s28 + $0x6f8] sm:$0xff] }
 0x282   :  { %v289_v53 = vld [vmem:[%s17806_s28 + $0x5b0] sm:$0xff] }
 0x283   :  { %v11251_v28 = vcombine.low %v285_v14, %v289_v53 }
 0x284   :  { %7096 = vmatpush1.bf16.msra.mxu0 %v11195_v19  ;;  %7424 = vmatpush1.bf16.msra.mxu1 %v11197_v20  ;;  %v11252_v19 = vcombine.high %v285_v14, %v289_v53  ;;  %v11254_v20 = vcombine.high %v286_v15, %v290_v17  ;;  %v334_v14 = vld [vmem:[%s17806_s28 + $0x718] sm:$0xff]  ;;  %v11293_v17 = vcombine.low %v326_v4, %v330_v63 }
 0x285   :  { %7106 = vmatprep.subr.bf16.mxu0 %v11204_v22  ;;  %7434 = vmatprep.subr.bf16.mxu1 %v11206_v24  ;;  %v293_v22 = vld [vmem:[%s17806_s28 + $0x5d0] sm:$0xff]  ;;  %v338_v53 = vld [vmem:[%s17806_s28 + $0x738] sm:$0xff] }
 0x286   :  { %v297_v24 = vld [vmem:[%s17806_s28 + $0x5f0] sm:$0xff] }
 0x287   :  { %7098 = vmatmul.mubr.bf16.vlgmr.msra.gmra.mrb[4].mxu0 %v13816_v23  ;;  %7426 = vmatmul.mubr.bf16.vlgmr.msra.gmra.mrb[4].mxu1 %v13816_v23  ;;  %v262_v23 = vld [vmem:[%s17806_s28 + $0x4d8] sm:$0xff]  ;;  %v11259_v38 = vcombine.low %v293_v22, %v297_v24 }
 0x288   :  { %7107 = vmatpush1.bf16.msra.mxu0 %v11203_v29  ;;  %7435 = vmatpush1.bf16.msra.mxu1 %v11205_v31  ;;  %v11230_v56 = vcombine.high %v262_v23, %v266_v49  ;;  %v11229_v0 = vcombine.low %v262_v23, %v266_v49  ;;  %v11260_v29 = vcombine.high %v293_v22, %v297_v24  ;;  %v342_v22 = vld [vmem:[%s17806_s28 + $0x758] sm:$0xff] }
 0x289   :  { %7108 = vmatprep.subr.bf16.mxu0 %v11212_v32  ;;  %7436 = vmatprep.subr.bf16.mxu1 %v11214_v34  ;;  %v11262_v31 = vcombine.high %v294_v25, %v298_v26  ;;  %v301_v32 = vld [vmem:[%s17806_s28 + $0x610] sm:$0xff]  ;;  %v11269_v49 = vcombine.low %v302_v35, %v306_v36  ;;  %v346_v24 = vld [vmem:[%s17806_s28 + $0x778] sm:$0xff]  ;;  %v11301_v26 = vcombine.low %v334_v14, %v338_v53 }
 0x28a   :  { %7138 = vmatprep.mubr.bf16.mxu0 %v13838_v33  ;;  %7466 = vmatprep.mubr.bf16.mxu1 %v13838_v33  ;;  %v270_v33 = vld [vmem:[%s17806_s28 + $0x518] sm:$0xff]  ;;  %v305_v34 = vld [vmem:[%s17806_s28 + $0x630] sm:$0xff] }
 0x28b   :  { %v11238_v3 = vcombine.high %v270_v33, %v274_v11  ;;  %v11237_v12 = vcombine.low %v270_v33, %v274_v11  ;;  %v11267_v23 = vcombine.low %v301_v32, %v305_v34  ;;  %v11277_v11 = vcombine.low %v310_v46, %v314_v47 }
 0x28c   :  { %7109 = vmatpush1.bf16.msra.mxu0 %v11211_v41  ;;  %7437 = vmatpush1.bf16.msra.mxu1 %v11213_v42  ;;  %v11268_v41 = vcombine.high %v301_v32, %v305_v34  ;;  %v11270_v42 = vcombine.high %v302_v35, %v306_v36  ;;  %v350_v32 = vld [vmem:[%s17806_s28 + $0x798] sm:$0xff]  ;;  %v11309_v36 = vcombine.low %v342_v22, %v346_v24 }
 0x28d   :  { %7110 = vmatprep.subr.bf16.mxu0 %v11220_v44  ;;  %7438 = vmatprep.subr.bf16.mxu1 %v11222_v45  ;;  %v309_v44 = vld [vmem:[%s17806_s28 + $0x650] sm:$0xff]  ;;  %v354_v34 = vld [vmem:[%s17806_s28 + $0x7b8] sm:$0xff] }
 0x28e   :  { %v313_v45 = vld [vmem:[%s17806_s28 + $0x670] sm:$0xff] }
 0x28f   :  { %v11275_v33 = vcombine.low %v309_v44, %v313_v45 }
 0x290   :  { %7111 = vmatpush1.bf16.msra.mxu0 %v11219_v52  ;;  %7439 = vmatpush1.bf16.msra.mxu1 %v11221_v54  ;;  %v11276_v52 = vcombine.high %v309_v44, %v313_v45  ;;  %v11278_v54 = vcombine.high %v310_v46, %v314_v47  ;;  %v358_v44 = vld [vmem:[%s17806_s28 + $0x7d8] sm:$0xff]  ;;  %v11317_v47 = vcombine.low %v350_v32, %v354_v34 }
 0x291   :  { %7112 = vmatprep.subr.bf16.mxu0 %v11228_v55  ;;  %7440 = vmatprep.subr.bf16.mxu1 %v11230_v56  ;;  %v317_v55 = vld [vmem:[%s17806_s28 + $0x690] sm:$0xff]  ;;  %v362_v45 = vld [vmem:[%s17806_s28 + $0x7f8] sm:$0xff] }
 0x292   :  { %v321_v56 = vld [vmem:[%s17806_s28 + $0x6b0] sm:$0xff] }
 0x293   :  { %v11283_v5 = vcombine.low %v317_v55, %v321_v56 }
 0x294   :  { %7113 = vmatpush1.bf16.msra.mxu0 %v11227_v60  ;;  %7441 = vmatpush1.bf16.msra.mxu1 %v11229_v0  ;;  %v11284_v60 = vcombine.high %v317_v55, %v321_v56  ;;  %v11286_v0 = vcombine.high %v318_v57, %v322_v58  ;;  %v366_v55 = vld [vmem:[%s17806_s28 + $0x818] sm:$0xff]  ;;  %v11325_v58 = vcombine.low %v358_v44, %v362_v45 }
 0x295   :  { %7114 = vmatprep.subr.bf16.mxu0 %v11236_v2  ;;  %7442 = vmatprep.subr.bf16.mxu1 %v11238_v3  ;;  %v325_v2 = vld [vmem:[%s17806_s28 + $0x6d0] sm:$0xff]  ;;  %v370_v56 = vld [vmem:[%s17806_s28 + $0x838] sm:$0xff] }
 0x296   :  { %v329_v3 = vld [vmem:[%s17806_s28 + $0x6f0] sm:$0xff] }
 0x297   :  { %v11291_v15 = vcombine.low %v325_v2, %v329_v3 }
 0x298   :  { %7115 = vmatpush1.bf16.msra.mxu0 %v11235_v10  ;;  %7443 = vmatpush1.bf16.msra.mxu1 %v11237_v12  ;;  %v11292_v10 = vcombine.high %v325_v2, %v329_v3  ;;  %v11294_v12 = vcombine.high %v326_v4, %v330_v63  ;;  %v374_v2 = vld [vmem:[%s17806_s28 + $0x858] sm:$0xff]  ;;  %v11333_v63 = vcombine.low %v366_v55, %v370_v56 }
 0x299   :  { %7116 = vmatprep.subr.bf16.mxu0 %v11244_v13  ;;  %7444 = vmatprep.subr.bf16.mxu1 %v11246_v1  ;;  %v333_v13 = vld [vmem:[%s17806_s28 + $0x710] sm:$0xff]  ;;  %v378_v3 = vld [vmem:[%s17806_s28 + $0x878] sm:$0xff] }
 0x29a   :  { %v337_v1 = vld [vmem:[%s17806_s28 + $0x730] sm:$0xff] }
 0x29b   :  { %v11299_v25 = vcombine.low %v333_v13, %v337_v1 }
 0x29c   :  { %7117 = vmatpush1.bf16.msra.mxu0 %v11243_v9  ;;  %7445 = vmatpush1.bf16.msra.mxu1 %v11245_v18  ;;  %v11300_v9 = vcombine.high %v333_v13, %v337_v1  ;;  %v11302_v18 = vcombine.high %v334_v14, %v338_v53  ;;  %v382_v13 = vld [vmem:[%s17806_s28 + $0x898] sm:$0xff]  ;;  %v11341_v53 = vcombine.low %v374_v2, %v378_v3 }
 0x29d   :  { %7118 = vmatprep.subr.bf16.mxu0 %v11252_v19  ;;  %7446 = vmatprep.subr.bf16.mxu1 %v11254_v20  ;;  %v341_v19 = vld [vmem:[%s17806_s28 + $0x750] sm:$0xff]  ;;  %v386_v1 = vld [vmem:[%s17806_s28 + $0x8b8] sm:$0xff] }
 0x29e   :  { %v345_v20 = vld [vmem:[%s17806_s28 + $0x770] sm:$0xff] }
 0x29f   :  { %v11307_v35 = vcombine.low %v341_v19, %v345_v20 }
 0x2a0   :  { %7119 = vmatpush1.bf16.msra.mxu0 %v11251_v28  ;;  %7447 = vmatpush1.bf16.msra.mxu1 %v11253_v59  ;;  %v11308_v28 = vcombine.high %v341_v19, %v345_v20  ;;  %v11310_v59 = vcombine.high %v342_v22, %v346_v24  ;;  %v394_v19 = vld [vmem:[%s17806_s28 + $0x8f8] sm:$0xff]  ;;  %v11349_v22 = vcombine.low %v382_v13, %v386_v1 }
 0x2a1   :  { %7120 = vmatprep.subr.bf16.mxu0 %v11260_v29  ;;  %7448 = vmatprep.subr.bf16.mxu1 %v11262_v31  ;;  %v349_v29 = vld [vmem:[%s17806_s28 + $0x790] sm:$0xff] }
 0x2a2   :  { %v353_v31 = vld [vmem:[%s17806_s28 + $0x7b0] sm:$0xff] }
 0x2a3   :  { %v11315_v46 = vcombine.low %v349_v29, %v353_v31 }
 0x2a4   :  { %7121 = vmatpush1.bf16.msra.mxu0 %v11259_v38  ;;  %7449 = vmatpush1.bf16.msra.mxu1 %v11261_v39  ;;  %v11316_v38 = vcombine.high %v349_v29, %v353_v31  ;;  %v11318_v39 = vcombine.high %v350_v32, %v354_v34 }
 0x2a5   :  { %7122 = vmatprep.subr.bf16.mxu0 %v11268_v41  ;;  %7450 = vmatprep.subr.bf16.mxu1 %v11270_v42  ;;  %v357_v41 = vld [vmem:[%s17806_s28 + $0x7d0] sm:$0xff] }
 0x2a6   :  { %v361_v42 = vld [vmem:[%s17806_s28 + $0x7f0] sm:$0xff] }
 0x2a7   :  { %v11323_v57 = vcombine.low %v357_v41, %v361_v42 }
 0x2a8   :  { %7123 = vmatpush1.bf16.msra.mxu0 %v11267_v23  ;;  %7451 = vmatpush1.bf16.msra.mxu1 %v11269_v49  ;;  %v11324_v23 = vcombine.high %v357_v41, %v361_v42  ;;  %v11326_v49 = vcombine.high %v358_v44, %v362_v45 }
 0x2a9   :  { %7124 = vmatprep.subr.bf16.mxu0 %v11276_v52  ;;  %7452 = vmatprep.subr.bf16.mxu1 %v11278_v54  ;;  %v365_v52 = vld [vmem:[%s17806_s28 + $0x810] sm:$0xff] }
 0x2aa   :  { %v369_v54 = vld [vmem:[%s17806_s28 + $0x830] sm:$0xff] }
 0x2ab   :  { %v11331_v4 = vcombine.low %v365_v52, %v369_v54 }
 0x2ac   :  { %7125 = vmatpush1.bf16.msra.mxu0 %v11275_v33  ;;  %7453 = vmatpush1.bf16.msra.mxu1 %v11277_v11  ;;  %v11332_v33 = vcombine.high %v365_v52, %v369_v54  ;;  %v11334_v11 = vcombine.high %v366_v55, %v370_v56 }
 0x2ad   :  { %7126 = vmatprep.subr.bf16.mxu0 %v11284_v60  ;;  %7454 = vmatprep.subr.bf16.mxu1 %v11286_v0  ;;  %v373_v60 = vld [vmem:[%s17806_s28 + $0x850] sm:$0xff] }
 0x2ae   :  { %v377_v0 = vld [vmem:[%s17806_s28 + $0x870] sm:$0xff] }
 0x2af   :  { %v11339_v14 = vcombine.low %v373_v60, %v377_v0 }
 0x2b0   :  { %7127 = vmatpush1.bf16.msra.mxu0 %v11283_v5  ;;  %7455 = vmatpush1.bf16.msra.mxu1 %v11285_v8  ;;  %v11340_v5 = vcombine.high %v373_v60, %v377_v0  ;;  %v11342_v8 = vcombine.high %v374_v2, %v378_v3 }
 0x2b1   :  { %7128 = vmatprep.subr.bf16.mxu0 %v11292_v10  ;;  %7456 = vmatprep.subr.bf16.mxu1 %v11294_v12  ;;  %v381_v10 = vld [vmem:[%s17806_s28 + $0x890] sm:$0xff] }
 0x2b2   :  { %v385_v12 = vld [vmem:[%s17806_s28 + $0x8b0] sm:$0xff] }
 0x2b3   :  { %v11347_v20 = vcombine.low %v381_v10, %v385_v12 }
 0x2b4   :  { %7129 = vmatpush1.bf16.msra.mxu0 %v11291_v15  ;;  %7457 = vmatpush1.bf16.msra.mxu1 %v11293_v17  ;;  %v11348_v15 = vcombine.high %v381_v10, %v385_v12  ;;  %v11350_v17 = vcombine.high %v382_v13, %v386_v1 }
 0x2b5   :  { %7130 = vmatprep.subr.bf16.mxu0 %v11300_v9  ;;  %7458 = vmatprep.subr.bf16.mxu1 %v11302_v18  ;;  %v389_v9 = vld [vmem:[%s17806_s28 + $0x8d0] sm:$0xff] }
 0x2b6   :  { %v393_v18 = vld [vmem:[%s17806_s28 + $0x8f0] sm:$0xff] }
 0x2b7   :  { %v11356_v24 = vcombine.high %v389_v9, %v393_v18  ;;  %v11355_v29 = vcombine.low %v389_v9, %v393_v18 }
 0x2b8   :  { %7131 = vmatpush1.bf16.msra.mxu0 %v11299_v25  ;;  %7459 = vmatpush1.bf16.msra.mxu1 %v11301_v26  ;;  %v397_v26 = vld [vmem:[%s17806_s28 + $0x910] sm:$0xff] }
 0x2b9   :  { %7132 = vmatprep.subr.bf16.mxu0 %v11308_v28  ;;  %7460 = vmatprep.subr.bf16.mxu1 %v11310_v59  ;;  %v401_v28 = vld [vmem:[%s17806_s28 + $0x930] sm:$0xff]  ;;  %v402_v59 = vld [vmem:[%s17806_s28 + $0x938] sm:$0xff] }
 0x2ba   :  { %v11364_v32 = vcombine.high %v397_v26, %v401_v28  ;;  %v11363_v41 = vcombine.low %v397_v26, %v401_v28 }
 0x2bc   :  { %7133 = vmatpush1.bf16.msra.mxu0 %v11307_v35  ;;  %7461 = vmatpush1.bf16.msra.mxu1 %v11309_v36  ;;  %v405_v35 = vld [vmem:[%s17806_s28 + $0x950] sm:$0xff] }
 0x2bd   :  { %7134 = vmatprep.subr.bf16.mxu0 %v11316_v38  ;;  %7462 = vmatprep.subr.bf16.mxu1 %v11318_v39  ;;  %v409_v36 = vld [vmem:[%s17806_s28 + $0x970] sm:$0xff]  ;;  %v406_v38 = vld [vmem:[%s17806_s28 + $0x958] sm:$0xff] }
 0x2be   :  { %v410_v39 = vld [vmem:[%s17806_s28 + $0x978] sm:$0xff]  ;;  %v11372_v44 = vcombine.high %v405_v35, %v409_v36  ;;  %v11371_v52 = vcombine.low %v405_v35, %v409_v36 }
 0x2bf   :  { %v11374_v45 = vcombine.high %v406_v38, %v410_v39  ;;  %v11373_v54 = vcombine.low %v406_v38, %v410_v39 }
 0x2c0   :  { %7135 = vmatpush1.bf16.msra.mxu0 %v11315_v46  ;;  %7463 = vmatpush1.bf16.msra.mxu1 %v11317_v47  ;;  %v413_v46 = vld [vmem:[%s17806_s28 + $0x990] sm:$0xff] }
 0x2c1   :  { %7136 = vmatprep.subr.bf16.mxu0 %v11324_v23  ;;  %7464 = vmatprep.subr.bf16.mxu1 %v11326_v49  ;;  %v417_v47 = vld [vmem:[%s17806_s28 + $0x9b0] sm:$0xff]  ;;  %v414_v23 = vld [vmem:[%s17806_s28 + $0x998] sm:$0xff] }
 0x2c2   :  { %v418_v49 = vld [vmem:[%s17806_s28 + $0x9b8] sm:$0xff]  ;;  %v11380_v55 = vcombine.high %v413_v46, %v417_v47  ;;  %v11379_v60 = vcombine.low %v413_v46, %v417_v47 }
 0x2c3   :  { %v11382_v56 = vcombine.high %v414_v23, %v418_v49  ;;  %v11381_v0 = vcombine.low %v414_v23, %v418_v49 }
 0x2c4   :  { %7137 = vmatpush1.bf16.msra.mxu0 %v11323_v57  ;;  %7465 = vmatpush1.bf16.msra.mxu1 %v11325_v58  ;;  %v421_v57 = vld [vmem:[%s17806_s28 + $0x9d0] sm:$0xff] }
 0x2c5   :  { %7147 = vmatprep.subr.bf16.mxu0 %v11332_v33  ;;  %7475 = vmatprep.subr.bf16.mxu1 %v11334_v11  ;;  %v425_v58 = vld [vmem:[%s17806_s28 + $0x9f0] sm:$0xff]  ;;  %v422_v33 = vld [vmem:[%s17806_s28 + $0x9d8] sm:$0xff] }
 0x2c6   :  { %v426_v11 = vld [vmem:[%s17806_s28 + $0x9f8] sm:$0xff]  ;;  %v11388_v2 = vcombine.high %v421_v57, %v425_v58  ;;  %v11387_v10 = vcombine.low %v421_v57, %v425_v58 }
 0x2c7   :  { %7139 = vmatmul.mubr.bf16.vlgmr.msra.gmra.mrb[4].mxu0 %v14033_v40  ;;  %7467 = vmatmul.mubr.bf16.vlgmr.msra.gmra.mrb[4].mxu1 %v14033_v40  ;;  %v390_v40 = vld [vmem:[%s17806_s28 + $0x8d8] sm:$0xff]  ;;  %v11390_v3 = vcombine.high %v422_v33, %v426_v11  ;;  %v11389_v12 = vcombine.low %v422_v33, %v426_v11 }
 0x2c8   :  { %7148 = vmatpush1.bf16.msra.mxu0 %v11331_v4  ;;  %7476 = vmatpush1.bf16.msra.mxu1 %v11333_v63  ;;  %v11358_v25 = vcombine.high %v390_v40, %v394_v19  ;;  %v11357_v31 = vcombine.low %v390_v40, %v394_v19  ;;  %v429_v4 = vld [vmem:[%s17806_s28 + $0xa10] sm:$0xff] }
 0x2c9   :  { %7149 = vmatprep.subr.bf16.mxu0 %v11340_v5  ;;  %7477 = vmatprep.subr.bf16.mxu1 %v11342_v8  ;;  %v433_v63 = vld [vmem:[%s17806_s28 + $0xa30] sm:$0xff]  ;;  %v430_v5 = vld [vmem:[%s17806_s28 + $0xa18] sm:$0xff] }
 0x2ca   :  { %7179 = vmatprep.mubr.bf16.mxu0 %v14048_v50  ;;  %7507 = vmatprep.mubr.bf16.mxu1 %v14048_v50  ;;  %v398_v50 = vld [vmem:[%s17806_s28 + $0x918] sm:$0xff]  ;;  %v11396_v13 = vcombine.high %v429_v4, %v433_v63  ;;  %v11395_v9 = vcombine.low %v429_v4, %v433_v63 }
 0x2cb   :  { %v11366_v34 = vcombine.high %v398_v50, %v402_v59  ;;  %v11365_v42 = vcombine.low %v398_v50, %v402_v59  ;;  %v434_v8 = vld [vmem:[%s17806_s28 + $0xa38] sm:$0xff] }
 0x2cc   :  { %7150 = vmatpush1.bf16.msra.mxu0 %v11339_v14  ;;  %7478 = vmatpush1.bf16.msra.mxu1 %v11341_v53  ;;  %v11398_v1 = vcombine.high %v430_v5, %v434_v8  ;;  %v437_v14 = vld [vmem:[%s17806_s28 + $0xa50] sm:$0xff]  ;;  %v11397_v18 = vcombine.low %v430_v5, %v434_v8 }
 0x2cd   :  { %7151 = vmatprep.subr.bf16.mxu0 %v11348_v15  ;;  %7479 = vmatprep.subr.bf16.mxu1 %v11350_v17  ;;  %v441_v53 = vld [vmem:[%s17806_s28 + $0xa70] sm:$0xff]  ;;  %v438_v15 = vld [vmem:[%s17806_s28 + $0xa58] sm:$0xff] }
 0x2ce   :  { %v442_v17 = vld [vmem:[%s17806_s28 + $0xa78] sm:$0xff]  ;;  %v11404_v40 = vcombine.high %v437_v14, %v441_v53  ;;  %v11403_v26 = vcombine.low %v437_v14, %v441_v53 }
 0x2cf   :  { %v11406_v19 = vcombine.high %v438_v15, %v442_v17  ;;  %v11405_v28 = vcombine.low %v438_v15, %v442_v17 }
 0x2d0   :  { %7152 = vmatpush1.bf16.msra.mxu0 %v11347_v20  ;;  %7480 = vmatpush1.bf16.msra.mxu1 %v11349_v22  ;;  %v445_v20 = vld [vmem:[%s17806_s28 + $0xa90] sm:$0xff] }
 0x2d1   :  { %7153 = vmatprep.subr.bf16.mxu0 %v11356_v24  ;;  %7481 = vmatprep.subr.bf16.mxu1 %v11358_v25  ;;  %v449_v22 = vld [vmem:[%s17806_s28 + $0xab0] sm:$0xff]  ;;  %v446_v24 = vld [vmem:[%s17806_s28 + $0xa98] sm:$0xff] }
 0x2d2   :  { %v450_v25 = vld [vmem:[%s17806_s28 + $0xab8] sm:$0xff]  ;;  %v11412_v50 = vcombine.high %v445_v20, %v449_v22  ;;  %v11411_v35 = vcombine.low %v445_v20, %v449_v22 }
 0x2d3   :  { %v11414_v59 = vcombine.high %v446_v24, %v450_v25  ;;  %v11413_v36 = vcombine.low %v446_v24, %v450_v25 }
 0x2d4   :  { %7154 = vmatpush1.bf16.msra.mxu0 %v11355_v29  ;;  %7482 = vmatpush1.bf16.msra.mxu1 %v11357_v31  ;;  %v453_v29 = vld [vmem:[%s17806_s28 + $0xad0] sm:$0xff] }
 0x2d5   :  { %7155 = vmatprep.subr.bf16.mxu0 %v11364_v32  ;;  %7483 = vmatprep.subr.bf16.mxu1 %v11366_v34  ;;  %v457_v31 = vld [vmem:[%s17806_s28 + $0xaf0] sm:$0xff]  ;;  %v454_v32 = vld [vmem:[%s17806_s28 + $0xad8] sm:$0xff] }
 0x2d6   :  { %v458_v34 = vld [vmem:[%s17806_s28 + $0xaf8] sm:$0xff]  ;;  %v11420_v38 = vcombine.high %v453_v29, %v457_v31  ;;  %v11419_v46 = vcombine.low %v453_v29, %v457_v31 }
 0x2d7   :  { %v11422_v39 = vcombine.high %v454_v32, %v458_v34  ;;  %v11421_v47 = vcombine.low %v454_v32, %v458_v34 }
 0x2d8   :  { %7156 = vmatpush1.bf16.msra.mxu0 %v11363_v41  ;;  %7484 = vmatpush1.bf16.msra.mxu1 %v11365_v42  ;;  %v461_v41 = vld [vmem:[%s17806_s28 + $0xb10] sm:$0xff] }
 0x2d9   :  { %7157 = vmatprep.subr.bf16.mxu0 %v11372_v44  ;;  %7485 = vmatprep.subr.bf16.mxu1 %v11374_v45  ;;  %v465_v42 = vld [vmem:[%s17806_s28 + $0xb30] sm:$0xff]  ;;  %v462_v44 = vld [vmem:[%s17806_s28 + $0xb18] sm:$0xff] }
 0x2da   :  { %v466_v45 = vld [vmem:[%s17806_s28 + $0xb38] sm:$0xff]  ;;  %v11428_v23 = vcombine.high %v461_v41, %v465_v42  ;;  %v11427_v57 = vcombine.low %v461_v41, %v465_v42 }
 0x2db   :  { %v11430_v49 = vcombine.high %v462_v44, %v466_v45  ;;  %v11429_v58 = vcombine.low %v462_v44, %v466_v45 }
 0x2dc   :  { %7158 = vmatpush1.bf16.msra.mxu0 %v11371_v52  ;;  %7486 = vmatpush1.bf16.msra.mxu1 %v11373_v54  ;;  %v469_v52 = vld [vmem:[%s17806_s28 + $0xb50] sm:$0xff] }
 0x2dd   :  { %7159 = vmatprep.subr.bf16.mxu0 %v11380_v55  ;;  %7487 = vmatprep.subr.bf16.mxu1 %v11382_v56  ;;  %v473_v54 = vld [vmem:[%s17806_s28 + $0xb70] sm:$0xff]  ;;  %v470_v55 = vld [vmem:[%s17806_s28 + $0xb58] sm:$0xff] }
 0x2de   :  { %v474_v56 = vld [vmem:[%s17806_s28 + $0xb78] sm:$0xff]  ;;  %v11436_v33 = vcombine.high %v469_v52, %v473_v54  ;;  %v11435_v4 = vcombine.low %v469_v52, %v473_v54 }
 0x2df   :  { %v11438_v11 = vcombine.high %v470_v55, %v474_v56  ;;  %v11437_v63 = vcombine.low %v470_v55, %v474_v56  ;;  %v525_v56 = vld [vmem:[%s17806_s28 + $0xd10] sm:$0xff] }
 0x2e0   :  { %7160 = vmatpush1.bf16.msra.mxu0 %v11379_v60  ;;  %7488 = vmatpush1.bf16.msra.mxu1 %v11381_v0  ;;  %v477_v60 = vld [vmem:[%s17806_s28 + $0xb90] sm:$0xff] }
 0x2e1   :  { %7161 = vmatprep.subr.bf16.mxu0 %v11388_v2  ;;  %7489 = vmatprep.subr.bf16.mxu1 %v11390_v3  ;;  %v481_v0 = vld [vmem:[%s17806_s28 + $0xbb0] sm:$0xff]  ;;  %v478_v2 = vld [vmem:[%s17806_s28 + $0xb98] sm:$0xff] }
 0x2e2   :  { %v482_v3 = vld [vmem:[%s17806_s28 + $0xbb8] sm:$0xff]  ;;  %v11444_v5 = vcombine.high %v477_v60, %v481_v0  ;;  %v11443_v14 = vcombine.low %v477_v60, %v481_v0 }
 0x2e3   :  { %v11446_v8 = vcombine.high %v478_v2, %v482_v3  ;;  %v11445_v53 = vcombine.low %v478_v2, %v482_v3  ;;  %v533_v2 = vld [vmem:[%s17806_s28 + $0xd50] sm:$0xff] }
 0x2e4   :  { %7162 = vmatpush1.bf16.msra.mxu0 %v11387_v10  ;;  %7490 = vmatpush1.bf16.msra.mxu1 %v11389_v12  ;;  %v485_v10 = vld [vmem:[%s17806_s28 + $0xbd0] sm:$0xff] }
 0x2e5   :  { %7163 = vmatprep.subr.bf16.mxu0 %v11396_v13  ;;  %7491 = vmatprep.subr.bf16.mxu1 %v11398_v1  ;;  %v489_v12 = vld [vmem:[%s17806_s28 + $0xbf0] sm:$0xff]  ;;  %v486_v13 = vld [vmem:[%s17806_s28 + $0xbd8] sm:$0xff] }
 0x2e6   :  { %v490_v1 = vld [vmem:[%s17806_s28 + $0xbf8] sm:$0xff]  ;;  %v11452_v15 = vcombine.high %v485_v10, %v489_v12  ;;  %v11451_v20 = vcombine.low %v485_v10, %v489_v12  ;;  %v537_v3 = vld [vmem:[%s17806_s28 + $0xd70] sm:$0xff] }
 0x2e7   :  { %v11454_v17 = vcombine.high %v486_v13, %v490_v1  ;;  %v11453_v22 = vcombine.low %v486_v13, %v490_v1  ;;  %v11500_v10 = vcombine.high %v533_v2, %v537_v3  ;;  %v541_v13 = vld [vmem:[%s17806_s28 + $0xd90] sm:$0xff] }
 0x2e8   :  { %7164 = vmatpush1.bf16.msra.mxu0 %v11395_v9  ;;  %7492 = vmatpush1.bf16.msra.mxu1 %v11397_v18  ;;  %v493_v9 = vld [vmem:[%s17806_s28 + $0xc10] sm:$0xff] }
 0x2e9   :  { %7165 = vmatprep.subr.bf16.mxu0 %v11404_v40  ;;  %7493 = vmatprep.subr.bf16.mxu1 %v11406_v19  ;;  %v497_v18 = vld [vmem:[%s17806_s28 + $0xc30] sm:$0xff]  ;;  %v494_v40 = vld [vmem:[%s17806_s28 + $0xc18] sm:$0xff] }
 0x2ea   :  { %v498_v19 = vld [vmem:[%s17806_s28 + $0xc38] sm:$0xff]  ;;  %v11460_v24 = vcombine.high %v493_v9, %v497_v18  ;;  %v11459_v29 = vcombine.low %v493_v9, %v497_v18  ;;  %v545_v1 = vld [vmem:[%s17806_s28 + $0xdb0] sm:$0xff] }
 0x2eb   :  { %v11462_v25 = vcombine.high %v494_v40, %v498_v19  ;;  %v11461_v31 = vcombine.low %v494_v40, %v498_v19  ;;  %v11508_v9 = vcombine.high %v541_v13, %v545_v1  ;;  %v549_v19 = vld [vmem:[%s17806_s28 + $0xdd0] sm:$0xff] }
 0x2ec   :  { %7166 = vmatpush1.bf16.msra.mxu0 %v11403_v26  ;;  %7494 = vmatpush1.bf16.msra.mxu1 %v11405_v28  ;;  %v501_v26 = vld [vmem:[%s17806_s28 + $0xc50] sm:$0xff] }
 0x2ed   :  { %7167 = vmatprep.subr.bf16.mxu0 %v11412_v50  ;;  %7495 = vmatprep.subr.bf16.mxu1 %v11414_v59  ;;  %v505_v28 = vld [vmem:[%s17806_s28 + $0xc70] sm:$0xff]  ;;  %v502_v50 = vld [vmem:[%s17806_s28 + $0xc58] sm:$0xff] }
 0x2ee   :  { %v506_v59 = vld [vmem:[%s17806_s28 + $0xc78] sm:$0xff]  ;;  %v11468_v32 = vcombine.high %v501_v26, %v505_v28  ;;  %v11467_v41 = vcombine.low %v501_v26, %v505_v28 }
 0x2ef   :  { %v11470_v34 = vcombine.high %v502_v50, %v506_v59  ;;  %v11469_v42 = vcombine.low %v502_v50, %v506_v59  ;;  %v554_v26 = vld [vmem:[%s17806_s28 + $0xdf8] sm:$0xff]  ;;  %v11507_v59 = vcombine.low %v541_v13, %v545_v1 }
 0x2f0   :  { %7168 = vmatpush1.bf16.msra.mxu0 %v11411_v35  ;;  %7496 = vmatpush1.bf16.msra.mxu1 %v11413_v36  ;;  %v509_v35 = vld [vmem:[%s17806_s28 + $0xc90] sm:$0xff] }
 0x2f1   :  { %7169 = vmatprep.subr.bf16.mxu0 %v11420_v38  ;;  %7497 = vmatprep.subr.bf16.mxu1 %v11422_v39  ;;  %v513_v36 = vld [vmem:[%s17806_s28 + $0xcb0] sm:$0xff]  ;;  %v510_v38 = vld [vmem:[%s17806_s28 + $0xc98] sm:$0xff] }
 0x2f2   :  { %v514_v39 = vld [vmem:[%s17806_s28 + $0xcb8] sm:$0xff]  ;;  %v11476_v44 = vcombine.high %v509_v35, %v513_v36 }
 0x2f3   :  { %v11478_v45 = vcombine.high %v510_v38, %v514_v39  ;;  %v11477_v52 = vcombine.low %v510_v38, %v514_v39  ;;  %v557_v38 = vld [vmem:[%s17806_s28 + $0xe10] sm:$0xff] }
 0x2f4   :  { %7170 = vmatpush1.bf16.msra.mxu0 %v11419_v46  ;;  %7498 = vmatpush1.bf16.msra.mxu1 %v11421_v47  ;;  %v517_v46 = vld [vmem:[%s17806_s28 + $0xcd0] sm:$0xff] }
 0x2f5   :  { %7171 = vmatprep.subr.bf16.mxu0 %v11428_v23  ;;  %7499 = vmatprep.subr.bf16.mxu1 %v11430_v49  ;;  %v521_v47 = vld [vmem:[%s17806_s28 + $0xcf0] sm:$0xff]  ;;  %v522_v23 = vld [vmem:[%s17806_s28 + $0xcf8] sm:$0xff]  ;;  %v11475_v49 = vcombine.low %v509_v35, %v513_v36 }
 0x2f6   :  { %v11484_v54 = vcombine.high %v517_v46, %v521_v47  ;;  %v561_v39 = vld [vmem:[%s17806_s28 + $0xe30] sm:$0xff] }
 0x2f8   :  { %7172 = vmatpush1.bf16.msra.mxu0 %v11427_v57  ;;  %7500 = vmatpush1.bf16.msra.mxu1 %v11429_v58  ;;  %v529_v57 = vld [vmem:[%s17806_s28 + $0xd30] sm:$0xff]  ;;  %v530_v58 = vld [vmem:[%s17806_s28 + $0xd38] sm:$0xff] }
 0x2f9   :  { %7173 = vmatprep.subr.bf16.mxu0 %v11436_v33  ;;  %7501 = vmatprep.subr.bf16.mxu1 %v11438_v11  ;;  %v11483_v33 = vcombine.low %v517_v46, %v521_v47  ;;  %v11492_v60 = vcombine.high %v525_v56, %v529_v57  ;;  %v11524_v46 = vcombine.high %v557_v38, %v561_v39 }
 0x2fc   :  { %7174 = vmatpush1.bf16.msra.mxu0 %v11435_v4  ;;  %7502 = vmatpush1.bf16.msra.mxu1 %v11437_v63  ;;  %v534_v4 = vld [vmem:[%s17806_s28 + $0xd58] sm:$0xff] }
 0x2fd   :  { %7175 = vmatprep.subr.bf16.mxu0 %v11444_v5  ;;  %7503 = vmatprep.subr.bf16.mxu1 %v11446_v8  ;;  %v538_v63 = vld [vmem:[%s17806_s28 + $0xd78] sm:$0xff]  ;;  %v11491_v5 = vcombine.low %v525_v56, %v529_v57 }
 0x2fe   :  { %v11502_v12 = vcombine.high %v534_v4, %v538_v63 }
 0x300   :  { %7176 = vmatpush1.bf16.msra.mxu0 %v11443_v14  ;;  %7504 = vmatpush1.bf16.msra.mxu1 %v11445_v53  ;;  %v542_v14 = vld [vmem:[%s17806_s28 + $0xd98] sm:$0xff] }
 0x301   :  { %7177 = vmatprep.subr.bf16.mxu0 %v11452_v15  ;;  %7505 = vmatprep.subr.bf16.mxu1 %v11454_v17  ;;  %v546_v53 = vld [vmem:[%s17806_s28 + $0xdb8] sm:$0xff]  ;;  %v11499_v15 = vcombine.low %v533_v2, %v537_v3  ;;  %v11501_v17 = vcombine.low %v534_v4, %v538_v63  ;;  %v581_v4 = vld [vmem:[%s17806_s28 + $0xed0] sm:$0xff] }
 0x302   :  { %v11510_v40 = vcombine.high %v542_v14, %v546_v53  ;;  %v585_v63 = vld [vmem:[%s17806_s28 + $0xef0] sm:$0xff] }
 0x303   :  { %v11548_v13 = vcombine.high %v581_v4, %v585_v63 }
 0x304   :  { %7178 = vmatpush1.bf16.msra.mxu0 %v11451_v20  ;;  %7506 = vmatpush1.bf16.msra.mxu1 %v11453_v22  ;;  %v553_v20 = vld [vmem:[%s17806_s28 + $0xdf0] sm:$0xff] }
 0x305   :  { %7188 = vmatprep.subr.bf16.mxu0 %v11460_v24  ;;  %7516 = vmatprep.subr.bf16.mxu1 %v11462_v25  ;;  %v550_v25 = vld [vmem:[%s17806_s28 + $0xdd8] sm:$0xff] }
 0x306   :  { %v11518_v36 = vcombine.high %v550_v25, %v554_v26 }
 0x307   :  { %7180 = vmatmul.mubr.bf16.vlgmr.msra.gmra.mrb[4].mxu0 %v14236_v61  ;;  %7508 = vmatmul.mubr.bf16.vlgmr.msra.gmra.mrb[4].mxu1 %v14236_v61  ;;  %v518_v61 = vld [vmem:[%s17806_s28 + $0xcd8] sm:$0xff] }
 0x308   :  { %7189 = vmatpush1.bf16.msra.mxu0 %v11459_v29  ;;  %7517 = vmatpush1.bf16.msra.mxu1 %v11461_v31  ;;  %v11486_v55 = vcombine.high %v518_v61, %v522_v23  ;;  %v11485_v11 = vcombine.low %v518_v61, %v522_v23  ;;  %v565_v61 = vld [vmem:[%s17806_s28 + $0xe50] sm:$0xff] }
 0x309   :  { %7190 = vmatprep.subr.bf16.mxu0 %v11468_v32  ;;  %7518 = vmatprep.subr.bf16.mxu1 %v11470_v34  ;;  %v11509_v32 = vcombine.low %v542_v14, %v546_v53  ;;  %v11516_v34 = vcombine.high %v549_v19, %v553_v20  ;;  %v569_v23 = vld [vmem:[%s17806_s28 + $0xe70] sm:$0xff] }
 0x30a   :  { %7220 = vmatprep.mubr.bf16.mxu0 %v14252_v6  ;;  %7548 = vmatprep.mubr.bf16.mxu1 %v14252_v6  ;;  %v526_v6 = vld [vmem:[%s17806_s28 + $0xd18] sm:$0xff]  ;;  %v11532_v56 = vcombine.high %v565_v61, %v569_v23  ;;  %v589_v14 = vld [vmem:[%s17806_s28 + $0xf10] sm:$0xff] }
 0x30b   :  { %v11494_v0 = vcombine.high %v526_v6, %v530_v58  ;;  %v11493_v8 = vcombine.low %v526_v6, %v530_v58  ;;  %v573_v6 = vld [vmem:[%s17806_s28 + $0xe90] sm:$0xff] }
 0x30c   :  { %7191 = vmatpush1.bf16.msra.mxu0 %v11467_v41  ;;  %7519 = vmatpush1.bf16.msra.mxu1 %v11469_v42  ;;  %v558_v41 = vld [vmem:[%s17806_s28 + $0xe18] sm:$0xff]  ;;  %v577_v58 = vld [vmem:[%s17806_s28 + $0xeb0] sm:$0xff] }
 0x30d   :  { %7192 = vmatprep.subr.bf16.mxu0 %v11476_v44  ;;  %7520 = vmatprep.subr.bf16.mxu1 %v11478_v45  ;;  %v562_v42 = vld [vmem:[%s17806_s28 + $0xe38] sm:$0xff]  ;;  %v11515_v44 = vcombine.low %v549_v19, %v553_v20  ;;  %v11517_v45 = vcombine.low %v550_v25, %v554_v26  ;;  %v11540_v2 = vcombine.high %v573_v6, %v577_v58  ;;  %v593_v53 = vld [vmem:[%s17806_s28 + $0xf30] sm:$0xff] }
 0x30e   :  { %v11526_v47 = vcombine.high %v558_v41, %v562_v42  ;;  %v11556_v19 = vcombine.high %v589_v14, %v593_v53  ;;  %v597_v25 = vld [vmem:[%s17806_s28 + $0xf50] sm:$0xff] }
 0x30f   :  { %v601_v26 = vld [vmem:[%s17806_s28 + $0xf70] sm:$0xff] }
 0x310   :  { %7193 = vmatpush1.bf16.msra.mxu0 %v11475_v49  ;;  %7521 = vmatpush1.bf16.msra.mxu1 %v11477_v52  ;;  %v566_v49 = vld [vmem:[%s17806_s28 + $0xe58] sm:$0xff] }
 0x311   :  { %7194 = vmatprep.subr.bf16.mxu0 %v11484_v54  ;;  %7522 = vmatprep.subr.bf16.mxu1 %v11486_v55  ;;  %v570_v52 = vld [vmem:[%s17806_s28 + $0xe78] sm:$0xff]  ;;  %v11523_v54 = vcombine.low %v557_v38, %v561_v39  ;;  %v11525_v55 = vcombine.low %v558_v41, %v562_v42  ;;  %v11563_v41 = vcombine.low %v597_v25, %v601_v26 }
 0x312   :  { %v11534_v57 = vcombine.high %v566_v49, %v570_v52  ;;  %v606_v38 = vld [vmem:[%s17806_s28 + $0xf98] sm:$0xff] }
 0x313   :  { %v610_v39 = vld [vmem:[%s17806_s28 + $0xfb8] sm:$0xff] }
 0x314   :  { %7195 = vmatpush1.bf16.msra.mxu0 %v11483_v33  ;;  %7523 = vmatpush1.bf16.msra.mxu1 %v11485_v11  ;;  %v574_v33 = vld [vmem:[%s17806_s28 + $0xe98] sm:$0xff] }
 0x315   :  { %7196 = vmatprep.subr.bf16.mxu0 %v11492_v60  ;;  %7524 = vmatprep.subr.bf16.mxu1 %v11494_v0  ;;  %v578_v11 = vld [vmem:[%s17806_s28 + $0xeb8] sm:$0xff]  ;;  %v11531_v60 = vcombine.low %v565_v61, %v569_v23  ;;  %v11533_v0 = vcombine.low %v566_v49, %v570_v52  ;;  %v11573_v52 = vcombine.low %v606_v38, %v610_v39 }
 0x316   :  { %v11542_v3 = vcombine.high %v574_v33, %v578_v11  ;;  %v614_v61 = vld [vmem:[%s17806_s28 + $0xfd8] sm:$0xff] }
 0x317   :  { %v618_v23 = vld [vmem:[%s17806_s28 + $0xff8] sm:$0xff] }
 0x318   :  { %7197 = vmatpush1.bf16.msra.mxu0 %v11491_v5  ;;  %7525 = vmatpush1.bf16.msra.mxu1 %v11493_v8  ;;  %v582_v5 = vld [vmem:[%s17806_s28 + $0xed8] sm:$0xff] }
 0x319   :  { %7198 = vmatprep.subr.bf16.mxu0 %v11500_v10  ;;  %7526 = vmatprep.subr.bf16.mxu1 %v11502_v12  ;;  %v586_v8 = vld [vmem:[%s17806_s28 + $0xef8] sm:$0xff]  ;;  %v11539_v10 = vcombine.low %v573_v6, %v577_v58  ;;  %v11541_v12 = vcombine.low %v574_v33, %v578_v11  ;;  %v11581_v11 = vcombine.low %v614_v61, %v618_v23 }
 0x31a   :  { %v15926_v18 = vpop.f32.mrb[0].mxu0  ;;  %v15934_v22 = vpop.f32.mrb[0].mxu1  ;;  %v11550_v1 = vcombine.high %v582_v5, %v586_v8  ;;  %v622_v6 = vld [vmem:[%s17806_s28 + $0x1018] sm:$0xff] }
 0x31b   :  { %v15936_v24 = vpop.f32.mrb[1].mxu0  ;;  %v15944_v28 = vpop.f32.mrb[1].mxu1  ;;  %v626_v58 = vld [vmem:[%s17806_s28 + $0x1038] sm:$0xff] }
 0x31c   :  { %v6734_v50 = vpop.f32.mrb[2].mxu0  ;;  %7199 = vmatpush1.bf16.msra.mxu0 %v11499_v15  ;;  %v7062_v29 = vpop.f32.mrb[2].mxu1  ;;  %7527 = vmatpush1.bf16.msra.mxu1 %v11501_v17  ;;  %v590_v15 = vld [vmem:[%s17806_s28 + $0xf18] sm:$0xff] }
 0x31d   :  { %v6735_v31 = vpop.f32.mrb[3].mxu0  ;;  %7200 = vmatprep.subr.bf16.mxu0 %v11508_v9  ;;  %v7063_v35 = vpop.f32.mrb[3].mxu1  ;;  %7528 = vmatprep.subr.bf16.mxu1 %v11510_v40  ;;  %v594_v17 = vld [vmem:[%s17806_s28 + $0xf38] sm:$0xff]  ;;  %v11547_v9 = vcombine.low %v581_v4, %v585_v63  ;;  %v11549_v40 = vcombine.low %v582_v5, %v586_v8  ;;  %v11555_v29 = vcombine.low %v589_v14, %v593_v53 }
 0x31e   :  { %v11558_v20 = vcombine.high %v590_v15, %v594_v17  ;;  %v598_v50 = vld [vmem:[%s17806_s28 + $0xf58] sm:$0xff]  ;;  %v11557_v31 = vcombine.low %v590_v15, %v594_v17  ;;  %v605_v35 = vld [vmem:[%s17806_s28 + $0xf90] sm:$0xff]  ;;  %v11589_v8 = vcombine.low %v622_v6, %v626_v58 }
 0x31f   :  { %v630_v4 = vld [vmem:[%s17806_s28 + $0x1058] sm:$0xff] }
 0x320   :  { %7201 = vmatpush1.bf16.msra.mxu0 %v11507_v59  ;;  %7529 = vmatpush1.bf16.msra.mxu1 %v11509_v32  ;;  %v602_v59 = vld [vmem:[%s17806_s28 + $0xf78] sm:$0xff]  ;;  %v11564_v32 = vcombine.high %v597_v25, %v601_v26 }
 0x321   :  { %7202 = vmatprep.subr.bf16.mxu0 %v11516_v34  ;;  %7530 = vmatprep.subr.bf16.mxu1 %v11518_v36  ;;  %v11566_v34 = vcombine.high %v598_v50, %v602_v59  ;;  %v609_v36 = vld [vmem:[%s17806_s28 + $0xfb0] sm:$0xff]  ;;  %v11565_v42 = vcombine.low %v598_v50, %v602_v59  ;;  %v634_v63 = vld [vmem:[%s17806_s28 + $0x1078] sm:$0xff] }
 0x322   :  { %v11571_v49 = vcombine.low %v605_v35, %v609_v36  ;;  %v638_v14 = vld [vmem:[%s17806_s28 + $0x1098] sm:$0xff]  ;;  %v11597_v17 = vcombine.low %v630_v4, %v634_v63 }
 0x323   :  { %v642_v53 = vld [vmem:[%s17806_s28 + $0x10b8] sm:$0xff] }
 0x324   :  { %7203 = vmatpush1.bf16.msra.mxu0 %v11515_v44  ;;  %7531 = vmatpush1.bf16.msra.mxu1 %v11517_v45  ;;  %v11572_v44 = vcombine.high %v605_v35, %v609_v36  ;;  %v11574_v45 = vcombine.high %v606_v38, %v610_v39  ;;  %v650_v25 = vld [vmem:[%s17806_s28 + $0x10f8] sm:$0xff]  ;;  %v11605_v50 = vcombine.low %v638_v14, %v642_v53 }
 0x325   :  { %7204 = vmatprep.subr.bf16.mxu0 %v11524_v46  ;;  %7532 = vmatprep.subr.bf16.mxu1 %v11526_v47  ;;  %v613_v46 = vld [vmem:[%s17806_s28 + $0xfd0] sm:$0xff] }
 0x326   :  { %v617_v47 = vld [vmem:[%s17806_s28 + $0xff0] sm:$0xff] }
 0x327   :  { %v11579_v33 = vcombine.low %v613_v46, %v617_v47 }
 0x328   :  { %7205 = vmatpush1.bf16.msra.mxu0 %v11523_v54  ;;  %7533 = vmatpush1.bf16.msra.mxu1 %v11525_v55  ;;  %v11580_v54 = vcombine.high %v613_v46, %v617_v47  ;;  %v11582_v55 = vcombine.high %v614_v61, %v618_v23 }
 0x329   :  { %7206 = vmatprep.subr.bf16.mxu0 %v11532_v56  ;;  %7534 = vmatprep.subr.bf16.mxu1 %v11534_v57  ;;  %v621_v56 = vld [vmem:[%s17806_s28 + $0x1010] sm:$0xff] }
 0x32a   :  { %v625_v57 = vld [vmem:[%s17806_s28 + $0x1030] sm:$0xff] }
 0x32b   :  { %v11587_v5 = vcombine.low %v621_v56, %v625_v57 }
 0x32c   :  { %7207 = vmatpush1.bf16.msra.mxu0 %v11531_v60  ;;  %7535 = vmatpush1.bf16.msra.mxu1 %v11533_v0  ;;  %v11588_v60 = vcombine.high %v621_v56, %v625_v57  ;;  %v11590_v0 = vcombine.high %v622_v6, %v626_v58 }
 0x32d   :  { %7208 = vmatprep.subr.bf16.mxu0 %v11540_v2  ;;  %7536 = vmatprep.subr.bf16.mxu1 %v11542_v3  ;;  %v629_v2 = vld [vmem:[%s17806_s28 + $0x1050] sm:$0xff] }
 0x32e   :  { %v633_v3 = vld [vmem:[%s17806_s28 + $0x1070] sm:$0xff] }
 0x32f   :  { %v11595_v15 = vcombine.low %v629_v2, %v633_v3 }
 0x330   :  { %7209 = vmatpush1.bf16.msra.mxu0 %v11539_v10  ;;  %7537 = vmatpush1.bf16.msra.mxu1 %v11541_v12  ;;  %v11596_v10 = vcombine.high %v629_v2, %v633_v3  ;;  %v11598_v12 = vcombine.high %v630_v4, %v634_v63 }
 0x331   :  { %7210 = vmatprep.subr.bf16.mxu0 %v11548_v13  ;;  %7538 = vmatprep.subr.bf16.mxu1 %v11550_v1  ;;  %v637_v13 = vld [vmem:[%s17806_s28 + $0x1090] sm:$0xff] }
 0x332   :  { %v641_v1 = vld [vmem:[%s17806_s28 + $0x10b0] sm:$0xff] }
 0x333   :  { %v11603_v26 = vcombine.low %v637_v13, %v641_v1 }
 0x334   :  { %7211 = vmatpush1.bf16.msra.mxu0 %v11547_v9  ;;  %7539 = vmatpush1.bf16.msra.mxu1 %v11549_v40  ;;  %v11604_v9 = vcombine.high %v637_v13, %v641_v1  ;;  %v11606_v40 = vcombine.high %v638_v14, %v642_v53 }
 0x335   :  { %7212 = vmatprep.subr.bf16.mxu0 %v11556_v19  ;;  %7540 = vmatprep.subr.bf16.mxu1 %v11558_v20  ;;  %v645_v19 = vld [vmem:[%s17806_s28 + $0x10d0] sm:$0xff] }
 0x336   :  { %v649_v20 = vld [vmem:[%s17806_s28 + $0x10f0] sm:$0xff] }
 0x337   :  { %v11612_v59 = vcombine.high %v645_v19, %v649_v20  ;;  %v11611_v35 = vcombine.low %v645_v19, %v649_v20 }
 0x338   :  { %7213 = vmatpush1.bf16.msra.mxu0 %v11555_v29  ;;  %7541 = vmatpush1.bf16.msra.mxu1 %v11557_v31  ;;  %v653_v31 = vld [vmem:[%s17806_s28 + $0x1110] sm:$0xff] }
 0x339   :  { %7214 = vmatprep.subr.bf16.mxu0 %v11564_v32  ;;  %7542 = vmatprep.subr.bf16.mxu1 %v11566_v34  ;;  %v657_v32 = vld [vmem:[%s17806_s28 + $0x1130] sm:$0xff]  ;;  %v658_v34 = vld [vmem:[%s17806_s28 + $0x1138] sm:$0xff] }
 0x33a   :  { %v11620_v38 = vcombine.high %v653_v31, %v657_v32  ;;  %v11619_v46 = vcombine.low %v653_v31, %v657_v32 }
 0x33c   :  { %7215 = vmatpush1.bf16.msra.mxu0 %v11563_v41  ;;  %7543 = vmatpush1.bf16.msra.mxu1 %v11565_v42  ;;  %v661_v41 = vld [vmem:[%s17806_s28 + $0x1150] sm:$0xff] }
 0x33d   :  { %7216 = vmatprep.subr.bf16.mxu0 %v11572_v44  ;;  %7544 = vmatprep.subr.bf16.mxu1 %v11574_v45  ;;  %v665_v42 = vld [vmem:[%s17806_s28 + $0x1170] sm:$0xff]  ;;  %v662_v44 = vld [vmem:[%s17806_s28 + $0x1158] sm:$0xff] }
 0x33e   :  { %v666_v45 = vld [vmem:[%s17806_s28 + $0x1178] sm:$0xff]  ;;  %v11628_v61 = vcombine.high %v661_v41, %v665_v42  ;;  %v11627_v56 = vcombine.low %v661_v41, %v665_v42 }
 0x33f   :  { %v11630_v23 = vcombine.high %v662_v44, %v666_v45  ;;  %v11629_v57 = vcombine.low %v662_v44, %v666_v45 }
 0x340   :  { %7217 = vmatpush1.bf16.msra.mxu0 %v11571_v49  ;;  %7545 = vmatpush1.bf16.msra.mxu1 %v11573_v52  ;;  %v669_v49 = vld [vmem:[%s17806_s28 + $0x1190] sm:$0xff] }
 0x341   :  { %7218 = vmatprep.subr.bf16.mxu0 %v11580_v54  ;;  %7546 = vmatprep.subr.bf16.mxu1 %v11582_v55  ;;  %v673_v52 = vld [vmem:[%s17806_s28 + $0x11b0] sm:$0xff]  ;;  %v670_v54 = vld [vmem:[%s17806_s28 + $0x1198] sm:$0xff] }
 0x342   :  { %v674_v55 = vld [vmem:[%s17806_s28 + $0x11b8] sm:$0xff]  ;;  %v11636_v6 = vcombine.high %v669_v49, %v673_v52  ;;  %v11635_v2 = vcombine.low %v669_v49, %v673_v52 }
 0x343   :  { %v11638_v58 = vcombine.high %v670_v54, %v674_v55  ;;  %v11637_v3 = vcombine.low %v670_v54, %v674_v55 }
 0x344   :  { %7219 = vmatpush1.bf16.msra.mxu0 %v11579_v33  ;;  %7547 = vmatpush1.bf16.msra.mxu1 %v11581_v11  ;;  %v677_v33 = vld [vmem:[%s17806_s28 + $0x11d0] sm:$0xff] }
 0x345   :  { %7229 = vmatprep.subr.bf16.mxu0 %v11588_v60  ;;  %7557 = vmatprep.subr.bf16.mxu1 %v11590_v0  ;;  %v681_v11 = vld [vmem:[%s17806_s28 + $0x11f0] sm:$0xff]  ;;  %v678_v60 = vld [vmem:[%s17806_s28 + $0x11d8] sm:$0xff] }
 0x346   :  { %v682_v0 = vld [vmem:[%s17806_s28 + $0x11f8] sm:$0xff]  ;;  %v11644_v4 = vcombine.high %v677_v33, %v681_v11  ;;  %v11643_v13 = vcombine.low %v677_v33, %v681_v11 }
 0x347   :  { %7221 = vmatmul.mubr.bf16.vlgmr.msra.gmra.mrb[4].mxu0 %v14451_v21  ;;  %7549 = vmatmul.mubr.bf16.vlgmr.msra.gmra.mrb[4].mxu1 %v14451_v21  ;;  %v646_v21 = vld [vmem:[%s17806_s28 + $0x10d8] sm:$0xff]  ;;  %v11646_v63 = vcombine.high %v678_v60, %v682_v0  ;;  %v11645_v1 = vcombine.low %v678_v60, %v682_v0 }
 0x348   :  { %7230 = vmatpush1.bf16.msra.mxu0 %v11587_v5  ;;  %7558 = vmatpush1.bf16.msra.mxu1 %v11589_v8  ;;  %v11614_v29 = vcombine.high %v646_v21, %v650_v25  ;;  %v11613_v36 = vcombine.low %v646_v21, %v650_v25  ;;  %v685_v5 = vld [vmem:[%s17806_s28 + $0x1210] sm:$0xff] }
 0x349   :  { %7231 = vmatprep.subr.bf16.mxu0 %v11596_v10  ;;  %7559 = vmatprep.subr.bf16.mxu1 %v11598_v12  ;;  %v689_v8 = vld [vmem:[%s17806_s28 + $0x1230] sm:$0xff]  ;;  %v686_v10 = vld [vmem:[%s17806_s28 + $0x1218] sm:$0xff] }
 0x34a   :  { %7261 = vmatprep.mubr.bf16.mxu0 %v14466_v30  ;;  %7589 = vmatprep.mubr.bf16.mxu1 %v14466_v30  ;;  %v654_v30 = vld [vmem:[%s17806_s28 + $0x1118] sm:$0xff]  ;;  %v11652_v14 = vcombine.high %v685_v5, %v689_v8  ;;  %v11651_v19 = vcombine.low %v685_v5, %v689_v8 }
 0x34b   :  { %v11622_v39 = vcombine.high %v654_v30, %v658_v34  ;;  %v11621_v47 = vcombine.low %v654_v30, %v658_v34  ;;  %v690_v12 = vld [vmem:[%s17806_s28 + $0x1238] sm:$0xff] }
 0x34c   :  { %7232 = vmatpush1.bf16.msra.mxu0 %v11595_v15  ;;  %7560 = vmatpush1.bf16.msra.mxu1 %v11597_v17  ;;  %v11654_v53 = vcombine.high %v686_v10, %v690_v12  ;;  %v693_v15 = vld [vmem:[%s17806_s28 + $0x1250] sm:$0xff]  ;;  %v11653_v20 = vcombine.low %v686_v10, %v690_v12 }
 0x34d   :  { %7233 = vmatprep.subr.bf16.mxu0 %v11604_v9  ;;  %7561 = vmatprep.subr.bf16.mxu1 %v11606_v40  ;;  %v697_v17 = vld [vmem:[%s17806_s28 + $0x1270] sm:$0xff]  ;;  %v694_v9 = vld [vmem:[%s17806_s28 + $0x1258] sm:$0xff] }
 0x34e   :  { %v698_v40 = vld [vmem:[%s17806_s28 + $0x1278] sm:$0xff]  ;;  %v11660_v21 = vcombine.high %v693_v15, %v697_v17  ;;  %v11659_v31 = vcombine.low %v693_v15, %v697_v17 }
 0x34f   :  { %v11662_v25 = vcombine.high %v694_v9, %v698_v40  ;;  %v11661_v32 = vcombine.low %v694_v9, %v698_v40 }
 0x350   :  { %7234 = vmatpush1.bf16.msra.mxu0 %v11603_v26  ;;  %7562 = vmatpush1.bf16.msra.mxu1 %v11605_v50  ;;  %v701_v26 = vld [vmem:[%s17806_s28 + $0x1290] sm:$0xff] }
 0x351   :  { %7235 = vmatprep.subr.bf16.mxu0 %v11612_v59  ;;  %7563 = vmatprep.subr.bf16.mxu1 %v11614_v29  ;;  %v705_v50 = vld [vmem:[%s17806_s28 + $0x12b0] sm:$0xff]  ;;  %v702_v59 = vld [vmem:[%s17806_s28 + $0x1298] sm:$0xff] }
 0x352   :  { %v706_v29 = vld [vmem:[%s17806_s28 + $0x12b8] sm:$0xff]  ;;  %v11668_v30 = vcombine.high %v701_v26, %v705_v50  ;;  %v11667_v41 = vcombine.low %v701_v26, %v705_v50 }
 0x353   :  { %v11670_v34 = vcombine.high %v702_v59, %v706_v29  ;;  %v11669_v42 = vcombine.low %v702_v59, %v706_v29 }
 0x354   :  { %7236 = vmatpush1.bf16.msra.mxu0 %v11611_v35  ;;  %7564 = vmatpush1.bf16.msra.mxu1 %v11613_v36  ;;  %v709_v35 = vld [vmem:[%s17806_s28 + $0x12d0] sm:$0xff] }
 0x355   :  { %7237 = vmatprep.subr.bf16.mxu0 %v11620_v38  ;;  %7565 = vmatprep.subr.bf16.mxu1 %v11622_v39  ;;  %v713_v36 = vld [vmem:[%s17806_s28 + $0x12f0] sm:$0xff]  ;;  %v710_v38 = vld [vmem:[%s17806_s28 + $0x12d8] sm:$0xff] }
 0x356   :  { %v714_v39 = vld [vmem:[%s17806_s28 + $0x12f8] sm:$0xff]  ;;  %v11676_v44 = vcombine.high %v709_v35, %v713_v36  ;;  %v11675_v49 = vcombine.low %v709_v35, %v713_v36 }
 0x357   :  { %v11678_v45 = vcombine.high %v710_v38, %v714_v39  ;;  %v11677_v52 = vcombine.low %v710_v38, %v714_v39 }
 0x358   :  { %7238 = vmatpush1.bf16.msra.mxu0 %v11619_v46  ;;  %7566 = vmatpush1.bf16.msra.mxu1 %v11621_v47  ;;  %v717_v46 = vld [vmem:[%s17806_s28 + $0x1310] sm:$0xff] }
 0x359   :  { %7239 = vmatprep.subr.bf16.mxu0 %v11628_v61  ;;  %7567 = vmatprep.subr.bf16.mxu1 %v11630_v23  ;;  %v721_v47 = vld [vmem:[%s17806_s28 + $0x1330] sm:$0xff]  ;;  %v718_v61 = vld [vmem:[%s17806_s28 + $0x1318] sm:$0xff] }
 0x35a   :  { %v722_v23 = vld [vmem:[%s17806_s28 + $0x1338] sm:$0xff]  ;;  %v11684_v54 = vcombine.high %v717_v46, %v721_v47  ;;  %v11683_v33 = vcombine.low %v717_v46, %v721_v47 }
 0x35b   :  { %v11686_v55 = vcombine.high %v718_v61, %v722_v23  ;;  %v11685_v11 = vcombine.low %v718_v61, %v722_v23 }
 0x35c   :  { %7240 = vmatpush1.bf16.msra.mxu0 %v11627_v56  ;;  %7568 = vmatpush1.bf16.msra.mxu1 %v11629_v57  ;;  %v725_v56 = vld [vmem:[%s17806_s28 + $0x1350] sm:$0xff] }
 0x35d   :  { %7241 = vmatprep.subr.bf16.mxu0 %v11636_v6  ;;  %7569 = vmatprep.subr.bf16.mxu1 %v11638_v58  ;;  %v729_v57 = vld [vmem:[%s17806_s28 + $0x1370] sm:$0xff]  ;;  %v726_v6 = vld [vmem:[%s17806_s28 + $0x1358] sm:$0xff] }
 0x35e   :  { %v730_v58 = vld [vmem:[%s17806_s28 + $0x1378] sm:$0xff]  ;;  %v11692_v60 = vcombine.high %v725_v56, %v729_v57  ;;  %v11691_v5 = vcombine.low %v725_v56, %v729_v57 }
 0x35f   :  { %v11694_v0 = vcombine.high %v726_v6, %v730_v58  ;;  %v11693_v8 = vcombine.low %v726_v6, %v730_v58  ;;  %v781_v58 = vld [vmem:[%s17806_s28 + $0x1510] sm:$0xff] }
 0x360   :  { %7242 = vmatpush1.bf16.msra.mxu0 %v11635_v2  ;;  %7570 = vmatpush1.bf16.msra.mxu1 %v11637_v3  ;;  %v733_v2 = vld [vmem:[%s17806_s28 + $0x1390] sm:$0xff] }
 0x361   :  { %7243 = vmatprep.subr.bf16.mxu0 %v11644_v4  ;;  %7571 = vmatprep.subr.bf16.mxu1 %v11646_v63  ;;  %v737_v3 = vld [vmem:[%s17806_s28 + $0x13b0] sm:$0xff]  ;;  %v734_v4 = vld [vmem:[%s17806_s28 + $0x1398] sm:$0xff] }
 0x362   :  { %v738_v63 = vld [vmem:[%s17806_s28 + $0x13b8] sm:$0xff]  ;;  %v11700_v10 = vcombine.high %v733_v2, %v737_v3  ;;  %v11699_v15 = vcombine.low %v733_v2, %v737_v3 }
 0x363   :  { %v11702_v12 = vcombine.high %v734_v4, %v738_v63  ;;  %v11701_v17 = vcombine.low %v734_v4, %v738_v63  ;;  %v789_v4 = vld [vmem:[%s17806_s28 + $0x1550] sm:$0xff] }
 0x364   :  { %7244 = vmatpush1.bf16.msra.mxu0 %v11643_v13  ;;  %7572 = vmatpush1.bf16.msra.mxu1 %v11645_v1  ;;  %v741_v13 = vld [vmem:[%s17806_s28 + $0x13d0] sm:$0xff] }
 0x365   :  { %7245 = vmatprep.subr.bf16.mxu0 %v11652_v14  ;;  %7573 = vmatprep.subr.bf16.mxu1 %v11654_v53  ;;  %v745_v1 = vld [vmem:[%s17806_s28 + $0x13f0] sm:$0xff]  ;;  %v742_v14 = vld [vmem:[%s17806_s28 + $0x13d8] sm:$0xff] }
 0x366   :  { %v746_v53 = vld [vmem:[%s17806_s28 + $0x13f8] sm:$0xff]  ;;  %v11708_v9 = vcombine.high %v741_v13, %v745_v1  ;;  %v11707_v26 = vcombine.low %v741_v13, %v745_v1  ;;  %v793_v63 = vld [vmem:[%s17806_s28 + $0x1570] sm:$0xff] }
 0x367   :  { %v11710_v40 = vcombine.high %v742_v14, %v746_v53  ;;  %v11709_v50 = vcombine.low %v742_v14, %v746_v53  ;;  %v11756_v13 = vcombine.high %v789_v4, %v793_v63  ;;  %v797_v14 = vld [vmem:[%s17806_s28 + $0x1590] sm:$0xff] }
 0x368   :  { %7246 = vmatpush1.bf16.msra.mxu0 %v11651_v19  ;;  %7574 = vmatpush1.bf16.msra.mxu1 %v11653_v20  ;;  %v749_v19 = vld [vmem:[%s17806_s28 + $0x1410] sm:$0xff] }
 0x369   :  { %7247 = vmatprep.subr.bf16.mxu0 %v11660_v21  ;;  %7575 = vmatprep.subr.bf16.mxu1 %v11662_v25  ;;  %v753_v20 = vld [vmem:[%s17806_s28 + $0x1430] sm:$0xff]  ;;  %v750_v21 = vld [vmem:[%s17806_s28 + $0x1418] sm:$0xff] }
 0x36a   :  { %v754_v25 = vld [vmem:[%s17806_s28 + $0x1438] sm:$0xff]  ;;  %v11716_v59 = vcombine.high %v749_v19, %v753_v20  ;;  %v11715_v35 = vcombine.low %v749_v19, %v753_v20  ;;  %v801_v53 = vld [vmem:[%s17806_s28 + $0x15b0] sm:$0xff] }
 0x36b   :  { %v11718_v29 = vcombine.high %v750_v21, %v754_v25  ;;  %v11717_v36 = vcombine.low %v750_v21, %v754_v25  ;;  %v11764_v19 = vcombine.high %v797_v14, %v801_v53  ;;  %v805_v21 = vld [vmem:[%s17806_s28 + $0x15d0] sm:$0xff] }
 0x36c   :  { %7248 = vmatpush1.bf16.msra.mxu0 %v11659_v31  ;;  %7576 = vmatpush1.bf16.msra.mxu1 %v11661_v32  ;;  %v757_v31 = vld [vmem:[%s17806_s28 + $0x1450] sm:$0xff] }
 0x36d   :  { %7249 = vmatprep.subr.bf16.mxu0 %v11668_v30  ;;  %7577 = vmatprep.subr.bf16.mxu1 %v11670_v34  ;;  %v761_v32 = vld [vmem:[%s17806_s28 + $0x1470] sm:$0xff]  ;;  %v758_v30 = vld [vmem:[%s17806_s28 + $0x1458] sm:$0xff] }
 0x36e   :  { %v762_v34 = vld [vmem:[%s17806_s28 + $0x1478] sm:$0xff]  ;;  %v11724_v38 = vcombine.high %v757_v31, %v761_v32  ;;  %v11723_v46 = vcombine.low %v757_v31, %v761_v32  ;;  %v809_v25 = vld [vmem:[%s17806_s28 + $0x15f0] sm:$0xff] }
 0x36f   :  { %v11726_v39 = vcombine.high %v758_v30, %v762_v34  ;;  %v11725_v47 = vcombine.low %v758_v30, %v762_v34  ;;  %v11772_v31 = vcombine.high %v805_v21, %v809_v25  ;;  %v813_v30 = vld [vmem:[%s17806_s28 + $0x1610] sm:$0xff] }
 0x370   :  { %7250 = vmatpush1.bf16.msra.mxu0 %v11667_v41  ;;  %7578 = vmatpush1.bf16.msra.mxu1 %v11669_v42  ;;  %v765_v41 = vld [vmem:[%s17806_s28 + $0x1490] sm:$0xff] }
 0x371   :  { %7251 = vmatprep.subr.bf16.mxu0 %v11676_v44  ;;  %7579 = vmatprep.subr.bf16.mxu1 %v11678_v45  ;;  %v769_v42 = vld [vmem:[%s17806_s28 + $0x14b0] sm:$0xff]  ;;  %v766_v44 = vld [vmem:[%s17806_s28 + $0x1498] sm:$0xff] }
 0x372   :  { %v770_v45 = vld [vmem:[%s17806_s28 + $0x14b8] sm:$0xff]  ;;  %v11732_v61 = vcombine.high %v765_v41, %v769_v42  ;;  %v817_v34 = vld [vmem:[%s17806_s28 + $0x1630] sm:$0xff] }
 0x373   :  { %v11734_v23 = vcombine.high %v766_v44, %v770_v45  ;;  %v11733_v56 = vcombine.low %v766_v44, %v770_v45  ;;  %v821_v44 = vld [vmem:[%s17806_s28 + $0x1650] sm:$0xff] }
 0x374   :  { %7252 = vmatpush1.bf16.msra.mxu0 %v11675_v49  ;;  %7580 = vmatpush1.bf16.msra.mxu1 %v11677_v52  ;;  %v773_v49 = vld [vmem:[%s17806_s28 + $0x14d0] sm:$0xff] }
 0x375   :  { %7253 = vmatprep.subr.bf16.mxu0 %v11684_v54  ;;  %7581 = vmatprep.subr.bf16.mxu1 %v11686_v55  ;;  %v777_v52 = vld [vmem:[%s17806_s28 + $0x14f0] sm:$0xff]  ;;  %v778_v54 = vld [vmem:[%s17806_s28 + $0x14f8] sm:$0xff]  ;;  %v11731_v55 = vcombine.low %v765_v41, %v769_v42  ;;  %v11780_v41 = vcombine.high %v813_v30, %v817_v34 }
 0x376   :  { %v11740_v57 = vcombine.high %v773_v49, %v777_v52  ;;  %v825_v45 = vld [vmem:[%s17806_s28 + $0x1670] sm:$0xff] }
 0x378   :  { %7254 = vmatpush1.bf16.msra.mxu0 %v11683_v33  ;;  %7582 = vmatpush1.bf16.msra.mxu1 %v11685_v11  ;;  %v785_v33 = vld [vmem:[%s17806_s28 + $0x1530] sm:$0xff]  ;;  %v786_v11 = vld [vmem:[%s17806_s28 + $0x1538] sm:$0xff] }
 0x379   :  { %7255 = vmatprep.subr.bf16.mxu0 %v11692_v60  ;;  %7583 = vmatprep.subr.bf16.mxu1 %v11694_v0  ;;  %v11739_v60 = vcombine.low %v773_v49, %v777_v52  ;;  %v11748_v2 = vcombine.high %v781_v58, %v785_v33  ;;  %v11788_v49 = vcombine.high %v821_v44, %v825_v45 }
 0x37c   :  { %7256 = vmatpush1.bf16.msra.mxu0 %v11691_v5  ;;  %7584 = vmatpush1.bf16.msra.mxu1 %v11693_v8  ;;  %v790_v5 = vld [vmem:[%s17806_s28 + $0x1558] sm:$0xff] }
 0x37d   :  { %7257 = vmatprep.subr.bf16.mxu0 %v11700_v10  ;;  %7585 = vmatprep.subr.bf16.mxu1 %v11702_v12  ;;  %v794_v8 = vld [vmem:[%s17806_s28 + $0x1578] sm:$0xff]  ;;  %v11747_v10 = vcombine.low %v781_v58, %v785_v33 }
 0x37e   :  { %v11758_v1 = vcombine.high %v790_v5, %v794_v8 }
 0x380   :  { %7258 = vmatpush1.bf16.msra.mxu0 %v11699_v15  ;;  %7586 = vmatpush1.bf16.msra.mxu1 %v11701_v17  ;;  %v798_v15 = vld [vmem:[%s17806_s28 + $0x1598] sm:$0xff] }
 0x381   :  { %7259 = vmatprep.subr.bf16.mxu0 %v11708_v9  ;;  %7587 = vmatprep.subr.bf16.mxu1 %v11710_v40  ;;  %v802_v17 = vld [vmem:[%s17806_s28 + $0x15b8] sm:$0xff]  ;;  %v11755_v9 = vcombine.low %v789_v4, %v793_v63  ;;  %v11757_v40 = vcombine.low %v790_v5, %v794_v8  ;;  %v845_v5 = vld [vmem:[%s17806_s28 + $0x1710] sm:$0xff] }
 0x382   :  { %v11766_v20 = vcombine.high %v798_v15, %v802_v17  ;;  %v849_v8 = vld [vmem:[%s17806_s28 + $0x1730] sm:$0xff] }
 0x384   :  { %7260 = vmatpush1.bf16.msra.mxu0 %v11707_v26  ;;  %7588 = vmatpush1.bf16.msra.mxu1 %v11709_v50  ;;  %v806_v26 = vld [vmem:[%s17806_s28 + $0x15d8] sm:$0xff] }
 0x385   :  { %7270 = vmatprep.subr.bf16.mxu0 %v11716_v59  ;;  %7598 = vmatprep.subr.bf16.mxu1 %v11718_v29  ;;  %v810_v50 = vld [vmem:[%s17806_s28 + $0x15f8] sm:$0xff]  ;;  %v11763_v59 = vcombine.low %v797_v14, %v801_v53  ;;  %v11765_v29 = vcombine.low %v798_v15, %v802_v17  ;;  %v11812_v14 = vcombine.high %v845_v5, %v849_v8  ;;  %v853_v15 = vld [vmem:[%s17806_s28 + $0x1750] sm:$0xff] }
 0x386   :  { %v11774_v32 = vcombine.high %v806_v26, %v810_v50  ;;  %v857_v17 = vld [vmem:[%s17806_s28 + $0x1770] sm:$0xff] }
 0x387   :  { %7262 = vmatmul.mubr.bf16.vlgmr.msra.gmra.mrb[4].mxu0 %v14648_v51  ;;  %7590 = vmatmul.mubr.bf16.vlgmr.msra.gmra.mrb[4].mxu1 %v14648_v51  ;;  %v774_v51 = vld [vmem:[%s17806_s28 + $0x14d8] sm:$0xff] }
 0x388   :  { %7271 = vmatpush1.bf16.msra.mxu0 %v11715_v35  ;;  %7599 = vmatpush1.bf16.msra.mxu1 %v11717_v36  ;;  %v11742_v6 = vcombine.high %v774_v51, %v778_v54  ;;  %v11741_v0 = vcombine.low %v774_v51, %v778_v54  ;;  %v814_v35 = vld [vmem:[%s17806_s28 + $0x1618] sm:$0xff]  ;;  %v829_v51 = vld [vmem:[%s17806_s28 + $0x1690] sm:$0xff] }
 0x389   :  { %7272 = vmatprep.subr.bf16.mxu0 %v11724_v38  ;;  %7600 = vmatprep.subr.bf16.mxu1 %v11726_v39  ;;  %v818_v36 = vld [vmem:[%s17806_s28 + $0x1638] sm:$0xff]  ;;  %v11771_v38 = vcombine.low %v805_v21, %v809_v25  ;;  %v11773_v39 = vcombine.low %v806_v26, %v810_v50  ;;  %v833_v54 = vld [vmem:[%s17806_s28 + $0x16b0] sm:$0xff]  ;;  %v11820_v21 = vcombine.high %v853_v15, %v857_v17 }
 0x38a   :  { %7302 = vmatprep.mubr.bf16.mxu0 %v14664_v62  ;;  %7630 = vmatprep.mubr.bf16.mxu1 %v14664_v62  ;;  %v782_v62 = vld [vmem:[%s17806_s28 + $0x1518] sm:$0xff]  ;;  %v11782_v42 = vcombine.high %v814_v35, %v818_v36  ;;  %v11796_v58 = vcombine.high %v829_v51, %v833_v54  ;;  %v861_v26 = vld [vmem:[%s17806_s28 + $0x1790] sm:$0xff] }
 0x38b   :  { %v11750_v3 = vcombine.high %v782_v62, %v786_v11  ;;  %v11749_v12 = vcombine.low %v782_v62, %v786_v11  ;;  %v837_v62 = vld [vmem:[%s17806_s28 + $0x16d0] sm:$0xff] }
 0x38c   :  { %7273 = vmatpush1.bf16.msra.mxu0 %v11723_v46  ;;  %7601 = vmatpush1.bf16.msra.mxu1 %v11725_v47  ;;  %v822_v46 = vld [vmem:[%s17806_s28 + $0x1658] sm:$0xff]  ;;  %v841_v11 = vld [vmem:[%s17806_s28 + $0x16f0] sm:$0xff] }
 0x38d   :  { %7274 = vmatprep.subr.bf16.mxu0 %v11732_v61  ;;  %7602 = vmatprep.subr.bf16.mxu1 %v11734_v23  ;;  %v826_v47 = vld [vmem:[%s17806_s28 + $0x1678] sm:$0xff]  ;;  %v11779_v61 = vcombine.low %v813_v30, %v817_v34  ;;  %v11781_v23 = vcombine.low %v814_v35, %v818_v36  ;;  %v11804_v4 = vcombine.high %v837_v62, %v841_v11  ;;  %v865_v50 = vld [vmem:[%s17806_s28 + $0x17b0] sm:$0xff] }
 0x38e   :  { %v11790_v52 = vcombine.high %v822_v46, %v826_v47  ;;  %v11828_v30 = vcombine.high %v861_v26, %v865_v50  ;;  %v869_v35 = vld [vmem:[%s17806_s28 + $0x17d0] sm:$0xff] }
 0x38f   :  { %v873_v36 = vld [vmem:[%s17806_s28 + $0x17f0] sm:$0xff] }
 0x390   :  { %7275 = vmatpush1.bf16.msra.mxu0 %v11731_v55  ;;  %7603 = vmatpush1.bf16.msra.mxu1 %v11733_v56  ;;  %v830_v55 = vld [vmem:[%s17806_s28 + $0x1698] sm:$0xff] }
 0x391   :  { %7276 = vmatprep.subr.bf16.mxu0 %v11740_v57  ;;  %7604 = vmatprep.subr.bf16.mxu1 %v11742_v6  ;;  %v834_v56 = vld [vmem:[%s17806_s28 + $0x16b8] sm:$0xff]  ;;  %v11787_v57 = vcombine.low %v821_v44, %v825_v45  ;;  %v11789_v6 = vcombine.low %v822_v46, %v826_v47  ;;  %v11836_v44 = vcombine.high %v869_v35, %v873_v36  ;;  %v877_v46 = vld [vmem:[%s17806_s28 + $0x1810] sm:$0xff] }
 0x392   :  { %v11798_v33 = vcombine.high %v830_v55, %v834_v56  ;;  %v881_v47 = vld [vmem:[%s17806_s28 + $0x1830] sm:$0xff] }
 0x394   :  { %7277 = vmatpush1.bf16.msra.mxu0 %v11739_v60  ;;  %7605 = vmatpush1.bf16.msra.mxu1 %v11741_v0  ;;  %v838_v60 = vld [vmem:[%s17806_s28 + $0x16d8] sm:$0xff] }
 0x395   :  { %7278 = vmatprep.subr.bf16.mxu0 %v11748_v2  ;;  %7606 = vmatprep.subr.bf16.mxu1 %v11750_v3  ;;  %v842_v0 = vld [vmem:[%s17806_s28 + $0x16f8] sm:$0xff]  ;;  %v11795_v2 = vcombine.low %v829_v51, %v833_v54  ;;  %v11797_v3 = vcombine.low %v830_v55, %v834_v56  ;;  %v11844_v51 = vcombine.high %v877_v46, %v881_v47  ;;  %v885_v55 = vld [vmem:[%s17806_s28 + $0x1850] sm:$0xff] }
 0x396   :  { %v11806_v63 = vcombine.high %v838_v60, %v842_v0  ;;  %v889_v56 = vld [vmem:[%s17806_s28 + $0x1870] sm:$0xff] }
 0x398   :  { %7279 = vmatpush1.bf16.msra.mxu0 %v11747_v10  ;;  %7607 = vmatpush1.bf16.msra.mxu1 %v11749_v12  ;;  %v846_v10 = vld [vmem:[%s17806_s28 + $0x1718] sm:$0xff] }
 0x399   :  { %7280 = vmatprep.subr.bf16.mxu0 %v11756_v13  ;;  %7608 = vmatprep.subr.bf16.mxu1 %v11758_v1  ;;  %v850_v12 = vld [vmem:[%s17806_s28 + $0x1738] sm:$0xff]  ;;  %v11803_v13 = vcombine.low %v837_v62, %v841_v11  ;;  %v11805_v1 = vcombine.low %v838_v60, %v842_v0  ;;  %v11852_v62 = vcombine.high %v885_v55, %v889_v56  ;;  %v893_v60 = vld [vmem:[%s17806_s28 + $0x1890] sm:$0xff] }
 0x39a   :  { %v11814_v53 = vcombine.high %v846_v10, %v850_v12  ;;  %v897_v0 = vld [vmem:[%s17806_s28 + $0x18b0] sm:$0xff] }
 0x39c   :  { %7281 = vmatpush1.bf16.msra.mxu0 %v11755_v9  ;;  %7609 = vmatpush1.bf16.msra.mxu1 %v11757_v40  ;;  %v854_v9 = vld [vmem:[%s17806_s28 + $0x1758] sm:$0xff] }
 0x39d   :  { %7282 = vmatprep.subr.bf16.mxu0 %v11764_v19  ;;  %7610 = vmatprep.subr.bf16.mxu1 %v11766_v20  ;;  %v858_v40 = vld [vmem:[%s17806_s28 + $0x1778] sm:$0xff]  ;;  %v11811_v19 = vcombine.low %v845_v5, %v849_v8  ;;  %v11813_v20 = vcombine.low %v846_v10, %v850_v12  ;;  %v11860_v5 = vcombine.high %v893_v60, %v897_v0  ;;  %v901_v10 = vld [vmem:[%s17806_s28 + $0x18d0] sm:$0xff] }
 0x39e   :  { %v11822_v25 = vcombine.high %v854_v9, %v858_v40  ;;  %v905_v12 = vld [vmem:[%s17806_s28 + $0x18f0] sm:$0xff] }
 0x3a0   :  { %7283 = vmatpush1.bf16.msra.mxu0 %v11763_v59  ;;  %7611 = vmatpush1.bf16.msra.mxu1 %v11765_v29  ;;  %v862_v59 = vld [vmem:[%s17806_s28 + $0x1798] sm:$0xff] }
 0x3a1   :  { %7284 = vmatprep.subr.bf16.mxu0 %v11772_v31  ;;  %7612 = vmatprep.subr.bf16.mxu1 %v11774_v32  ;;  %v866_v29 = vld [vmem:[%s17806_s28 + $0x17b8] sm:$0xff]  ;;  %v11819_v31 = vcombine.low %v853_v15, %v857_v17  ;;  %v11821_v32 = vcombine.low %v854_v9, %v858_v40  ;;  %v909_v17 = vld [vmem:[%s17806_s28 + $0x1910] sm:$0xff] }
 0x3a2   :  { %v11830_v34 = vcombine.high %v862_v59, %v866_v29  ;;  %v913_v9 = vld [vmem:[%s17806_s28 + $0x1930] sm:$0xff]  ;;  %v914_v40 = vld [vmem:[%s17806_s28 + $0x1938] sm:$0xff] }
 0x3a4   :  { %7285 = vmatpush1.bf16.msra.mxu0 %v11771_v38  ;;  %7613 = vmatpush1.bf16.msra.mxu1 %v11773_v39  ;;  %v870_v38 = vld [vmem:[%s17806_s28 + $0x17d8] sm:$0xff] }
 0x3a5   :  { %7286 = vmatprep.subr.bf16.mxu0 %v11780_v41  ;;  %7614 = vmatprep.subr.bf16.mxu1 %v11782_v42  ;;  %v874_v39 = vld [vmem:[%s17806_s28 + $0x17f8] sm:$0xff]  ;;  %v11827_v41 = vcombine.low %v861_v26, %v865_v50  ;;  %v11829_v42 = vcombine.low %v862_v59, %v866_v29  ;;  %v917_v26 = vld [vmem:[%s17806_s28 + $0x1950] sm:$0xff] }
 0x3a6   :  { %v11838_v45 = vcombine.high %v870_v38, %v874_v39  ;;  %v921_v50 = vld [vmem:[%s17806_s28 + $0x1970] sm:$0xff]  ;;  %v918_v59 = vld [vmem:[%s17806_s28 + $0x1958] sm:$0xff] }
 0x3a7   :  { %v922_v29 = vld [vmem:[%s17806_s28 + $0x1978] sm:$0xff] }
 0x3a8   :  { %7287 = vmatpush1.bf16.msra.mxu0 %v11779_v61  ;;  %7615 = vmatpush1.bf16.msra.mxu1 %v11781_v23  ;;  %v878_v61 = vld [vmem:[%s17806_s28 + $0x1818] sm:$0xff] }
 0x3a9   :  { %7288 = vmatprep.subr.bf16.mxu0 %v11788_v49  ;;  %7616 = vmatprep.subr.bf16.mxu1 %v11790_v52  ;;  %v882_v23 = vld [vmem:[%s17806_s28 + $0x1838] sm:$0xff]  ;;  %v11835_v49 = vcombine.low %v869_v35, %v873_v36  ;;  %v11837_v52 = vcombine.low %v870_v38, %v874_v39  ;;  %v925_v35 = vld [vmem:[%s17806_s28 + $0x1990] sm:$0xff] }
 0x3aa   :  { %v11846_v54 = vcombine.high %v878_v61, %v882_v23  ;;  %v929_v36 = vld [vmem:[%s17806_s28 + $0x19b0] sm:$0xff]  ;;  %v926_v38 = vld [vmem:[%s17806_s28 + $0x1998] sm:$0xff] }
 0x3ab   :  { %v930_v39 = vld [vmem:[%s17806_s28 + $0x19b8] sm:$0xff] }
 0x3ac   :  { %7289 = vmatpush1.bf16.msra.mxu0 %v11787_v57  ;;  %7617 = vmatpush1.bf16.msra.mxu1 %v11789_v6  ;;  %v886_v57 = vld [vmem:[%s17806_s28 + $0x1858] sm:$0xff] }
 0x3ad   :  { %7290 = vmatprep.subr.bf16.mxu0 %v11796_v58  ;;  %7618 = vmatprep.subr.bf16.mxu1 %v11798_v33  ;;  %v890_v6 = vld [vmem:[%s17806_s28 + $0x1878] sm:$0xff]  ;;  %v11843_v58 = vcombine.low %v877_v46, %v881_v47  ;;  %v11845_v33 = vcombine.low %v878_v61, %v882_v23  ;;  %v933_v46 = vld [vmem:[%s17806_s28 + $0x19d0] sm:$0xff] }
 0x3ae   :  { %v11854_v11 = vcombine.high %v886_v57, %v890_v6  ;;  %v937_v47 = vld [vmem:[%s17806_s28 + $0x19f0] sm:$0xff]  ;;  %v934_v61 = vld [vmem:[%s17806_s28 + $0x19d8] sm:$0xff] }
 0x3af   :  { %v938_v23 = vld [vmem:[%s17806_s28 + $0x19f8] sm:$0xff] }
 0x3b0   :  { %7291 = vmatpush1.bf16.msra.mxu0 %v11795_v2  ;;  %7619 = vmatpush1.bf16.msra.mxu1 %v11797_v3  ;;  %v894_v2 = vld [vmem:[%s17806_s28 + $0x1898] sm:$0xff] }
 0x3b1   :  { %7292 = vmatprep.subr.bf16.mxu0 %v11804_v4  ;;  %7620 = vmatprep.subr.bf16.mxu1 %v11806_v63  ;;  %v898_v3 = vld [vmem:[%s17806_s28 + $0x18b8] sm:$0xff]  ;;  %v11851_v4 = vcombine.low %v885_v55, %v889_v56  ;;  %v11853_v63 = vcombine.low %v886_v57, %v890_v6  ;;  %v941_v55 = vld [vmem:[%s17806_s28 + $0x1a10] sm:$0xff] }
 0x3b2   :  { %v11862_v8 = vcombine.high %v894_v2, %v898_v3  ;;  %v945_v56 = vld [vmem:[%s17806_s28 + $0x1a30] sm:$0xff]  ;;  %v942_v57 = vld [vmem:[%s17806_s28 + $0x1a18] sm:$0xff] }
 0x3b3   :  { %v946_v6 = vld [vmem:[%s17806_s28 + $0x1a38] sm:$0xff] }
 0x3b4   :  { %7293 = vmatpush1.bf16.msra.mxu0 %v11803_v13  ;;  %7621 = vmatpush1.bf16.msra.mxu1 %v11805_v1  ;;  %v906_v13 = vld [vmem:[%s17806_s28 + $0x18f8] sm:$0xff]  ;;  %v11859_v1 = vcombine.low %v893_v60, %v897_v0  ;;  %v949_v60 = vld [vmem:[%s17806_s28 + $0x1a50] sm:$0xff] }
 0x3b5   :  { %7294 = vmatprep.subr.bf16.mxu0 %v11812_v14  ;;  %7622 = vmatprep.subr.bf16.mxu1 %v11814_v53  ;;  %v11861_v14 = vcombine.low %v894_v2, %v898_v3  ;;  %v11868_v53 = vcombine.high %v901_v10, %v905_v12  ;;  %v953_v0 = vld [vmem:[%s17806_s28 + $0x1a70] sm:$0xff]  ;;  %v950_v2 = vld [vmem:[%s17806_s28 + $0x1a58] sm:$0xff] }
 0x3b6   :  { %v954_v3 = vld [vmem:[%s17806_s28 + $0x1a78] sm:$0xff] }
 0x3b8   :  { %7295 = vmatpush1.bf16.msra.mxu0 %v11811_v19  ;;  %7623 = vmatpush1.bf16.msra.mxu1 %v11813_v20  ;;  %v11867_v19 = vcombine.low %v901_v10, %v905_v12  ;;  %v957_v10 = vld [vmem:[%s17806_s28 + $0x1a90] sm:$0xff] }
 0x3b9   :  { %7296 = vmatprep.subr.bf16.mxu0 %v11820_v21  ;;  %7624 = vmatprep.subr.bf16.mxu1 %v11822_v25  ;;  %v11876_v21 = vcombine.high %v909_v17, %v913_v9  ;;  %v961_v12 = vld [vmem:[%s17806_s28 + $0x1ab0] sm:$0xff] }
 0x3bc   :  { %7297 = vmatpush1.bf16.msra.mxu0 %v11819_v31  ;;  %7625 = vmatpush1.bf16.msra.mxu1 %v11821_v32  ;;  %v11875_v31 = vcombine.low %v909_v17, %v913_v9  ;;  %v965_v17 = vld [vmem:[%s17806_s28 + $0x1ad0] sm:$0xff] }
 0x3bd   :  { %7298 = vmatprep.subr.bf16.mxu0 %v11828_v30  ;;  %7626 = vmatprep.subr.bf16.mxu1 %v11830_v34  ;;  %v11884_v30 = vcombine.high %v917_v26, %v921_v50  ;;  %v11886_v34 = vcombine.high %v918_v59, %v922_v29  ;;  %v969_v9 = vld [vmem:[%s17806_s28 + $0x1af0] sm:$0xff] }
 0x3c0   :  { %7299 = vmatpush1.bf16.msra.mxu0 %v11827_v41  ;;  %7627 = vmatpush1.bf16.msra.mxu1 %v11829_v42  ;;  %v11883_v41 = vcombine.low %v917_v26, %v921_v50  ;;  %v11885_v42 = vcombine.low %v918_v59, %v922_v29  ;;  %v973_v26 = vld [vmem:[%s17806_s28 + $0x1b10] sm:$0xff]  ;;  %v974_v59 = vld [vmem:[%s17806_s28 + $0x1b18] sm:$0xff] }
 0x3c1   :  { %7300 = vmatprep.subr.bf16.mxu0 %v11836_v44  ;;  %7628 = vmatprep.subr.bf16.mxu1 %v11838_v45  ;;  %v11892_v44 = vcombine.high %v925_v35, %v929_v36  ;;  %v11894_v45 = vcombine.high %v926_v38, %v930_v39  ;;  %v977_v50 = vld [vmem:[%s17806_s28 + $0x1b30] sm:$0xff]  ;;  %v978_v29 = vld [vmem:[%s17806_s28 + $0x1b38] sm:$0xff] }
 0x3c4   :  { %7301 = vmatpush1.bf16.msra.mxu0 %v11835_v49  ;;  %7629 = vmatpush1.bf16.msra.mxu1 %v11837_v52  ;;  %v11891_v49 = vcombine.low %v925_v35, %v929_v36  ;;  %v11893_v52 = vcombine.low %v926_v38, %v930_v39  ;;  %v981_v35 = vld [vmem:[%s17806_s28 + $0x1b50] sm:$0xff]  ;;  %v982_v38 = vld [vmem:[%s17806_s28 + $0x1b58] sm:$0xff] }
 0x3c5   :  { %7311 = vmatprep.subr.bf16.mxu0 %v11844_v51  ;;  %7639 = vmatprep.subr.bf16.mxu1 %v11846_v54  ;;  %v11900_v51 = vcombine.high %v933_v46, %v937_v47  ;;  %v11902_v54 = vcombine.high %v934_v61, %v938_v23  ;;  %v985_v36 = vld [vmem:[%s17806_s28 + $0x1b70] sm:$0xff]  ;;  %v986_v39 = vld [vmem:[%s17806_s28 + $0x1b78] sm:$0xff] }
 0x3c7   :  { %7303 = vmatmul.mubr.bf16.vlgmr.msra.gmra.mrb[4].mxu0 %v14859_v27  ;;  %7631 = vmatmul.mubr.bf16.vlgmr.msra.gmra.mrb[4].mxu1 %v14859_v27  ;;  %v902_v27 = vld [vmem:[%s17806_s28 + $0x18d8] sm:$0xff] }
 0x3c8   :  { %7312 = vmatpush1.bf16.msra.mxu0 %v11843_v58  ;;  %7640 = vmatpush1.bf16.msra.mxu1 %v11845_v33  ;;  %v11870_v15 = vcombine.high %v902_v27, %v906_v13  ;;  %v11869_v20 = vcombine.low %v902_v27, %v906_v13  ;;  %v11899_v58 = vcombine.low %v933_v46, %v937_v47  ;;  %v958_v27 = vld [vmem:[%s17806_s28 + $0x1a98] sm:$0xff]  ;;  %v989_v46 = vld [vmem:[%s17806_s28 + $0x1b90] sm:$0xff] }
 0x3c9   :  { %7313 = vmatprep.subr.bf16.mxu0 %v11852_v62  ;;  %7641 = vmatprep.subr.bf16.mxu1 %v11854_v11  ;;  %v11901_v33 = vcombine.low %v934_v61, %v938_v23  ;;  %v11908_v62 = vcombine.high %v941_v55, %v945_v56  ;;  %v11910_v11 = vcombine.high %v942_v57, %v946_v6  ;;  %v962_v13 = vld [vmem:[%s17806_s28 + $0x1ab8] sm:$0xff]  ;;  %v993_v47 = vld [vmem:[%s17806_s28 + $0x1bb0] sm:$0xff] }
 0x3ca   :  { %7343 = vmatprep.mubr.bf16.mxu0 %v14874_v37  ;;  %7671 = vmatprep.mubr.bf16.mxu1 %v14874_v37  ;;  %v910_v37 = vld [vmem:[%s17806_s28 + $0x1918] sm:$0xff] }
 0x3cb   :  { %v11878_v25 = vcombine.high %v910_v37, %v914_v40  ;;  %v11877_v32 = vcombine.low %v910_v37, %v914_v40  ;;  %v966_v37 = vld [vmem:[%s17806_s28 + $0x1ad8] sm:$0xff] }
 0x3cc   :  { %7314 = vmatpush1.bf16.msra.mxu0 %v11851_v4  ;;  %7642 = vmatpush1.bf16.msra.mxu1 %v11853_v63  ;;  %v11907_v4 = vcombine.low %v941_v55, %v945_v56  ;;  %v11909_v63 = vcombine.low %v942_v57, %v946_v6  ;;  %v970_v40 = vld [vmem:[%s17806_s28 + $0x1af8] sm:$0xff]  ;;  %v997_v55 = vld [vmem:[%s17806_s28 + $0x1bd0] sm:$0xff] }
 0x3cd   :  { %7315 = vmatprep.subr.bf16.mxu0 %v11860_v5  ;;  %7643 = vmatprep.subr.bf16.mxu1 %v11862_v8  ;;  %v11916_v5 = vcombine.high %v949_v60, %v953_v0  ;;  %v11918_v8 = vcombine.high %v950_v2, %v954_v3  ;;  %v990_v61 = vld [vmem:[%s17806_s28 + $0x1b98] sm:$0xff]  ;;  %v1001_v56 = vld [vmem:[%s17806_s28 + $0x1bf0] sm:$0xff] }
 0x3ce   :  { %v994_v23 = vld [vmem:[%s17806_s28 + $0x1bb8] sm:$0xff] }
 0x3cf   :  { %v998_v57 = vld [vmem:[%s17806_s28 + $0x1bd8] sm:$0xff] }
 0x3d0   :  { %7316 = vmatpush1.bf16.msra.mxu0 %v11859_v1  ;;  %7644 = vmatpush1.bf16.msra.mxu1 %v11861_v14  ;;  %v11915_v1 = vcombine.low %v949_v60, %v953_v0  ;;  %v11917_v14 = vcombine.low %v950_v2, %v954_v3  ;;  %v1002_v6 = vld [vmem:[%s17806_s28 + $0x1bf8] sm:$0xff]  ;;  %v1005_v60 = vld [vmem:[%s17806_s28 + $0x1c10] sm:$0xff] }
 0x3d1   :  { %7317 = vmatprep.subr.bf16.mxu0 %v11868_v53  ;;  %7645 = vmatprep.subr.bf16.mxu1 %v11870_v15  ;;  %v11924_v53 = vcombine.high %v957_v10, %v961_v12  ;;  %v11926_v15 = vcombine.high %v958_v27, %v962_v13  ;;  %v1009_v0 = vld [vmem:[%s17806_s28 + $0x1c30] sm:$0xff]  ;;  %v1006_v2 = vld [vmem:[%s17806_s28 + $0x1c18] sm:$0xff] }
 0x3d2   :  { %v1010_v3 = vld [vmem:[%s17806_s28 + $0x1c38] sm:$0xff] }
 0x3d4   :  { %7318 = vmatpush1.bf16.msra.mxu0 %v11867_v19  ;;  %7646 = vmatpush1.bf16.msra.mxu1 %v11869_v20  ;;  %v11923_v19 = vcombine.low %v957_v10, %v961_v12  ;;  %v11925_v20 = vcombine.low %v958_v27, %v962_v13  ;;  %v1013_v10 = vld [vmem:[%s17806_s28 + $0x1c50] sm:$0xff]  ;;  %v1014_v27 = vld [vmem:[%s17806_s28 + $0x1c58] sm:$0xff] }
 0x3d5   :  { %7319 = vmatprep.subr.bf16.mxu0 %v11876_v21  ;;  %7647 = vmatprep.subr.bf16.mxu1 %v11878_v25  ;;  %v11932_v21 = vcombine.high %v965_v17, %v969_v9  ;;  %v11934_v25 = vcombine.high %v966_v37, %v970_v40  ;;  %v1017_v12 = vld [vmem:[%s17806_s28 + $0x1c70] sm:$0xff]  ;;  %v1018_v13 = vld [vmem:[%s17806_s28 + $0x1c78] sm:$0xff] }
 0x3d8   :  { %7320 = vmatpush1.bf16.msra.mxu0 %v11875_v31  ;;  %7648 = vmatpush1.bf16.msra.mxu1 %v11877_v32  ;;  %v11931_v31 = vcombine.low %v965_v17, %v969_v9  ;;  %v11933_v32 = vcombine.low %v966_v37, %v970_v40  ;;  %v1021_v17 = vld [vmem:[%s17806_s28 + $0x1c90] sm:$0xff]  ;;  %v1022_v37 = vld [vmem:[%s17806_s28 + $0x1c98] sm:$0xff] }
 0x3d9   :  { %7321 = vmatprep.subr.bf16.mxu0 %v11884_v30  ;;  %7649 = vmatprep.subr.bf16.mxu1 %v11886_v34  ;;  %v11940_v30 = vcombine.high %v973_v26, %v977_v50  ;;  %v11942_v34 = vcombine.high %v974_v59, %v978_v29  ;;  %v1025_v9 = vld [vmem:[%s17806_s28 + $0x1cb0] sm:$0xff]  ;;  %v1026_v40 = vld [vmem:[%s17806_s28 + $0x1cb8] sm:$0xff] }
 0x3dc   :  { %7322 = vmatpush1.bf16.msra.mxu0 %v11883_v41  ;;  %7650 = vmatpush1.bf16.msra.mxu1 %v11885_v42  ;;  %v11939_v41 = vcombine.low %v973_v26, %v977_v50  ;;  %v11941_v42 = vcombine.low %v974_v59, %v978_v29  ;;  %v1029_v26 = vld [vmem:[%s17806_s28 + $0x1cd0] sm:$0xff]  ;;  %v1034_v59 = vld [vmem:[%s17806_s28 + $0x1cf8] sm:$0xff]  ;;  %v11987_v29 = vcombine.low %v1021_v17, %v1025_v9 }
 0x3dd   :  { %7323 = vmatprep.subr.bf16.mxu0 %v11892_v44  ;;  %7651 = vmatprep.subr.bf16.mxu1 %v11894_v45  ;;  %v11948_v44 = vcombine.high %v981_v35, %v985_v36  ;;  %v11950_v45 = vcombine.high %v982_v38, %v986_v39  ;;  %v1033_v50 = vld [vmem:[%s17806_s28 + $0x1cf0] sm:$0xff] }
 0x3e0   :  { %7324 = vmatpush1.bf16.msra.mxu0 %v11891_v49  ;;  %7652 = vmatpush1.bf16.msra.mxu1 %v11893_v52  ;;  %v11947_v49 = vcombine.low %v981_v35, %v985_v36  ;;  %v11949_v52 = vcombine.low %v982_v38, %v986_v39  ;;  %v1041_v35 = vld [vmem:[%s17806_s28 + $0x1d30] sm:$0xff]  ;;  %v1042_v36 = vld [vmem:[%s17806_s28 + $0x1d38] sm:$0xff]  ;;  %v11995_v38 = vcombine.low %v1029_v26, %v1033_v50 }
 0x3e1   :  { %7325 = vmatprep.subr.bf16.mxu0 %v11900_v51  ;;  %7653 = vmatprep.subr.bf16.mxu1 %v11902_v54  ;;  %v11956_v51 = vcombine.high %v989_v46, %v993_v47  ;;  %v11958_v54 = vcombine.high %v990_v61, %v994_v23 }
 0x3e4   :  { %7326 = vmatpush1.bf16.msra.mxu0 %v11899_v58  ;;  %7654 = vmatpush1.bf16.msra.mxu1 %v11901_v33  ;;  %v11955_v58 = vcombine.low %v989_v46, %v993_v47  ;;  %v11957_v33 = vcombine.low %v990_v61, %v994_v23  ;;  %v1046_v46 = vld [vmem:[%s17806_s28 + $0x1d58] sm:$0xff] }
 0x3e5   :  { %7327 = vmatprep.subr.bf16.mxu0 %v11908_v62  ;;  %7655 = vmatprep.subr.bf16.mxu1 %v11910_v11  ;;  %v11964_v62 = vcombine.high %v997_v55, %v1001_v56  ;;  %v11966_v11 = vcombine.high %v998_v57, %v1002_v6  ;;  %v1050_v47 = vld [vmem:[%s17806_s28 + $0x1d78] sm:$0xff] }
 0x3e8   :  { %7328 = vmatpush1.bf16.msra.mxu0 %v11907_v4  ;;  %7656 = vmatpush1.bf16.msra.mxu1 %v11909_v63  ;;  %v11963_v4 = vcombine.low %v997_v55, %v1001_v56  ;;  %v11965_v63 = vcombine.low %v998_v57, %v1002_v6  ;;  %v1054_v55 = vld [vmem:[%s17806_s28 + $0x1d98] sm:$0xff]  ;;  %v12013_v6 = vcombine.low %v1046_v46, %v1050_v47 }
 0x3e9   :  { %7329 = vmatprep.subr.bf16.mxu0 %v11916_v5  ;;  %7657 = vmatprep.subr.bf16.mxu1 %v11918_v8  ;;  %v11972_v5 = vcombine.high %v1005_v60, %v1009_v0  ;;  %v11974_v8 = vcombine.high %v1006_v2, %v1010_v3  ;;  %v1058_v56 = vld [vmem:[%s17806_s28 + $0x1db8] sm:$0xff] }
 0x3ec   :  { %7330 = vmatpush1.bf16.msra.mxu0 %v11915_v1  ;;  %7658 = vmatpush1.bf16.msra.mxu1 %v11917_v14  ;;  %v11971_v1 = vcombine.low %v1005_v60, %v1009_v0  ;;  %v11973_v14 = vcombine.low %v1006_v2, %v1010_v3  ;;  %v1062_v60 = vld [vmem:[%s17806_s28 + $0x1dd8] sm:$0xff]  ;;  %v12021_v3 = vcombine.low %v1054_v55, %v1058_v56 }
 0x3ed   :  { %7331 = vmatprep.subr.bf16.mxu0 %v11924_v53  ;;  %7659 = vmatprep.subr.bf16.mxu1 %v11926_v15  ;;  %v11980_v53 = vcombine.high %v1013_v10, %v1017_v12  ;;  %v11982_v15 = vcombine.high %v1014_v27, %v1018_v13  ;;  %v1066_v0 = vld [vmem:[%s17806_s28 + $0x1df8] sm:$0xff] }
 0x3f0   :  { %7332 = vmatpush1.bf16.msra.mxu0 %v11923_v19  ;;  %7660 = vmatpush1.bf16.msra.mxu1 %v11925_v20  ;;  %v11979_v19 = vcombine.low %v1013_v10, %v1017_v12  ;;  %v11981_v20 = vcombine.low %v1014_v27, %v1018_v13  ;;  %v1070_v10 = vld [vmem:[%s17806_s28 + $0x1e18] sm:$0xff]  ;;  %v12029_v13 = vcombine.low %v1062_v60, %v1066_v0 }
 0x3f1   :  { %7333 = vmatprep.subr.bf16.mxu0 %v11932_v21  ;;  %7661 = vmatprep.subr.bf16.mxu1 %v11934_v25  ;;  %v11988_v21 = vcombine.high %v1021_v17, %v1025_v9  ;;  %v11990_v25 = vcombine.high %v1022_v37, %v1026_v40  ;;  %v1074_v12 = vld [vmem:[%s17806_s28 + $0x1e38] sm:$0xff] }
 0x3f2   :  { %v1078_v17 = vld [vmem:[%s17806_s28 + $0x1e58] sm:$0xff] }
 0x3f3   :  { %v1082_v9 = vld [vmem:[%s17806_s28 + $0x1e78] sm:$0xff] }
 0x3f4   :  { %7334 = vmatpush1.bf16.msra.mxu0 %v11931_v31  ;;  %7662 = vmatpush1.bf16.msra.mxu1 %v11933_v32  ;;  %v11989_v31 = vcombine.low %v1022_v37, %v1026_v40  ;;  %v11996_v32 = vcombine.high %v1029_v26, %v1033_v50  ;;  %v12037_v40 = vcombine.low %v1070_v10, %v1074_v12  ;;  %v1086_v26 = vld [vmem:[%s17806_s28 + $0x1e98] sm:$0xff] }
 0x3f5   :  { %7335 = vmatprep.subr.bf16.mxu0 %v11940_v30  ;;  %7663 = vmatprep.subr.bf16.mxu1 %v11942_v34  ;;  %v1037_v34 = vld [vmem:[%s17806_s28 + $0x1d10] sm:$0xff]  ;;  %v1090_v50 = vld [vmem:[%s17806_s28 + $0x1eb8] sm:$0xff] }
 0x3f6   :  { %v12003_v61 = vcombine.low %v1037_v34, %v1041_v35 }
 0x3f8   :  { %7336 = vmatpush1.bf16.msra.mxu0 %v11939_v41  ;;  %7664 = vmatpush1.bf16.msra.mxu1 %v11941_v42  ;;  %v12004_v41 = vcombine.high %v1037_v34, %v1041_v35  ;;  %v1094_v34 = vld [vmem:[%s17806_s28 + $0x1ed8] sm:$0xff] }
 0x3f9   :  { %7337 = vmatprep.subr.bf16.mxu0 %v11948_v44  ;;  %7665 = vmatprep.subr.bf16.mxu1 %v11950_v45  ;;  %v1045_v44 = vld [vmem:[%s17806_s28 + $0x1d50] sm:$0xff]  ;;  %v1098_v35 = vld [vmem:[%s17806_s28 + $0x1ef8] sm:$0xff] }
 0x3fa   :  { %v1049_v45 = vld [vmem:[%s17806_s28 + $0x1d70] sm:$0xff] }
 0x3fb   :  { %v12011_v57 = vcombine.low %v1045_v44, %v1049_v45 }
 0x3fc   :  { %7338 = vmatpush1.bf16.msra.mxu0 %v11947_v49  ;;  %7666 = vmatpush1.bf16.msra.mxu1 %v11949_v52  ;;  %v12012_v49 = vcombine.high %v1045_v44, %v1049_v45  ;;  %v12014_v52 = vcombine.high %v1046_v46, %v1050_v47  ;;  %v1102_v44 = vld [vmem:[%s17806_s28 + $0x1f18] sm:$0xff]  ;;  %v12061_v47 = vcombine.low %v1094_v34, %v1098_v35 }
 0x3fd   :  { %7339 = vmatprep.subr.bf16.mxu0 %v11956_v51  ;;  %7667 = vmatprep.subr.bf16.mxu1 %v11958_v54  ;;  %v1053_v51 = vld [vmem:[%s17806_s28 + $0x1d90] sm:$0xff]  ;;  %v1106_v45 = vld [vmem:[%s17806_s28 + $0x1f38] sm:$0xff] }
 0x3fe   :  { %v1057_v54 = vld [vmem:[%s17806_s28 + $0x1db0] sm:$0xff] }
 0x3ff   :  { %v12019_v2 = vcombine.low %v1053_v51, %v1057_v54 }
 0x400   :  { %7340 = vmatpush1.bf16.msra.mxu0 %v11955_v58  ;;  %7668 = vmatpush1.bf16.msra.mxu1 %v11957_v33  ;;  %v12020_v58 = vcombine.high %v1053_v51, %v1057_v54  ;;  %v12022_v33 = vcombine.high %v1054_v55, %v1058_v56  ;;  %v1110_v51 = vld [vmem:[%s17806_s28 + $0x1f58] sm:$0xff]  ;;  %v12069_v56 = vcombine.low %v1102_v44, %v1106_v45 }
 0x401   :  { %7341 = vmatprep.subr.bf16.mxu0 %v11964_v62  ;;  %7669 = vmatprep.subr.bf16.mxu1 %v11966_v11  ;;  %v1061_v62 = vld [vmem:[%s17806_s28 + $0x1dd0] sm:$0xff]  ;;  %v1114_v54 = vld [vmem:[%s17806_s28 + $0x1f78] sm:$0xff] }
 0x402   :  { %v1065_v11 = vld [vmem:[%s17806_s28 + $0x1df0] sm:$0xff] }
 0x403   :  { %v12027_v27 = vcombine.low %v1061_v62, %v1065_v11 }
 0x404   :  { %7342 = vmatpush1.bf16.msra.mxu0 %v11963_v4  ;;  %7670 = vmatpush1.bf16.msra.mxu1 %v11965_v63  ;;  %v12028_v4 = vcombine.high %v1061_v62, %v1065_v11  ;;  %v12030_v63 = vcombine.high %v1062_v60, %v1066_v0  ;;  %v16809_v62 = vsub.s32 1, %v13649_v43  ;;  %v1118_v11 = vld [vmem:[%s17806_s28 + $0x1f98] sm:$0xff]  ;;  %v16820_v0 = vld [vmem:[%s17808_s27] sm:$0xff] }
 0x405   :  { %7352 = vmatprep.subr.bf16.mxu0 %v11972_v5  ;;  %7680 = vmatprep.subr.bf16.mxu1 %v11974_v8  ;;  %v1069_v5 = vld [vmem:[%s17806_s28 + $0x1e10] sm:$0xff]  ;;  %v1122_v60 = vld [vmem:[%s17806_s28 + $0x1fb8] sm:$0xff] }
 0x406   :  { %v1073_v8 = vld [vmem:[%s17806_s28 + $0x1e30] sm:$0xff] }
 0x407   :  { %7344 = vmatmul.mubr.bf16.vlgmr.msra.gmra.mrb[4].mxu0 %v15062_v7  ;;  %7672 = vmatmul.mubr.bf16.vlgmr.msra.gmra.mrb[4].mxu1 %v15062_v7  ;;  %v1030_v7 = vld [vmem:[%s17806_s28 + $0x1cd8] sm:$0xff]  ;;  %v12035_v37 = vcombine.low %v1069_v5, %v1073_v8 }
 0x408   :  { %7353 = vmatpush1.bf16.msra.mxu0 %v11971_v1  ;;  %7681 = vmatpush1.bf16.msra.mxu1 %v11973_v14  ;;  %v11998_v30 = vcombine.high %v1030_v7, %v1034_v59  ;;  %v11997_v39 = vcombine.low %v1030_v7, %v1034_v59  ;;  %v12036_v1 = vcombine.high %v1069_v5, %v1073_v8  ;;  %v1125_v5 = vld [vmem:[%s17806_s28 + $0x1fd0] sm:$0xff] }
 0x409   :  { %7354 = vmatprep.subr.bf16.mxu0 %v11980_v53  ;;  %7682 = vmatprep.subr.bf16.mxu1 %v11982_v15  ;;  %v12038_v14 = vcombine.high %v1070_v10, %v1074_v12  ;;  %v1077_v53 = vld [vmem:[%s17806_s28 + $0x1e50] sm:$0xff]  ;;  %v12045_v59 = vcombine.low %v1078_v17, %v1082_v9  ;;  %v1140_v10 = vrot.slane %v16820_v0, %v16809_v62  ;;  %v1126_v12 = vld [vmem:[%s17806_s28 + $0x1fd8] sm:$0xff] }
 0x40a   :  { %7384 = vmatprep.mubr.bf16.mxu0 %v15078_v16  ;;  %7712 = vmatprep.mubr.bf16.mxu1 %v15078_v16  ;;  %v1038_v16 = vld [vmem:[%s17806_s28 + $0x1d18] sm:$0xff]  ;;  %v1081_v15 = vld [vmem:[%s17806_s28 + $0x1e70] sm:$0xff] }
 0x40b   :  { %v12006_v42 = vcombine.high %v1038_v16, %v1042_v36  ;;  %v12005_v23 = vcombine.low %v1038_v16, %v1042_v36  ;;  %v12043_v7 = vcombine.low %v1077_v53, %v1081_v15  ;;  %v12053_v36 = vcombine.low %v1086_v26, %v1090_v50  ;;  %v1129_v8 = vld [vmem:[%s17806_s28 + $0x1ff0] sm:$0xff] }
 0x40c   :  { %7355 = vmatpush1.bf16.msra.mxu0 %v11979_v19  ;;  %7683 = vmatpush1.bf16.msra.mxu1 %v11981_v20  ;;  %v12044_v19 = vcombine.high %v1077_v53, %v1081_v15  ;;  %v12046_v20 = vcombine.high %v1078_v17, %v1082_v9  ;;  %v12563_v15 = vadd.f32 %v15936_v24, %v1140_v10  ;;  %v12732_v24 = vld [vmem:[%s17809_s24 + $0x14] ss:$8 sps:$4 sm:$0xff]  }
 0x40d   :  { %7356 = vmatprep.subr.bf16.mxu0 %v11988_v21  ;;  %7684 = vmatprep.subr.bf16.mxu1 %v11990_v25  ;;  %v1085_v21 = vld [vmem:[%s17806_s28 + $0x1e90] sm:$0xff]  ;;  %v12091_v17 = vcombine.low %v1125_v5, %v1129_v8 }
 0x40e   :  { %v1089_v25 = vld [vmem:[%s17806_s28 + $0x1eb0] sm:$0xff] }
 0x40f   :  { %v12051_v16 = vcombine.low %v1085_v21, %v1089_v25  ;;  %v12786_v10 = vld [vmem:[%s17809_s24 + $0x134] ss:$8 sps:$4 sm:$0xff]  }
 0x410   :  { %7357 = vmatpush1.bf16.msra.mxu0 %v11987_v29  ;;  %7685 = vmatpush1.bf16.msra.mxu1 %v11989_v31  ;;  %v12052_v29 = vcombine.high %v1085_v21, %v1089_v25  ;;  %v12054_v31 = vcombine.high %v1086_v26, %v1090_v50  ;;  %v12730_v21 = vld [vmem:[%s17809_s24 + $0x10] ss:$8 sps:$4 sm:$0xff]   ;;  %v12735_v25 = vld [vmem:[%s17809_s24 + $0x24] ss:$8 sps:$4 sm:$0xff]   ;;  %v12733_v26 = vld [vmem:[%s17809_s24 + $0x20] ss:$8 sps:$4 sm:$0xff]  }
 0x411   :  { %7358 = vmatprep.subr.bf16.mxu0 %v11996_v32  ;;  %7686 = vmatprep.subr.bf16.mxu1 %v11998_v30  ;;  %v1093_v32 = vld [vmem:[%s17806_s28 + $0x1ed0] sm:$0xff] }
 0x412   :  { %v1097_v30 = vld [vmem:[%s17806_s28 + $0x1ef0] sm:$0xff] }
 0x413   :  { %v12059_v46 = vcombine.low %v1093_v32, %v1097_v30  ;;  %v12736_v50 = vld [vmem:[%s17809_s24 + $0x30] ss:$8 sps:$4 sm:$0xff]  }
 0x414   :  { %7359 = vmatpush1.bf16.msra.mxu0 %v11995_v38  ;;  %7687 = vmatpush1.bf16.msra.mxu1 %v11997_v39  ;;  %v12060_v38 = vcombine.high %v1093_v32, %v1097_v30  ;;  %v12062_v39 = vcombine.high %v1094_v34, %v1098_v35  ;;  %v12747_v32 = vld [vmem:[%s17809_s24 + $0x64] ss:$8 sps:$4 sm:$0xff]   ;;  %v12745_v30 = vld [vmem:[%s17809_s24 + $0x60] ss:$8 sps:$4 sm:$0xff]   ;;  %v12750_v34 = vld [vmem:[%s17809_s24 + $0x74] ss:$8 sps:$4 sm:$0xff]  }
 0x415   :  { %7360 = vmatprep.subr.bf16.mxu0 %v12004_v41  ;;  %7688 = vmatprep.subr.bf16.mxu1 %v12006_v42  ;;  %v1101_v41 = vld [vmem:[%s17806_s28 + $0x1f10] sm:$0xff] }
 0x416   :  { %v1105_v42 = vld [vmem:[%s17806_s28 + $0x1f30] sm:$0xff] }
 0x417   :  { %v12067_v55 = vcombine.low %v1101_v41, %v1105_v42  ;;  %v12748_v35 = vld [vmem:[%s17809_s24 + $0x70] ss:$8 sps:$4 sm:$0xff]  }
 0x418   :  { %7361 = vmatpush1.bf16.msra.mxu0 %v12003_v61  ;;  %7689 = vmatpush1.bf16.msra.mxu1 %v12005_v23  ;;  %v12068_v61 = vcombine.high %v1101_v41, %v1105_v42  ;;  %v12070_v23 = vcombine.high %v1102_v44, %v1106_v45  ;;  %v12759_v41 = vld [vmem:[%s17809_s24 + $0xa4] ss:$8 sps:$4 sm:$0xff]   ;;  %v12757_v42 = vld [vmem:[%s17809_s24 + $0xa0] ss:$8 sps:$4 sm:$0xff]   ;;  %v12762_v44 = vld [vmem:[%s17809_s24 + $0xb4] ss:$8 sps:$4 sm:$0xff]  }
 0x419   :  { %7362 = vmatprep.subr.bf16.mxu0 %v12012_v49  ;;  %7690 = vmatprep.subr.bf16.mxu1 %v12014_v52  ;;  %v1109_v49 = vld [vmem:[%s17806_s28 + $0x1f50] sm:$0xff] }
 0x41a   :  { %v1113_v52 = vld [vmem:[%s17806_s28 + $0x1f70] sm:$0xff] }
 0x41b   :  { %v12760_v45 = vld [vmem:[%s17809_s24 + $0xb0] ss:$8 sps:$4 sm:$0xff]  }
 0x41c   :  { %7363 = vmatpush1.bf16.msra.mxu0 %v12011_v57  ;;  %7691 = vmatpush1.bf16.msra.mxu1 %v12013_v6  ;;  %v12076_v57 = vcombine.high %v1109_v49, %v1113_v52  ;;  %v12078_v6 = vcombine.high %v1110_v51, %v1114_v54 }
 0x41d   :  { %7364 = vmatprep.subr.bf16.mxu0 %v12020_v58  ;;  %7692 = vmatprep.subr.bf16.mxu1 %v12022_v33  ;;  %v1117_v58 = vld [vmem:[%s17806_s28 + $0x1f90] sm:$0xff] }
 0x41e   :  { %v1121_v33 = vld [vmem:[%s17806_s28 + $0x1fb0] sm:$0xff] }
 0x420   :  { %7365 = vmatpush1.bf16.msra.mxu0 %v12019_v2  ;;  %7693 = vmatpush1.bf16.msra.mxu1 %v12021_v3  ;;  %v12075_v2 = vcombine.low %v1109_v49, %v1113_v52  ;;  %v12077_v3 = vcombine.low %v1110_v51, %v1114_v54  ;;  %v16924_v49 = vsub.s32 3, %v13649_v43  ;;  %v12766_v52 = vld [vmem:[%s17809_s24 + $0xd0] ss:$8 sps:$4 sm:$0xff]   ;;  %v12771_v54 = vld [vmem:[%s17809_s24 + $0xe4] ss:$8 sps:$4 sm:$0xff]  }
 0x421   :  { %7366 = vmatprep.subr.bf16.mxu0 %v12028_v4  ;;  %7694 = vmatprep.subr.bf16.mxu1 %v12030_v63  ;;  %v12084_v4 = vcombine.high %v1117_v58, %v1121_v33  ;;  %v12086_v63 = vcombine.high %v1118_v11, %v1122_v60 }
 0x424   :  { %7367 = vmatpush1.bf16.msra.mxu0 %v12027_v27  ;;  %7695 = vmatpush1.bf16.msra.mxu1 %v12029_v13  ;;  %v1130_v27 = vld [vmem:[%s17806_s28 + $0x1ff8] sm:$0xff]  ;;  %v12083_v13 = vcombine.low %v1117_v58, %v1121_v33 }
 0x425   :  { %7368 = vmatprep.subr.bf16.mxu0 %v12036_v1  ;;  %7696 = vmatprep.subr.bf16.mxu1 %v12038_v14  ;;  %v12085_v1 = vcombine.low %v1118_v11, %v1122_v60  ;;  %v12092_v14 = vcombine.high %v1125_v5, %v1129_v8  ;;  %v12094_v53 = vcombine.high %v1126_v12, %v1130_v27  ;;  %v12772_v33 = vld [vmem:[%s17809_s24 + $0xf0] ss:$8 sps:$4 sm:$0xff]   ;;  %v12777_v60 = vld [vmem:[%s17809_s24 + $0x104] ss:$8 sps:$4 sm:$0xff]   ;;  %v12781_v8 = vld [vmem:[%s17809_s24 + $0x120] ss:$8 sps:$4 sm:$0xff]  }
 0x426   :  { %v12093_v9 = vcombine.low %v1126_v12, %v1130_v27  ;;  %v12783_v5 = vld [vmem:[%s17809_s24 + $0x124] ss:$8 sps:$4 sm:$0xff]   ;;  %v12784_v12 = vld [vmem:[%s17809_s24 + $0x130] ss:$8 sps:$4 sm:$0xff]  }
 0x427   :  { %v12789_v27 = vld [vmem:[%s17809_s24 + $0x144] ss:$8 sps:$4 sm:$0xff]  }
 0x428   :  { %7369 = vmatpush1.bf16.msra.mxu0 %v12035_v37  ;;  %7697 = vmatpush1.bf16.msra.mxu1 %v12037_v40  ;;  %v12729_v37 = vld [vmem:[%s17809_s24 + $0x4] ss:$8 sps:$4 sm:$0xff]   ;;  %v7722_v40 = vmax.f32 %v12563_v15, 0.0  ;;  %v12793_v15 = vld [vmem:[%s17809_s24 + $0x160] ss:$8 sps:$4 sm:$0xff]  }
 0x429   :  { %7370 = vmatprep.subr.bf16.mxu0 %v12044_v19  ;;  %7698 = vmatprep.subr.bf16.mxu1 %v12046_v20  ;;  %v12727_v19 = vld [vmem:[%s17809_s24] ss:$8 sps:$4 sm:$0xff]  }
 0x42a   :  { %v7730_v20 = vpack.c.bf16 %v7722_v40, %v7722_v40  ;;  %v12799_v40 = vld [vmem:[%s17809_s24 + $0x180] ss:$8 sps:$4 sm:$0xff]  }
 0x42c   :  { %7371 = vmatpush1.bf16.msra.mxu0 %v12043_v7  ;;  %7699 = vmatpush1.bf16.msra.mxu1 %v12045_v59  ;;  %v12741_v7 = vld [vmem:[%s17809_s24 + $0x44] ss:$8 sps:$4 sm:$0xff]   ;;  %v12739_v59 = vld [vmem:[%s17809_s24 + $0x40] ss:$8 sps:$4 sm:$0xff]  }
 0x42d   :  { %7372 = vmatprep.subr.bf16.mxu0 %v12052_v29  ;;  %7700 = vmatprep.subr.bf16.mxu1 %v12054_v31  ;;  %v12744_v29 = vld [vmem:[%s17809_s24 + $0x54] ss:$8 sps:$4 sm:$0xff]   ;;  %v12742_v31 = vld [vmem:[%s17809_s24 + $0x50] ss:$8 sps:$4 sm:$0xff]  }
 0x430   :  { %7373 = vmatpush1.bf16.msra.mxu0 %v12051_v16  ;;  %7701 = vmatpush1.bf16.msra.mxu1 %v12053_v36  ;;  %v12753_v16 = vld [vmem:[%s17809_s24 + $0x84] ss:$8 sps:$4 sm:$0xff]   ;;  %v12751_v36 = vld [vmem:[%s17809_s24 + $0x80] ss:$8 sps:$4 sm:$0xff]  }
 0x431   :  { %7374 = vmatprep.subr.bf16.mxu0 %v12060_v38  ;;  %7702 = vmatprep.subr.bf16.mxu1 %v12062_v39  ;;  %v12756_v38 = vld [vmem:[%s17809_s24 + $0x94] ss:$8 sps:$4 sm:$0xff]   ;;  %v12754_v39 = vld [vmem:[%s17809_s24 + $0x90] ss:$8 sps:$4 sm:$0xff]  }
 0x434   :  { %7375 = vmatpush1.bf16.msra.mxu0 %v12059_v46  ;;  %7703 = vmatpush1.bf16.msra.mxu1 %v12061_v47  ;;  %v12765_v46 = vld [vmem:[%s17809_s24 + $0xc4] ss:$8 sps:$4 sm:$0xff]   ;;  %v12763_v47 = vld [vmem:[%s17809_s24 + $0xc0] ss:$8 sps:$4 sm:$0xff]  }
 0x435   :  { %7376 = vmatprep.subr.bf16.mxu0 %v12068_v61  ;;  %7704 = vmatprep.subr.bf16.mxu1 %v12070_v23  ;;  %v16918_v61 = vsub.s32 0, %v13649_v43  ;;  %v12768_v23 = vld [vmem:[%s17809_s24 + $0xd4] ss:$8 sps:$4 sm:$0xff]  }
 0x437   :  { %v1136_v51 = vrot.slane %v16820_v0, %v16918_v61 }
 0x438   :  { %7377 = vmatpush1.bf16.msra.mxu0 %v12067_v55  ;;  %7705 = vmatpush1.bf16.msra.mxu1 %v12069_v56  ;;  %v1148_v55 = vrot.slane %v16820_v0, %v16924_v49  ;;  %v12769_v56 = vld [vmem:[%s17809_s24 + $0xe0] ss:$8 sps:$4 sm:$0xff]  }
 0x439   :  { %7378 = vmatprep.subr.bf16.mxu0 %v12076_v57  ;;  %7706 = vmatprep.subr.bf16.mxu1 %v12078_v6  ;;  %v12562_v57 = vadd.f32 %v15926_v18, %v1136_v51  ;;  %v12774_v6 = vld [vmem:[%s17809_s24 + $0xf4] ss:$8 sps:$4 sm:$0xff]   ;;  %v12775_v18 = vld [vmem:[%s17809_s24 + $0x100] ss:$8 sps:$4 sm:$0xff]  }
 0x43a   :  { %v12565_v58 = vadd.f32 %v15944_v28, %v1148_v55  ;;  %v12780_v28 = vld [vmem:[%s17809_s24 + $0x114] ss:$8 sps:$4 sm:$0xff]   ;;  %v12843_v55 = vld [vmem:[%s17809_s24 + $0x264] ss:$8 sps:$4 sm:$0xff]  }
 0x43b   :  { %v7721_v11 = vmax.f32 %v12562_v57, 0.0  ;;  %v12840_v51 = vld [vmem:[%s17809_s24 + $0x254] ss:$8 sps:$4 sm:$0xff]  }
 0x43c   :  { %7379 = vmatpush1.bf16.msra.mxu0 %v12075_v2  ;;  %7707 = vmatpush1.bf16.msra.mxu1 %v12077_v3  ;;  %v7724_v2 = vmax.f32 %v12565_v58, 0.0  ;;  %v12846_v57 = vld [vmem:[%s17809_s24 + $0x274] ss:$8 sps:$4 sm:$0xff]   ;;  %v12849_v58 = vld [vmem:[%s17809_s24 + $0x284] ss:$8 sps:$4 sm:$0xff]  }
 0x43d   :  { %7380 = vmatprep.subr.bf16.mxu0 %v12084_v4  ;;  %7708 = vmatprep.subr.bf16.mxu1 %v12086_v63  ;;  %v7729_v3 = vpack.c.bf16 %v7721_v11, %v7721_v11  ;;  %v12778_v63 = vld [vmem:[%s17809_s24 + $0x110] ss:$8 sps:$4 sm:$0xff]   ;;  %v12921_v11 = vld [vmem:[#allocation2 + $0x4] ss:$16 sps:$4 sm:$0xff]  }
 0x43e   :  { %v7732_v4 = vpack.c.bf16 %v7724_v2, %v7724_v2  ;;  %v12924_v2 = vld [vmem:[#allocation2 + $0x24] ss:$16 sps:$4 sm:$0xff]  }
 0x440   :  { %7381 = vmatpush1.bf16.msra.mxu0 %v12083_v13  ;;  %7709 = vmatpush1.bf16.msra.mxu1 %v12085_v1  ;;  %v12787_v13 = vld [vmem:[%s17809_s24 + $0x140] ss:$8 sps:$4 sm:$0xff]   ;;  %v12792_v1 = vld [vmem:[%s17809_s24 + $0x154] ss:$8 sps:$4 sm:$0xff]  }
 0x441   :  { %7382 = vmatprep.subr.bf16.mxu0 %v12092_v14  ;;  %7710 = vmatprep.subr.bf16.mxu1 %v12094_v53  ;;  %v12790_v14 = vld [vmem:[%s17809_s24 + $0x150] ss:$8 sps:$4 sm:$0xff]   ;;  %v12795_v53 = vld [vmem:[%s17809_s24 + $0x164] ss:$8 sps:$4 sm:$0xff]  }
 0x444   :  { %7383 = vmatpush1.bf16.msra.mxu0 %v12091_v17  ;;  %7711 = vmatpush1.bf16.msra.mxu1 %v12093_v9  ;;  %v12798_v17 = vld [vmem:[%s17809_s24 + $0x174] ss:$8 sps:$4 sm:$0xff]   ;;  %v12796_v9 = vld [vmem:[%s17809_s24 + $0x170] ss:$8 sps:$4 sm:$0xff]  }
 0x445   :  { %8517 = vmatprep.subr.bf16.mxu0 %v12729_v37  ;;  %v12801_v37 = vld [vmem:[%s17809_s24 + $0x184] ss:$8 sps:$4 sm:$0xff]   ;;  %8949 = vmatprep.subr.bf16.mxu1 %v12921_v11  ;;  %v12874_v11 = vld [vmem:[%s17809_s24 + $0x310] ss:$8 sps:$4 sm:$0xff]  }
 0x447   :  { %7385 = vmatmul.mubr.bf16.vlgmr.msra.gmra.mrb[4].mxu0 %v15266_v48  ;;  %7713 = vmatmul.mubr.bf16.vlgmr.msra.gmra.mrb[4].mxu1 %v15266_v48  ;;  %v12738_v48 = vld [vmem:[%s17809_s24 + $0x34] ss:$8 sps:$4 sm:$0xff]  }
 0x448   :  { %8518 = vmatpush1.bf16.msra.mxu0 %v12727_v19  ;;  %8549 = vmatprep.mubr.bf16.mxu0 %v7730_v20  ;;  %v12804_v19 = vld [vmem:[%s17809_s24 + $0x194] ss:$8 sps:$4 sm:$0xff]   ;;  %v12807_v20 = vld [vmem:[%s17809_s24 + $0x1a4] ss:$8 sps:$4 sm:$0xff]  }
 0x449   :  { %8519 = vmatprep.subr.bf16.mxu0 %v12732_v24  ;;  %v12802_v24 = vld [vmem:[%s17809_s24 + $0x190] ss:$8 sps:$4 sm:$0xff]  }
 0x44c   :  { %8520 = vmatpush1.bf16.msra.mxu0 %v12730_v21  ;;  %v12805_v21 = vld [vmem:[%s17809_s24 + $0x1a0] ss:$8 sps:$4 sm:$0xff]  }
 0x44d   :  { %8521 = vmatprep.subr.bf16.mxu0 %v12735_v25  ;;  %v12810_v25 = vld [vmem:[%s17809_s24 + $0x1b4] ss:$8 sps:$4 sm:$0xff]  }
 0x450   :  { %8522 = vmatpush1.bf16.msra.mxu0 %v12733_v26  ;;  %v12808_v26 = vld [vmem:[%s17809_s24 + $0x1b0] ss:$8 sps:$4 sm:$0xff]  }
 0x451   :  { %8523 = vmatprep.subr.bf16.mxu0 %v12738_v48  ;;  %v12813_v48 = vld [vmem:[%s17809_s24 + $0x1c4] ss:$8 sps:$4 sm:$0xff]  }
 0x454   :  { %8524 = vmatpush1.bf16.msra.mxu0 %v12736_v50  ;;  %v12811_v50 = vld [vmem:[%s17809_s24 + $0x1c0] ss:$8 sps:$4 sm:$0xff]  }
 0x455   :  { %8525 = vmatprep.subr.bf16.mxu0 %v12741_v7  ;;  %v17026_v7 = vsub.s32 2, %v13649_v43 }
 0x458   :  { %8526 = vmatpush1.bf16.msra.mxu0 %v12739_v59  ;;  %v12816_v59 = vld [vmem:[%s17809_s24 + $0x1d4] ss:$8 sps:$4 sm:$0xff]  }
 0x459   :  { %8527 = vmatprep.subr.bf16.mxu0 %v12744_v29  ;;  %v12814_v29 = vld [vmem:[%s17809_s24 + $0x1d0] ss:$8 sps:$4 sm:$0xff]  }
 0x45c   :  { %8528 = vmatpush1.bf16.msra.mxu0 %v12742_v31  ;;  %v1144_v31 = vrot.slane %v16820_v0, %v17026_v7 }
 0x45d   :  { %8529 = vmatprep.subr.bf16.mxu0 %v12747_v32  ;;  %v12819_v32 = vld [vmem:[%s17809_s24 + $0x1e4] ss:$8 sps:$4 sm:$0xff]  }
 0x460   :  { %8530 = vmatpush1.bf16.msra.mxu0 %v12745_v30  ;;  %v12817_v30 = vld [vmem:[%s17809_s24 + $0x1e0] ss:$8 sps:$4 sm:$0xff]  }
 0x461   :  { %8531 = vmatprep.subr.bf16.mxu0 %v12750_v34  ;;  %v12564_v34 = vadd.f32 %v15934_v22, %v1144_v31  ;;  %v12823_v22 = vld [vmem:[%s17809_s24 + $0x200] ss:$8 sps:$4 sm:$0xff]  }
 0x462   :  { %v12943_v31 = vld [vmem:[#allocation2 + $0x100] ss:$16 sps:$4 sm:$0xff]  }
 0x464   :  { %8532 = vmatpush1.bf16.msra.mxu0 %v12748_v35  ;;  %v12822_v35 = vld [vmem:[%s17809_s24 + $0x1f4] ss:$8 sps:$4 sm:$0xff]  }
 0x465   :  { %8533 = vmatprep.subr.bf16.mxu0 %v12753_v16  ;;  %v12820_v16 = vld [vmem:[%s17809_s24 + $0x1f0] ss:$8 sps:$4 sm:$0xff]  }
 0x468   :  { %8534 = vmatpush1.bf16.msra.mxu0 %v12751_v36  ;;  %v7723_v36 = vmax.f32 %v12564_v34, 0.0  ;;  %v1163_v34 = vsub.s32 7, %v13649_v43 }
 0x469   :  { %8535 = vmatprep.subr.bf16.mxu0 %v12756_v38  ;;  %v12825_v38 = vld [vmem:[%s17809_s24 + $0x204] ss:$8 sps:$4 sm:$0xff]  }
 0x46c   :  { %8536 = vmatpush1.bf16.msra.mxu0 %v12754_v39  ;;  %v7731_v39 = vpack.c.bf16 %v7723_v36, %v7723_v36  ;;  %v1164_v36 = vrot.slane %v16820_v0, %v1163_v34  ;;  %v7865_v34 = vld [vmem:[%s17781_s4] sm:$0x3] }
 0x46d   :  { %8537 = vmatprep.subr.bf16.mxu0 %v12759_v41  ;;  %v12828_v41 = vld [vmem:[%s17809_s24 + $0x214] ss:$8 sps:$4 sm:$0xff]  }
 0x470   :  { %8538 = vmatpush1.bf16.msra.mxu0 %v12757_v42  ;;  %v12826_v42 = vld [vmem:[%s17809_s24 + $0x210] ss:$8 sps:$4 sm:$0xff]  }
 0x471   :  { %8539 = vmatprep.subr.bf16.mxu0 %v12762_v44  ;;  %v12831_v44 = vld [vmem:[%s17809_s24 + $0x224] ss:$8 sps:$4 sm:$0xff]  }
 0x474   :  { %8540 = vmatpush1.bf16.msra.mxu0 %v12760_v45  ;;  %v12829_v45 = vld [vmem:[%s17809_s24 + $0x220] ss:$8 sps:$4 sm:$0xff]  }
 0x475   :  { %8541 = vmatprep.subr.bf16.mxu0 %v12765_v46  ;;  %v12834_v46 = vld [vmem:[%s17809_s24 + $0x234] ss:$8 sps:$4 sm:$0xff]  }
 0x478   :  { %8542 = vmatpush1.bf16.msra.mxu0 %v12763_v47  ;;  %v12832_v47 = vld [vmem:[%s17809_s24 + $0x230] ss:$8 sps:$4 sm:$0xff]  }
 0x479   :  { %8543 = vmatprep.subr.bf16.mxu0 %v12768_v23  ;;  %v12837_v23 = vld [vmem:[%s17809_s24 + $0x244] ss:$8 sps:$4 sm:$0xff]  }
 0x47c   :  { %8544 = vmatpush1.bf16.msra.mxu0 %v12766_v52  ;;  %v12835_v52 = vld [vmem:[%s17809_s24 + $0x240] ss:$8 sps:$4 sm:$0xff]  }
 0x47d   :  { %8545 = vmatprep.subr.bf16.mxu0 %v12771_v54  ;;  %v12838_v54 = vld [vmem:[%s17809_s24 + $0x250] ss:$8 sps:$4 sm:$0xff]  }
 0x480   :  { %8546 = vmatpush1.bf16.msra.mxu0 %v12769_v56  ;;  %v12841_v56 = vld [vmem:[%s17809_s24 + $0x260] ss:$8 sps:$4 sm:$0xff]  }
 0x481   :  { %8547 = vmatprep.subr.bf16.mxu0 %v12774_v6  ;;  %v12844_v6 = vld [vmem:[%s17809_s24 + $0x270] ss:$8 sps:$4 sm:$0xff]  }
 0x484   :  { %8548 = vmatpush1.bf16.msra.mxu0 %v12772_v33  ;;  %v12919_v33 = vld [vmem:[#allocation2] ss:$16 sps:$4 sm:$0xff]  }
 0x485   :  { %8558 = vmatprep.subr.bf16.mxu0 %v12777_v60  ;;  %v12847_v60 = vld [vmem:[%s17809_s24 + $0x280] ss:$8 sps:$4 sm:$0xff]   ;;  %8950 = vmatpush1.bf16.msra.mxu1 %v12919_v33 }
 0x486   :  { %8951 = vmatprep.subr.bf16.mxu1 %v12924_v2  ;;  %v12877_v2 = vld [vmem:[%s17809_s24 + $0x320] ss:$8 sps:$4 sm:$0xff]  }
 0x487   :  { %8550 = vmatmul.mubr.bf16.vlgmr.msra.gmra.mrb[8].mxu0 %v7729_v3  ;;  %v12922_v3 = vld [vmem:[#allocation2 + $0x20] ss:$16 sps:$4 sm:$0xff]  }
 0x488   :  { %8559 = vmatpush1.bf16.msra.mxu0 %v12775_v18  ;;  %8590 = vmatprep.mubr.bf16.mxu0 %v7732_v4  ;;  %v12852_v18 = vld [vmem:[%s17809_s24 + $0x294] ss:$8 sps:$4 sm:$0xff]   ;;  %v12850_v4 = vld [vmem:[%s17809_s24 + $0x290] ss:$8 sps:$4 sm:$0xff]  }
 0x489   :  { %8560 = vmatprep.subr.bf16.mxu0 %v12780_v28  ;;  %v12927_v28 = vld [vmem:[#allocation2 + $0x44] ss:$16 sps:$4 sm:$0xff]   ;;  %8952 = vmatpush1.bf16.msra.mxu1 %v12922_v3  ;;  %v12880_v3 = vld [vmem:[%s17809_s24 + $0x330] ss:$8 sps:$4 sm:$0xff]  }
 0x48a   :  { %8953 = vmatprep.subr.bf16.mxu1 %v12927_v28  ;;  %v12885_v28 = vld [vmem:[%s17809_s24 + $0x344] ss:$8 sps:$4 sm:$0xff]  }
 0x48c   :  { %8561 = vmatpush1.bf16.msra.mxu0 %v12778_v63  ;;  %v12855_v63 = vld [vmem:[%s17809_s24 + $0x2a4] ss:$8 sps:$4 sm:$0xff]  }
 0x48d   :  { %8562 = vmatprep.subr.bf16.mxu0 %v12783_v5  ;;  %v12925_v5 = vld [vmem:[#allocation2 + $0x40] ss:$16 sps:$4 sm:$0xff]  }
 0x48e   :  { %8954 = vmatpush1.bf16.msra.mxu1 %v12925_v5  ;;  %v12886_v5 = vld [vmem:[%s17809_s24 + $0x350] ss:$8 sps:$4 sm:$0xff]  }
 0x490   :  { %8563 = vmatpush1.bf16.msra.mxu0 %v12781_v8  ;;  %v12930_v8 = vld [vmem:[#allocation2 + $0x64] ss:$16 sps:$4 sm:$0xff]  }
 0x491   :  { %8564 = vmatprep.subr.bf16.mxu0 %v12786_v10  ;;  %v12853_v10 = vld [vmem:[%s17809_s24 + $0x2a0] ss:$8 sps:$4 sm:$0xff]   ;;  %8955 = vmatprep.subr.bf16.mxu1 %v12930_v8  ;;  %v12891_v8 = vld [vmem:[%s17809_s24 + $0x364] ss:$8 sps:$4 sm:$0xff]  }
 0x494   :  { %8565 = vmatpush1.bf16.msra.mxu0 %v12784_v12  ;;  %v12858_v12 = vld [vmem:[%s17809_s24 + $0x2b4] ss:$8 sps:$4 sm:$0xff]  }
 0x495   :  { %8566 = vmatprep.subr.bf16.mxu0 %v12789_v27  ;;  %v12928_v27 = vld [vmem:[#allocation2 + $0x60] ss:$16 sps:$4 sm:$0xff]  }
 0x496   :  { %8956 = vmatpush1.bf16.msra.mxu1 %v12928_v27  ;;  %v12892_v27 = vld [vmem:[%s17809_s24 + $0x370] ss:$8 sps:$4 sm:$0xff]  }
 0x498   :  { %8567 = vmatpush1.bf16.msra.mxu0 %v12787_v13  ;;  %v12933_v13 = vld [vmem:[#allocation2 + $0x84] ss:$16 sps:$4 sm:$0xff]  }
 0x499   :  { %8568 = vmatprep.subr.bf16.mxu0 %v12792_v1  ;;  %v12856_v1 = vld [vmem:[%s17809_s24 + $0x2b0] ss:$8 sps:$4 sm:$0xff]   ;;  %8957 = vmatprep.subr.bf16.mxu1 %v12933_v13  ;;  %v12897_v13 = vld [vmem:[%s17809_s24 + $0x384] ss:$8 sps:$4 sm:$0xff]  }
 0x49c   :  { %8569 = vmatpush1.bf16.msra.mxu0 %v12790_v14  ;;  %v12861_v14 = vld [vmem:[%s17809_s24 + $0x2c4] ss:$8 sps:$4 sm:$0xff]  }
 0x49d   :  { %8570 = vmatprep.subr.bf16.mxu0 %v12795_v53  ;;  %v12931_v53 = vld [vmem:[#allocation2 + $0x80] ss:$16 sps:$4 sm:$0xff]  }
 0x49e   :  { %8958 = vmatpush1.bf16.msra.mxu1 %v12931_v53  ;;  %v12898_v53 = vld [vmem:[%s17809_s24 + $0x390] ss:$8 sps:$4 sm:$0xff]  }
 0x4a0   :  { %8571 = vmatpush1.bf16.msra.mxu0 %v12793_v15  ;;  %v12936_v15 = vld [vmem:[#allocation2 + $0xa4] ss:$16 sps:$4 sm:$0xff]  }
 0x4a1   :  { %8572 = vmatprep.subr.bf16.mxu0 %v12798_v17  ;;  %v12859_v17 = vld [vmem:[%s17809_s24 + $0x2c0] ss:$8 sps:$4 sm:$0xff]   ;;  %8959 = vmatprep.subr.bf16.mxu1 %v12936_v15  ;;  %v12903_v15 = vld [vmem:[%s17809_s24 + $0x3a4] ss:$8 sps:$4 sm:$0xff]  }
 0x4a4   :  { %8573 = vmatpush1.bf16.msra.mxu0 %v12796_v9  ;;  %v12864_v9 = vld [vmem:[%s17809_s24 + $0x2d4] ss:$8 sps:$4 sm:$0xff]  }
 0x4a5   :  { %8574 = vmatprep.subr.bf16.mxu0 %v12801_v37  ;;  %v12934_v37 = vld [vmem:[#allocation2 + $0xa0] ss:$16 sps:$4 sm:$0xff]  }
 0x4a6   :  { %8960 = vmatpush1.bf16.msra.mxu1 %v12934_v37  ;;  %v12904_v37 = vld [vmem:[%s17809_s24 + $0x3b0] ss:$8 sps:$4 sm:$0xff]  }
 0x4a8   :  { %8575 = vmatpush1.bf16.msra.mxu0 %v12799_v40  ;;  %v12939_v40 = vld [vmem:[#allocation2 + $0xc4] ss:$16 sps:$4 sm:$0xff]  }
 0x4a9   :  { %8576 = vmatprep.subr.bf16.mxu0 %v12804_v19  ;;  %v12862_v19 = vld [vmem:[%s17809_s24 + $0x2d0] ss:$8 sps:$4 sm:$0xff]   ;;  %8961 = vmatprep.subr.bf16.mxu1 %v12939_v40  ;;  %v12909_v40 = vld [vmem:[%s17809_s24 + $0x3c4] ss:$8 sps:$4 sm:$0xff]  }
 0x4ac   :  { %8577 = vmatpush1.bf16.msra.mxu0 %v12802_v24  ;;  %v12867_v24 = vld [vmem:[%s17809_s24 + $0x2e4] ss:$8 sps:$4 sm:$0xff]  }
 0x4ad   :  { %8578 = vmatprep.subr.bf16.mxu0 %v12807_v20  ;;  %v12937_v20 = vld [vmem:[#allocation2 + $0xc0] ss:$16 sps:$4 sm:$0xff]  }
 0x4ae   :  { %8962 = vmatpush1.bf16.msra.mxu1 %v12937_v20  ;;  %v12912_v20 = vld [vmem:[%s17809_s24 + $0x3d4] ss:$8 sps:$4 sm:$0xff]  }
 0x4b0   :  { %8579 = vmatpush1.bf16.msra.mxu0 %v12805_v21  ;;  %v12942_v21 = vld [vmem:[#allocation2 + $0xe4] ss:$16 sps:$4 sm:$0xff]  }
 0x4b1   :  { %8580 = vmatprep.subr.bf16.mxu0 %v12810_v25  ;;  %v12865_v25 = vld [vmem:[%s17809_s24 + $0x2e0] ss:$8 sps:$4 sm:$0xff]   ;;  %8963 = vmatprep.subr.bf16.mxu1 %v12942_v21  ;;  %v12910_v21 = vld [vmem:[%s17809_s24 + $0x3d0] ss:$8 sps:$4 sm:$0xff]  }
 0x4b4   :  { %8581 = vmatpush1.bf16.msra.mxu0 %v12808_v26  ;;  %v12870_v26 = vld [vmem:[%s17809_s24 + $0x2f4] ss:$8 sps:$4 sm:$0xff]  }
 0x4b5   :  { %8582 = vmatprep.subr.bf16.mxu0 %v12813_v48  ;;  %v12940_v48 = vld [vmem:[#allocation2 + $0xe0] ss:$16 sps:$4 sm:$0xff]  }
 0x4b6   :  { %8964 = vmatpush1.bf16.msra.mxu1 %v12940_v48 }
 0x4b8   :  { %8583 = vmatpush1.bf16.msra.mxu0 %v12811_v50  ;;  %v12945_v50 = vld [vmem:[#allocation2 + $0x104] ss:$16 sps:$4 sm:$0xff]  }
 0x4b9   :  { %8584 = vmatprep.subr.bf16.mxu0 %v12816_v59  ;;  %v12868_v59 = vld [vmem:[%s17809_s24 + $0x2f0] ss:$8 sps:$4 sm:$0xff]   ;;  %8965 = vmatprep.subr.bf16.mxu1 %v12945_v50  ;;  %v12918_v50 = vld [vmem:[%s17809_s24 + $0x3f4] ss:$8 sps:$4 sm:$0xff]  }
 0x4ba   :  { %8966 = vmatpush1.bf16.msra.mxu1 %v12943_v31  ;;  %v12948_v31 = vld [vmem:[#allocation2 + $0x124] ss:$16 sps:$4 sm:$0xff]  }
 0x4bb   :  { %8967 = vmatprep.subr.bf16.mxu1 %v12948_v31  ;;  %v13018_v31 = vld [vmem:[%s17784_s7 + $0x1a0] ss:$16 sps:$4 sm:$0xff]  }
 0x4bc   :  { %8585 = vmatpush1.bf16.msra.mxu0 %v12814_v29  ;;  %v12873_v29 = vld [vmem:[%s17809_s24 + $0x304] ss:$8 sps:$4 sm:$0xff]  }
 0x4bd   :  { %8586 = vmatprep.subr.bf16.mxu0 %v12819_v32  ;;  %v1151_v32 = vsub.s32 4, %v13649_v43 }
 0x4c0   :  { %8587 = vmatpush1.bf16.msra.mxu0 %v12817_v30  ;;  %v1155_v30 = vsub.s32 5, %v13649_v43 }
 0x4c1   :  { %8588 = vmatprep.subr.bf16.mxu0 %v12822_v35  ;;  %v1152_v35 = vrot.slane %v16820_v0, %v1151_v32  ;;  %v12946_v32 = vld [vmem:[#allocation2 + $0x120] ss:$16 sps:$4 sm:$0xff]  }
 0x4c2   :  { %8968 = vmatpush1.bf16.msra.mxu1 %v12946_v32  ;;  %v13023_v32 = vld [vmem:[%s17784_s7 + $0x1c4] ss:$16 sps:$4 sm:$0xff]  }
 0x4c4   :  { %8589 = vmatpush1.bf16.msra.mxu0 %v12820_v16  ;;  %v1156_v16 = vrot.slane %v16820_v0, %v1155_v30  ;;  %v12951_v30 = vld [vmem:[#allocation2 + $0xc] ss:$16 sps:$4 sm:$0xff]  }
 0x4c5   :  { %8599 = vmatprep.subr.bf16.mxu0 %v12825_v38  ;;  %8990 = vmatprep.subr.bf16.mxu1 %v12951_v30  ;;  %v13021_v30 = vld [vmem:[%s17784_s7 + $0x1c0] ss:$16 sps:$4 sm:$0xff]  }
 0x4c7   :  { %8591 = vmatmul.mubr.bf16.vlgmr.msra.gmra.mrb[8].mxu0 %v7731_v39 }
 0x4c8   :  { %8600 = vmatpush1.bf16.msra.mxu0 %v12823_v22 }
 0x4c9   :  { %8601 = vmatprep.subr.bf16.mxu0 %v12828_v41 }
 0x4cc   :  { %8602 = vmatpush1.bf16.msra.mxu0 %v12826_v42 }
 0x4cd   :  { %8603 = vmatprep.subr.bf16.mxu0 %v12831_v44 }
 0x4d0   :  { %8604 = vmatpush1.bf16.msra.mxu0 %v12829_v45 }
 0x4d1   :  { %8605 = vmatprep.subr.bf16.mxu0 %v12834_v46 }
 0x4d4   :  { %8606 = vmatpush1.bf16.msra.mxu0 %v12832_v47 }
 0x4d5   :  { %8607 = vmatprep.subr.bf16.mxu0 %v12837_v23 }
 0x4d8   :  { %8608 = vmatpush1.bf16.msra.mxu0 %v12835_v52 }
 0x4d9   :  { %8609 = vmatprep.subr.bf16.mxu0 %v12840_v51 }
 0x4dc   :  { %8610 = vmatpush1.bf16.msra.mxu0 %v12838_v54 }
 0x4dd   :  { %8611 = vmatprep.subr.bf16.mxu0 %v12843_v55 }
 0x4e0   :  { %8612 = vmatpush1.bf16.msra.mxu0 %v12841_v56 }
 0x4e1   :  { %8613 = vmatprep.subr.bf16.mxu0 %v12846_v57  ;;  %v12871_v57 = vld [vmem:[%s17809_s24 + $0x300] ss:$8 sps:$4 sm:$0xff]  }
 0x4e4   :  { %8614 = vmatpush1.bf16.msra.mxu0 %v12844_v6 }
 0x4e5   :  { %8615 = vmatprep.subr.bf16.mxu0 %v12849_v58  ;;  %v12876_v58 = vld [vmem:[%s17809_s24 + $0x314] ss:$8 sps:$4 sm:$0xff]  }
 0x4e8   :  { %8616 = vmatpush1.bf16.msra.mxu0 %v12847_v60  ;;  %v12879_v60 = vld [vmem:[%s17809_s24 + $0x324] ss:$8 sps:$4 sm:$0xff]  }
 0x4e9   :  { %8617 = vmatprep.subr.bf16.mxu0 %v12852_v18  ;;  %v12882_v18 = vld [vmem:[%s17809_s24 + $0x334] ss:$8 sps:$4 sm:$0xff]  }
 0x4ec   :  { %8618 = vmatpush1.bf16.msra.mxu0 %v12850_v4  ;;  %v12883_v4 = vld [vmem:[%s17809_s24 + $0x340] ss:$8 sps:$4 sm:$0xff]  }
 0x4ed   :  { %8619 = vmatprep.subr.bf16.mxu0 %v12855_v63  ;;  %v12888_v63 = vld [vmem:[%s17809_s24 + $0x354] ss:$8 sps:$4 sm:$0xff]  }
 0x4f0   :  { %8620 = vmatpush1.bf16.msra.mxu0 %v12853_v10  ;;  %v12889_v10 = vld [vmem:[%s17809_s24 + $0x360] ss:$8 sps:$4 sm:$0xff]  }
 0x4f1   :  { %8621 = vmatprep.subr.bf16.mxu0 %v12858_v12  ;;  %v12894_v12 = vld [vmem:[%s17809_s24 + $0x374] ss:$8 sps:$4 sm:$0xff]  }
 0x4f4   :  { %8622 = vmatpush1.bf16.msra.mxu0 %v12856_v1  ;;  %v12895_v1 = vld [vmem:[%s17809_s24 + $0x380] ss:$8 sps:$4 sm:$0xff]  }
 0x4f5   :  { %8623 = vmatprep.subr.bf16.mxu0 %v12861_v14  ;;  %v12900_v14 = vld [vmem:[%s17809_s24 + $0x394] ss:$8 sps:$4 sm:$0xff]  }
 0x4f8   :  { %8624 = vmatpush1.bf16.msra.mxu0 %v12859_v17  ;;  %v12901_v17 = vld [vmem:[%s17809_s24 + $0x3a0] ss:$8 sps:$4 sm:$0xff]  }
 0x4f9   :  { %8625 = vmatprep.subr.bf16.mxu0 %v12864_v9  ;;  %v12906_v9 = vld [vmem:[%s17809_s24 + $0x3b4] ss:$8 sps:$4 sm:$0xff]  }
 0x4fc   :  { %8626 = vmatpush1.bf16.msra.mxu0 %v12862_v19  ;;  %v12907_v19 = vld [vmem:[%s17809_s24 + $0x3c0] ss:$8 sps:$4 sm:$0xff]  }
 0x4fd   :  { %8627 = vmatprep.subr.bf16.mxu0 %v12867_v24  ;;  %v1159_v24 = vsub.s32 6, %v13649_v43  ;;  %v12913_v43 = vld [vmem:[%s17809_s24 + $0x3e0] ss:$8 sps:$4 sm:$0xff]  }
 0x500   :  { %8628 = vmatpush1.bf16.msra.mxu0 %v12865_v25  ;;  %v1160_v25 = vrot.slane %v16820_v0, %v1159_v24  ;;  %v12916_v0 = vld [vmem:[%s17809_s24 + $0x3f0] ss:$8 sps:$4 sm:$0xff]   ;;  %v13005_v24 = vld [vmem:[%s17784_s7 + $0x104] ss:$16 sps:$4 sm:$0xff]  }
 0x501   :  { %8629 = vmatprep.subr.bf16.mxu0 %v12870_v26  ;;  %v12915_v26 = vld [vmem:[%s17809_s24 + $0x3e4] ss:$8 sps:$4 sm:$0xff]  }
 0x504   :  { %8630 = vmatpush1.bf16.msra.mxu0 %v12868_v59 }
 0x505   :  { %8640 = vmatprep.subr.bf16.mxu0 %v12873_v29 }
 0x51a   :  { %v7386_v38 = vpop.f32.mrb[4].mxu0  ;;  %v17154_v39 = vpop.f32.mrb[4].mxu1 }
 0x51b   :  { %v12566_v22 = vadd.f32 %v7386_v38, %v1152_v35  ;;  %v7388_v41 = vpop.f32.mrb[5].mxu0  ;;  %v7716_v44 = vpop.f32.mrb[5].mxu1  ;;  %v12568_v48 = vadd.f32 %v17154_v39, %v1160_v25  ;;  %v7870_v35 = vrot.slane %v7865_v34, %v16918_v61  ;;  %v13006_v25 = vld [vmem:[%s17784_s7 + $0x120] ss:$16 sps:$4 sm:$0xff]  }
 0x51c   :  { %v12567_v42 = vadd.f32 %v7388_v41, %v1156_v16  ;;  %v7390_v45 = vpop.f32.mrb[6].mxu0  ;;  %v12569_v47 = vadd.f32 %v7716_v44, %v1164_v36  ;;  %v7718_v23 = vpop.f32.mrb[6].mxu1  ;;  %v7874_v16 = vrot.slane %v7865_v34, %v16809_v62  ;;  %v13026_v34 = vld [vmem:[%s17784_s7 + $0x1e4] ss:$16 sps:$4 sm:$0xff]  }
 0x51d   :  { %v7725_v46 = vmax.f32 %v12566_v22, 0.0  ;;  %v7391_v52 = vpop.f32.mrb[7].mxu0  ;;  %v7719_v54 = vpop.f32.mrb[7].mxu1  ;;  %v7727_v59 = vmax.f32 %v12568_v48, 0.0  ;;  %v12949_v45 = vld [vmem:[#allocation2 + $0x8] ss:$16 sps:$4 sm:$0xff]  }
 0x51e   :  { %v7726_v51 = vmax.f32 %v12567_v42, 0.0  ;;  %v7728_v55 = vmax.f32 %v12569_v47, 0.0  ;;  %v12954_v47 = vld [vmem:[#allocation2 + $0x2c] ss:$16 sps:$4 sm:$0xff]   ;;  %v12952_v23 = vld [vmem:[#allocation2 + $0x28] ss:$16 sps:$4 sm:$0xff]  }
 0x51f   :  { %v7733_v6 = vpack.c.bf16 %v7725_v46, %v7725_v46  ;;  %v7735_v29 = vpack.c.bf16 %v7727_v59, %v7727_v59  ;;  %v12957_v52 = vld [vmem:[#allocation2 + $0x4c] ss:$16 sps:$4 sm:$0xff]   ;;  %v13014_v48 = vld [vmem:[%s17784_s7 + $0x164] ss:$16 sps:$4 sm:$0xff]   ;;  %v13015_v59 = vld [vmem:[%s17784_s7 + $0x180] ss:$16 sps:$4 sm:$0xff]  }
 0x520   :  { %v7734_v56 = vpack.c.bf16 %v7726_v51, %v7726_v51  ;;  %v7736_v33 = vpack.c.bf16 %v7728_v55, %v7728_v55  ;;  %v12955_v51 = vld [vmem:[#allocation2 + $0x48] ss:$16 sps:$4 sm:$0xff]   ;;  %v12960_v54 = vld [vmem:[#allocation2 + $0x6c] ss:$16 sps:$4 sm:$0xff]  }
 0x521   :  { %v12958_v55 = vld [vmem:[#allocation2 + $0x68] ss:$16 sps:$4 sm:$0xff]  }
 0x522   :  { %8631 = vmatprep.mubr.bf16.mxu0 %v7734_v56  ;;  %v12963_v56 = vld [vmem:[#allocation2 + $0x8c] ss:$16 sps:$4 sm:$0xff]  }
 0x523   :  { %8632 = vmatmul.mubr.bf16.vlgmr.msra.gmra.mrb[8].mxu0 %v7733_v6  ;;  %v12966_v6 = vld [vmem:[#allocation2 + $0xac] ss:$16 sps:$4 sm:$0xff]  }
 0x524   :  { %8641 = vmatpush1.bf16.msra.mxu0 %v12871_v57  ;;  %8672 = vmatprep.mubr.bf16.mxu0 %v7736_v33  ;;  %v12961_v57 = vld [vmem:[#allocation2 + $0x88] ss:$16 sps:$4 sm:$0xff]   ;;  %v12969_v33 = vld [vmem:[#allocation2 + $0xcc] ss:$16 sps:$4 sm:$0xff]  }
 0x525   :  { %8642 = vmatprep.subr.bf16.mxu0 %v12876_v58  ;;  %v12964_v58 = vld [vmem:[#allocation2 + $0xa8] ss:$16 sps:$4 sm:$0xff]  }
 0x528   :  { %8643 = vmatpush1.bf16.msra.mxu0 %v12874_v11  ;;  %v12967_v11 = vld [vmem:[#allocation2 + $0xc8] ss:$16 sps:$4 sm:$0xff]  }
 0x529   :  { %8644 = vmatprep.subr.bf16.mxu0 %v12879_v60  ;;  %v12972_v60 = vld [vmem:[#allocation2 + $0xec] ss:$16 sps:$4 sm:$0xff]  }
 0x52c   :  { %8645 = vmatpush1.bf16.msra.mxu0 %v12877_v2  ;;  %v12970_v2 = vld [vmem:[#allocation2 + $0xe8] ss:$16 sps:$4 sm:$0xff]  }
 0x52d   :  { %8646 = vmatprep.subr.bf16.mxu0 %v12882_v18  ;;  %v12975_v18 = vld [vmem:[#allocation2 + $0x10c] ss:$16 sps:$4 sm:$0xff]  }
 0x530   :  { %8647 = vmatpush1.bf16.msra.mxu0 %v12880_v3  ;;  %v12973_v3 = vld [vmem:[#allocation2 + $0x108] ss:$16 sps:$4 sm:$0xff]  }
 0x531   :  { %8648 = vmatprep.subr.bf16.mxu0 %v12885_v28  ;;  %v12978_v28 = vld [vmem:[#allocation2 + $0x12c] ss:$16 sps:$4 sm:$0xff]  }
 0x534   :  { %8649 = vmatpush1.bf16.msra.mxu0 %v12883_v4  ;;  %v12976_v4 = vld [vmem:[#allocation2 + $0x128] ss:$16 sps:$4 sm:$0xff]  }
 0x535   :  { %8650 = vmatprep.subr.bf16.mxu0 %v12888_v63  ;;  %v12981_v63 = vld [vmem:[%s17784_s7 + $0x4] ss:$16 sps:$4 sm:$0xff]  }
 0x538   :  { %8651 = vmatpush1.bf16.msra.mxu0 %v12886_v5  ;;  %v12979_v5 = vld [vmem:[%s17784_s7] ss:$16 sps:$4 sm:$0xff]  }
 0x539   :  { %8652 = vmatprep.subr.bf16.mxu0 %v12891_v8  ;;  %v12984_v8 = vld [vmem:[%s17784_s7 + $0x24] ss:$16 sps:$4 sm:$0xff]  }
 0x53c   :  { %8653 = vmatpush1.bf16.msra.mxu0 %v12889_v10  ;;  %v12982_v10 = vld [vmem:[%s17784_s7 + $0x20] ss:$16 sps:$4 sm:$0xff]  }
 0x53d   :  { %8654 = vmatprep.subr.bf16.mxu0 %v12894_v12  ;;  %v12987_v12 = vld [vmem:[%s17784_s7 + $0x44] ss:$16 sps:$4 sm:$0xff]  }
 0x540   :  { %8655 = vmatpush1.bf16.msra.mxu0 %v12892_v27  ;;  %v12985_v27 = vld [vmem:[%s17784_s7 + $0x40] ss:$16 sps:$4 sm:$0xff]  }
 0x541   :  { %8656 = vmatprep.subr.bf16.mxu0 %v12897_v13  ;;  %v12990_v13 = vld [vmem:[%s17784_s7 + $0x64] ss:$16 sps:$4 sm:$0xff]  }
 0x544   :  { %8657 = vmatpush1.bf16.msra.mxu0 %v12895_v1  ;;  %v12988_v1 = vld [vmem:[%s17784_s7 + $0x60] ss:$16 sps:$4 sm:$0xff]  }
 0x545   :  { %8658 = vmatprep.subr.bf16.mxu0 %v12900_v14  ;;  %v12993_v14 = vld [vmem:[%s17784_s7 + $0x84] ss:$16 sps:$4 sm:$0xff]  }
 0x548   :  { %8659 = vmatpush1.bf16.msra.mxu0 %v12898_v53  ;;  %v12991_v53 = vld [vmem:[%s17784_s7 + $0x80] ss:$16 sps:$4 sm:$0xff]  }
 0x549   :  { %8660 = vmatprep.subr.bf16.mxu0 %v12903_v15  ;;  %v12996_v15 = vld [vmem:[%s17784_s7 + $0xa4] ss:$16 sps:$4 sm:$0xff]  }
 0x54c   :  { %8661 = vmatpush1.bf16.msra.mxu0 %v12901_v17  ;;  %v12994_v17 = vld [vmem:[%s17784_s7 + $0xa0] ss:$16 sps:$4 sm:$0xff]  }
 0x54d   :  { %8662 = vmatprep.subr.bf16.mxu0 %v12906_v9  ;;  %v12999_v9 = vld [vmem:[%s17784_s7 + $0xc4] ss:$16 sps:$4 sm:$0xff]  }
 0x550   :  { %8663 = vmatpush1.bf16.msra.mxu0 %v12904_v37  ;;  %v12997_v37 = vld [vmem:[%s17784_s7 + $0xc0] ss:$16 sps:$4 sm:$0xff]  }
 0x551   :  { %8664 = vmatprep.subr.bf16.mxu0 %v12909_v40  ;;  %v13002_v40 = vld [vmem:[%s17784_s7 + $0xe4] ss:$16 sps:$4 sm:$0xff]  }
 0x554   :  { %8665 = vmatpush1.bf16.msra.mxu0 %v12907_v19  ;;  %v13000_v19 = vld [vmem:[%s17784_s7 + $0xe0] ss:$16 sps:$4 sm:$0xff]  }
 0x555   :  { %8666 = vmatprep.subr.bf16.mxu0 %v12912_v20  ;;  %v13003_v20 = vld [vmem:[%s17784_s7 + $0x100] ss:$16 sps:$4 sm:$0xff]  }
 0x558   :  { %8667 = vmatpush1.bf16.msra.mxu0 %v12910_v21  ;;  %v13008_v21 = vld [vmem:[%s17784_s7 + $0x124] ss:$16 sps:$4 sm:$0xff]  }
 0x559   :  { %8668 = vmatprep.subr.bf16.mxu0 %v12915_v26  ;;  %v13011_v26 = vld [vmem:[%s17784_s7 + $0x144] ss:$16 sps:$4 sm:$0xff]  }
 0x55c   :  { %8669 = vmatpush1.bf16.msra.mxu0 %v12913_v43  ;;  %v13009_v43 = vld [vmem:[%s17784_s7 + $0x140] ss:$16 sps:$4 sm:$0xff]  }
 0x55d   :  { %8670 = vmatprep.subr.bf16.mxu0 %v12918_v50  ;;  %v13012_v50 = vld [vmem:[%s17784_s7 + $0x160] ss:$16 sps:$4 sm:$0xff]  }
 0x560   :  { %8671 = vmatpush1.bf16.msra.mxu0 %v12916_v0  ;;  %v13017_v0 = vld [vmem:[%s17784_s7 + $0x184] ss:$16 sps:$4 sm:$0xff]  }
 0x563   :  { %8673 = vmatmul.mubr.bf16.vlgmr.msra.gmra.mrb[8].mxu0 %v7735_v29  ;;  %v13020_v29 = vld [vmem:[%s17784_s7 + $0x1a4] ss:$16 sps:$4 sm:$0xff]  }
 0x636   :  { %v8674_v36 = vpop.f32.mrb[8].mxu0 }
 0x637   :  { %v12570_v38 = vadd.f32 %v8674_v36, %v7870_v35  ;;  %v8676_v22 = vpop.f32.mrb[9].mxu0  ;;  %v13024_v35 = vld [vmem:[%s17784_s7 + $0x1e0] ss:$16 sps:$4 sm:$0xff]  }
 0x638   :  { %v12571_v39 = vadd.f32 %v8676_v22, %v7874_v16  ;;  %v8678_v41 = vpop.f32.mrb[10].mxu0  ;;  %v13029_v16 = vld [vmem:[%s17784_s7 + $0x204] ss:$16 sps:$4 sm:$0xff]   ;;  %v17359_v36 = vld [vmem:[%s17783_s6] sm:$0xf] }
 0x639   :  { %v8679_v42 = vpop.f32.mrb[11].mxu0  ;;  %v8681_v46 = vpack.c.bf16 %v12570_v38, %v12570_v38  ;;  %v8728_v38 = vrot.slane %v17359_v36, %v16918_v61  ;;  %v8732_v22 = vrot.slane %v17359_v36, %v16809_v62 }
 0x63a   :  { %v8682_v44 = vpack.c.bf16 %v12571_v39, %v12571_v39 }
 0x63c   :  { %12263 = vmatprep.mubr.msk.bf16.mxu1 %vm8945_vm0, %v8682_v44 }
 0x63d   :  { %8982 = vmatmul.mubr.bf16.vlgmr.msra.gmra.mrb[8].mxu1 %v8681_v46 }
 0x63e   :  { %8991 = vmatpush1.bf16.msra.mxu1 %v12949_v45  ;;  %12264 = vmatprep.mubr.msk.bf16.mxu1 %vm8945_vm0, %v8682_v44 }
 0x63f   :  { %8992 = vmatprep.subr.bf16.mxu1 %v12954_v47 }
 0x642   :  { %8993 = vmatpush1.bf16.msra.mxu1 %v12952_v23 }
 0x643   :  { %8994 = vmatprep.subr.bf16.mxu1 %v12957_v52 }
 0x646   :  { %8995 = vmatpush1.bf16.msra.mxu1 %v12955_v51  ;;  %v13027_v51 = vld [vmem:[%s17784_s7 + $0x200] ss:$16 sps:$4 sm:$0xff]  }
 0x647   :  { %8996 = vmatprep.subr.bf16.mxu1 %v12960_v54 }
 0x64a   :  { %8997 = vmatpush1.bf16.msra.mxu1 %v12958_v55  ;;  %v13032_v55 = vld [vmem:[%s17784_s7 + $0x224] ss:$16 sps:$4 sm:$0xff]  }
 0x64b   :  { %8998 = vmatprep.subr.bf16.mxu1 %v12963_v56  ;;  %v13030_v56 = vld [vmem:[%s17784_s7 + $0x220] ss:$16 sps:$4 sm:$0xff]  }
 0x64e   :  { %8999 = vmatpush1.bf16.msra.mxu1 %v12961_v57  ;;  %v13035_v57 = vld [vmem:[%s17784_s7 + $0x244] ss:$16 sps:$4 sm:$0xff]  }
 0x64f   :  { %9000 = vmatprep.subr.bf16.mxu1 %v12966_v6  ;;  %v13033_v6 = vld [vmem:[%s17784_s7 + $0x240] ss:$16 sps:$4 sm:$0xff]  }
 0x652   :  { %9001 = vmatpush1.bf16.msra.mxu1 %v12964_v58  ;;  %v13038_v58 = vld [vmem:[%s17784_s7 + $0x264] ss:$16 sps:$4 sm:$0xff]  }
 0x653   :  { %9002 = vmatprep.subr.bf16.mxu1 %v12969_v33  ;;  %v13036_v33 = vld [vmem:[%s17784_s7 + $0x260] ss:$16 sps:$4 sm:$0xff]  }
 0x656   :  { %9003 = vmatpush1.bf16.msra.mxu1 %v12967_v11  ;;  %v13041_v11 = vld [vmem:[%s17784_s7 + $0x284] ss:$16 sps:$4 sm:$0xff]  }
 0x657   :  { %9004 = vmatprep.subr.bf16.mxu1 %v12972_v60  ;;  %v13039_v60 = vld [vmem:[%s17784_s7 + $0x280] ss:$16 sps:$4 sm:$0xff]  }
 0x65a   :  { %9005 = vmatpush1.bf16.msra.mxu1 %v12970_v2  ;;  %v13044_v2 = vld [vmem:[%s17784_s7 + $0x2a4] ss:$16 sps:$4 sm:$0xff]  }
 0x65b   :  { %9006 = vmatprep.subr.bf16.mxu1 %v12975_v18  ;;  %v13042_v18 = vld [vmem:[%s17784_s7 + $0x2a0] ss:$16 sps:$4 sm:$0xff]  }
 0x65e   :  { %9007 = vmatpush1.bf16.msra.mxu1 %v12973_v3  ;;  %v13047_v3 = vld [vmem:[%s17784_s7 + $0x2c4] ss:$16 sps:$4 sm:$0xff]  }
 0x65f   :  { %9008 = vmatprep.subr.bf16.mxu1 %v12978_v28  ;;  %v13045_v28 = vld [vmem:[%s17784_s7 + $0x2c0] ss:$16 sps:$4 sm:$0xff]  }
 0x662   :  { %9009 = vmatpush1.bf16.msra.mxu1 %v12976_v4  ;;  %v13050_v4 = vld [vmem:[%s17784_s7 + $0x2e4] ss:$16 sps:$4 sm:$0xff]  }
 0x663   :  { %9829 = vmatprep.subr.bf16.mxu1 %v12981_v63  ;;  %v13048_v63 = vld [vmem:[%s17784_s7 + $0x2e0] ss:$16 sps:$4 sm:$0xff]  }
 0x665   :  { %9023 = vmatmul.mubr.bf16.vlgmr.msra.gmra.mrb[12].mxu1 %v8681_v46 }
 0x666   :  { %9830 = vmatpush1.bf16.msra.mxu1 %v12979_v5  ;;  %v13053_v5 = vld [vmem:[%s17784_s7 + $0x304] ss:$16 sps:$4 sm:$0xff]  }
 0x667   :  { %9831 = vmatprep.subr.bf16.mxu1 %v12984_v8  ;;  %v8740_v8 = vrot.slane %v17359_v36, %v16924_v49 }
 0x66a   :  { %9832 = vmatpush1.bf16.msra.mxu1 %v12982_v10  ;;  %v13051_v10 = vld [vmem:[%s17784_s7 + $0x300] ss:$16 sps:$4 sm:$0xff]  }
 0x66b   :  { %9833 = vmatprep.subr.bf16.mxu1 %v12987_v12  ;;  %v13056_v12 = vld [vmem:[%s17784_s7 + $0x324] ss:$16 sps:$4 sm:$0xff]  }
 0x66e   :  { %9834 = vmatpush1.bf16.msra.mxu1 %v12985_v27 }
 0x66f   :  { %9835 = vmatprep.subr.bf16.mxu1 %v12990_v13 }
 0x672   :  { %9836 = vmatpush1.bf16.msra.mxu1 %v12988_v1 }
 0x673   :  { %9837 = vmatprep.subr.bf16.mxu1 %v12993_v14 }
 0x676   :  { %9838 = vmatpush1.bf16.msra.mxu1 %v12991_v53  ;;  %v13054_v53 = vld [vmem:[%s17784_s7 + $0x320] ss:$16 sps:$4 sm:$0xff]  }
 0x677   :  { %9839 = vmatprep.subr.bf16.mxu1 %v12996_v15 }
 0x67a   :  { %9840 = vmatpush1.bf16.msra.mxu1 %v12994_v17  ;;  %v13059_v17 = vld [vmem:[%s17784_s7 + $0x344] ss:$16 sps:$4 sm:$0xff]  }
 0x67b   :  { %9841 = vmatprep.subr.bf16.mxu1 %v12999_v9 }
 0x67e   :  { %9842 = vmatpush1.bf16.msra.mxu1 %v12997_v37 }
 0x67f   :  { %9843 = vmatprep.subr.bf16.mxu1 %v13002_v40  ;;  %v13057_v40 = vld [vmem:[%s17784_s7 + $0x340] ss:$16 sps:$4 sm:$0xff]  }
 0x682   :  { %9844 = vmatpush1.bf16.msra.mxu1 %v13000_v19  ;;  %v13062_v19 = vld [vmem:[%s17784_s7 + $0x364] ss:$16 sps:$4 sm:$0xff]  }
 0x683   :  { %9845 = vmatprep.subr.bf16.mxu1 %v13005_v24  ;;  %v13060_v24 = vld [vmem:[%s17784_s7 + $0x360] ss:$16 sps:$4 sm:$0xff]  }
 0x686   :  { %9846 = vmatpush1.bf16.msra.mxu1 %v13003_v20  ;;  %v13065_v20 = vld [vmem:[%s17784_s7 + $0x384] ss:$16 sps:$4 sm:$0xff]  }
 0x687   :  { %9847 = vmatprep.subr.bf16.mxu1 %v13008_v21  ;;  %v13063_v21 = vld [vmem:[%s17784_s7 + $0x380] ss:$16 sps:$4 sm:$0xff]  }
 0x68a   :  { %9848 = vmatpush1.bf16.msra.mxu1 %v13006_v25  ;;  %v13068_v25 = vld [vmem:[%s17784_s7 + $0x3a4] ss:$16 sps:$4 sm:$0xff]  }
 0x68b   :  { %9849 = vmatprep.subr.bf16.mxu1 %v13011_v26  ;;  %v13066_v26 = vld [vmem:[%s17784_s7 + $0x3a0] ss:$16 sps:$4 sm:$0xff]  }
 0x68e   :  { %9850 = vmatpush1.bf16.msra.mxu1 %v13009_v43  ;;  %v8736_v43 = vrot.slane %v17359_v36, %v17026_v7  ;;  %v13173_v36 = vld [vmem:[#allocation5 + $0x4] ss:$8 sps:$4 sm:$0xff]  }
 0x68f   :  { %9851 = vmatprep.subr.bf16.mxu1 %v13014_v48  ;;  %v13071_v48 = vld [vmem:[%s17784_s7 + $0x3c4] ss:$16 sps:$4 sm:$0xff]   ;;  %10397 = vmatprep.subr.bf16.mxu0 %v13173_v36  ;;  %v13123_v36 = vld [vmem:[%s17784_s7 + $0x208] ss:$16 sps:$4 sm:$0xff]  }
 0x692   :  { %9852 = vmatpush1.bf16.msra.mxu1 %v13012_v50  ;;  %v13069_v50 = vld [vmem:[%s17784_s7 + $0x3c0] ss:$16 sps:$4 sm:$0xff]  }
 0x693   :  { %9853 = vmatprep.subr.bf16.mxu1 %v13017_v0 }
 0x696   :  { %9854 = vmatpush1.bf16.msra.mxu1 %v13015_v59  ;;  %v13074_v59 = vld [vmem:[%s17784_s7 + $0x3e4] ss:$16 sps:$4 sm:$0xff]  }
 0x697   :  { %9855 = vmatprep.subr.bf16.mxu1 %v13020_v29  ;;  %v13072_v29 = vld [vmem:[%s17784_s7 + $0x3e0] ss:$16 sps:$4 sm:$0xff]  }
 0x69a   :  { %9856 = vmatpush1.bf16.msra.mxu1 %v13018_v31 }
 0x69b   :  { %9857 = vmatprep.subr.bf16.mxu1 %v13023_v32  ;;  %v13077_v32 = vld [vmem:[%s17784_s7 + $0xc] ss:$16 sps:$4 sm:$0xff]  }
 0x69e   :  { %9858 = vmatpush1.bf16.msra.mxu1 %v13021_v30  ;;  %v13075_v30 = vld [vmem:[%s17784_s7 + $0x8] ss:$16 sps:$4 sm:$0xff]  }
 0x69f   :  { %9859 = vmatprep.subr.bf16.mxu1 %v13026_v34 }
 0x6a2   :  { %9860 = vmatpush1.bf16.msra.mxu1 %v13024_v35  ;;  %v13080_v35 = vld [vmem:[%s17784_s7 + $0x2c] ss:$16 sps:$4 sm:$0xff]  }
 0x6a3   :  { %9870 = vmatprep.subr.bf16.mxu1 %v13029_v16  ;;  %v13171_v16 = vld [vmem:[#allocation5] ss:$8 sps:$4 sm:$0xff]  }
 0x6a4   :  { %10398 = vmatpush1.bf16.msra.mxu0 %v13171_v16  ;;  %v13125_v16 = vld [vmem:[%s17784_s7 + $0x20c] ss:$16 sps:$4 sm:$0xff]  }
 0x710   :  { %v8983_v39 = vpop.f32.mrb[8].mxu1 }
 0x711   :  { %v8984_v41 = vadd.f32 %v8983_v39, %v8728_v38  ;;  %v8985_v42 = vpop.f32.mrb[9].mxu1  ;;  %v13078_v38 = vld [vmem:[%s17784_s7 + $0x28] ss:$16 sps:$4 sm:$0xff]   ;;  %v13083_v39 = vld [vmem:[%s17784_s7 + $0x4c] ss:$16 sps:$4 sm:$0xff]  }
 0x712   :  { %v8986_v44 = vadd.f32 %v8985_v42, %v8732_v22  ;;  %v8987_v45 = vpop.f32.mrb[10].mxu1  ;;  %v13176_v22 = vld [vmem:[#allocation5 + $0x14] ss:$8 sps:$4 sm:$0xff]   ;;  %v13179_v42 = vld [vmem:[#allocation5 + $0x24] ss:$8 sps:$4 sm:$0xff]  }
 0x713   :  { %v9031_v46 = vmax.f32 %v8984_v41, 0.0  ;;  %v8988_v47 = vpop.f32.mrb[11].mxu1  ;;  %v13174_v41 = vld [vmem:[#allocation5 + $0x10] ss:$8 sps:$4 sm:$0xff]   ;;  %10399 = vmatprep.subr.bf16.mxu0 %v13176_v22  ;;  %v13086_v45 = vld [vmem:[%s17784_s7 + $0x6c] ss:$16 sps:$4 sm:$0xff]  }
 0x714   :  { %v9032_v23 = vmax.f32 %v8986_v44, 0.0  ;;  %v13081_v44 = vld [vmem:[%s17784_s7 + $0x48] ss:$16 sps:$4 sm:$0xff]   ;;  %10400 = vmatpush1.bf16.msra.mxu0 %v13174_v41  ;;  %v13182_v47 = vld [vmem:[#allocation5 + $0x34] ss:$8 sps:$4 sm:$0xff]  }
 0x715   :  { %v17370_v54 = vpack.c.bf16 %v9031_v46, %v9031_v46  ;;  %v13177_v46 = vld [vmem:[#allocation5 + $0x20] ss:$8 sps:$4 sm:$0xff]   ;;  %10401 = vmatprep.subr.bf16.mxu0 %v13179_v42  ;;  %v13137_v42 = vld [vmem:[%s17784_s7 + $0x28c] ss:$16 sps:$4 sm:$0xff]  }
 0x716   :  { %v17365_v52 = vpack.c.bf16 %v9032_v23, %v9032_v23  ;;  %v13084_v23 = vld [vmem:[%s17784_s7 + $0x68] ss:$16 sps:$4 sm:$0xff]  }
 0x717   :  { %v13126_v22 = vld [vmem:[%s17784_s7 + $0x228] ss:$16 sps:$4 sm:$0xff]  }
 0x718   :  { %9861 = vmatprep.mubr.bf16.mxu1 %v17365_v52  ;;  %10402 = vmatpush1.bf16.msra.mxu0 %v13177_v46  ;;  %v13129_v41 = vld [vmem:[%s17784_s7 + $0x248] ss:$16 sps:$4 sm:$0xff]  }
 0x719   :  { %9862 = vmatmul.mubr.bf16.vlgmr.msra.gmra.mrb[16].mxu1 %v17370_v54  ;;  %10403 = vmatprep.subr.bf16.mxu0 %v13182_v47  ;;  %v13138_v46 = vld [vmem:[%s17784_s7 + $0x2a8] ss:$16 sps:$4 sm:$0xff]   ;;  %v13143_v47 = vld [vmem:[%s17784_s7 + $0x2cc] ss:$16 sps:$4 sm:$0xff]  }
 0x71a   :  { %9871 = vmatpush1.bf16.msra.mxu1 %v13027_v51  ;;  %v13180_v51 = vld [vmem:[#allocation5 + $0x30] ss:$8 sps:$4 sm:$0xff]  }
 0x71b   :  { %9872 = vmatprep.subr.bf16.mxu1 %v13032_v55  ;;  %v13185_v55 = vld [vmem:[#allocation5 + $0x44] ss:$8 sps:$4 sm:$0xff]  }
 0x71c   :  { %10404 = vmatpush1.bf16.msra.mxu0 %v13180_v51  ;;  %v13141_v51 = vld [vmem:[%s17784_s7 + $0x2c8] ss:$16 sps:$4 sm:$0xff]  }
 0x71d   :  { %10405 = vmatprep.subr.bf16.mxu0 %v13185_v55  ;;  %v13146_v55 = vld [vmem:[%s17784_s7 + $0x2ec] ss:$16 sps:$4 sm:$0xff]  }
 0x71e   :  { %9873 = vmatpush1.bf16.msra.mxu1 %v13030_v56  ;;  %v13087_v56 = vld [vmem:[%s17784_s7 + $0x88] ss:$16 sps:$4 sm:$0xff]  }
 0x71f   :  { %9874 = vmatprep.subr.bf16.mxu1 %v13035_v57  ;;  %v13092_v57 = vld [vmem:[%s17784_s7 + $0xac] ss:$16 sps:$4 sm:$0xff]  }
 0x722   :  { %9875 = vmatpush1.bf16.msra.mxu1 %v13033_v6  ;;  %v13183_v6 = vld [vmem:[#allocation5 + $0x40] ss:$8 sps:$4 sm:$0xff]  }
 0x723   :  { %9876 = vmatprep.subr.bf16.mxu1 %v13038_v58  ;;  %v13188_v58 = vld [vmem:[#allocation5 + $0x54] ss:$8 sps:$4 sm:$0xff]   ;;  %10406 = vmatpush1.bf16.msra.mxu0 %v13183_v6  ;;  %v13144_v6 = vld [vmem:[%s17784_s7 + $0x2e8] ss:$16 sps:$4 sm:$0xff]  }
 0x724   :  { %10407 = vmatprep.subr.bf16.mxu0 %v13188_v58  ;;  %v13149_v58 = vld [vmem:[%s17784_s7 + $0x30c] ss:$16 sps:$4 sm:$0xff]  }
 0x726   :  { %9877 = vmatpush1.bf16.msra.mxu1 %v13036_v33  ;;  %v13090_v33 = vld [vmem:[%s17784_s7 + $0xa8] ss:$16 sps:$4 sm:$0xff]  }
 0x727   :  { %9878 = vmatprep.subr.bf16.mxu1 %v13041_v11  ;;  %v13095_v11 = vld [vmem:[%s17784_s7 + $0xcc] ss:$16 sps:$4 sm:$0xff]  }
 0x72a   :  { %9879 = vmatpush1.bf16.msra.mxu1 %v13039_v60  ;;  %v13186_v60 = vld [vmem:[#allocation5 + $0x50] ss:$8 sps:$4 sm:$0xff]  }
 0x72b   :  { %9880 = vmatprep.subr.bf16.mxu1 %v13044_v2  ;;  %v13191_v2 = vld [vmem:[#allocation5 + $0x64] ss:$8 sps:$4 sm:$0xff]   ;;  %10408 = vmatpush1.bf16.msra.mxu0 %v13186_v60 }
 0x72c   :  { %10409 = vmatprep.subr.bf16.mxu0 %v13191_v2  ;;  %v13152_v60 = vld [vmem:[%s17784_s7 + $0x32c] ss:$16 sps:$4 sm:$0xff]   ;;  %v13150_v2 = vld [vmem:[%s17784_s7 + $0x328] ss:$16 sps:$4 sm:$0xff]  }
 0x72e   :  { %9881 = vmatpush1.bf16.msra.mxu1 %v13042_v18  ;;  %v13093_v18 = vld [vmem:[%s17784_s7 + $0xc8] ss:$16 sps:$4 sm:$0xff]  }
 0x72f   :  { %9882 = vmatprep.subr.bf16.mxu1 %v13047_v3  ;;  %v13098_v3 = vld [vmem:[%s17784_s7 + $0xec] ss:$16 sps:$4 sm:$0xff]  }
 0x732   :  { %9883 = vmatpush1.bf16.msra.mxu1 %v13045_v28  ;;  %v13189_v28 = vld [vmem:[#allocation5 + $0x60] ss:$8 sps:$4 sm:$0xff]  }
 0x733   :  { %9884 = vmatprep.subr.bf16.mxu1 %v13050_v4  ;;  %v13194_v4 = vld [vmem:[#allocation5 + $0x74] ss:$8 sps:$4 sm:$0xff]   ;;  %10410 = vmatpush1.bf16.msra.mxu0 %v13189_v28 }
 0x734   :  { %10411 = vmatprep.subr.bf16.mxu0 %v13194_v4  ;;  %v13158_v28 = vld [vmem:[%s17784_s7 + $0x36c] ss:$16 sps:$4 sm:$0xff]   ;;  %v13156_v4 = vld [vmem:[%s17784_s7 + $0x368] ss:$16 sps:$4 sm:$0xff]  }
 0x736   :  { %9885 = vmatpush1.bf16.msra.mxu1 %v13048_v63  ;;  %v13096_v63 = vld [vmem:[%s17784_s7 + $0xe8] ss:$16 sps:$4 sm:$0xff]  }
 0x737   :  { %9886 = vmatprep.subr.bf16.mxu1 %v13053_v5  ;;  %v13101_v5 = vld [vmem:[%s17784_s7 + $0x10c] ss:$16 sps:$4 sm:$0xff]  }
 0x738   :  { %v9024_v27 = vpop.f32.mrb[12].mxu1 }
 0x739   :  { %v9026_v13 = vpop.f32.mrb[13].mxu1  ;;  %v9025_v0 = vadd.f32 %v9024_v27, %v8736_v43  ;;  %v13104_v27 = vld [vmem:[%s17784_s7 + $0x12c] ss:$16 sps:$4 sm:$0xff]   ;;  %v13111_v43 = vld [vmem:[%s17784_s7 + $0x188] ss:$16 sps:$4 sm:$0xff]  }
 0x73a   :  { %v9027_v1 = vadd.f32 %v9026_v13, %v8740_v8  ;;  %v9028_v14 = vpop.f32.mrb[14].mxu1  ;;  %9887 = vmatpush1.bf16.msra.mxu1 %v13051_v10  ;;  %v13192_v8 = vld [vmem:[#allocation5 + $0x70] ss:$8 sps:$4 sm:$0xff]   ;;  %v13197_v10 = vld [vmem:[#allocation5 + $0x84] ss:$8 sps:$4 sm:$0xff]  }
 0x73b   :  { %v9029_v15 = vpop.f32.mrb[15].mxu1  ;;  %9888 = vmatprep.subr.bf16.mxu1 %v13056_v12  ;;  %v9033_v31 = vmax.f32 %v9025_v0, 0.0  ;;  %v13099_v12 = vld [vmem:[%s17784_s7 + $0x108] ss:$16 sps:$4 sm:$0xff]   ;;  %10412 = vmatpush1.bf16.msra.mxu0 %v13192_v8  ;;  %v13212_v0 = vld [vmem:[#allocation5 + $0xd4] ss:$8 sps:$4 sm:$0xff]  }
 0x73c   :  { %v9034_v9 = vmax.f32 %v9027_v1, 0.0  ;;  %v13195_v13 = vld [vmem:[#allocation5 + $0x80] ss:$8 sps:$4 sm:$0xff]   ;;  %10413 = vmatprep.subr.bf16.mxu0 %v13197_v10  ;;  %v13200_v1 = vld [vmem:[#allocation5 + $0x94] ss:$8 sps:$4 sm:$0xff]  }
 0x73d   :  { %v17477_v34 = vpack.c.bf16 %v9033_v31, %v9033_v31  ;;  %v13102_v14 = vld [vmem:[%s17784_s7 + $0x128] ss:$16 sps:$4 sm:$0xff]   ;;  %v13164_v8 = vld [vmem:[%s17784_s7 + $0x3ac] ss:$16 sps:$4 sm:$0xff]  }
 0x73e   :  { %v17433_v37 = vpack.c.bf16 %v9034_v9, %v9034_v9  ;;  %9889 = vmatpush1.bf16.msra.mxu1 %v13054_v53  ;;  %v13107_v53 = vld [vmem:[%s17784_s7 + $0x14c] ss:$16 sps:$4 sm:$0xff]   ;;  %v13198_v15 = vld [vmem:[#allocation5 + $0x90] ss:$8 sps:$4 sm:$0xff]  }
 0x73f   :  { %9890 = vmatprep.subr.bf16.mxu1 %v13059_v17  ;;  %10414 = vmatpush1.bf16.msra.mxu0 %v13195_v13  ;;  %v13203_v17 = vld [vmem:[#allocation5 + $0xa4] ss:$8 sps:$4 sm:$0xff]   ;;  %v13105_v9 = vld [vmem:[%s17784_s7 + $0x148] ss:$16 sps:$4 sm:$0xff]  }
 0x740   :  { %9902 = vmatprep.mubr.bf16.mxu1 %v17433_v37  ;;  %10415 = vmatprep.subr.bf16.mxu0 %v13200_v1  ;;  %v13210_v31 = vld [vmem:[#allocation5 + $0xd0] ss:$8 sps:$4 sm:$0xff]   ;;  %v13170_v13 = vld [vmem:[%s17784_s7 + $0x3ec] ss:$16 sps:$4 sm:$0xff]  }
 0x741   :  { %v13162_v10 = vld [vmem:[%s17784_s7 + $0x3a8] ss:$16 sps:$4 sm:$0xff]  }
 0x742   :  { %9891 = vmatpush1.bf16.msra.mxu1 %v13057_v40  ;;  %v13110_v40 = vld [vmem:[%s17784_s7 + $0x16c] ss:$16 sps:$4 sm:$0xff]   ;;  %v13168_v1 = vld [vmem:[%s17784_s7 + $0x3e8] ss:$16 sps:$4 sm:$0xff]  }
 0x743   :  { %9892 = vmatprep.subr.bf16.mxu1 %v13062_v19  ;;  %10416 = vmatpush1.bf16.msra.mxu0 %v13198_v15  ;;  %v13201_v19 = vld [vmem:[#allocation5 + $0xa0] ss:$8 sps:$4 sm:$0xff]  }
 0x744   :  { %10417 = vmatprep.subr.bf16.mxu0 %v13203_v17 }
 0x746   :  { %9893 = vmatpush1.bf16.msra.mxu1 %v13060_v24  ;;  %v13206_v24 = vld [vmem:[#allocation5 + $0xb4] ss:$8 sps:$4 sm:$0xff]  }
 0x747   :  { %9894 = vmatprep.subr.bf16.mxu1 %v13065_v20  ;;  %v13108_v20 = vld [vmem:[%s17784_s7 + $0x168] ss:$16 sps:$4 sm:$0xff]   ;;  %10418 = vmatpush1.bf16.msra.mxu0 %v13201_v19 }
 0x748   :  { %10419 = vmatprep.subr.bf16.mxu0 %v13206_v24 }
 0x74a   :  { %9895 = vmatpush1.bf16.msra.mxu1 %v13063_v21  ;;  %v13113_v21 = vld [vmem:[%s17784_s7 + $0x18c] ss:$16 sps:$4 sm:$0xff]  }
 0x74b   :  { %9896 = vmatprep.subr.bf16.mxu1 %v13068_v25  ;;  %v13204_v25 = vld [vmem:[#allocation5 + $0xb0] ss:$8 sps:$4 sm:$0xff]  }
 0x74c   :  { %10420 = vmatpush1.bf16.msra.mxu0 %v13204_v25 }
 0x74e   :  { %9897 = vmatpush1.bf16.msra.mxu1 %v13066_v26  ;;  %v13209_v26 = vld [vmem:[#allocation5 + $0xc4] ss:$8 sps:$4 sm:$0xff]  }
 0x74f   :  { %9898 = vmatprep.subr.bf16.mxu1 %v13071_v48  ;;  %v13116_v48 = vld [vmem:[%s17784_s7 + $0x1ac] ss:$16 sps:$4 sm:$0xff]   ;;  %10421 = vmatprep.subr.bf16.mxu0 %v13209_v26  ;;  %v13219_v26 = vld [vmem:[#allocation5 + $0x100] ss:$8 sps:$4 sm:$0xff]  }
 0x752   :  { %9899 = vmatpush1.bf16.msra.mxu1 %v13069_v50  ;;  %v13207_v50 = vld [vmem:[#allocation5 + $0xc0] ss:$8 sps:$4 sm:$0xff]  }
 0x753   :  { %9900 = vmatprep.subr.bf16.mxu1 %v13074_v59  ;;  %v13114_v59 = vld [vmem:[%s17784_s7 + $0x1a8] ss:$16 sps:$4 sm:$0xff]   ;;  %10422 = vmatpush1.bf16.msra.mxu0 %v13207_v50 }
 0x754   :  { %10423 = vmatprep.subr.bf16.mxu0 %v13212_v0  ;;  %v13267_v50 = vld [vmem:[#allocation7] ss:$8 sps:$4 sm:$0xff]   ;;  %v13269_v0 = vld [vmem:[#allocation7 + $0x4] ss:$8 sps:$4 sm:$0xff]  }
 0x756   :  { %9901 = vmatpush1.bf16.msra.mxu1 %v13072_v29  ;;  %v13119_v29 = vld [vmem:[%s17784_s7 + $0x1cc] ss:$16 sps:$4 sm:$0xff]  }
 0x757   :  { %9911 = vmatprep.subr.bf16.mxu1 %v13077_v32  ;;  %v13117_v32 = vld [vmem:[%s17784_s7 + $0x1c8] ss:$16 sps:$4 sm:$0xff]   ;;  %10424 = vmatpush1.bf16.msra.mxu0 %v13210_v31  ;;  %v13227_v31 = vld [vmem:[#allocation5 + $0x124] ss:$8 sps:$4 sm:$0xff]  }
 0x759   :  { %9903 = vmatmul.mubr.bf16.vlgmr.msra.gmra.mrb[16].mxu1 %v17477_v34 }
 0x75a   :  { %9912 = vmatpush1.bf16.msra.mxu1 %v13075_v30  ;;  %9943 = vmatprep.mubr.bf16.mxu1 %v17365_v52  ;;  %v13089_v52 = vld [vmem:[%s17784_s7 + $0x8c] ss:$16 sps:$4 sm:$0xff]  }
 0x75b   :  { %9913 = vmatprep.subr.bf16.mxu1 %v13080_v35  ;;  %v13122_v30 = vld [vmem:[%s17784_s7 + $0x1ec] ss:$16 sps:$4 sm:$0xff]   ;;  %v13120_v35 = vld [vmem:[%s17784_s7 + $0x1e8] ss:$16 sps:$4 sm:$0xff]  }
 0x75e   :  { %9914 = vmatpush1.bf16.msra.mxu1 %v13078_v38  ;;  %v13128_v38 = vld [vmem:[%s17784_s7 + $0x22c] ss:$16 sps:$4 sm:$0xff]  }
 0x75f   :  { %9915 = vmatprep.subr.bf16.mxu1 %v13083_v39  ;;  %v13131_v39 = vld [vmem:[%s17784_s7 + $0x24c] ss:$16 sps:$4 sm:$0xff]  }
 0x762   :  { %9916 = vmatpush1.bf16.msra.mxu1 %v13081_v44  ;;  %v13135_v44 = vld [vmem:[%s17784_s7 + $0x288] ss:$16 sps:$4 sm:$0xff]  }
 0x763   :  { %9917 = vmatprep.subr.bf16.mxu1 %v13086_v45  ;;  %v13140_v45 = vld [vmem:[%s17784_s7 + $0x2ac] ss:$16 sps:$4 sm:$0xff]  }
 0x766   :  { %9918 = vmatpush1.bf16.msra.mxu1 %v13084_v23  ;;  %v13215_v23 = vld [vmem:[#allocation5 + $0xe4] ss:$8 sps:$4 sm:$0xff]  }
 0x767   :  { %9919 = vmatprep.subr.bf16.mxu1 %v13089_v52  ;;  %v13213_v52 = vld [vmem:[#allocation5 + $0xe0] ss:$8 sps:$4 sm:$0xff]   ;;  %10425 = vmatprep.subr.bf16.mxu0 %v13215_v23  ;;  %v13282_v23 = vld [vmem:[#allocation7 + $0x50] ss:$8 sps:$4 sm:$0xff]  }
 0x768   :  { %10426 = vmatpush1.bf16.msra.mxu0 %v13213_v52  ;;  %v13287_v52 = vld [vmem:[#allocation7 + $0x64] ss:$8 sps:$4 sm:$0xff]  }
 0x76a   :  { %9920 = vmatpush1.bf16.msra.mxu1 %v13087_v56  ;;  %v13218_v56 = vld [vmem:[#allocation5 + $0xf4] ss:$8 sps:$4 sm:$0xff]  }
 0x76b   :  { %9921 = vmatprep.subr.bf16.mxu1 %v13092_v57  ;;  %v13216_v57 = vld [vmem:[#allocation5 + $0xf0] ss:$8 sps:$4 sm:$0xff]   ;;  %10427 = vmatprep.subr.bf16.mxu0 %v13218_v56  ;;  %v13285_v56 = vld [vmem:[#allocation7 + $0x60] ss:$8 sps:$4 sm:$0xff]  }
 0x76c   :  { %10428 = vmatpush1.bf16.msra.mxu0 %v13216_v57  ;;  %v13290_v57 = vld [vmem:[#allocation7 + $0x74] ss:$8 sps:$4 sm:$0xff]  }
 0x76e   :  { %9922 = vmatpush1.bf16.msra.mxu1 %v13090_v33  ;;  %v13221_v33 = vld [vmem:[#allocation5 + $0x104] ss:$8 sps:$4 sm:$0xff]  }
 0x76f   :  { %9923 = vmatprep.subr.bf16.mxu1 %v13095_v11  ;;  %v13147_v11 = vld [vmem:[%s17784_s7 + $0x308] ss:$16 sps:$4 sm:$0xff]   ;;  %10438 = vmatprep.subr.bf16.mxu0 %v13221_v33 }
 0x770   :  { %v13288_v33 = vld [vmem:[#allocation7 + $0x70] ss:$8 sps:$4 sm:$0xff]  }
 0x772   :  { %9924 = vmatpush1.bf16.msra.mxu1 %v13093_v18  ;;  %v13155_v18 = vld [vmem:[%s17784_s7 + $0x34c] ss:$16 sps:$4 sm:$0xff]  }
 0x773   :  { %9925 = vmatprep.subr.bf16.mxu1 %v13098_v3  ;;  %v13153_v3 = vld [vmem:[%s17784_s7 + $0x348] ss:$16 sps:$4 sm:$0xff]  }
 0x776   :  { %9926 = vmatpush1.bf16.msra.mxu1 %v13096_v63  ;;  %v13161_v63 = vld [vmem:[%s17784_s7 + $0x38c] ss:$16 sps:$4 sm:$0xff]  }
 0x777   :  { %9927 = vmatprep.subr.bf16.mxu1 %v13101_v5  ;;  %v13159_v5 = vld [vmem:[%s17784_s7 + $0x388] ss:$16 sps:$4 sm:$0xff]  }
 0x77a   :  { %9928 = vmatpush1.bf16.msra.mxu1 %v13099_v12  ;;  %v13167_v12 = vld [vmem:[%s17784_s7 + $0x3cc] ss:$16 sps:$4 sm:$0xff]  }
 0x77b   :  { %9929 = vmatprep.subr.bf16.mxu1 %v13104_v27  ;;  %v13165_v27 = vld [vmem:[%s17784_s7 + $0x3c8] ss:$16 sps:$4 sm:$0xff]  }
 0x77e   :  { %9930 = vmatpush1.bf16.msra.mxu1 %v13102_v14  ;;  %v17673_v14 = vld [vmem:[%s17785_s8] sm:$0xf] }
 0x77f   :  { %9931 = vmatprep.subr.bf16.mxu1 %v13107_v53  ;;  %v9172_v53 = vrot.slane %v17673_v14, %v16918_v61  ;;  %v9176_v15 = vrot.slane %v17673_v14, %v16809_v62 }
 0x782   :  { %9932 = vmatpush1.bf16.msra.mxu1 %v13105_v9 }
 0x783   :  { %9933 = vmatprep.subr.bf16.mxu1 %v13110_v40 }
 0x786   :  { %9934 = vmatpush1.bf16.msra.mxu1 %v13108_v20 }
 0x787   :  { %9935 = vmatprep.subr.bf16.mxu1 %v13113_v21 }
 0x78a   :  { %9936 = vmatpush1.bf16.msra.mxu1 %v13111_v43 }
 0x78b   :  { %9937 = vmatprep.subr.bf16.mxu1 %v13116_v48  ;;  %v13224_v48 = vld [vmem:[#allocation5 + $0x114] ss:$8 sps:$4 sm:$0xff]  }
 0x78e   :  { %9938 = vmatpush1.bf16.msra.mxu1 %v13114_v59  ;;  %v13222_v59 = vld [vmem:[#allocation5 + $0x110] ss:$8 sps:$4 sm:$0xff]  }
 0x78f   :  { %9939 = vmatprep.subr.bf16.mxu1 %v13119_v29  ;;  %v13272_v29 = vld [vmem:[#allocation7 + $0x14] ss:$8 sps:$4 sm:$0xff]  }
 0x792   :  { %9940 = vmatpush1.bf16.msra.mxu1 %v13117_v32  ;;  %v13270_v32 = vld [vmem:[#allocation7 + $0x10] ss:$8 sps:$4 sm:$0xff]  }
 0x793   :  { %9941 = vmatprep.subr.bf16.mxu1 %v13122_v30  ;;  %v13275_v30 = vld [vmem:[#allocation7 + $0x24] ss:$8 sps:$4 sm:$0xff]  }
 0x796   :  { %9942 = vmatpush1.bf16.msra.mxu1 %v13120_v35  ;;  %v13225_v35 = vld [vmem:[#allocation5 + $0x120] ss:$8 sps:$4 sm:$0xff]  }
 0x797   :  { %9952 = vmatprep.subr.bf16.mxu1 %v13125_v16  ;;  %v13230_v16 = vld [vmem:[#allocation5 + $0x134] ss:$8 sps:$4 sm:$0xff]  }
 0x799   :  { %9944 = vmatmul.mubr.bf16.vlgmr.msra.gmra.mrb[20].mxu1 %v17370_v54  ;;  %v13134_v54 = vld [vmem:[%s17784_s7 + $0x26c] ss:$16 sps:$4 sm:$0xff]  }
 0x79a   :  { %9953 = vmatpush1.bf16.msra.mxu1 %v13123_v36  ;;  %9984 = vmatprep.mubr.bf16.mxu1 %v17433_v37  ;;  %v13132_v37 = vld [vmem:[%s17784_s7 + $0x268] ss:$16 sps:$4 sm:$0xff]  }
 0x79b   :  { %9954 = vmatprep.subr.bf16.mxu1 %v13128_v38  ;;  %v13273_v36 = vld [vmem:[#allocation7 + $0x20] ss:$8 sps:$4 sm:$0xff]   ;;  %v13278_v38 = vld [vmem:[#allocation7 + $0x34] ss:$8 sps:$4 sm:$0xff]  }
 0x79e   :  { %9955 = vmatpush1.bf16.msra.mxu1 %v13126_v22  ;;  %v13228_v22 = vld [vmem:[#allocation5 + $0x130] ss:$8 sps:$4 sm:$0xff]  }
 0x79f   :  { %9956 = vmatprep.subr.bf16.mxu1 %v13131_v39  ;;  %v13233_v39 = vld [vmem:[#allocation5 + $0x144] ss:$8 sps:$4 sm:$0xff]  }
 0x7a2   :  { %9957 = vmatpush1.bf16.msra.mxu1 %v13129_v41  ;;  %v13276_v41 = vld [vmem:[#allocation7 + $0x30] ss:$8 sps:$4 sm:$0xff]  }
 0x7a3   :  { %9958 = vmatprep.subr.bf16.mxu1 %v13134_v54  ;;  %v13281_v54 = vld [vmem:[#allocation7 + $0x44] ss:$8 sps:$4 sm:$0xff]  }
 0x7a6   :  { %9959 = vmatpush1.bf16.msra.mxu1 %v13132_v37  ;;  %v13231_v37 = vld [vmem:[#allocation5 + $0x140] ss:$8 sps:$4 sm:$0xff]  }
 0x7a7   :  { %9960 = vmatprep.subr.bf16.mxu1 %v13137_v42  ;;  %v13236_v42 = vld [vmem:[#allocation5 + $0x154] ss:$8 sps:$4 sm:$0xff]  }
 0x7aa   :  { %9961 = vmatpush1.bf16.msra.mxu1 %v13135_v44  ;;  %v13279_v44 = vld [vmem:[#allocation7 + $0x40] ss:$8 sps:$4 sm:$0xff]  }
 0x7ab   :  { %9962 = vmatprep.subr.bf16.mxu1 %v13140_v45  ;;  %v13284_v45 = vld [vmem:[#allocation7 + $0x54] ss:$8 sps:$4 sm:$0xff]  }
 0x7ae   :  { %9963 = vmatpush1.bf16.msra.mxu1 %v13138_v46  ;;  %v13234_v46 = vld [vmem:[#allocation5 + $0x150] ss:$8 sps:$4 sm:$0xff]  }
 0x7af   :  { %9964 = vmatprep.subr.bf16.mxu1 %v13143_v47  ;;  %v13239_v47 = vld [vmem:[#allocation5 + $0x164] ss:$8 sps:$4 sm:$0xff]  }
 0x7b2   :  { %9965 = vmatpush1.bf16.msra.mxu1 %v13141_v51  ;;  %v13237_v51 = vld [vmem:[#allocation5 + $0x160] ss:$8 sps:$4 sm:$0xff]  }
 0x7b3   :  { %9966 = vmatprep.subr.bf16.mxu1 %v13146_v55  ;;  %v13242_v55 = vld [vmem:[#allocation5 + $0x174] ss:$8 sps:$4 sm:$0xff]  }
 0x7b6   :  { %9967 = vmatpush1.bf16.msra.mxu1 %v13144_v6  ;;  %v13240_v6 = vld [vmem:[#allocation5 + $0x170] ss:$8 sps:$4 sm:$0xff]  }
 0x7b7   :  { %9968 = vmatprep.subr.bf16.mxu1 %v13149_v58  ;;  %v13245_v58 = vld [vmem:[#allocation5 + $0x184] ss:$8 sps:$4 sm:$0xff]  }
 0x7ba   :  { %9969 = vmatpush1.bf16.msra.mxu1 %v13147_v11  ;;  %v13293_v11 = vld [vmem:[#allocation7 + $0x84] ss:$8 sps:$4 sm:$0xff]  }
 0x7bb   :  { %9970 = vmatprep.subr.bf16.mxu1 %v13152_v60  ;;  %v13243_v60 = vld [vmem:[#allocation5 + $0x180] ss:$8 sps:$4 sm:$0xff]  }
 0x7be   :  { %9971 = vmatpush1.bf16.msra.mxu1 %v13150_v2  ;;  %v13248_v2 = vld [vmem:[#allocation5 + $0x194] ss:$8 sps:$4 sm:$0xff]  }
 0x7bf   :  { %9972 = vmatprep.subr.bf16.mxu1 %v13155_v18  ;;  %v13291_v18 = vld [vmem:[#allocation7 + $0x80] ss:$8 sps:$4 sm:$0xff]  }
 0x7c2   :  { %9973 = vmatpush1.bf16.msra.mxu1 %v13153_v3  ;;  %v13296_v3 = vld [vmem:[#allocation7 + $0x94] ss:$8 sps:$4 sm:$0xff]  }
 0x7c3   :  { %9974 = vmatprep.subr.bf16.mxu1 %v13158_v28  ;;  %v13246_v28 = vld [vmem:[#allocation5 + $0x190] ss:$8 sps:$4 sm:$0xff]  }
 0x7c6   :  { %9975 = vmatpush1.bf16.msra.mxu1 %v13156_v4  ;;  %v13251_v4 = vld [vmem:[#allocation5 + $0x1a4] ss:$8 sps:$4 sm:$0xff]  }
 0x7c7   :  { %9976 = vmatprep.subr.bf16.mxu1 %v13161_v63  ;;  %v13294_v63 = vld [vmem:[#allocation7 + $0x90] ss:$8 sps:$4 sm:$0xff]  }
 0x7ca   :  { %9977 = vmatpush1.bf16.msra.mxu1 %v13159_v5  ;;  %v13299_v5 = vld [vmem:[#allocation7 + $0xa4] ss:$8 sps:$4 sm:$0xff]  }
 0x7cb   :  { %9978 = vmatprep.subr.bf16.mxu1 %v13164_v8  ;;  %v13249_v8 = vld [vmem:[#allocation5 + $0x1a0] ss:$8 sps:$4 sm:$0xff]  }
 0x7ce   :  { %9979 = vmatpush1.bf16.msra.mxu1 %v13162_v10  ;;  %v13254_v10 = vld [vmem:[#allocation5 + $0x1b4] ss:$8 sps:$4 sm:$0xff]  }
 0x7cf   :  { %9980 = vmatprep.subr.bf16.mxu1 %v13167_v12  ;;  %v13297_v12 = vld [vmem:[#allocation7 + $0xa0] ss:$8 sps:$4 sm:$0xff]  }
 0x7d2   :  { %9981 = vmatpush1.bf16.msra.mxu1 %v13165_v27  ;;  %v13302_v27 = vld [vmem:[#allocation7 + $0xb4] ss:$8 sps:$4 sm:$0xff]  }
 0x7d3   :  { %9982 = vmatprep.subr.bf16.mxu1 %v13170_v13  ;;  %v13252_v13 = vld [vmem:[#allocation5 + $0x1b0] ss:$8 sps:$4 sm:$0xff]  }
 0x7d6   :  { %9983 = vmatpush1.bf16.msra.mxu1 %v13168_v1  ;;  %v13257_v1 = vld [vmem:[#allocation5 + $0x1c4] ss:$8 sps:$4 sm:$0xff]  }
 0x7d7   :  { %10687 = vmatprep.subr.bf16.mxu1 %v13269_v0 }
 0x7d9   :  { %9985 = vmatmul.mubr.bf16.vlgmr.msra.gmra.mrb[20].mxu1 %v17477_v34 }
 0x7da   :  { %10688 = vmatpush1.bf16.msra.mxu1 %v13267_v50 }
 0x7db   :  { %10689 = vmatprep.subr.bf16.mxu1 %v13272_v29 }
 0x7de   :  { %10690 = vmatpush1.bf16.msra.mxu1 %v13270_v32 }
 0x7df   :  { %10691 = vmatprep.subr.bf16.mxu1 %v13275_v30 }
 0x7e2   :  { %10692 = vmatpush1.bf16.msra.mxu1 %v13273_v36 }
 0x7e3   :  { %10693 = vmatprep.subr.bf16.mxu1 %v13278_v38  ;;  %v13311_v38 = vld [vmem:[#allocation7 + $0xe4] ss:$8 sps:$4 sm:$0xff]  }
 0x7e6   :  { %10694 = vmatpush1.bf16.msra.mxu1 %v13276_v41  ;;  %v13317_v41 = vld [vmem:[%s17790_s13 + $0x48] sm:$0xff]  }
 0x7e7   :  { %10695 = vmatprep.subr.bf16.mxu1 %v13281_v54  ;;  %v13318_v54 = vld [vmem:[%s17790_s13 + $0x8] sm:$0xff]  }
 0x7ea   :  { %10696 = vmatpush1.bf16.msra.mxu1 %v13279_v44  ;;  %v13321_v44 = vld [vmem:[%s17790_s13 + $0x58] sm:$0xff]  }
 0x7eb   :  { %10697 = vmatprep.subr.bf16.mxu1 %v13284_v45  ;;  %v13322_v45 = vld [vmem:[%s17790_s13 + $0x18] sm:$0xff]  }
 0x7ee   :  { %10698 = vmatpush1.bf16.msra.mxu1 %v13282_v23  ;;  %v13325_v23 = vld [vmem:[%s17790_s13 + $0x68] sm:$0xff]  }
 0x7ef   :  { %10699 = vmatprep.subr.bf16.mxu1 %v13287_v52  ;;  %v13326_v52 = vld [vmem:[%s17790_s13 + $0x28] sm:$0xff]  }
 0x7f2   :  { %10700 = vmatpush1.bf16.msra.mxu1 %v13285_v56 }
 0x7f3   :  { %10701 = vmatprep.subr.bf16.mxu1 %v13290_v57 }
 0x7f6   :  { %10702 = vmatpush1.bf16.msra.mxu1 %v13288_v33 }
 0x7f7   :  { %10703 = vmatprep.subr.bf16.mxu1 %v13293_v11 }
 0x7fa   :  { %10704 = vmatpush1.bf16.msra.mxu1 %v13291_v18 }
 0x7fb   :  { %10705 = vmatprep.subr.bf16.mxu1 %v13296_v3 }
 0x7fe   :  { %10706 = vmatpush1.bf16.msra.mxu1 %v13294_v63  ;;  %v13328_v63 = vld [vmem:[%s17790_s13 + $0x30] sm:$0xff]  }
 0x7ff   :  { %10707 = vmatprep.subr.bf16.mxu1 %v13299_v5  ;;  %v13329_v5 = vld [vmem:[%s17790_s13 + $0x78] sm:$0xff]  }
 0x802   :  { %10708 = vmatpush1.bf16.msra.mxu1 %v13297_v12  ;;  %v13438_v12 = vmov 0.0  }
 0x803   :  { %10709 = vmatprep.subr.bf16.mxu1 %v13302_v27  ;;  %v13332_v27 = vld [vmem:[%s17792_s15 + $0x8] sm:$0xff]  }
 0x82c   :  { %v9904_v17 = vpop.f32.mrb[16].mxu1 }
 0x82d   :  { %v12572_v9 = vadd.f32 %v9904_v17, %v9172_v53  ;;  %v9906_v40 = vpop.f32.mrb[17].mxu1  ;;  %v13300_v53 = vld [vmem:[#allocation7 + $0xb0] ss:$8 sps:$4 sm:$0xff]   ;;  %v13255_v17 = vld [vmem:[#allocation5 + $0x1c0] ss:$8 sps:$4 sm:$0xff]  }
 0x82e   :  { %v12573_v19 = vadd.f32 %v9906_v40, %v9176_v15  ;;  %v9908_v24 = vpop.f32.mrb[18].mxu1  ;;  %v13305_v15 = vld [vmem:[#allocation7 + $0xc4] ss:$8 sps:$4 sm:$0xff]   ;;  %10710 = vmatpush1.bf16.msra.mxu1 %v13300_v53  ;;  %v13303_v40 = vld [vmem:[#allocation7 + $0xc0] ss:$8 sps:$4 sm:$0xff]  }
 0x82f   :  { %v9993_v20 = vmax.f32 %v12572_v9, 0.0  ;;  %v9909_v21 = vpop.f32.mrb[19].mxu1  ;;  %v13260_v9 = vld [vmem:[#allocation5 + $0x1d4] ss:$8 sps:$4 sm:$0xff]   ;;  %10711 = vmatprep.subr.bf16.mxu1 %v13305_v15  ;;  %v13258_v24 = vld [vmem:[#allocation5 + $0x1d0] ss:$8 sps:$4 sm:$0xff]  }
 0x830   :  { %v9994_v25 = vmax.f32 %v12573_v19, 0.0  ;;  %v13308_v19 = vld [vmem:[#allocation7 + $0xd4] ss:$8 sps:$4 sm:$0xff]   ;;  %v13306_v21 = vld [vmem:[#allocation7 + $0xd0] ss:$8 sps:$4 sm:$0xff]  }
 0x831   :  { %v9997_v43 = vpack.c.bf16 %v9993_v20, %v9993_v20  ;;  %v13263_v20 = vld [vmem:[#allocation5 + $0x1e4] ss:$8 sps:$4 sm:$0xff]  }
 0x832   :  { %v9998_v34 = vpack.c.bf16 %v9994_v25, %v9994_v25  ;;  %10712 = vmatpush1.bf16.msra.mxu1 %v13303_v40  ;;  %v13261_v25 = vld [vmem:[#allocation5 + $0x1e0] ss:$8 sps:$4 sm:$0xff]  }
 0x833   :  { %10713 = vmatprep.subr.bf16.mxu1 %v13308_v19 }
 0x834   :  { %10429 = vmatprep.mubr.bf16.mxu0 %v9998_v34  ;;  %v13266_v34 = vld [vmem:[#allocation5 + $0x1f4] ss:$8 sps:$4 sm:$0xff]  }
 0x835   :  { %10430 = vmatmul.mubr.bf16.vlgmr.msra.gmra.mrb[12].mxu0 %v9997_v43  ;;  %v9180_v43 = vrot.slane %v17673_v14, %v17026_v7  ;;  %v13314_v7 = vld [vmem:[#allocation7 + $0xf4] ss:$8 sps:$4 sm:$0xff]  }
 0x836   :  { %10439 = vmatpush1.bf16.msra.mxu0 %v13219_v26  ;;  %10714 = vmatpush1.bf16.msra.mxu1 %v13306_v21  ;;  %v13264_v26 = vld [vmem:[#allocation5 + $0x1f0] ss:$8 sps:$4 sm:$0xff]  }
 0x837   :  { %10440 = vmatprep.subr.bf16.mxu0 %v13224_v48  ;;  %v9184_v48 = vrot.slane %v17673_v14, %v16924_v49  ;;  %10715 = vmatprep.subr.bf16.mxu1 %v13311_v38  ;;  %v13315_v49 = vld [vmem:[%s17790_s13 + $0x40] sm:$0xff]  }
 0x838   :  { %v13316_v14 = vld [vmem:[%s17790_s13] sm:$0xff]  }
 0x83a   :  { %10441 = vmatpush1.bf16.msra.mxu0 %v13222_v59 }
 0x83b   :  { %10442 = vmatprep.subr.bf16.mxu0 %v13227_v31 }
 0x83e   :  { %10443 = vmatpush1.bf16.msra.mxu0 %v13225_v35 }
 0x83f   :  { %10444 = vmatprep.subr.bf16.mxu0 %v13230_v16 }
 0x842   :  { %10445 = vmatpush1.bf16.msra.mxu0 %v13228_v22  ;;  %v13309_v22 = vld [vmem:[#allocation7 + $0xe0] ss:$8 sps:$4 sm:$0xff]  }
 0x843   :  { %10446 = vmatprep.subr.bf16.mxu0 %v13233_v39  ;;  %10716 = vmatpush1.bf16.msra.mxu1 %v13309_v22  ;;  %v13312_v39 = vld [vmem:[#allocation7 + $0xf0] ss:$8 sps:$4 sm:$0xff]  }
 0x844   :  { %10717 = vmatprep.subr.bf16.mxu1 %v13314_v7 }
 0x846   :  { %10447 = vmatpush1.bf16.msra.mxu0 %v13231_v37  ;;  %v13319_v37 = vld [vmem:[%s17790_s13 + $0x50] sm:$0xff]  }
 0x847   :  { %10448 = vmatprep.subr.bf16.mxu0 %v13236_v42  ;;  %10718 = vmatpush1.bf16.msra.mxu1 %v13312_v39  ;;  %v13320_v42 = vld [vmem:[%s17790_s13 + $0x10] sm:$0xff]  }
 0x848   :  { %12544 = vmatprep.subr.bf16.mxu1 %v13438_v12 }
 0x84a   :  { %10449 = vmatpush1.bf16.msra.mxu0 %v13234_v46  ;;  %v13323_v46 = vld [vmem:[%s17790_s13 + $0x60] sm:$0xff]  }
 0x84b   :  { %10450 = vmatprep.subr.bf16.mxu0 %v13239_v47  ;;  %v13324_v47 = vld [vmem:[%s17790_s13 + $0x20] sm:$0xff]  }
 0x84e   :  { %10451 = vmatpush1.bf16.msra.mxu0 %v13237_v51  ;;  %v10065_v51 = vld [vmem:[%s17787_s10] sm:$0x3] }
 0x84f   :  { %10452 = vmatprep.subr.bf16.mxu0 %v13242_v55  ;;  %v10070_v55 = vrot.slane %v10065_v51, %v16918_v61  ;;  %v10074_v56 = vrot.slane %v10065_v51, %v16809_v62 }
 0x852   :  { %10453 = vmatpush1.bf16.msra.mxu0 %v13240_v6 }
 0x853   :  { %10454 = vmatprep.subr.bf16.mxu0 %v13245_v58 }
 0x856   :  { %10455 = vmatpush1.bf16.msra.mxu0 %v13243_v60 }
 0x857   :  { %10456 = vmatprep.subr.bf16.mxu0 %v13248_v2 }
 0x85a   :  { %10457 = vmatpush1.bf16.msra.mxu0 %v13246_v28 }
 0x85b   :  { %10458 = vmatprep.subr.bf16.mxu0 %v13251_v4  ;;  %v13327_v4 = vld [vmem:[%s17790_s13 + $0x70] sm:$0xff]  }
 0x85e   :  { %10459 = vmatpush1.bf16.msra.mxu0 %v13249_v8  ;;  %v13330_v8 = vld [vmem:[%s17790_s13 + $0x38] sm:$0xff]  }
 0x85f   :  { %10460 = vmatprep.subr.bf16.mxu0 %v13254_v10  ;;  %v13331_v10 = vld [vmem:[%s17792_s15] sm:$0xff]  }
 0x862   :  { %10461 = vmatpush1.bf16.msra.mxu0 %v13252_v13  ;;  %v10515_v13 = vld [vmem:[%s17789_s12] sm:$0x3] }
 0x863   :  { %10462 = vmatprep.subr.bf16.mxu0 %v13257_v1  ;;  %v10520_v1 = vrot.slane %v10515_v13, %v16918_v61  ;;  %v10524_v53 = vrot.slane %v10515_v13, %v16809_v62  ;;  %v13334_v62 = vld [vmem:[%s17792_s15 + $0x18] sm:$0xff]   ;;  %v13335_v61 = vld [vmem:[%s17794_s17] sm:$0xff]  }
 0x866   :  { %10463 = vmatpush1.bf16.msra.mxu0 %v13255_v17 }
 0x867   :  { %10464 = vmatprep.subr.bf16.mxu0 %v13260_v9 }
 0x86a   :  { %10465 = vmatpush1.bf16.msra.mxu0 %v13258_v24 }
 0x86b   :  { %10466 = vmatprep.subr.bf16.mxu0 %v13263_v20 }
 0x86e   :  { %10467 = vmatpush1.bf16.msra.mxu0 %v13261_v25 }
 0x86f   :  { %10468 = vmatprep.subr.bf16.mxu0 %v13266_v34 }
 0x872   :  { %10469 = vmatpush1.bf16.msra.mxu0 %v13264_v26  ;;  %v13333_v26 = vld [vmem:[%s17792_s15 + $0x10] sm:$0xff]  }
 0x873   :  { %12515 = vmatprep.subr.bf16.mxu0 %v13315_v49 }
 0x8ac   :  { %v9986_v50 = vpop.f32.mrb[20].mxu1 }
 0x8ad   :  { %v12574_v0 = vadd.f32 %v9986_v50, %v9180_v43  ;;  %v9988_v59 = vpop.f32.mrb[21].mxu1 }
 0x8ae   :  { %v12575_v29 = vadd.f32 %v9988_v59, %v9184_v48  ;;  %v9990_v31 = vpop.f32.mrb[22].mxu1  ;;  %v12489_v48 = vld [vmem:[%s17791_s14] ss:$0 sm:$0xff] }
 0x8af   :  { %v9995_v32 = vmax.f32 %v12574_v0, 0.0  ;;  %v9991_v30 = vpop.f32.mrb[23].mxu1 }
 0x8b0   :  { %v9996_v35 = vmax.f32 %v12575_v29, 0.0 }
 0x8b1   :  { %v9999_v36 = vpack.c.bf16 %v9995_v32, %v9995_v32 }
 0x8b2   :  { %v10000_v16 = vpack.c.bf16 %v9996_v35, %v9996_v35  ;;  %v12506_v35 = vld [vmem:[%s17793_s16] ss:$0 sm:$0xff]  ;;  %s13402_s16 = scalar_lea.vmem %s11062_s0, 32 }
 0x8b3   :  { %p13403_p10 = scmp.ne.s32.totalorder %s11062_s0, %s13402_s16  ;;  %p13408_p12 = scmp.lt.s32.totalorder %s13402_s16, %s13402_s16 }
 0x8b4   :  { %10470 = vmatprep.mubr.bf16.mxu0 %v10000_v16 }
 0x8b5   :  { %10471 = vmatmul.mubr.bf16.vlgmr.msra.gmra.mrb[12].mxu0 %v9999_v36  ;;  %p13409_p13 = por %p13408_p12, %p13407_p11 }
 0x8b6   :  { %12516 = vmatpush3.bf16.msra.mxu0 %v13316_v14  ;;  %v12512_v14 = vld [vmem:[%s17795_s18] ss:$0 sm:$0xff] }
 0x8b7   :  { %12517 = vmatprep.subr.bf16.mxu0 %v13317_v41  ;;  %p13410_p0 = pnand %p13409_p13, %p13403_p10 }
 0x8ba   :  { %12518 = vmatpush3.bf16.msra.mxu0 %v13318_v54 }
 0x8bb   :  { %12519 = vmatprep.subr.bf16.mxu0 %v13319_v37 }
 0x8be   :  { %12520 = vmatpush3.bf16.msra.mxu0 %v13320_v42 }
 0x8bf   :  { %12521 = vmatprep.subr.bf16.mxu0 %v13321_v44 }
 0x8c2   :  { %12522 = vmatpush3.bf16.msra.mxu0 %v13322_v45 }
 0x8c3   :  { %12523 = vmatprep.subr.bf16.mxu0 %v13323_v46 }
 0x8c6   :  { %12524 = vmatpush3.bf16.msra.mxu0 %v13324_v47 }
 0x8c7   :  { %12525 = vmatprep.subr.bf16.mxu0 %v13325_v23 }
 0x8ca   :  { %12526 = vmatpush3.bf16.msra.mxu0 %v13326_v52 }
 0x8cb   :  { %12527 = vmatprep.subr.bf16.mxu0 %v13327_v4 }
 0x8ce   :  { %12528 = vmatpush3.bf16.msra.mxu0 %v13328_v63 }
 0x8cf   :  { %12529 = vmatprep.subr.bf16.mxu0 %v13329_v5 }
 0x8d2   :  { %12530 = vmatpush3.bf16.msra.mxu0 %v13330_v8 }
 0x8d3   :  { %12556 = vmatprep.subr.bf16.mxu0 %v13438_v12 }
 0x988   :  { %v10472_v57 = vpop.f32.mrb[12].mxu0 }
 0x989   :  { %v12576_v6 = vadd.f32 %v10472_v57, %v10070_v55  ;;  %v10474_v58 = vpop.f32.mrb[13].mxu0 }
 0x98a   :  { %v12577_v33 = vadd.f32 %v10474_v58, %v10074_v56  ;;  %v10476_v11 = vpop.f32.mrb[14].mxu0 }
 0x98b   :  { %v10479_v60 = vmax.f32 %v12576_v6, 0.0  ;;  %v10477_v2 = vpop.f32.mrb[15].mxu0 }
 0x98c   :  { %v10480_v18 = vmax.f32 %v12577_v33, 0.0 }
 0x98d   :  { %v10481_v28 = vpack.c.bf16 %v10479_v60, %v10479_v60 }
 0x98e   :  { %v10482_v3 = vpack.c.bf16 %v10480_v18, %v10480_v18 }
 0x990   :  { %10719 = vmatprep.mubr.bf16.mxu1 %v10482_v3 }
 0x991   :  { %10720 = vmatmul.mubr.bf16.vlgmr.msra.gmra.mrb[24].mxu1 %v10481_v28 }
 0x992   :  { %12545 = vmatpush3.bf16.msra.mxu1 %v13331_v10  ;;  %12552 = vmatprep.mubr.msk.bf16.mxu1 %vm13439_vm1, %v13438_v12 }
 0x993   :  { %12546 = vmatprep.subr.bf16.mxu1 %v13438_v12 }
 0x996   :  { %12547 = vmatpush3.bf16.msra.mxu1 %v13332_v27 }
 0x997   :  { %12548 = vmatprep.subr.bf16.mxu1 %v13438_v12 }
 0x99a   :  { %12549 = vmatpush3.bf16.msra.mxu1 %v13333_v26 }
 0x99b   :  { %12550 = vmatprep.subr.bf16.mxu1 %v13438_v12 }
 0x99e   :  { %12551 = vmatpush3.bf16.msra.mxu1 %v13334_v62 }
 0xa64   :  { %v10721_v15 = vpop.f32.mrb[24].mxu1 }
 0xa65   :  { %v10722_v17 = vadd.f32 %v10721_v15, %v10520_v1  ;;  %v10723_v9 = vpop.f32.mrb[25].mxu1 }
 0xa66   :  { %v10724_v40 = vadd.f32 %v10723_v9, %v10524_v53  ;;  %v10725_v19 = vpop.f32.mrb[26].mxu1 }
 0xa67   :  { %v10728_v24 = vmax.f32 %v10722_v17, 0.0  ;;  %v10726_v20 = vpop.f32.mrb[27].mxu1 }
 0xa68   :  { %v10729_v21 = vmax.f32 %v10724_v40, 0.0 }
 0xa69   :  { %v10730_v34 = vpack.c.bf16 %v10728_v24, %v10728_v24 }
 0xa6a   :  { %v10731_v25 = vpack.c.bf16 %v10729_v21, %v10729_v21 }
 0xa6c   :  { %10899 = vmatprep.mubr.bf16.mxu0 %v10731_v25 }
 0xa6d   :  { %10900 = vmatmul.mubr.bf16.vlgmr.msra.gmra.mrb[16].mxu0 %v10730_v34 }
 0xa6e   :  { %12558 = vmatprep.mubr.msk.bf16.mxu0 %vm13439_vm1, %v13438_v12  ;;  %12557 = vmatpush3.bf16.msra.mxu0 %v13335_v61 }
 0xb40   :  { %v12531_v43 = vpop.f32.mrb[16].mxu0 }
 0xb41   :  { %v12532_v50 = vpop.f32.mrb[17].mxu0 }
 0xb42   :  { %v12533_v0 = vadd.f32 %v12532_v50, %v12531_v43  ;;  %v12534_v59 = vpop.f32.mrb[18].mxu0 }
 0xb43   :  { %v12535_v29 = vpop.f32.mrb[19].mxu0 }
 0xb44   :  { %v10902_v31 = vadd.f32 %v12533_v0, %v12489_v48 }
 0xb46   :  { %v10907_v32 = vmax.f32 %v10902_v31, 0.0 }
 0xb48   :  { %v10908_v30 = vpack.c.bf16 %v10907_v32, %v10907_v32 }
 0xb4a   :  { %12553 = vmatmul.mubr.msk.bf16.vlgmr.msra.gmra.mrb[28].mxu1 %vm10948_vm2, %v10908_v30 }
 0xc1d   :  { %v10986_v16 = vpop.f32.mrb[28].mxu1 }
 0xc1e   :  { %v10987_v36 = vadd.f32 %v12506_v35, %v10986_v16  ;;  %v12554_v38 = vpop.f32.mrb[29].mxu1 }
 0xc1f   :  { %v10989_v22 = vpop.f32.mrb[30].mxu1 }
 0xc20   :  { %v10992_v7 = vmax.f32 %v10987_v36, 0.0  ;;  %v12555_v39 = vpop.f32.mrb[31].mxu1 }
 0xc22   :  { %v10993_v49 = vpack.c.bf16 %v10992_v7, %v10992_v7 }
 0xc24   :  { %12559 = vmatmul.mubr.msk.bf16.vlgmr.msra.gmra.mrb[20].mxu0 %vm11009_vm3, %v10993_v49 }
 0xcf7   :  { %v11047_v41 = vpop.f32.mrb[20].mxu0 }
 0xcf8   :  { %v11048_v54 = vadd.f32 %v12512_v14, %v11047_v41  ;;  %v12560_v37 = vpop.f32.mrb[21].mxu0 }
 0xcf9   :  { %v11050_v42 = vpop.f32.mrb[22].mxu0 }
 0xcfa   :  { %v12561_v44 = vpop.f32.mrb[23].mxu0  ;;  %11054 = vst.msk [vmem:[#allocation8] sm:$0x3] %vm11053_vm4, %v11048_v54 }
 0xcfb   :  { %13413 = shalt.err (!%p13410_p0)
}
 0xcfc   :  { %s13414_s18 = scalar_lea.hbm %s17796_s19, 32 }
 0xcfd   :  { %p13415_p1 = scmp.ne.s32.totalorder %s17796_s19, %s13414_s18  ;;  %p13418_p2 = scmp.lt.u32.totalorder %s13414_s18, %s17796_s19 }
 0xcff   :  { %p13420_p3 = pnand %p13418_p2, %p13415_p1 }
 0xd01   :  { %13423 = shalt.err (!%p13420_p3)
}
 0xd02   :  { %11064 = dma.vmem_to_hbm [thread:$0]  %s11062_s0, 32, %s17796_s19, [#allocation4]  }
 0xd03   :  { %13428 = dma.done.wait [#allocation4], 32  }
 0xd04   :  { %13429 = vsyncadd [#allocation4], 4294967264 }
 0xd05   :  { %11068 = vsyncpa [#allocation3], 1 }
 0xd06   :  { %11069 = vsyncpa [#allocation6], 1 }
 0xd07   :  { %11070 = vsyncpa [#allocation4], 1 }

</bundles_post_ra>
